<compile_context>
chip_gen: v6e
topology: v6e:2x2x1
jax: 0.10.0
libtpu: 0.0.40
codegen_flags: <defaults>
</compile_context>

<pallas_src>
import math

import jax
import jax.numpy as jnp
from jax.experimental import pallas as pl
from jax.experimental.pallas import tpu as pltpu

BN_EPS = 1e-5


def _silu(x):
    return x * jax.nn.sigmoid(x)


def _compiler_params(dim_semantics, vmem_need_bytes):
    """dimension_semantics + an explicit VMEM limit when the default scoped
    budget (16 MiB v5e / 32 MiB v6e-v7x) could bind for larger shapes."""
    kwargs = {"dimension_semantics": dim_semantics}
    if vmem_need_bytes > (16 << 20):
        kwargs["vmem_limit_bytes"] = int(min(vmem_need_bytes, 96 << 20))
    return pltpu.CompilerParams(**kwargs)


# ----------------------------------------------------------------------------
# Pallas kernels
# ----------------------------------------------------------------------------
def _pw_conv_kernel(x_ref, w_ref, b_ref, o_ref):
    """1x1 conv: (tm, Cin) @ (Cin, Cout) + bias, SiLU.  BN scale is pre-folded
    into w; operands stay in the storage dtype (bf16-friendly), accumulate f32."""
    y = jnp.dot(x_ref[...], w_ref[...], preferred_element_type=jnp.float32)
    y = y + b_ref[...]
    o_ref[...] = _silu(y).astype(o_ref.dtype)


def _pw_pair_conv_kernel(a_ref, c_ref, wa_ref, wc_ref, b_ref, o_ref):
    """Fused cv3: silu(a @ Wa + c @ Wc + bias) == silu(concat(a, c) @ W + bias)
    without writing / re-reading the channel concat through HBM."""
    y = jnp.dot(a_ref[...], wa_ref[...], preferred_element_type=jnp.float32)
    y = y + jnp.dot(c_ref[...], wc_ref[...], preferred_element_type=jnp.float32)
    y = y + b_ref[...]
    o_ref[...] = _silu(y).astype(o_ref.dtype)


def _make_conv3x3_kernel(with_residual):
    """3x3 conv (pad=1) + bias + SiLU (+ optional residual).  The input block
    is the UNPADDED (H, W, Cin) image; zero-padding is done in a VMEM scratch,
    so no padded activation copy ever touches HBM."""

    def kernel(*refs):
        if with_residual:
            x_ref, w_ref, b_ref, r_ref, o_ref, xp_ref = refs
        else:
            x_ref, w_ref, b_ref, o_ref, xp_ref = refs
        H, W, Cout = o_ref.shape
        Cin = x_ref.shape[-1]

        # Zero-pad into the VMEM scratch.  (Only the 1-px border needs the
        # zero fill; a full aligned clear is cheap and keeps stores simple.)
        xp_ref[...] = jnp.zeros_like(xp_ref)
        xp_ref[pl.ds(1, H), pl.ds(1, W), :] = x_ref[...]

        # 9 shifted matmuls, one per tap; accumulate in f32 on the MXU.
        # TODO(synk): replace the per-tap slice+reshape with an im2col
        # (H*W, 9*Cin) buffer + single K=9*Cin matmul (or pltpu.roll shifts)
        # for better MXU utilization at large Cin.
        acc = jnp.zeros((H * W, Cout), jnp.float32)
        for ky in range(3):
            for kx in range(3):
                patch = xp_ref[ky:ky + H, kx:kx + W, :].reshape(H * W, Cin)
                acc = acc + jnp.dot(patch, w_ref[ky * 3 + kx],
                                    preferred_element_type=jnp.float32)
        y = _silu(acc + b_ref[...])
        if with_residual:
            y = y + r_ref[...].reshape(H * W, Cout).astype(jnp.float32)
        o_ref[...] = y.reshape(H, W, Cout).astype(o_ref.dtype)

    return kernel


# ----------------------------------------------------------------------------
# pallas_call wrappers
# ----------------------------------------------------------------------------
def conv1x1_bn_silu(x, w_oi, scale, bias, *, tile_m=512):
    """1x1 conv + BN + SiLU.  x: (N,H,W,Cin) NHWC; w_oi: (Cout,Cin) raw conv
    weight; scale/bias: folded inference-mode BN affine (Cout,)."""
    N, H, W, Cin = x.shape
    Cout = w_oi.shape[0]
    cdt = x.dtype
    w = (w_oi.T * scale[None, :]).astype(cdt)                 # fold BN scale
    b = bias.astype(jnp.float32).reshape(1, Cout)

    M = N * H * W
    tm = min(tile_m, M)
    grid = (pl.cdiv(M, tm),)
    esz = jnp.dtype(cdt).itemsize
    vmem_need = 3 * tm * (Cin + Cout) * esz + 4 * tm * Cout * 4 + 8 * Cin * Cout

    out = pl.pallas_call(
        _pw_conv_kernel,
        out_shape=jax.ShapeDtypeStruct((M, Cout), cdt),
        grid_spec=pltpu.PrefetchScalarGridSpec(
            num_scalar_prefetch=0,
            grid=grid,
            in_specs=[
                pl.BlockSpec((tm, Cin), lambda i: (i, 0)),
                pl.BlockSpec((Cin, Cout), lambda i: (0, 0)),
                pl.BlockSpec((1, Cout), lambda i: (0, 0)),
            ],
            out_specs=pl.BlockSpec((tm, Cout), lambda i: (i, 0)),
        ),
        compiler_params=_compiler_params(("parallel",), vmem_need),
    )(x.reshape(M, Cin), w, b)
    return out.reshape(N, H, W, Cout)


def conv1x1_pair_bn_silu(a, c, wa_oi, wc_oi, scale, bias, *, tile_m=512):
    """Fused `cv3(concat([a, c], axis=-1))`: the 1x1 weight is split into the
    halves acting on `a` and `c`, so the concat tensor never hits HBM."""
    N, H, W, Ca = a.shape
    Cb = c.shape[-1]
    Cout = wa_oi.shape[0]
    cdt = a.dtype
    wa = (wa_oi.T * scale[None, :]).astype(cdt)               # (Ca, Cout)
    wc = (wc_oi.T * scale[None, :]).astype(cdt)               # (Cb, Cout)
    b = bias.astype(jnp.float32).reshape(1, Cout)

    M = N * H * W
    tm = min(tile_m, M)
    grid = (pl.cdiv(M, tm),)
    esz = jnp.dtype(cdt).itemsize
    vmem_need = (3 * tm * (Ca + Cb + Cout) * esz + 4 * tm * Cout * 4
                 + 8 * (Ca + Cb) * Cout)

    out = pl.pallas_call(
        _pw_pair_conv_kernel,
        out_shape=jax.ShapeDtypeStruct((M, Cout), cdt),
        grid_spec=pltpu.PrefetchScalarGridSpec(
            num_scalar_prefetch=0,
            grid=grid,
            in_specs=[
                pl.BlockSpec((tm, Ca), lambda i: (i, 0)),
                pl.BlockSpec((tm, Cb), lambda i: (i, 0)),
                pl.BlockSpec((Ca, Cout), lambda i: (0, 0)),
                pl.BlockSpec((Cb, Cout), lambda i: (0, 0)),
                pl.BlockSpec((1, Cout), lambda i: (0, 0)),
            ],
            out_specs=pl.BlockSpec((tm, Cout), lambda i: (i, 0)),
        ),
        compiler_params=_compiler_params(("parallel",), vmem_need),
    )(a.reshape(M, Ca), c.reshape(M, Cb), wa, wc, b)
    return out.reshape(N, H, W, Cout)


def conv3x3_bn_silu(x, w_oihw, scale, bias, residual=None):
    """3x3 conv (pad=1, stride=1) + BN + SiLU (+ optional residual add).
    x: (N,H,W,Cin); w_oihw: (Cout,Cin,3,3); residual: (N,H,W,Cout) or None.
    No HBM-level padding: the kernel zero-pads its tile in a VMEM scratch.

    TODO(synk): for large feature maps (e.g. 80x80x256) add an H-row tile grid
    axis with a halo (manual DMA or pl.Element offsets) so the per-step working
    set fits v7x's 64 MiB VMEM with double-buffering headroom.
    """
    N, H, W, Cin = x.shape
    Cout = w_oihw.shape[0]
    cdt = x.dtype
    # taps laid out row-major (ky*3 + kx); BN scale folded into the weights.
    w = jnp.transpose(w_oihw, (2, 3, 1, 0)).reshape(9, Cin, Cout)
    w = (w * scale[None, None, :]).astype(cdt)
    b = bias.astype(jnp.float32).reshape(1, Cout)

    with_res = residual is not None
    kernel = _make_conv3x3_kernel(with_res)

    in_specs = [
        pl.BlockSpec((pl.Squeezed(), H, W, Cin), lambda n: (n, 0, 0, 0)),
        pl.BlockSpec((9, Cin, Cout), lambda n: (0, 0, 0)),
        pl.BlockSpec((1, Cout), lambda n: (0, 0)),
    ]
    args = [x, w, b]
    if with_res:
        in_specs.append(
            pl.BlockSpec((pl.Squeezed(), H, W, Cout), lambda n: (n, 0, 0, 0)))
        args.append(residual)

    esz = jnp.dtype(cdt).itemsize
    n_act = Cin + (2 * Cout if with_res else Cout)
    vmem_need = (2 * 2 * H * W * n_act * esz            # double-buffered act blocks
                 + 2 * (H + 2) * (W + 2) * Cin * esz    # padded scratch (+ slack)
                 + 12 * H * W * Cin * esz               # per-tap slice temporaries
                 + 4 * H * W * Cout * 4                 # f32 accumulator values
                 + 2 * 9 * Cin * Cout * esz)            # weights

    out = pl.pallas_call(
        kernel,
        out_shape=jax.ShapeDtypeStruct((N, H, W, Cout), cdt),
        grid_spec=pltpu.PrefetchScalarGridSpec(
            num_scalar_prefetch=0,
            grid=(N,),
            in_specs=in_specs,
            out_specs=pl.BlockSpec((pl.Squeezed(), H, W, Cout),
                                   lambda n: (n, 0, 0, 0)),
            scratch_shapes=[pltpu.VMEM((H + 2, W + 2, Cin), cdt)],
        ),
        compiler_params=_compiler_params(("parallel",), vmem_need),
    )(*args)
    return out


# ----------------------------------------------------------------------------
# Parameter init (deterministic, synthetic) and C3 forward
# ----------------------------------------------------------------------------
def init_conv_params(key, c_in, c_out, k):
    kw, kg, kb, km, kv = jax.random.split(key, 5)
    w = jax.random.normal(kw, (c_out, c_in, k, k), jnp.float32) / math.sqrt(c_in * k * k)
    gamma = 1.0 + 0.1 * jax.random.normal(kg, (c_out,), jnp.float32)
    beta = 0.1 * jax.random.normal(kb, (c_out,), jnp.float32)
    mean = 0.1 * jax.random.normal(km, (c_out,), jnp.float32)
    var = jax.random.uniform(kv, (c_out,), jnp.float32, 0.5, 1.5)
    scale = gamma / jnp.sqrt(var + BN_EPS)          # fold BN (inference mode)
    bias = beta - mean * scale
    return {"w": w, "scale": scale, "bias": bias}


def init_c3_params(key, c1, c2, n=1, e=0.5):
    c_ = int(c2 * e)
    keys = jax.random.split(key, 3 + 2 * n)
    params = {
        "cv1": init_conv_params(keys[0], c1, c_, 1),
        "cv2": init_conv_params(keys[1], c1, c_, 1),
        "cv3": init_conv_params(keys[2], 2 * c_, c2, 1),
        "m": [],
    }
    for i in range(n):
        params["m"].append({
            "cv1": init_conv_params(keys[3 + 2 * i], c_, c_, 1),
            "cv2": init_conv_params(keys[4 + 2 * i], c_, c_, 3),
        })
    return params


def c3_forward(x_nchw, params, shortcut=True, compute_dtype=jnp.float32, tile_m=512):
    """C3 forward pass.  Input/output are NCHW to match the PyTorch module.
    compute_dtype=bf16 keeps activations/weights on the MXU's fast bf16 path
    (accumulation stays f32 inside the kernels)."""
    x = jnp.transpose(x_nchw, (0, 2, 3, 1)).astype(compute_dtype)     # -> NHWC

    p = params["cv1"]
    y1 = conv1x1_bn_silu(x, p["w"][:, :, 0, 0], p["scale"], p["bias"], tile_m=tile_m)

    for bp in params["m"]:                                            # Bottlenecks
        p1 = bp["cv1"]
        t = conv1x1_bn_silu(y1, p1["w"][:, :, 0, 0], p1["scale"], p1["bias"],
                            tile_m=tile_m)
        # TODO(synk): fuse this 1x1 into the 3x3 kernel so `t` never round-trips HBM.
        p2 = bp["cv2"]
        y1 = conv3x3_bn_silu(t, p2["w"], p2["scale"], p2["bias"],
                             residual=y1 if shortcut else None)

    p = params["cv2"]
    y2 = conv1x1_bn_silu(x, p["w"][:, :, 0, 0], p["scale"], p["bias"], tile_m=tile_m)

    # cv3 over concat([y1, y2]) without materializing the concat in HBM.
    p = params["cv3"]
    c_ = y1.shape[-1]
    w_full = p["w"][:, :, 0, 0]                                       # (C2, 2*c_)
    out = conv1x1_pair_bn_silu(y1, y2, w_full[:, :c_], w_full[:, c_:],
                               p["scale"], p["bias"], tile_m=tile_m)
    return jnp.transpose(out, (0, 3, 1, 2)).astype(x_nchw.dtype)      # -> NCHW


# ----------------------------------------------------------------------------
# Pure-JAX reference (for correctness check)
# ----------------------------------------------------------------------------
def _conv_bn_silu_ref(x, p, pad):
    y = jax.lax.conv_general_dilated(
        x, jnp.transpose(p["w"], (2, 3, 1, 0)), (1, 1),
        ((pad, pad), (pad, pad)),
        dimension_numbers=("NHWC", "HWIO", "NHWC"))
    return _silu(y * p["scale"] + p["bias"])


def c3_ref(x_nchw, params, shortcut=True):
    x = jnp.transpose(x_nchw, (0, 2, 3, 1))
    y1 = _conv_bn_silu_ref(x, params["cv1"], 0)
    for bp in params["m"]:
        t = _conv_bn_silu_ref(y1, bp["cv1"], 0)
        t = _conv_bn_silu_ref(t, bp["cv2"], 1)
        y1 = y1 + t if shortcut else t
    y2 = _conv_bn_silu_ref(x, params["cv2"], 0)
    out = _conv_bn_silu_ref(jnp.concatenate([y1, y2], axis=-1), params["cv3"], 0)
    return jnp.transpose(out, (0, 3, 1, 2))


if __name__ == "__main__":
    key = jax.random.PRNGKey(0)
    kx, kp = jax.random.split(key)

    N, C1, H, W = 2, 4, 16, 16
    C2, n = 4, 1
    x = jax.random.normal(kx, (N, C1, H, W), jnp.float32)
    params = init_c3_params(kp, C1, C2, n=n, e=0.5)

    ref = jax.block_until_ready(c3_ref(x, params))

    # f32 path: tight numerical check against the pure-JAX reference.
    out_f32 = jax.jit(lambda xx: c3_forward(xx, params, compute_dtype=jnp.float32))(x)
    out_f32 = jax.block_until_ready(out_f32)
    assert out_f32.shape == (N, C2, H, W)
    assert jnp.max(jnp.abs(out_f32 - ref)) < 2e-3, "f32 mismatch vs. JAX reference"

    # bf16 fast path (bf16 MXU operands, f32 accumulation): looser tolerance.
    out_bf16 = jax.jit(lambda xx: c3_forward(xx, params, compute_dtype=jnp.bfloat16))(x)
    out_bf16 = jax.block_until_ready(out_bf16)
    assert jnp.max(jnp.abs(out_bf16 - ref)) < 2e-1, "bf16 mismatch vs. JAX reference"

    # shortcut=False variant (no zeros residual streamed).
    out_ns = jax.jit(lambda xx: c3_forward(xx, params, shortcut=False))(x)
    ref_ns = c3_ref(x, params, shortcut=False)
    out_ns = jax.block_until_ready(out_ns)
    assert jnp.max(jnp.abs(out_ns - ref_ns)) < 2e-3, "shortcut=False mismatch"

    print("KERNEL_OK")
</pallas_src>

<mosaic_0001>
module attributes {stable_mosaic.version = 11 : i64} {
  func.func @_pw_conv_kernel(%arg0: i32, %arg1: memref<512x2xf32, #tpu.memory_space<vmem>>, %arg2: memref<2x2xf32, #tpu.memory_space<vmem>>, %arg3: memref<1x2xf32, #tpu.memory_space<vmem>>, %arg4: memref<512x2xf32, #tpu.memory_space<vmem>>) attributes {dimension_semantics = [#tpu.dimension_semantics<parallel>], iteration_bounds = array<i64: 1>, scalar_prefetch = 0 : i64, scratch_operands = 0 : i64, tpu.core_type = #tpu.core_type<tc>, window_params = [{transform_indices = @transform_0, window_bounds = array<i64: 512, 2>}, {pipeline_mode = #tpu.pipeline_mode<synchronous>, transform_indices = @transform_1, window_bounds = array<i64: 2, 2>}, {pipeline_mode = #tpu.pipeline_mode<synchronous>, transform_indices = @transform_2, window_bounds = array<i64: 1, 2>}, {transform_indices = @transform_3, window_bounds = array<i64: 512, 2>}]} {
    %c0 = arith.constant 0 : index
    %c0_0 = arith.constant 0 : index
    %0 = vector.load %arg1[%c0, %c0_0] : memref<512x2xf32, #tpu.memory_space<vmem>>, vector<512x2xf32>
    %c0_1 = arith.constant 0 : index
    %c0_2 = arith.constant 0 : index
    %1 = vector.load %arg2[%c0_1, %c0_2] : memref<2x2xf32, #tpu.memory_space<vmem>>, vector<2x2xf32>
    %cst = arith.constant dense<0.000000e+00> : vector<512x2xf32>
    %2 = tpu.matmul %0, %1, %cst {dimension_numbers = #tpu.dot_dimension_numbers<[1], [0], [0], [1], [0, 0, 1, 1], [], []>} : vector<512x2xf32>, vector<2x2xf32>, vector<512x2xf32> -> vector<512x2xf32>
    %c0_3 = arith.constant 0 : index
    %c0_4 = arith.constant 0 : index
    %3 = vector.load %arg3[%c0_3, %c0_4] : memref<1x2xf32, #tpu.memory_space<vmem>>, vector<1x2xf32>
    %4 = vector.broadcast %3 : vector<1x2xf32> to vector<512x2xf32>
    %5 = arith.addf %2, %4 : vector<512x2xf32>
    %6 = arith.negf %5 : vector<512x2xf32>
    %7 = math.exp %6 : vector<512x2xf32>
    %cst_5 = arith.constant 1.000000e+00 : f32
    %8 = vector.broadcast %cst_5 : f32 to vector<512x2xf32>
    %9 = arith.addf %8, %7 : vector<512x2xf32>
    %10 = arith.divf %8, %9 : vector<512x2xf32>
    %11 = arith.mulf %5, %10 : vector<512x2xf32>
    %c0_6 = arith.constant 0 : index
    %c0_7 = arith.constant 0 : index
    %12 = vector.load %arg4[%c0_6, %c0_7] : memref<512x2xf32, #tpu.memory_space<vmem>>, vector<512x2xf32>
    tpu.vector_store %arg4[%c0_6, %c0_7], %11 {strides = array<i32>} : memref<512x2xf32, #tpu.memory_space<vmem>>, vector<512x2xf32>,
    return
  }
  func.func @transform_0(%arg0: i32) -> (i32, i32) {
    %c0_i32 = arith.constant 0 : i32
    %c0_i32_0 = arith.constant 0 : i32
    return %arg0, %c0_i32 : i32, i32
  }
  func.func @transform_1(%arg0: i32) -> (i32, i32) {
    %c0_i32 = arith.constant 0 : i32
    %c0_i32_0 = arith.constant 0 : i32
    %c0_i32_1 = arith.constant 0 : i32
    return %c0_i32, %c0_i32_0 : i32, i32
  }
  func.func @transform_2(%arg0: i32) -> (i32, i32) {
    %c0_i32 = arith.constant 0 : i32
    %c0_i32_0 = arith.constant 0 : i32
    %c0_i32_1 = arith.constant 0 : i32
    return %c0_i32, %c0_i32_0 : i32, i32
  }
  func.func @transform_3(%arg0: i32) -> (i32, i32) {
    %c0_i32 = arith.constant 0 : i32
    %c0_i32_0 = arith.constant 0 : i32
    return %arg0, %c0_i32 : i32, i32
  }
}

module attributes {stable_mosaic.version = 11 : i64} {
  func.func @_pw_conv_kernel(%arg0: i32, %arg1: memref<512x4xf32, #tpu.memory_space<vmem>>, %arg2: memref<4x2xf32, #tpu.memory_space<vmem>>, %arg3: memref<1x2xf32, #tpu.memory_space<vmem>>, %arg4: memref<512x2xf32, #tpu.memory_space<vmem>>) attributes {dimension_semantics = [#tpu.dimension_semantics<parallel>], iteration_bounds = array<i64: 1>, scalar_prefetch = 0 : i64, scratch_operands = 0 : i64, tpu.core_type = #tpu.core_type<tc>, window_params = [{transform_indices = @transform_0, window_bounds = array<i64: 512, 4>}, {pipeline_mode = #tpu.pipeline_mode<synchronous>, transform_indices = @transform_1, window_bounds = array<i64: 4, 2>}, {pipeline_mode = #tpu.pipeline_mode<synchronous>, transform_indices = @transform_2, window_bounds = array<i64: 1, 2>}, {transform_indices = @transform_3, window_bounds = array<i64: 512, 2>}]} {
    %c0 = arith.constant 0 : index
    %c0_0 = arith.constant 0 : index
    %0 = vector.load %arg1[%c0, %c0_0] : memref<512x4xf32, #tpu.memory_space<vmem>>, vector<512x4xf32>
    %c0_1 = arith.constant 0 : index
    %c0_2 = arith.constant 0 : index
    %1 = vector.load %arg2[%c0_1, %c0_2] : memref<4x2xf32, #tpu.memory_space<vmem>>, vector<4x2xf32>
    %cst = arith.constant dense<0.000000e+00> : vector<512x2xf32>
    %2 = tpu.matmul %0, %1, %cst {dimension_numbers = #tpu.dot_dimension_numbers<[1], [0], [0], [1], [0, 0, 1, 1], [], []>} : vector<512x4xf32>, vector<4x2xf32>, vector<512x2xf32> -> vector<512x2xf32>
    %c0_3 = arith.constant 0 : index
    %c0_4 = arith.constant 0 : index
    %3 = vector.load %arg3[%c0_3, %c0_4] : memref<1x2xf32, #tpu.memory_space<vmem>>, vector<1x2xf32>
    %4 = vector.broadcast %3 : vector<1x2xf32> to vector<512x2xf32>
    %5 = arith.addf %2, %4 : vector<512x2xf32>
    %6 = arith.negf %5 : vector<512x2xf32>
    %7 = math.exp %6 : vector<512x2xf32>
    %cst_5 = arith.constant 1.000000e+00 : f32
    %8 = vector.broadcast %cst_5 : f32 to vector<512x2xf32>
    %9 = arith.addf %8, %7 : vector<512x2xf32>
    %10 = arith.divf %8, %9 : vector<512x2xf32>
    %11 = arith.mulf %5, %10 : vector<512x2xf32>
    %c0_6 = arith.constant 0 : index
    %c0_7 = arith.constant 0 : index
    %12 = vector.load %arg4[%c0_6, %c0_7] : memref<512x2xf32, #tpu.memory_space<vmem>>, vector<512x2xf32>
    tpu.vector_store %arg4[%c0_6, %c0_7], %11 {strides = array<i32>} : memref<512x2xf32, #tpu.memory_space<vmem>>, vector<512x2xf32>,
    return
  }
  func.func @transform_0(%arg0: i32) -> (i32, i32) {
    %c0_i32 = arith.constant 0 : i32
    %c0_i32_0 = arith.constant 0 : i32
    return %arg0, %c0_i32 : i32, i32
  }
  func.func @transform_1(%arg0: i32) -> (i32, i32) {
    %c0_i32 = arith.constant 0 : i32
    %c0_i32_0 = arith.constant 0 : i32
    %c0_i32_1 = arith.constant 0 : i32
    return %c0_i32, %c0_i32_0 : i32, i32
  }
  func.func @transform_2(%arg0: i32) -> (i32, i32) {
    %c0_i32 = arith.constant 0 : i32
    %c0_i32_0 = arith.constant 0 : i32
    %c0_i32_1 = arith.constant 0 : i32
    return %c0_i32, %c0_i32_0 : i32, i32
  }
  func.func @transform_3(%arg0: i32) -> (i32, i32) {
    %c0_i32 = arith.constant 0 : i32
    %c0_i32_0 = arith.constant 0 : i32
    return %arg0, %c0_i32 : i32, i32
  }
}

module attributes {stable_mosaic.version = 11 : i64} {
  func.func @kernel(%arg0: i32, %arg1: memref<1x16x16x2xf32, #tpu.memory_space<vmem>>, %arg2: memref<9x2x2xf32, #tpu.memory_space<vmem>>, %arg3: memref<1x2xf32, #tpu.memory_space<vmem>>, %arg4: memref<1x16x16x2xf32, #tpu.memory_space<vmem>>, %arg5: memref<1x16x16x2xf32, #tpu.memory_space<vmem>>, %arg6: memref<18x18x2xf32, #tpu.memory_space<vmem>>) attributes {dimension_semantics = [#tpu.dimension_semantics<parallel>], iteration_bounds = array<i64: 2>, scalar_prefetch = 0 : i64, scratch_operands = 1 : i64, tpu.core_type = #tpu.core_type<tc>, window_params = [{transform_indices = @transform_0, window_bounds = array<i64: 1, 16, 16, 2>}, {pipeline_mode = #tpu.pipeline_mode<synchronous>, transform_indices = @transform_1, window_bounds = array<i64: 9, 2, 2>}, {pipeline_mode = #tpu.pipeline_mode<synchronous>, transform_indices = @transform_2, window_bounds = array<i64: 1, 2>}, {transform_indices = @transform_3, window_bounds = array<i64: 1, 16, 16, 2>}, {transform_indices = @transform_4, window_bounds = array<i64: 1, 16, 16, 2>}]} {
    %cst = arith.constant 0.000000e+00 : f32
    %0 = vector.broadcast %cst : f32 to vector<18x18x2xf32>
    %c0 = arith.constant 0 : index
    %c0_0 = arith.constant 0 : index
    %c0_1 = arith.constant 0 : index
    %1 = vector.load %arg6[%c0, %c0_0, %c0_1] : memref<18x18x2xf32, #tpu.memory_space<vmem>>, vector<18x18x2xf32>
    tpu.vector_store %arg6[%c0, %c0_0, %c0_1], %0 {strides = array<i32>} : memref<18x18x2xf32, #tpu.memory_space<vmem>>, vector<18x18x2xf32>,
    %c0_2 = arith.constant 0 : index
    %c0_3 = arith.constant 0 : index
    %c0_4 = arith.constant 0 : index
    %c0_5 = arith.constant 0 : index
    %2 = vector.load %arg1[%c0_2, %c0_3, %c0_4, %c0_5] : memref<1x16x16x2xf32, #tpu.memory_space<vmem>>, vector<1x16x16x2xf32>
    %3 = vector.shape_cast %2 : vector<1x16x16x2xf32> to vector<16x16x2xf32>
    %c1 = arith.constant 1 : index
    %c1_6 = arith.constant 1 : index
    %c0_7 = arith.constant 0 : index
    %4 = vector.load %arg6[%c1, %c1_6, %c0_7] : memref<18x18x2xf32, #tpu.memory_space<vmem>>, vector<16x16x2xf32>
    tpu.vector_store %arg6[%c1, %c1_6, %c0_7], %3 {strides = array<i32>} : memref<18x18x2xf32, #tpu.memory_space<vmem>>, vector<16x16x2xf32>,
    %cst_8 = arith.constant 0.000000e+00 : f32
    %5 = vector.broadcast %cst_8 : f32 to vector<256x2xf32>
    %c0_9 = arith.constant 0 : index
    %c0_10 = arith.constant 0 : index
    %c0_11 = arith.constant 0 : index
    %6 = vector.load %arg6[%c0_9, %c0_10, %c0_11] : memref<18x18x2xf32, #tpu.memory_space<vmem>>, vector<16x16x2xf32>
    %7 = vector.shape_cast %6 : vector<16x16x2xf32> to vector<256x2xf32>
    %c0_12 = arith.constant 0 : index
    %c0_13 = arith.constant 0 : index
    %c0_14 = arith.constant 0 : index
    %8 = vector.load %arg2[%c0_12, %c0_13, %c0_14] : memref<9x2x2xf32, #tpu.memory_space<vmem>>, vector<1x2x2xf32>
    %9 = vector.shape_cast %8 : vector<1x2x2xf32> to vector<2x2xf32>
    %cst_15 = arith.constant dense<0.000000e+00> : vector<256x2xf32>
    %10 = tpu.matmul %7, %9, %cst_15 {dimension_numbers = #tpu.dot_dimension_numbers<[1], [0], [0], [1], [0, 0, 1, 1], [], []>} : vector<256x2xf32>, vector<2x2xf32>, vector<256x2xf32> -> vector<256x2xf32>
    %11 = arith.addf %5, %10 : vector<256x2xf32>
    %c0_16 = arith.constant 0 : index
    %c1_17 = arith.constant 1 : index
    %c0_18 = arith.constant 0 : index
    %12 = vector.load %arg6[%c0_16, %c1_17, %c0_18] : memref<18x18x2xf32, #tpu.memory_space<vmem>>, vector<16x16x2xf32>
    %13 = vector.shape_cast %12 : vector<16x16x2xf32> to vector<256x2xf32>
    %c1_19 = arith.constant 1 : index
    %c0_20 = arith.constant 0 : index
    %c0_21 = arith.constant 0 : index
    %14 = vector.load %arg2[%c1_19, %c0_20, %c0_21] : memref<9x2x2xf32, #tpu.memory_space<vmem>>, vector<1x2x2xf32>
    %15 = vector.shape_cast %14 : vector<1x2x2xf32> to vector<2x2xf32>
    %cst_22 = arith.constant dense<0.000000e+00> : vector<256x2xf32>
    %16 = tpu.matmul %13, %15, %cst_22 {dimension_numbers = #tpu.dot_dimension_numbers<[1], [0], [0], [1], [0, 0, 1, 1], [], []>} : vector<256x2xf32>, vector<2x2xf32>, vector<256x2xf32> -> vector<256x2xf32>
    %17 = arith.addf %11, %16 : vector<256x2xf32>
    %c0_23 = arith.constant 0 : index
    %c2 = arith.constant 2 : index
    %c0_24 = arith.constant 0 : index
    %18 = vector.load %arg6[%c0_23, %c2, %c0_24] : memref<18x18x2xf32, #tpu.memory_space<vmem>>, vector<16x16x2xf32>
    %19 = vector.shape_cast %18 : vector<16x16x2xf32> to vector<256x2xf32>
    %c2_25 = arith.constant 2 : index
    %c0_26 = arith.constant 0 : index
    %c0_27 = arith.constant 0 : index
    %20 = vector.load %arg2[%c2_25, %c0_26, %c0_27] : memref<9x2x2xf32, #tpu.memory_space<vmem>>, vector<1x2x2xf32>
    %21 = vector.shape_cast %20 : vector<1x2x2xf32> to vector<2x2xf32>
    %cst_28 = arith.constant dense<0.000000e+00> : vector<256x2xf32>
    %22 = tpu.matmul %19, %21, %cst_28 {dimension_numbers = #tpu.dot_dimension_numbers<[1], [0], [0], [1], [0, 0, 1, 1], [], []>} : vector<256x2xf32>, vector<2x2xf32>, vector<256x2xf32> -> vector<256x2xf32>
    %23 = arith.addf %17, %22 : vector<256x2xf32>
    %c1_29 = arith.constant 1 : index
    %c0_30 = arith.constant 0 : index
    %c0_31 = arith.constant 0 : index
    %24 = vector.load %arg6[%c1_29, %c0_30, %c0_31] : memref<18x18x2xf32, #tpu.memory_space<vmem>>, vector<16x16x2xf32>
    %25 = vector.shape_cast %24 : vector<16x16x2xf32> to vector<256x2xf32>
    %c3 = arith.constant 3 : index
    %c0_32 = arith.constant 0 : index
    %c0_33 = arith.constant 0 : index
    %26 = vector.load %arg2[%c3, %c0_32, %c0_33] : memref<9x2x2xf32, #tpu.memory_space<vmem>>, vector<1x2x2xf32>
    %27 = vector.shape_cast %26 : vector<1x2x2xf32> to vector<2x2xf32>
    %cst_34 = arith.constant dense<0.000000e+00> : vector<256x2xf32>
    %28 = tpu.matmul %25, %27, %cst_34 {dimension_numbers = #tpu.dot_dimension_numbers<[1], [0], [0], [1], [0, 0, 1, 1], [], []>} : vector<256x2xf32>, vector<2x2xf32>, vector<256x2xf32> -> vector<256x2xf32>
    %29 = arith.addf %23, %28 : vector<256x2xf32>
    %c1_35 = arith.constant 1 : index
    %c1_36 = arith.constant 1 : index
    %c0_37 = arith.constant 0 : index
    %30 = vector.load %arg6[%c1_35, %c1_36, %c0_37] : memref<18x18x2xf32, #tpu.memory_space<vmem>>, vector<16x16x2xf32>
    %31 = vector.shape_cast %30 : vector<16x16x2xf32> to vector<256x2xf32>
    %c4 = arith.constant 4 : index
    %c0_38 = arith.constant 0 : index
    %c0_39 = arith.constant 0 : index
    %32 = vector.load %arg2[%c4, %c0_38, %c0_39] : memref<9x2x2xf32, #tpu.memory_space<vmem>>, vector<1x2x2xf32>
    %33 = vector.shape_cast %32 : vector<1x2x2xf32> to vector<2x2xf32>
    %cst_40 = arith.constant dense<0.000000e+00> : vector<256x2xf32>
    %34 = tpu.matmul %31, %33, %cst_40 {dimension_numbers = #tpu.dot_dimension_numbers<[1], [0], [0], [1], [0, 0, 1, 1], [], []>} : vector<256x2xf32>, vector<2x2xf32>, vector<256x2xf32> -> vector<256x2xf32>
    %35 = arith.addf %29, %34 : vector<256x2xf32>
    %c1_41 = arith.constant 1 : index
    %c2_42 = arith.constant 2 : index
    %c0_43 = arith.constant 0 : index
    %36 = vector.load %arg6[%c1_41, %c2_42, %c0_43] : memref<18x18x2xf32, #tpu.memory_space<vmem>>, vector<16x16x2xf32>
    %37 = vector.shape_cast %36 : vector<16x16x2xf32> to vector<256x2xf32>
    %c5 = arith.constant 5 : index
    %c0_44 = arith.constant 0 : index
    %c0_45 = arith.constant 0 : index
    %38 = vector.load %arg2[%c5, %c0_44, %c0_45] : memref<9x2x2xf32, #tpu.memory_space<vmem>>, vector<1x2x2xf32>
    %39 = vector.shape_cast %38 : vector<1x2x2xf32> to vector<2x2xf32>
    %cst_46 = arith.constant dense<0.000000e+00> : vector<256x2xf32>
    %40 = tpu.matmul %37, %39, %cst_46 {dimension_numbers = #tpu.dot_dimension_numbers<[1], [0], [0], [1], [0, 0, 1, 1], [], []>} : vector<256x2xf32>, vector<2x2xf32>, vector<256x2xf32> -> vector<256x2xf32>
    %41 = arith.addf %35, %40 : vector<256x2xf32>
    %c2_47 = arith.constant 2 : index
    %c0_48 = arith.constant 0 : index
    %c0_49 = arith.constant 0 : index
    %42 = vector.load %arg6[%c2_47, %c0_48, %c0_49] : memref<18x18x2xf32, #tpu.memory_space<vmem>>, vector<16x16x2xf32>
    %43 = vector.shape_cast %42 : vector<16x16x2xf32> to vector<256x2xf32>
    %c6 = arith.constant 6 : index
    %c0_50 = arith.constant 0 : index
    %c0_51 = arith.constant 0 : index
    %44 = vector.load %arg2[%c6, %c0_50, %c0_51] : memref<9x2x2xf32, #tpu.memory_space<vmem>>, vector<1x2x2xf32>
    %45 = vector.shape_cast %44 : vector<1x2x2xf32> to vector<2x2xf32>
    %cst_52 = arith.constant dense<0.000000e+00> : vector<256x2xf32>
    %46 = tpu.matmul %43, %45, %cst_52 {dimension_numbers = #tpu.dot_dimension_numbers<[1], [0], [0], [1], [0, 0, 1, 1], [], []>} : vector<256x2xf32>, vector<2x2xf32>, vector<256x2xf32> -> vector<256x2xf32>
    %47 = arith.addf %41, %46 : vector<256x2xf32>
    %c2_53 = arith.constant 2 : index
    %c1_54 = arith.constant 1 : index
    %c0_55 = arith.constant 0 : index
    %48 = vector.load %arg6[%c2_53, %c1_54, %c0_55] : memref<18x18x2xf32, #tpu.memory_space<vmem>>, vector<16x16x2xf32>
    %49 = vector.shape_cast %48 : vector<16x16x2xf32> to vector<256x2xf32>
    %c7 = arith.constant 7 : index
    %c0_56 = arith.constant 0 : index
    %c0_57 = arith.constant 0 : index
    %50 = vector.load %arg2[%c7, %c0_56, %c0_57] : memref<9x2x2xf32, #tpu.memory_space<vmem>>, vector<1x2x2xf32>
    %51 = vector.shape_cast %50 : vector<1x2x2xf32> to vector<2x2xf32>
    %cst_58 = arith.constant dense<0.000000e+00> : vector<256x2xf32>
    %52 = tpu.matmul %49, %51, %cst_58 {dimension_numbers = #tpu.dot_dimension_numbers<[1], [0], [0], [1], [0, 0, 1, 1], [], []>} : vector<256x2xf32>, vector<2x2xf32>, vector<256x2xf32> -> vector<256x2xf32>
    %53 = arith.addf %47, %52 : vector<256x2xf32>
    %c2_59 = arith.constant 2 : index
    %c2_60 = arith.constant 2 : index
    %c0_61 = arith.constant 0 : index
    %54 = vector.load %arg6[%c2_59, %c2_60, %c0_61] : memref<18x18x2xf32, #tpu.memory_space<vmem>>, vector<16x16x2xf32>
    %55 = vector.shape_cast %54 : vector<16x16x2xf32> to vector<256x2xf32>
    %c8 = arith.constant 8 : index
    %c0_62 = arith.constant 0 : index
    %c0_63 = arith.constant 0 : index
    %56 = vector.load %arg2[%c8, %c0_62, %c0_63] : memref<9x2x2xf32, #tpu.memory_space<vmem>>, vector<1x2x2xf32>
    %57 = vector.shape_cast %56 : vector<1x2x2xf32> to vector<2x2xf32>
    %cst_64 = arith.constant dense<0.000000e+00> : vector<256x2xf32>
    %58 = tpu.matmul %55, %57, %cst_64 {dimension_numbers = #tpu.dot_dimension_numbers<[1], [0], [0], [1], [0, 0, 1, 1], [], []>} : vector<256x2xf32>, vector<2x2xf32>, vector<256x2xf32> -> vector<256x2xf32>
    %59 = arith.addf %53, %58 : vector<256x2xf32>
    %c0_65 = arith.constant 0 : index
    %c0_66 = arith.constant 0 : index
    %60 = vector.load %arg3[%c0_65, %c0_66] : memref<1x2xf32, #tpu.memory_space<vmem>>, vector<1x2xf32>
    %61 = vector.broadcast %60 : vector<1x2xf32> to vector<256x2xf32>
    %62 = arith.addf %59, %61 : vector<256x2xf32>
    %63 = arith.negf %62 : vector<256x2xf32>
    %64 = math.exp %63 : vector<256x2xf32>
    %cst_67 = arith.constant 1.000000e+00 : f32
    %65 = vector.broadcast %cst_67 : f32 to vector<256x2xf32>
    %66 = arith.addf %65, %64 : vector<256x2xf32>
    %67 = arith.divf %65, %66 : vector<256x2xf32>
    %68 = arith.mulf %62, %67 : vector<256x2xf32>
    %c0_68 = arith.constant 0 : index
    %c0_69 = arith.constant 0 : index
    %c0_70 = arith.constant 0 : index
    %c0_71 = arith.constant 0 : index
    %69 = vector.load %arg4[%c0_68, %c0_69, %c0_70, %c0_71] : memref<1x16x16x2xf32, #tpu.memory_space<vmem>>, vector<1x16x16x2xf32>
    %70 = vector.shape_cast %69 : vector<1x16x16x2xf32> to vector<16x16x2xf32>
    %71 = vector.shape_cast %70 : vector<16x16x2xf32> to vector<256x2xf32>
    %72 = arith.addf %68, %71 : vector<256x2xf32>
    %73 = vector.shape_cast %72 : vector<256x2xf32> to vector<16x16x2xf32>
    %c0_72 = arith.constant 0 : index
    %c0_73 = arith.constant 0 : index
    %c0_74 = arith.constant 0 : index
    %c0_75 = arith.constant 0 : index
    %74 = vector.load %arg5[%c0_72, %c0_73, %c0_74, %c0_75] : memref<1x16x16x2xf32, #tpu.memory_space<vmem>>, vector<1x16x16x2xf32>
    %75 = vector.shape_cast %74 : vector<1x16x16x2xf32> to vector<16x16x2xf32>
    %76 = vector.shape_cast %73 : vector<16x16x2xf32> to vector<1x16x16x2xf32>
    tpu.vector_store %arg5[%c0_72, %c0_73, %c0_74, %c0_75], %76 {strides = array<i32>} : memref<1x16x16x2xf32, #tpu.memory_space<vmem>>, vector<1x16x16x2xf32>,
    return
  }
  func.func @transform_0(%arg0: i32) -> (i32, i32, i32, i32) {
    %c0_i32 = arith.constant 0 : i32
    %c0_i32_0 = arith.constant 0 : i32
    %c0_i32_1 = arith.constant 0 : i32
    %c0_i32_2 = arith.constant 0 : i32
    return %arg0, %c0_i32, %c0_i32_0, %c0_i32_1 : i32, i32, i32, i32
  }
  func.func @transform_1(%arg0: i32) -> (i32, i32, i32) {
    %c0_i32 = arith.constant 0 : i32
    %c0_i32_0 = arith.constant 0 : i32
    %c0_i32_1 = arith.constant 0 : i32
    %c0_i32_2 = arith.constant 0 : i32
    return %c0_i32, %c0_i32_0, %c0_i32_1 : i32, i32, i32
  }
  func.func @transform_2(%arg0: i32) -> (i32, i32) {
    %c0_i32 = arith.constant 0 : i32
    %c0_i32_0 = arith.constant 0 : i32
    %c0_i32_1 = arith.constant 0 : i32
    return %c0_i32, %c0_i32_0 : i32, i32
  }
  func.func @transform_3(%arg0: i32) -> (i32, i32, i32, i32) {
    %c0_i32 = arith.constant 0 : i32
    %c0_i32_0 = arith.constant 0 : i32
    %c0_i32_1 = arith.constant 0 : i32
    %c0_i32_2 = arith.constant 0 : i32
    return %arg0, %c0_i32, %c0_i32_0, %c0_i32_1 : i32, i32, i32, i32
  }
  func.func @transform_4(%arg0: i32) -> (i32, i32, i32, i32) {
    %c0_i32 = arith.constant 0 : i32
    %c0_i32_0 = arith.constant 0 : i32
    %c0_i32_1 = arith.constant 0 : i32
    %c0_i32_2 = arith.constant 0 : i32
    return %arg0, %c0_i32, %c0_i32_0, %c0_i32_1 : i32, i32, i32, i32
  }
}

module attributes {stable_mosaic.version = 11 : i64} {
  func.func @_pw_pair_conv_kernel(%arg0: i32, %arg1: memref<512x2xf32, #tpu.memory_space<vmem>>, %arg2: memref<512x2xf32, #tpu.memory_space<vmem>>, %arg3: memref<2x4xf32, #tpu.memory_space<vmem>>, %arg4: memref<2x4xf32, #tpu.memory_space<vmem>>, %arg5: memref<1x4xf32, #tpu.memory_space<vmem>>, %arg6: memref<512x4xf32, #tpu.memory_space<vmem>>) attributes {dimension_semantics = [#tpu.dimension_semantics<parallel>], iteration_bounds = array<i64: 1>, scalar_prefetch = 0 : i64, scratch_operands = 0 : i64, tpu.core_type = #tpu.core_type<tc>, window_params = [{transform_indices = @transform_0, window_bounds = array<i64: 512, 2>}, {transform_indices = @transform_1, window_bounds = array<i64: 512, 2>}, {pipeline_mode = #tpu.pipeline_mode<synchronous>, transform_indices = @transform_2, window_bounds = array<i64: 2, 4>}, {pipeline_mode = #tpu.pipeline_mode<synchronous>, transform_indices = @transform_3, window_bounds = array<i64: 2, 4>}, {pipeline_mode = #tpu.pipeline_mode<synchronous>, transform_indices = @transform_4, window_bounds = array<i64: 1, 4>}, {transform_indices = @transform_5, window_bounds = array<i64: 512, 4>}]} {
    %c0 = arith.constant 0 : index
    %c0_0 = arith.constant 0 : index
    %0 = vector.load %arg1[%c0, %c0_0] : memref<512x2xf32, #tpu.memory_space<vmem>>, vector<512x2xf32>
    %c0_1 = arith.constant 0 : index
    %c0_2 = arith.constant 0 : index
    %1 = vector.load %arg3[%c0_1, %c0_2] : memref<2x4xf32, #tpu.memory_space<vmem>>, vector<2x4xf32>
    %cst = arith.constant dense<0.000000e+00> : vector<512x4xf32>
    %2 = tpu.matmul %0, %1, %cst {dimension_numbers = #tpu.dot_dimension_numbers<[1], [0], [0], [1], [0, 0, 1, 1], [], []>} : vector<512x2xf32>, vector<2x4xf32>, vector<512x4xf32> -> vector<512x4xf32>
    %c0_3 = arith.constant 0 : index
    %c0_4 = arith.constant 0 : index
    %3 = vector.load %arg2[%c0_3, %c0_4] : memref<512x2xf32, #tpu.memory_space<vmem>>, vector<512x2xf32>
    %c0_5 = arith.constant 0 : index
    %c0_6 = arith.constant 0 : index
    %4 = vector.load %arg4[%c0_5, %c0_6] : memref<2x4xf32, #tpu.memory_space<vmem>>, vector<2x4xf32>
    %cst_7 = arith.constant dense<0.000000e+00> : vector<512x4xf32>
    %5 = tpu.matmul %3, %4, %cst_7 {dimension_numbers = #tpu.dot_dimension_numbers<[1], [0], [0], [1], [0, 0, 1, 1], [], []>} : vector<512x2xf32>, vector<2x4xf32>, vector<512x4xf32> -> vector<512x4xf32>
    %6 = arith.addf %2, %5 : vector<512x4xf32>
    %c0_8 = arith.constant 0 : index
    %c0_9 = arith.constant 0 : index
    %7 = vector.load %arg5[%c0_8, %c0_9] : memref<1x4xf32, #tpu.memory_space<vmem>>, vector<1x4xf32>
    %8 = vector.broadcast %7 : vector<1x4xf32> to vector<512x4xf32>
    %9 = arith.addf %6, %8 : vector<512x4xf32>
    %10 = arith.negf %9 : vector<512x4xf32>
    %11 = math.exp %10 : vector<512x4xf32>
    %cst_10 = arith.constant 1.000000e+00 : f32
    %12 = vector.broadcast %cst_10 : f32 to vector<512x4xf32>
    %13 = arith.addf %12, %11 : vector<512x4xf32>
    %14 = arith.divf %12, %13 : vector<512x4xf32>
    %15 = arith.mulf %9, %14 : vector<512x4xf32>
    %c0_11 = arith.constant 0 : index
    %c0_12 = arith.constant 0 : index
    %16 = vector.load %arg6[%c0_11, %c0_12] : memref<512x4xf32, #tpu.memory_space<vmem>>, vector<512x4xf32>
    tpu.vector_store %arg6[%c0_11, %c0_12], %15 {strides = array<i32>} : memref<512x4xf32, #tpu.memory_space<vmem>>, vector<512x4xf32>,
    return
  }
  func.func @transform_0(%arg0: i32) -> (i32, i32) {
    %c0_i32 = arith.constant 0 : i32
    %c0_i32_0 = arith.constant 0 : i32
    return %arg0, %c0_i32 : i32, i32
  }
  func.func @transform_1(%arg0: i32) -> (i32, i32) {
    %c0_i32 = arith.constant 0 : i32
    %c0_i32_0 = arith.constant 0 : i32
    return %arg0, %c0_i32 : i32, i32
  }
  func.func @transform_2(%arg0: i32) -> (i32, i32) {
    %c0_i32 = arith.constant 0 : i32
    %c0_i32_0 = arith.constant 0 : i32
    %c0_i32_1 = arith.constant 0 : i32
    return %c0_i32, %c0_i32_0 : i32, i32
  }
  func.func @transform_3(%arg0: i32) -> (i32, i32) {
    %c0_i32 = arith.constant 0 : i32
    %c0_i32_0 = arith.constant 0 : i32
    %c0_i32_1 = arith.constant 0 : i32
    return %c0_i32, %c0_i32_0 : i32, i32
  }
  func.func @transform_4(%arg0: i32) -> (i32, i32) {
    %c0_i32 = arith.constant 0 : i32
    %c0_i32_0 = arith.constant 0 : i32
    %c0_i32_1 = arith.constant 0 : i32
    return %c0_i32, %c0_i32_0 : i32, i32
  }
  func.func @transform_5(%arg0: i32) -> (i32, i32) {
    %c0_i32 = arith.constant 0 : i32
    %c0_i32_0 = arith.constant 0 : i32
    return %arg0, %c0_i32 : i32, i32
  }
}

</mosaic_0001>

<bundles_post_ra>
// kernel: _lambda_.5
= control target key start
LH: loop header
LB: loop body
LE: loop exit
PB: predicated region body
PF: predicated region fallthrough
CT: control target
= control target key end

     0   :  { %vm279_vm0 = vcmask 1043456   ;;  %vm86_vm1 = vcmask 31744   ;;  %vm1116_vm2 = vcmask 15360   ;;  %s2611_s1 = inlined_call_operand.vmem [shape: f32[4,2], index: 1, kind: input, shape index: {}]   ;;  %s2612_s0 = inlined_call_operand.vmem [shape: f32[512,4], index: 0, kind: input, shape index: {}]   ;;  %s2613_s2 = inlined_call_operand.vmem [shape: f32[1,2], index: 2, kind: input, shape index: {}]   ;;  %s2614_s3 = inlined_call_operand.vmem [shape: f32[512,2], index: 3, kind: output, shape index: {}]  }
   0x1   :  { %v78_v0 = vld [vmem:[%s2611_s1] sm:$0xf]  ;;  %v15_v3 = vld [vmem:[%s2612_s0 + $0x8] sm:$0xff]  ;;  %v16_v5 = vld [vmem:[%s2612_s0 + $0x10] sm:$0xff] }
   0x2   :  { %v14_v1 = vld [vmem:[%s2612_s0] sm:$0xff]  ;;  %1380 = vmatprep.subr.msk.mxu0 %vm279_vm0, %v78_v0  ;;  %1478 = vmatprep.subr.msk.mxu1 %vm279_vm0, %v78_v0  ;;  %v47_v4 = vld [vmem:[%s2612_s0 + $0x108] sm:$0xff]  ;;  %v48_v6 = vld [vmem:[%s2612_s0 + $0x110] sm:$0xff] }
   0x3   :  { %v46_v2 = vld [vmem:[%s2612_s0 + $0x100] sm:$0xff]  ;;  %1381 = vmatpush3.msk.msra.mxu0 %vm279_vm0, %v78_v0  ;;  %1479 = vmatpush3.msk.msra.mxu1 %vm279_vm0, %v78_v0  ;;  %v17_v7 = vld [vmem:[%s2612_s0 + $0x18] sm:$0xff]  ;;  %v19_v11 = vld [vmem:[%s2612_s0 + $0x28] sm:$0xff] }
   0x4   :  { %1382 = vmatprep.mubr.msk.f32.mxu0 %vm86_vm1, %v14_v1  ;;  %1430 = vmatprep.mubr.msk.f32.mxu1 %vm86_vm1, %v46_v2  ;;  %v49_v8 = vld [vmem:[%s2612_s0 + $0x118] sm:$0xff]  ;;  %v18_v9 = vld [vmem:[%s2612_s0 + $0x20] sm:$0xff]  ;;  %v51_v12 = vld [vmem:[%s2612_s0 + $0x128] sm:$0xff] }
   0x5   :  { %1383 = vmatmul.mubr.msk.f32.vlgmr.msra.gmra.mxu0 %vm86_vm1, %v15_v3  ;;  %1431 = vmatmul.mubr.msk.f32.vlgmr.msra.gmra.mxu1 %vm86_vm1, %v47_v4  ;;  %v50_v10 = vld [vmem:[%s2612_s0 + $0x120] sm:$0xff]  ;;  %v20_v13 = vld [vmem:[%s2612_s0 + $0x30] sm:$0xff]  ;;  %v21_v15 = vld [vmem:[%s2612_s0 + $0x38] sm:$0xff] }
   0x6   :  { %1385 = vmatprep.mubr.msk.f32.mxu0 %vm86_vm1, %v16_v5  ;;  %1433 = vmatprep.mubr.msk.f32.mxu1 %vm86_vm1, %v48_v6  ;;  %v52_v14 = vld [vmem:[%s2612_s0 + $0x130] sm:$0xff]  ;;  %v53_v16 = vld [vmem:[%s2612_s0 + $0x138] sm:$0xff]  ;;  %v22_v17 = vld [vmem:[%s2612_s0 + $0x40] sm:$0xff] }
   0x7   :  { %v54_v18 = vld [vmem:[%s2612_s0 + $0x140] sm:$0xff]  ;;  %v23_v19 = vld [vmem:[%s2612_s0 + $0x48] sm:$0xff]  ;;  %v24_v21 = vld [vmem:[%s2612_s0 + $0x50] sm:$0xff] }
   0x8   :  { %v55_v20 = vld [vmem:[%s2612_s0 + $0x148] sm:$0xff]  ;;  %v56_v22 = vld [vmem:[%s2612_s0 + $0x150] sm:$0xff]  ;;  %v25_v23 = vld [vmem:[%s2612_s0 + $0x58] sm:$0xff] }
   0x9   :  { %1386 = vmatmul.mubr.msk.f32.gmra.mxu0 %vm86_vm1, %v17_v7  ;;  %1434 = vmatmul.mubr.msk.f32.gmra.mxu1 %vm86_vm1, %v49_v8  ;;  %v57_v24 = vld [vmem:[%s2612_s0 + $0x158] sm:$0xff]  ;;  %v26_v25 = vld [vmem:[%s2612_s0 + $0x60] sm:$0xff]  ;;  %v27_v27 = vld [vmem:[%s2612_s0 + $0x68] sm:$0xff] }
   0xa   :  { %1388 = vmatprep.mubr.msk.f32.mxu0 %vm86_vm1, %v18_v9  ;;  %1436 = vmatprep.mubr.msk.f32.mxu1 %vm86_vm1, %v50_v10  ;;  %v58_v26 = vld [vmem:[%s2612_s0 + $0x160] sm:$0xff]  ;;  %v59_v28 = vld [vmem:[%s2612_s0 + $0x168] sm:$0xff]  ;;  %v28_v29 = vld [vmem:[%s2612_s0 + $0x70] sm:$0xff] }
   0xb   :  { %v60_v30 = vld [vmem:[%s2612_s0 + $0x170] sm:$0xff]  ;;  %v29_v31 = vld [vmem:[%s2612_s0 + $0x78] sm:$0xff]  ;;  %v30_v33 = vld [vmem:[%s2612_s0 + $0x80] sm:$0xff] }
   0xc   :  { %v61_v32 = vld [vmem:[%s2612_s0 + $0x178] sm:$0xff]  ;;  %v62_v34 = vld [vmem:[%s2612_s0 + $0x180] sm:$0xff]  ;;  %v31_v35 = vld [vmem:[%s2612_s0 + $0x88] sm:$0xff] }
   0xd   :  { %1389 = vmatmul.mubr.msk.f32.gmra.mxu0 %vm86_vm1, %v19_v11  ;;  %1437 = vmatmul.mubr.msk.f32.gmra.mxu1 %vm86_vm1, %v51_v12  ;;  %v63_v36 = vld [vmem:[%s2612_s0 + $0x188] sm:$0xff]  ;;  %v32_v37 = vld [vmem:[%s2612_s0 + $0x90] sm:$0xff]  ;;  %v33_v39 = vld [vmem:[%s2612_s0 + $0x98] sm:$0xff] }
   0xe   :  { %1391 = vmatprep.mubr.msk.f32.mxu0 %vm86_vm1, %v20_v13  ;;  %1439 = vmatprep.mubr.msk.f32.mxu1 %vm86_vm1, %v52_v14  ;;  %v64_v38 = vld [vmem:[%s2612_s0 + $0x190] sm:$0xff]  ;;  %v65_v40 = vld [vmem:[%s2612_s0 + $0x198] sm:$0xff]  ;;  %v34_v41 = vld [vmem:[%s2612_s0 + $0xa0] sm:$0xff] }
   0xf   :  { %v66_v42 = vld [vmem:[%s2612_s0 + $0x1a0] sm:$0xff]  ;;  %v35_v43 = vld [vmem:[%s2612_s0 + $0xa8] sm:$0xff]  ;;  %v36_v45 = vld [vmem:[%s2612_s0 + $0xb0] sm:$0xff] }
  0x10   :  { %v67_v44 = vld [vmem:[%s2612_s0 + $0x1a8] sm:$0xff]  ;;  %v68_v46 = vld [vmem:[%s2612_s0 + $0x1b0] sm:$0xff]  ;;  %v37_v47 = vld [vmem:[%s2612_s0 + $0xb8] sm:$0xff] }
  0x11   :  { %1392 = vmatmul.mubr.msk.f32.gmra.mxu0 %vm86_vm1, %v21_v15  ;;  %1440 = vmatmul.mubr.msk.f32.gmra.mxu1 %vm86_vm1, %v53_v16  ;;  %v69_v48 = vld [vmem:[%s2612_s0 + $0x1b8] sm:$0xff]  ;;  %v38_v49 = vld [vmem:[%s2612_s0 + $0xc0] sm:$0xff]  ;;  %v39_v51 = vld [vmem:[%s2612_s0 + $0xc8] sm:$0xff] }
  0x12   :  { %1394 = vmatprep.mubr.msk.f32.mxu0 %vm86_vm1, %v22_v17  ;;  %1442 = vmatprep.mubr.msk.f32.mxu1 %vm86_vm1, %v54_v18  ;;  %v70_v50 = vld [vmem:[%s2612_s0 + $0x1c0] sm:$0xff]  ;;  %v71_v52 = vld [vmem:[%s2612_s0 + $0x1c8] sm:$0xff]  ;;  %v40_v53 = vld [vmem:[%s2612_s0 + $0xd0] sm:$0xff] }
  0x13   :  { %v72_v54 = vld [vmem:[%s2612_s0 + $0x1d0] sm:$0xff]  ;;  %v41_v55 = vld [vmem:[%s2612_s0 + $0xd8] sm:$0xff]  ;;  %v42_v57 = vld [vmem:[%s2612_s0 + $0xe0] sm:$0xff] }
  0x14   :  { %v73_v56 = vld [vmem:[%s2612_s0 + $0x1d8] sm:$0xff]  ;;  %v74_v58 = vld [vmem:[%s2612_s0 + $0x1e0] sm:$0xff]  ;;  %v43_v59 = vld [vmem:[%s2612_s0 + $0xe8] sm:$0xff] }
  0x15   :  { %1395 = vmatmul.mubr.msk.f32.gmra.mxu0 %vm86_vm1, %v23_v19  ;;  %1443 = vmatmul.mubr.msk.f32.gmra.mxu1 %vm86_vm1, %v55_v20  ;;  %v75_v60 = vld [vmem:[%s2612_s0 + $0x1e8] sm:$0xff]  ;;  %v44_v61 = vld [vmem:[%s2612_s0 + $0xf0] sm:$0xff]  ;;  %v45_v63 = vld [vmem:[%s2612_s0 + $0xf8] sm:$0xff] }
  0x16   :  { %1397 = vmatprep.mubr.msk.f32.mxu0 %vm86_vm1, %v24_v21  ;;  %1445 = vmatprep.mubr.msk.f32.mxu1 %vm86_vm1, %v56_v22  ;;  %v76_v62 = vld [vmem:[%s2612_s0 + $0x1f0] sm:$0xff]  ;;  %v77_v0 = vld [vmem:[%s2612_s0 + $0x1f8] sm:$0xff]  ;;  %v2019_v1 = vld [vmem:[%s2613_s2] ss:$0 sm:$0xff] }
  0x19   :  { %1398 = vmatmul.mubr.msk.f32.gmra.mxu0 %vm86_vm1, %v25_v23  ;;  %1446 = vmatmul.mubr.msk.f32.gmra.mxu1 %vm86_vm1, %v57_v24 }
  0x1a   :  { %1400 = vmatprep.mubr.msk.f32.mxu0 %vm86_vm1, %v26_v25  ;;  %1448 = vmatprep.mubr.msk.f32.mxu1 %vm86_vm1, %v58_v26 }
  0x1d   :  { %1401 = vmatmul.mubr.msk.f32.gmra.mxu0 %vm86_vm1, %v27_v27  ;;  %1449 = vmatmul.mubr.msk.f32.gmra.mxu1 %vm86_vm1, %v59_v28 }
  0x1e   :  { %1403 = vmatprep.mubr.msk.f32.mxu0 %vm86_vm1, %v28_v29  ;;  %1451 = vmatprep.mubr.msk.f32.mxu1 %vm86_vm1, %v60_v30 }
  0x21   :  { %1404 = vmatmul.mubr.msk.f32.gmra.mxu0 %vm86_vm1, %v29_v31  ;;  %1452 = vmatmul.mubr.msk.f32.gmra.mxu1 %vm86_vm1, %v61_v32 }
  0x22   :  { %1406 = vmatprep.mubr.msk.f32.mxu0 %vm86_vm1, %v30_v33  ;;  %1454 = vmatprep.mubr.msk.f32.mxu1 %vm86_vm1, %v62_v34 }
  0x25   :  { %1407 = vmatmul.mubr.msk.f32.gmra.mxu0 %vm86_vm1, %v31_v35  ;;  %1455 = vmatmul.mubr.msk.f32.gmra.mxu1 %vm86_vm1, %v63_v36 }
  0x26   :  { %1409 = vmatprep.mubr.msk.f32.mxu0 %vm86_vm1, %v32_v37  ;;  %1457 = vmatprep.mubr.msk.f32.mxu1 %vm86_vm1, %v64_v38 }
  0x29   :  { %1410 = vmatmul.mubr.msk.f32.gmra.mxu0 %vm86_vm1, %v33_v39  ;;  %1458 = vmatmul.mubr.msk.f32.gmra.mxu1 %vm86_vm1, %v65_v40 }
  0x2a   :  { %1412 = vmatprep.mubr.msk.f32.mxu0 %vm86_vm1, %v34_v41  ;;  %1460 = vmatprep.mubr.msk.f32.mxu1 %vm86_vm1, %v66_v42 }
  0x2d   :  { %1413 = vmatmul.mubr.msk.f32.gmra.mxu0 %vm86_vm1, %v35_v43  ;;  %1461 = vmatmul.mubr.msk.f32.gmra.mxu1 %vm86_vm1, %v67_v44 }
  0x2e   :  { %1415 = vmatprep.mubr.msk.f32.mxu0 %vm86_vm1, %v36_v45  ;;  %1463 = vmatprep.mubr.msk.f32.mxu1 %vm86_vm1, %v68_v46 }
  0x31   :  { %1416 = vmatmul.mubr.msk.f32.gmra.mxu0 %vm86_vm1, %v37_v47  ;;  %1464 = vmatmul.mubr.msk.f32.gmra.mxu1 %vm86_vm1, %v69_v48 }
  0x32   :  { %1418 = vmatprep.mubr.msk.f32.mxu0 %vm86_vm1, %v38_v49  ;;  %1466 = vmatprep.mubr.msk.f32.mxu1 %vm86_vm1, %v70_v50 }
  0x35   :  { %1419 = vmatmul.mubr.msk.f32.gmra.mxu0 %vm86_vm1, %v39_v51  ;;  %1467 = vmatmul.mubr.msk.f32.gmra.mxu1 %vm86_vm1, %v71_v52 }
  0x36   :  { %1421 = vmatprep.mubr.msk.f32.mxu0 %vm86_vm1, %v40_v53  ;;  %1469 = vmatprep.mubr.msk.f32.mxu1 %vm86_vm1, %v72_v54 }
  0x39   :  { %1422 = vmatmul.mubr.msk.f32.gmra.mxu0 %vm86_vm1, %v41_v55  ;;  %1470 = vmatmul.mubr.msk.f32.gmra.mxu1 %vm86_vm1, %v73_v56 }
  0x3a   :  { %1424 = vmatprep.mubr.msk.f32.mxu0 %vm86_vm1, %v42_v57  ;;  %1472 = vmatprep.mubr.msk.f32.mxu1 %vm86_vm1, %v74_v58 }
  0x3d   :  { %1425 = vmatmul.mubr.msk.f32.gmra.mxu0 %vm86_vm1, %v43_v59  ;;  %1473 = vmatmul.mubr.msk.f32.gmra.mxu1 %vm86_vm1, %v75_v60 }
  0x3e   :  { %1427 = vmatprep.mubr.msk.f32.mxu0 %vm86_vm1, %v44_v61  ;;  %1475 = vmatprep.mubr.msk.f32.mxu1 %vm86_vm1, %v76_v62 }
  0x41   :  { %1428 = vmatmul.mubr.msk.f32.gmra.mxu0 %vm86_vm1, %v45_v63  ;;  %1476 = vmatmul.mubr.msk.f32.gmra.mxu1 %vm86_vm1, %v77_v0 }
  0xc5   :  { %v1384_v2 = vpop.f32.mrf.mxu0  ;;  %v1432_v3 = vpop.f32.mrf.mxu1 }
  0xc6   :  { %v2022_v4 = vadd.f32 %v1384_v2, %v2019_v1  ;;  %v2025_v5 = vadd.f32 %v1432_v3, %v2019_v1 }
  0xc7   :  { %v349_v6 = vpop.f32.mrf.mxu0  ;;  %v509_v7 = vpop.f32.mrf.mxu1 }
  0xc8   :  { %v1252_v8 = vmul.f32 -1.442695, %v2022_v4  ;;  %v1284_v9 = vmul.f32 -1.442695, %v2025_v5  ;;  %v2030_v10 = vadd.f32 %v2019_v1, %v349_v6  ;;  %v2033_v11 = vadd.f32 %v2019_v1, %v509_v7 }
  0xc9   :  { %v1387_v12 = vpop.f32.mrf.mxu0  ;;  %v1435_v13 = vpop.f32.mrf.mxu1 }
  0xca   :  { %1480 = vpow2.f32 %v1252_v8  ;;  %v1251_v14 = vmul.f32 -1.442695, %v2030_v10  ;;  %v1283_v15 = vmul.f32 -1.442695, %v2033_v11  ;;  %v2038_v16 = vadd.f32 %v1387_v12, %v2019_v1 }
  0xcb   :  { %1482 = vpow2.f32 %v1284_v9  ;;  %v2041_v17 = vadd.f32 %v1435_v13, %v2019_v1  ;;  %v359_v18 = vpop.f32.mrf.mxu0  ;;  %v519_v19 = vpop.f32.mrf.mxu1 }
  0xcc   :  { %1484 = vpow2.f32 %v1251_v14  ;;  %v1254_v20 = vmul.f32 -1.442695, %v2038_v16  ;;  %v2045_v21 = vadd.f32 %v2019_v1, %v359_v18  ;;  %v2048_v22 = vadd.f32 %v2019_v1, %v519_v19 }
  0xcd   :  { %1486 = vpow2.f32 %v1283_v15  ;;  %v1286_v23 = vmul.f32 -1.442695, %v2041_v17  ;;  %v1390_v24 = vpop.f32.mrf.mxu0  ;;  %v1438_v25 = vpop.f32.mrf.mxu1 }
  0xce   :  { %1488 = vpow2.f32 %v1254_v20  ;;  %v1253_v26 = vmul.f32 -1.442695, %v2045_v21  ;;  %v1285_v27 = vmul.f32 -1.442695, %v2048_v22  ;;  %v2054_v28 = vadd.f32 %v1390_v24, %v2019_v1 }
  0xcf   :  { %1490 = vpow2.f32 %v1286_v23  ;;  %v2057_v29 = vadd.f32 %v1438_v25, %v2019_v1  ;;  %v369_v30 = vpop.f32.mrf.mxu0  ;;  %v529_v31 = vpop.f32.mrf.mxu1 }
  0xd0   :  { %1492 = vpow2.f32 %v1253_v26  ;;  %v1256_v32 = vmul.f32 -1.442695, %v2054_v28  ;;  %v2061_v33 = vadd.f32 %v2019_v1, %v369_v30  ;;  %v2064_v34 = vadd.f32 %v2019_v1, %v529_v31 }
  0xd1   :  { %1494 = vpow2.f32 %v1285_v27  ;;  %v1288_v35 = vmul.f32 -1.442695, %v2057_v29  ;;  %v1393_v36 = vpop.f32.mrf.mxu0  ;;  %v1441_v37 = vpop.f32.mrf.mxu1 }
  0xd2   :  { %1496 = vpow2.f32 %v1256_v32  ;;  %v1255_v38 = vmul.f32 -1.442695, %v2061_v33  ;;  %v1287_v39 = vmul.f32 -1.442695, %v2064_v34  ;;  %v2070_v40 = vadd.f32 %v1393_v36, %v2019_v1 }
  0xd3   :  { %1498 = vpow2.f32 %v1288_v35  ;;  %v2073_v41 = vadd.f32 %v1441_v37, %v2019_v1  ;;  %v379_v42 = vpop.f32.mrf.mxu0  ;;  %v539_v43 = vpop.f32.mrf.mxu1 }
  0xd4   :  { %1500 = vpow2.f32 %v1255_v38  ;;  %v1258_v44 = vmul.f32 -1.442695, %v2070_v40  ;;  %v2077_v45 = vadd.f32 %v2019_v1, %v379_v42  ;;  %v2080_v46 = vadd.f32 %v2019_v1, %v539_v43 }
  0xd5   :  { %1502 = vpow2.f32 %v1287_v39  ;;  %v1290_v47 = vmul.f32 -1.442695, %v2073_v41  ;;  %v1396_v48 = vpop.f32.mrf.mxu0  ;;  %v1444_v49 = vpop.f32.mrf.mxu1 }
  0xd6   :  { %1504 = vpow2.f32 %v1258_v44  ;;  %v1257_v50 = vmul.f32 -1.442695, %v2077_v45  ;;  %v1289_v51 = vmul.f32 -1.442695, %v2080_v46  ;;  %v2086_v27 = vadd.f32 %v1396_v48, %v2019_v1 }
  0xd7   :  { %v1481_v52 = vpop.eup %1480  ;;  %1506 = vpow2.f32 %v1290_v47  ;;  %v389_v53 = vpop.f32.mrf.mxu0  ;;  %v2089_v35 = vadd.f32 %v1444_v49, %v2019_v1 }
  0xd8   :  { %v549_v54 = vpop.f32.mrf.mxu1  ;;  %v1483_v55 = vpop.eup %1482  ;;  %v861_v56 = vadd.f32 1.0, %v1481_v52  ;;  %1508 = vpow2.f32 %v1257_v50  ;;  %v2092_v38 = vadd.f32 %v2019_v1, %v389_v53  ;;  %v1260_v49 = vmul.f32 -1.442695, %v2086_v27 }
  0xd9   :  { %v1485_v57 = vpop.eup %1484  ;;  %v893_v58 = vadd.f32 1.0, %v1483_v55  ;;  %1510 = vpow2.f32 %v1289_v51  ;;  %v1399_v59 = vpop.f32.mrf.mxu0  ;;  %v2095_v43 = vadd.f32 %v2019_v1, %v549_v54  ;;  %v1292_v55 = vmul.f32 -1.442695, %v2089_v35 }
  0xda   :  { %v1487_v60 = vpop.eup %1486  ;;  %1512 = vrcp.f32 %v861_v56  ;;  %v860_v61 = vadd.f32 1.0, %v1485_v57  ;;  %v1447_v62 = vpop.f32.mrf.mxu1  ;;  %v2099_v50 = vadd.f32 %v1399_v59, %v2019_v1 }
  0xdb   :  { %v1489_v63 = vpop.eup %1488  ;;  %1514 = vrcp.f32 %v893_v58  ;;  %v892_v0 = vadd.f32 1.0, %v1487_v60  ;;  %v399_v8 = vpop.f32.mrf.mxu0  ;;  %v2103_v56 = vadd.f32 %v1447_v62, %v2019_v1  ;;  %v1259_v58 = vmul.f32 -1.442695, %v2092_v38 }
  0xdc   :  { %v1491_v2 = vpop.eup %1490  ;;  %1516 = vrcp.f32 %v860_v61  ;;  %v863_v3 = vadd.f32 1.0, %v1489_v63  ;;  %v559_v13 = vpop.f32.mrf.mxu1  ;;  %v2108_v60 = vadd.f32 %v2019_v1, %v399_v8  ;;  %v1291_v63 = vmul.f32 -1.442695, %v2095_v43 }
  0xdd   :  { %v1493_v6 = vpop.eup %1492  ;;  %1518 = vrcp.f32 %v892_v0  ;;  %v895_v7 = vadd.f32 1.0, %v1491_v2  ;;  %v1402_v24 = vpop.f32.mrf.mxu0  ;;  %v2113_v0 = vadd.f32 %v2019_v1, %v559_v13 }
  0xde   :  { %v1495_v9 = vpop.eup %1494  ;;  %1520 = vrcp.f32 %v863_v3  ;;  %v862_v12 = vadd.f32 1.0, %v1493_v6  ;;  %v1450_v30 = vpop.f32.mrf.mxu1  ;;  %v1262_v3 = vmul.f32 -1.442695, %v2099_v50 }
  0xdf   :  { %v1497_v14 = vpop.eup %1496  ;;  %1522 = vrcp.f32 %v895_v7  ;;  %v894_v15 = vadd.f32 1.0, %v1495_v9  ;;  %v409_v44 = vpop.f32.mrf.mxu0  ;;  %v1294_v9 = vmul.f32 -1.442695, %v2103_v56 }
  0xe0   :  { %v1499_v18 = vpop.eup %1498  ;;  %1524 = vrcp.f32 %v862_v12  ;;  %v865_v19 = vadd.f32 1.0, %v1497_v14  ;;  %v569_v51 = vpop.f32.mrf.mxu1  ;;  %v1261_v14 = vmul.f32 -1.442695, %v2108_v60 }
  0xe1   :  { %v1501_v20 = vpop.eup %1500  ;;  %1526 = vrcp.f32 %v894_v15  ;;  %v897_v23 = vadd.f32 1.0, %v1499_v18  ;;  %v1405_v62 = vpop.f32.mrf.mxu0  ;;  %v2140_v15 = vadd.f32 %v2019_v1, %v409_v44 }
  0xe2   :  { %v1503_v25 = vpop.eup %1502  ;;  %1528 = vrcp.f32 %v865_v19  ;;  %v864_v26 = vadd.f32 1.0, %v1501_v20  ;;  %v1453_v6 = vpop.f32.mrf.mxu1  ;;  %v1293_v19 = vmul.f32 -1.442695, %v2113_v0  ;;  %v2149_v20 = vadd.f32 %v2019_v1, %v569_v51 }
  0xe3   :  { %v1505_v31 = vpop.eup %1504  ;;  %1530 = vrcp.f32 %v897_v23  ;;  %v896_v32 = vadd.f32 1.0, %v1503_v25 }
  0xe4   :  { %v1507_v36 = vpop.eup %1506  ;;  %1532 = vrcp.f32 %v864_v26  ;;  %v867_v37 = vadd.f32 1.0, %v1505_v31  ;;  %v579_v26 = vpop.f32.mrf.mxu1 }
  0xe5   :  { %v1509_v39 = vpop.eup %1508  ;;  %1534 = vrcp.f32 %v896_v32  ;;  %v899_v42 = vadd.f32 1.0, %v1507_v36 }
  0xe6   :  { %v1511_v47 = vpop.eup %1510  ;;  %1536 = vrcp.f32 %v867_v37  ;;  %v866_v48 = vadd.f32 1.0, %v1509_v39  ;;  %v1263_v39 = vmul.f32 -1.442695, %v2140_v15 }
  0xe7   :  { %v1513_v52 = vpop.eup %1512  ;;  %1538 = vrcp.f32 %v899_v42  ;;  %v898_v53 = vadd.f32 1.0, %v1511_v47  ;;  %v1295_v47 = vmul.f32 -1.442695, %v2149_v20 }
  0xe8   :  { %v1515_v54 = vpop.eup %1514  ;;  %v1053_v57 = vmul.f32 %v1513_v52, %v2022_v4  ;;  %1540 = vrcp.f32 %v866_v48  ;;  %v2185_v48 = vadd.f32 %v2019_v1, %v579_v26 }
  0xe9   :  { %v1517_v59 = vpop.eup %1516  ;;  %v1085_v61 = vmul.f32 %v1515_v54, %v2025_v5  ;;  %1542 = vrcp.f32 %v898_v53  ;;  %v2122_v5 = vadd.f32 %v1402_v24, %v2019_v1 }
  0xea   :  { %v1519_v2 = vpop.eup %1518  ;;  %1118 = vst.msk [vmem:[%s2614_s3 + $0x8] sm:$0xff] %vm1116_vm2, %v1053_v57  ;;  %v1052_v4 = vmul.f32 %v1517_v59, %v2030_v10  ;;  %1544 = vpow2.f32 %v1260_v49  ;;  %v2131_v10 = vadd.f32 %v1450_v30, %v2019_v1 }
  0xeb   :  { %v1521_v7 = vpop.eup %1520  ;;  %1150 = vst.msk [vmem:[%s2614_s3 + $0x108] sm:$0xff] %vm1116_vm2, %v1085_v61  ;;  %v1084_v8 = vmul.f32 %v1519_v2, %v2033_v11  ;;  %1546 = vpow2.f32 %v1292_v55  ;;  %v1264_v25 = vmul.f32 -1.442695, %v2122_v5  ;;  %v1297_v61 = vmul.f32 -1.442695, %v2185_v48 }
  0xec   :  { %v1523_v12 = vpop.eup %1522  ;;  %1117 = vst.msk [vmem:[%s2614_s3] sm:$0xff] %vm1116_vm2, %v1052_v4  ;;  %v1055_v13 = vmul.f32 %v1521_v7, %v2038_v16  ;;  %1548 = vpow2.f32 %v1259_v58  ;;  %v419_v16 = vpop.f32.mrf.mxu0  ;;  %v1296_v32 = vmul.f32 -1.442695, %v2131_v10 }
  0xed   :  { %v1525_v11 = vpop.eup %1524  ;;  %1149 = vst.msk [vmem:[%s2614_s3 + $0x100] sm:$0xff] %vm1116_vm2, %v1084_v8  ;;  %v1087_v18 = vmul.f32 %v1523_v12, %v2041_v17  ;;  %1550 = vpow2.f32 %v1291_v63  ;;  %v2158_v17 = vadd.f32 %v1405_v62, %v2019_v1  ;;  %v2176_v42 = vadd.f32 %v2019_v1, %v419_v16 }
  0xee   :  { %v1527_v23 = vpop.eup %1526  ;;  %1120 = vst.msk [vmem:[%s2614_s3 + $0x18] sm:$0xff] %vm1116_vm2, %v1055_v13  ;;  %v1054_v24 = vmul.f32 %v1525_v11, %v2045_v21  ;;  %1552 = vpow2.f32 %v1262_v3  ;;  %v2167_v21 = vadd.f32 %v1453_v6, %v2019_v1 }
  0xef   :  { %v1529_v30 = vpop.eup %1528  ;;  %1152 = vst.msk [vmem:[%s2614_s3 + $0x118] sm:$0xff] %vm1116_vm2, %v1087_v18  ;;  %v1086_v31 = vmul.f32 %v1527_v23, %v2048_v22  ;;  %1554 = vpow2.f32 %v1294_v9  ;;  %v1266_v52 = vmul.f32 -1.442695, %v2158_v17  ;;  %v1265_v58 = vmul.f32 -1.442695, %v2176_v42 }
  0xf0   :  { %v1531_v36 = vpop.eup %1530  ;;  %1119 = vst.msk [vmem:[%s2614_s3 + $0x10] sm:$0xff] %vm1116_vm2, %v1054_v24  ;;  %v1057_v37 = vmul.f32 %v1529_v30, %v2054_v28  ;;  %1556 = vpow2.f32 %v1261_v14  ;;  %v2187_v28 = vpop.f32.mrf.mxu0  ;;  %v1298_v54 = vmul.f32 -1.442695, %v2167_v21 }
  0xf1   :  { %v1533_v22 = vpop.eup %1532  ;;  %1151 = vst.msk [vmem:[%s2614_s3 + $0x110] sm:$0xff] %vm1116_vm2, %v1086_v31  ;;  %v1089_v44 = vmul.f32 %v1531_v36, %v2057_v29  ;;  %1558 = vpow2.f32 %v1293_v19  ;;  %v2195_v29 = vpop.f32.mrf.mxu1 }
  0xf2   :  { %v1535_v49 = vpop.eup %1534  ;;  %1122 = vst.msk [vmem:[%s2614_s3 + $0x28] sm:$0xff] %vm1116_vm2, %v1057_v37  ;;  %v1056_v51 = vmul.f32 %v1533_v22, %v2061_v33  ;;  %1560 = vpow2.f32 %v1264_v25  ;;  %v429_v63 = vpop.f32.mrf.mxu0 }
  0xf3   :  { %v1537_v53 = vpop.eup %1536  ;;  %1154 = vst.msk [vmem:[%s2614_s3 + $0x128] sm:$0xff] %vm1116_vm2, %v1089_v44  ;;  %v1088_v55 = vmul.f32 %v1535_v49, %v2064_v34  ;;  %1562 = vpow2.f32 %v1296_v32  ;;  %v589_v2 = vpop.f32.mrf.mxu1  ;;  %v2235_v49 = vadd.f32 %v2187_v28, %v2019_v1 }
  0xf4   :  { %v1539_v57 = vpop.eup %1538  ;;  %1121 = vst.msk [vmem:[%s2614_s3 + $0x20] sm:$0xff] %vm1116_vm2, %v1056_v51  ;;  %v1059_v33 = vmul.f32 %v1537_v53, %v2070_v40  ;;  %1564 = vpow2.f32 %v1263_v39  ;;  %v1411_v8 = vpop.f32.mrf.mxu0  ;;  %v2245_v28 = vadd.f32 %v2019_v1, %v589_v2 }
  0xf5   :  { %v1541_v59 = vpop.eup %1540  ;;  %1153 = vst.msk [vmem:[%s2614_s3 + $0x120] sm:$0xff] %vm1116_vm2, %v1088_v55  ;;  %v1091_v34 = vmul.f32 %v1539_v57, %v2073_v41  ;;  %1566 = vpow2.f32 %v1295_v47  ;;  %v1459_v12 = vpop.f32.mrf.mxu1  ;;  %v2239_v55 = vadd.f32 %v2195_v29, %v2019_v1  ;;  %v2249_v29 = vadd.f32 %v1411_v8, %v2019_v1 }
  0xf6   :  { %v1543_v62 = vpop.eup %1542  ;;  %1124 = vst.msk [vmem:[%s2614_s3 + $0x38] sm:$0xff] %vm1116_vm2, %v1059_v33  ;;  %v1058_v40 = vmul.f32 %v1541_v59, %v2077_v45  ;;  %1568 = vpow2.f32 %v1266_v52  ;;  %v439_v23 = vpop.f32.mrf.mxu0  ;;  %v2242_v33 = vadd.f32 %v2019_v1, %v429_v63 }
  0xf7   :  { %v1545_v4 = vpop.eup %1544  ;;  %1156 = vst.msk [vmem:[%s2614_s3 + $0x138] sm:$0xff] %vm1116_vm2, %v1091_v34  ;;  %v1090_v41 = vmul.f32 %v1543_v62, %v2080_v46  ;;  %1570 = vpow2.f32 %v1298_v54  ;;  %v599_v26 = vpop.f32.mrf.mxu1 }
  0xf8   :  { %v1547_v3 = vpop.eup %1546  ;;  %1123 = vst.msk [vmem:[%s2614_s3 + $0x30] sm:$0xff] %vm1116_vm2, %v1058_v40  ;;  %v869_v6 = vadd.f32 1.0, %v1545_v4  ;;  %1572 = vpow2.f32 %v1265_v58  ;;  %v1414_v22 = vpop.f32.mrf.mxu0  ;;  %v1268_v40 = vmul.f32 -1.442695, %v2235_v49 }
  0xf9   :  { %v1549_v45 = vpop.eup %1548  ;;  %1155 = vst.msk [vmem:[%s2614_s3 + $0x130] sm:$0xff] %vm1116_vm2, %v1090_v41  ;;  %v901_v7 = vadd.f32 1.0, %v1547_v3  ;;  %1574 = vpow2.f32 %v1297_v61  ;;  %v1462_v51 = vpop.f32.mrf.mxu1  ;;  %v1300_v3 = vmul.f32 -1.442695, %v2239_v55 }
  0xfa   :  { %v1551_v9 = vpop.eup %1550  ;;  %1576 = vrcp.f32 %v869_v6  ;;  %v868_v46 = vadd.f32 1.0, %v1549_v45  ;;  %v449_v34 = vpop.f32.mrf.mxu0  ;;  %v2253_v6 = vadd.f32 %v1459_v12, %v2019_v1 }
  0xfb   :  { %v1553_v13 = vpop.eup %1552  ;;  %1578 = vrcp.f32 %v901_v7  ;;  %v900_v14 = vadd.f32 1.0, %v1551_v9  ;;  %v609_v4 = vpop.f32.mrf.mxu1  ;;  %v1267_v7 = vmul.f32 -1.442695, %v2242_v33  ;;  %v2258_v9 = vadd.f32 %v2019_v1, %v439_v23 }
  0xfc   :  { %v1555_v11 = vpop.eup %1554  ;;  %1580 = vrcp.f32 %v868_v46  ;;  %v871_v18 = vadd.f32 1.0, %v1553_v13  ;;  %v1299_v13 = vmul.f32 -1.442695, %v2245_v28  ;;  %v1417_v12 = vpop.f32.mrf.mxu0 }
  0xfd   :  { %v1557_v19 = vpop.eup %1556  ;;  %1582 = vrcp.f32 %v900_v14  ;;  %v903_v16 = vadd.f32 1.0, %v1555_v11  ;;  %v2263_v14 = vadd.f32 %v2019_v1, %v599_v26 }
  0xfe   :  { %v1559_v24 = vpop.eup %1558  ;;  %1584 = vrcp.f32 %v871_v18  ;;  %v870_v25 = vadd.f32 1.0, %v1557_v19  ;;  %v1270_v18 = vmul.f32 -1.442695, %v2249_v29  ;;  %v1465_v19 = vpop.f32.mrf.mxu1 }
  0xff   :  { %v1561_v30 = vpop.eup %1560  ;;  %1586 = vrcp.f32 %v903_v16  ;;  %v902_v31 = vadd.f32 1.0, %v1559_v24  ;;  %v1302_v24 = vmul.f32 -1.442695, %v2253_v6 }
 0x100   :  { %v1563_v32 = vpop.eup %1562  ;;  %1588 = vrcp.f32 %v870_v25  ;;  %v873_v36 = vadd.f32 1.0, %v1561_v30  ;;  %v1269_v30 = vmul.f32 -1.442695, %v2258_v9 }
 0x101   :  { %v1565_v37 = vpop.eup %1564  ;;  %1590 = vrcp.f32 %v902_v31  ;;  %v905_v39 = vadd.f32 1.0, %v1563_v32  ;;  %v2290_v31 = vadd.f32 %v2019_v1, %v449_v34 }
 0x102   :  { %v1567_v44 = vpop.eup %1566  ;;  %1592 = vrcp.f32 %v873_v36  ;;  %v872_v47 = vadd.f32 1.0, %v1565_v37  ;;  %v1301_v36 = vmul.f32 -1.442695, %v2263_v14  ;;  %v2299_v37 = vadd.f32 %v2019_v1, %v609_v4 }
 0x103   :  { %v1569_v52 = vpop.eup %1568  ;;  %1594 = vrcp.f32 %v905_v39  ;;  %v904_v53 = vadd.f32 1.0, %v1567_v44 }
 0x104   :  { %v1571_v54 = vpop.eup %1570  ;;  %1596 = vrcp.f32 %v872_v47  ;;  %v875_v57 = vadd.f32 1.0, %v1569_v52  ;;  %v619_v47 = vpop.f32.mrf.mxu1 }
 0x105   :  { %v1573_v58 = vpop.eup %1572  ;;  %1598 = vrcp.f32 %v904_v53  ;;  %v907_v59 = vadd.f32 1.0, %v1571_v54 }
 0x106   :  { %v1575_v61 = vpop.eup %1574  ;;  %1600 = vrcp.f32 %v875_v57  ;;  %v874_v62 = vadd.f32 1.0, %v1573_v58  ;;  %v1271_v58 = vmul.f32 -1.442695, %v2290_v31 }
 0x107   :  { %v1577_v41 = vpop.eup %1576  ;;  %1602 = vrcp.f32 %v907_v59  ;;  %v906_v63 = vadd.f32 1.0, %v1575_v61  ;;  %v1303_v61 = vmul.f32 -1.442695, %v2299_v37 }
 0x108   :  { %v1579_v2 = vpop.eup %1578  ;;  %v1061_v45 = vmul.f32 %v1577_v41, %v2086_v27  ;;  %1604 = vrcp.f32 %v874_v62  ;;  %v2335_v62 = vadd.f32 %v2019_v1, %v619_v47 }
 0x109   :  { %v1581_v8 = vpop.eup %1580  ;;  %v1093_v46 = vmul.f32 %v1579_v2, %v2089_v35  ;;  %1606 = vrcp.f32 %v906_v63  ;;  %v2272_v35 = vadd.f32 %v1414_v22, %v2019_v1 }
 0x10a   :  { %v1583_v11 = vpop.eup %1582  ;;  %1126 = vst.msk [vmem:[%s2614_s3 + $0x48] sm:$0xff] %vm1116_vm2, %v1061_v45  ;;  %v1060_v27 = vmul.f32 %v1581_v8, %v2092_v38  ;;  %1608 = vpow2.f32 %v1268_v40  ;;  %v2281_v38 = vadd.f32 %v1462_v51, %v2019_v1 }
 0x10b   :  { %v1585_v16 = vpop.eup %1584  ;;  %1158 = vst.msk [vmem:[%s2614_s3 + $0x148] sm:$0xff] %vm1116_vm2, %v1093_v46  ;;  %v1092_v23 = vmul.f32 %v1583_v11, %v2095_v43  ;;  %1610 = vpow2.f32 %v1300_v3  ;;  %v1272_v44 = vmul.f32 -1.442695, %v2272_v35  ;;  %v1305_v46 = vmul.f32 -1.442695, %v2335_v62 }
 0x10c   :  { %v1587_v25 = vpop.eup %1586  ;;  %1125 = vst.msk [vmem:[%s2614_s3 + $0x40] sm:$0xff] %vm1116_vm2, %v1060_v27  ;;  %v1063_v26 = vmul.f32 %v1585_v16, %v2099_v50  ;;  %1612 = vpow2.f32 %v1267_v7  ;;  %v459_v50 = vpop.f32.mrf.mxu0  ;;  %v1304_v53 = vmul.f32 -1.442695, %v2281_v38 }
 0x10d   :  { %v1589_v43 = vpop.eup %1588  ;;  %1157 = vst.msk [vmem:[%s2614_s3 + $0x140] sm:$0xff] %vm1116_vm2, %v1092_v23  ;;  %v1095_v32 = vmul.f32 %v1587_v25, %v2103_v56  ;;  %1614 = vpow2.f32 %v1299_v13  ;;  %v2308_v56 = vadd.f32 %v1417_v12, %v2019_v1  ;;  %v2326_v59 = vadd.f32 %v2019_v1, %v459_v50 }
 0x10e   :  { %v1591_v39 = vpop.eup %1590  ;;  %1128 = vst.msk [vmem:[%s2614_s3 + $0x58] sm:$0xff] %vm1116_vm2, %v1063_v26  ;;  %v1062_v22 = vmul.f32 %v1589_v43, %v2108_v60  ;;  %1616 = vpow2.f32 %v1270_v18  ;;  %v2317_v60 = vadd.f32 %v1465_v19, %v2019_v1 }
 0x10f   :  { %v1593_v51 = vpop.eup %1592  ;;  %1160 = vst.msk [vmem:[%s2614_s3 + $0x158] sm:$0xff] %vm1116_vm2, %v1095_v32  ;;  %v1094_v52 = vmul.f32 %v1591_v39, %v2113_v0  ;;  %1618 = vpow2.f32 %v1302_v24  ;;  %v1274_v41 = vmul.f32 -1.442695, %v2308_v56  ;;  %v1273_v7 = vmul.f32 -1.442695, %v2326_v59 }
 0x110   :  { %v1595_v54 = vpop.eup %1594  ;;  %1127 = vst.msk [vmem:[%s2614_s3 + $0x50] sm:$0xff] %vm1116_vm2, %v1062_v22  ;;  %v1065_v57 = vmul.f32 %v1593_v51, %v2122_v5  ;;  %1620 = vpow2.f32 %v1269_v30  ;;  %v2337_v5 = vpop.f32.mrf.mxu0  ;;  %v1306_v2 = vmul.f32 -1.442695, %v2317_v60 }
 0x111   :  { %v1597_v0 = vpop.eup %1596  ;;  %1159 = vst.msk [vmem:[%s2614_s3 + $0x150] sm:$0xff] %vm1116_vm2, %v1094_v52  ;;  %v1097_v34 = vmul.f32 %v1595_v54, %v2131_v10  ;;  %1622 = vpow2.f32 %v1301_v36  ;;  %v2345_v10 = vpop.f32.mrf.mxu1 }
 0x112   :  { %v1599_v40 = vpop.eup %1598  ;;  %1130 = vst.msk [vmem:[%s2614_s3 + $0x68] sm:$0xff] %vm1116_vm2, %v1065_v57  ;;  %v1064_v4 = vmul.f32 %v1597_v0, %v2140_v15  ;;  %1624 = vpow2.f32 %v1272_v44  ;;  %v469_v13 = vpop.f32.mrf.mxu0 }
 0x113   :  { %v1601_v63 = vpop.eup %1600  ;;  %1162 = vst.msk [vmem:[%s2614_s3 + $0x168] sm:$0xff] %vm1116_vm2, %v1097_v34  ;;  %v1096_v3 = vmul.f32 %v1599_v40, %v2149_v20  ;;  %1626 = vpow2.f32 %v1304_v53  ;;  %v629_v11 = vpop.f32.mrf.mxu1  ;;  %v2385_v40 = vadd.f32 %v2337_v5, %v2019_v1 }
 0x114   :  { %v1603_v45 = vpop.eup %1602  ;;  %1129 = vst.msk [vmem:[%s2614_s3 + $0x60] sm:$0xff] %vm1116_vm2, %v1064_v4  ;;  %v1067_v15 = vmul.f32 %v1601_v63, %v2158_v17  ;;  %1628 = vpow2.f32 %v1271_v58  ;;  %v1423_v23 = vpop.f32.mrf.mxu0  ;;  %v2395_v5 = vadd.f32 %v2019_v1, %v629_v11 }
 0x115   :  { %v1605_v8 = vpop.eup %1604  ;;  %1161 = vst.msk [vmem:[%s2614_s3 + $0x160] sm:$0xff] %vm1116_vm2, %v1096_v3  ;;  %v1099_v20 = vmul.f32 %v1603_v45, %v2167_v21  ;;  %1630 = vpow2.f32 %v1303_v61  ;;  %v1471_v25 = vpop.f32.mrf.mxu1  ;;  %v2389_v3 = vadd.f32 %v2345_v10, %v2019_v1  ;;  %v2399_v10 = vadd.f32 %v1423_v23, %v2019_v1 }
 0x116   :  { %v1607_v12 = vpop.eup %1606  ;;  %1132 = vst.msk [vmem:[%s2614_s3 + $0x78] sm:$0xff] %vm1116_vm2, %v1067_v15  ;;  %v1066_v17 = vmul.f32 %v1605_v8, %v2176_v42  ;;  %1632 = vpow2.f32 %v1274_v41  ;;  %v479_v39 = vpop.f32.mrf.mxu0  ;;  %v2392_v15 = vadd.f32 %v2019_v1, %v469_v13 }
 0x117   :  { %v1609_v27 = vpop.eup %1608  ;;  %1164 = vst.msk [vmem:[%s2614_s3 + $0x178] sm:$0xff] %vm1116_vm2, %v1099_v20  ;;  %v1098_v21 = vmul.f32 %v1607_v12, %v2185_v48  ;;  %1634 = vpow2.f32 %v1306_v2  ;;  %v639_v47 = vpop.f32.mrf.mxu1 }
 0x118   :  { %v1611_v18 = vpop.eup %1610  ;;  %1131 = vst.msk [vmem:[%s2614_s3 + $0x70] sm:$0xff] %vm1116_vm2, %v1066_v17  ;;  %v877_v19 = vadd.f32 1.0, %v1609_v27  ;;  %1636 = vpow2.f32 %v1273_v7  ;;  %v1426_v0 = vpop.f32.mrf.mxu0  ;;  %v1276_v17 = vmul.f32 -1.442695, %v2385_v40 }
 0x119   :  { %v1613_v42 = vpop.eup %1612  ;;  %1163 = vst.msk [vmem:[%s2614_s3 + $0x170] sm:$0xff] %vm1116_vm2, %v1098_v21  ;;  %v909_v16 = vadd.f32 1.0, %v1611_v18  ;;  %1638 = vpow2.f32 %v1305_v46  ;;  %v1474_v4 = vpop.f32.mrf.mxu1  ;;  %v1308_v18 = vmul.f32 -1.442695, %v2389_v3 }
 0x11a   :  { %v1615_v24 = vpop.eup %1614  ;;  %1640 = vrcp.f32 %v877_v19  ;;  %v876_v48 = vadd.f32 1.0, %v1613_v42  ;;  %v489_v20 = vpop.f32.mrf.mxu0  ;;  %v2403_v19 = vadd.f32 %v1471_v25, %v2019_v1 }
 0x11b   :  { %v1617_v26 = vpop.eup %1616  ;;  %1642 = vrcp.f32 %v909_v16  ;;  %v908_v30 = vadd.f32 1.0, %v1615_v24  ;;  %v649_v27 = vpop.f32.mrf.mxu1  ;;  %v1275_v16 = vmul.f32 -1.442695, %v2392_v15  ;;  %v2408_v24 = vadd.f32 %v2019_v1, %v479_v39 }
 0x11c   :  { %v1619_v43 = vpop.eup %1618  ;;  %1644 = vrcp.f32 %v876_v48  ;;  %v879_v32 = vadd.f32 1.0, %v1617_v26  ;;  %v1307_v26 = vmul.f32 -1.442695, %v2395_v5  ;;  %v1429_v25 = vpop.f32.mrf.mxu0 }
 0x11d   :  { %v1621_v36 = vpop.eup %1620  ;;  %1646 = vrcp.f32 %v908_v30  ;;  %v911_v50 = vadd.f32 1.0, %v1619_v43  ;;  %v2413_v30 = vadd.f32 %v2019_v1, %v639_v47 }
 0x11e   :  { %v1623_v22 = vpop.eup %1622  ;;  %1648 = vrcp.f32 %v879_v32  ;;  %v878_v44 = vadd.f32 1.0, %v1621_v36  ;;  %v1278_v32 = vmul.f32 -1.442695, %v2399_v10  ;;  %v1477_v36 = vpop.f32.mrf.mxu1 }
 0x11f   :  { %v1625_v51 = vpop.eup %1624  ;;  %1650 = vrcp.f32 %v911_v50  ;;  %v910_v52 = vadd.f32 1.0, %v1623_v22  ;;  %v1310_v22 = vmul.f32 -1.442695, %v2403_v19 }
 0x120   :  { %v1627_v53 = vpop.eup %1626  ;;  %1652 = vrcp.f32 %v878_v44  ;;  %v881_v54 = vadd.f32 1.0, %v1625_v51  ;;  %v1277_v51 = vmul.f32 -1.442695, %v2408_v24 }
 0x121   :  { %v1629_v57 = vpop.eup %1628  ;;  %1654 = vrcp.f32 %v910_v52  ;;  %v913_v58 = vadd.f32 1.0, %v1627_v53  ;;  %v2440_v52 = vadd.f32 %v2019_v1, %v489_v20 }
 0x122   :  { %v1631_v34 = vpop.eup %1630  ;;  %1656 = vrcp.f32 %v881_v54  ;;  %v880_v61 = vadd.f32 1.0, %v1629_v57  ;;  %v1309_v54 = vmul.f32 -1.442695, %v2413_v30  ;;  %v2449_v57 = vadd.f32 %v2019_v1, %v649_v27 }
 0x123   :  { %v1633_v41 = vpop.eup %1632  ;;  %1658 = vrcp.f32 %v913_v58  ;;  %v912_v63 = vadd.f32 1.0, %v1631_v34 }
 0x124   :  { %v1635_v2 = vpop.eup %1634  ;;  %1660 = vrcp.f32 %v880_v61  ;;  %v883_v45 = vadd.f32 1.0, %v1633_v41  ;;  %v659_v61 = vpop.f32.mrf.mxu1 }
 0x125   :  { %v1637_v7 = vpop.eup %1636  ;;  %1662 = vrcp.f32 %v912_v63  ;;  %v915_v8 = vadd.f32 1.0, %v1635_v2 }
 0x126   :  { %v1639_v46 = vpop.eup %1638  ;;  %1664 = vrcp.f32 %v883_v45  ;;  %v882_v12 = vadd.f32 1.0, %v1637_v7  ;;  %v1279_v7 = vmul.f32 -1.442695, %v2440_v52 }
 0x127   :  { %v1641_v21 = vpop.eup %1640  ;;  %1666 = vrcp.f32 %v915_v8  ;;  %v914_v13 = vadd.f32 1.0, %v1639_v46  ;;  %v1311_v46 = vmul.f32 -1.442695, %v2449_v57 }
 0x128   :  { %v1643_v11 = vpop.eup %1642  ;;  %v1069_v42 = vmul.f32 %v1641_v21, %v2235_v49  ;;  %1668 = vrcp.f32 %v882_v12 }
 0x129   :  { %v1645_v23 = vpop.eup %1644  ;;  %v1101_v48 = vmul.f32 %v1643_v11, %v2239_v55  ;;  %1670 = vrcp.f32 %v914_v13  ;;  %v2422_v55 = vadd.f32 %v1426_v0, %v2019_v1 }
 0x12a   :  { %v1647_v43 = vpop.eup %1646  ;;  %1134 = vst.msk [vmem:[%s2614_s3 + $0x88] sm:$0xff] %vm1116_vm2, %v1069_v42  ;;  %v1068_v49 = vmul.f32 %v1645_v23, %v2242_v33  ;;  %1672 = vpow2.f32 %v1276_v17  ;;  %v2431_v33 = vadd.f32 %v1474_v4, %v2019_v1 }
 0x12b   :  { %v1649_v50 = vpop.eup %1648  ;;  %1166 = vst.msk [vmem:[%s2614_s3 + $0x188] sm:$0xff] %vm1116_vm2, %v1101_v48  ;;  %v1100_v39 = vmul.f32 %v1647_v43, %v2245_v28  ;;  %1674 = vpow2.f32 %v1308_v18  ;;  %v1280_v34 = vmul.f32 -1.442695, %v2422_v55 }
 0x12c   :  { %v1651_v44 = vpop.eup %1650  ;;  %1133 = vst.msk [vmem:[%s2614_s3 + $0x80] sm:$0xff] %vm1116_vm2, %v1068_v49  ;;  %v1071_v47 = vmul.f32 %v1649_v50, %v2249_v29  ;;  %1676 = vpow2.f32 %v1275_v16  ;;  %v499_v29 = vpop.f32.mrf.mxu0  ;;  %v1312_v63 = vmul.f32 -1.442695, %v2431_v33 }
 0x12d   :  { %v1653_v28 = vpop.eup %1652  ;;  %1165 = vst.msk [vmem:[%s2614_s3 + $0x180] sm:$0xff] %vm1116_vm2, %v1100_v39  ;;  %v1103_v53 = vmul.f32 %v1651_v44, %v2253_v6  ;;  %1678 = vpow2.f32 %v1307_v26  ;;  %v2458_v6 = vadd.f32 %v1429_v25, %v2019_v1  ;;  %v2476_v8 = vadd.f32 %v2019_v1, %v499_v29 }
 0x12e   :  { %v1655_v58 = vpop.eup %1654  ;;  %1136 = vst.msk [vmem:[%s2614_s3 + $0x98] sm:$0xff] %vm1116_vm2, %v1071_v47  ;;  %v1070_v0 = vmul.f32 %v1653_v28, %v2258_v9  ;;  %1680 = vpow2.f32 %v1278_v32  ;;  %v2467_v9 = vadd.f32 %v1477_v36, %v2019_v1 }
 0x12f   :  { %v1657_v4 = vpop.eup %1656  ;;  %1168 = vst.msk [vmem:[%s2614_s3 + $0x198] sm:$0xff] %vm1116_vm2, %v1103_v53  ;;  %v1102_v41 = vmul.f32 %v1655_v58, %v2263_v14  ;;  %1682 = vpow2.f32 %v1310_v22  ;;  %v1281_v11 = vmul.f32 -1.442695, %v2476_v8 }
 0x130   :  { %v1659_v2 = vpop.eup %1658  ;;  %1135 = vst.msk [vmem:[%s2614_s3 + $0x90] sm:$0xff] %vm1116_vm2, %v1070_v0  ;;  %v1073_v45 = vmul.f32 %v1657_v4, %v2272_v35  ;;  %1684 = vpow2.f32 %v1277_v51  ;;  %v1736_v35 = vld [vmem:[%s2613_s2] ss:$0 sm:$0xff]  ;;  %v1314_v13 = vmul.f32 -1.442695, %v2467_v9 }
 0x131   :  { %v1661_v14 = vpop.eup %1660  ;;  %1167 = vst.msk [vmem:[%s2614_s3 + $0x190] sm:$0xff] %vm1116_vm2, %v1102_v41  ;;  %v1105_v20 = vmul.f32 %v1659_v2, %v2281_v38  ;;  %1686 = vpow2.f32 %v1309_v54  ;;  %v2487_v12 = vadd.f32 %v1736_v35, %v659_v61  ;;  %v1282_v38 = vmul.f32 -1.442695, %v2458_v6 }
 0x132   :  { %v1663_v17 = vpop.eup %1662  ;;  %1138 = vst.msk [vmem:[%s2614_s3 + $0xa8] sm:$0xff] %vm1116_vm2, %v1073_v45  ;;  %v1072_v1 = vmul.f32 %v1661_v14, %v2290_v31  ;;  %1688 = vpow2.f32 %v1280_v34 }
 0x133   :  { %v1665_v27 = vpop.eup %1664  ;;  %1170 = vst.msk [vmem:[%s2614_s3 + $0x1a8] sm:$0xff] %vm1116_vm2, %v1105_v20  ;;  %v1104_v21 = vmul.f32 %v1663_v17, %v2299_v37  ;;  %1690 = vpow2.f32 %v1312_v63  ;;  %v1313_v16 = vmul.f32 -1.442695, %v2487_v12 }
 0x134   :  { %v1667_v18 = vpop.eup %1666  ;;  %1137 = vst.msk [vmem:[%s2614_s3 + $0xa0] sm:$0xff] %vm1116_vm2, %v1072_v1  ;;  %v1075_v31 = vmul.f32 %v1665_v27, %v2308_v56  ;;  %1692 = vpow2.f32 %v1279_v7 }
 0x135   :  { %v1669_v42 = vpop.eup %1668  ;;  %1169 = vst.msk [vmem:[%s2614_s3 + $0x1a0] sm:$0xff] %vm1116_vm2, %v1104_v21  ;;  %v1107_v37 = vmul.f32 %v1667_v18, %v2317_v60  ;;  %1694 = vpow2.f32 %v1311_v46 }
 0x136   :  { %v1671_v23 = vpop.eup %1670  ;;  %1140 = vst.msk [vmem:[%s2614_s3 + $0xb8] sm:$0xff] %vm1116_vm2, %v1075_v31  ;;  %v1074_v56 = vmul.f32 %v1669_v42, %v2326_v59  ;;  %1696 = vpow2.f32 %v1282_v38 }
 0x137   :  { %v1673_v48 = vpop.eup %1672  ;;  %1172 = vst.msk [vmem:[%s2614_s3 + $0x1b8] sm:$0xff] %vm1116_vm2, %v1107_v37  ;;  %v1106_v60 = vmul.f32 %v1671_v23, %v2335_v62  ;;  %1698 = vpow2.f32 %v1314_v13 }
 0x138   :  { %v1675_v26 = vpop.eup %1674  ;;  %1139 = vst.msk [vmem:[%s2614_s3 + $0xb0] sm:$0xff] %vm1116_vm2, %v1074_v56  ;;  %v885_v25 = vadd.f32 1.0, %v1673_v48  ;;  %1700 = vpow2.f32 %v1281_v11 }
 0x139   :  { %v1677_v43 = vpop.eup %1676  ;;  %1171 = vst.msk [vmem:[%s2614_s3 + $0x1b0] sm:$0xff] %vm1116_vm2, %v1106_v60  ;;  %v917_v59 = vadd.f32 1.0, %v1675_v26  ;;  %1702 = vpow2.f32 %v1313_v16 }
 0x13a   :  { %v1679_v49 = vpop.eup %1678  ;;  %1704 = vrcp.f32 %v885_v25  ;;  %v884_v62 = vadd.f32 1.0, %v1677_v43 }
 0x13b   :  { %v1681_v32 = vpop.eup %1680  ;;  %1706 = vrcp.f32 %v917_v59  ;;  %v916_v36 = vadd.f32 1.0, %v1679_v49 }
 0x13c   :  { %v1683_v50 = vpop.eup %1682  ;;  %1708 = vrcp.f32 %v884_v62  ;;  %v887_v39 = vadd.f32 1.0, %v1681_v32 }
 0x13d   :  { %v1685_v22 = vpop.eup %1684  ;;  %1710 = vrcp.f32 %v916_v36  ;;  %v919_v44 = vadd.f32 1.0, %v1683_v50 }
 0x13e   :  { %v1687_v47 = vpop.eup %1686  ;;  %1712 = vrcp.f32 %v887_v39  ;;  %v886_v51 = vadd.f32 1.0, %v1685_v22 }
 0x13f   :  { %v1689_v28 = vpop.eup %1688  ;;  %1714 = vrcp.f32 %v919_v44  ;;  %v918_v53 = vadd.f32 1.0, %v1687_v47 }
 0x140   :  { %v1691_v54 = vpop.eup %1690  ;;  %1716 = vrcp.f32 %v886_v51  ;;  %v889_v29 = vadd.f32 1.0, %v1689_v28 }
 0x141   :  { %v1693_v58 = vpop.eup %1692  ;;  %1718 = vrcp.f32 %v918_v53  ;;  %v921_v0 = vadd.f32 1.0, %v1691_v54 }
 0x142   :  { %v1695_v34 = vpop.eup %1694  ;;  %1720 = vrcp.f32 %v889_v29  ;;  %v888_v61 = vadd.f32 1.0, %v1693_v58 }
 0x143   :  { %v1697_v4 = vpop.eup %1696  ;;  %1722 = vrcp.f32 %v921_v0  ;;  %v920_v41 = vadd.f32 1.0, %v1695_v34 }
 0x144   :  { %v1699_v63 = vpop.eup %1698  ;;  %1724 = vrcp.f32 %v888_v61  ;;  %v891_v2 = vadd.f32 1.0, %v1697_v4 }
 0x145   :  { %v1701_v45 = vpop.eup %1700  ;;  %1726 = vrcp.f32 %v920_v41  ;;  %v923_v7 = vadd.f32 1.0, %v1699_v63 }
 0x146   :  { %v1703_v14 = vpop.eup %1702  ;;  %1728 = vrcp.f32 %v891_v2  ;;  %v890_v20 = vadd.f32 1.0, %v1701_v45 }
 0x147   :  { %v1705_v46 = vpop.eup %1704  ;;  %1730 = vrcp.f32 %v923_v7  ;;  %v922_v35 = vadd.f32 1.0, %v1703_v14 }
 0x148   :  { %v1707_v17 = vpop.eup %1706  ;;  %v1077_v1 = vmul.f32 %v1705_v46, %v2385_v40  ;;  %1732 = vrcp.f32 %v890_v20 }
 0x149   :  { %v1709_v38 = vpop.eup %1708  ;;  %v1109_v27 = vmul.f32 %v1707_v17, %v2389_v3  ;;  %1734 = vrcp.f32 %v922_v35 }
 0x14a   :  { %v1711_v21 = vpop.eup %1710  ;;  %1142 = vst.msk [vmem:[%s2614_s3 + $0xc8] sm:$0xff] %vm1116_vm2, %v1077_v1  ;;  %v1076_v13 = vmul.f32 %v1709_v38, %v2392_v15 }
 0x14b   :  { %v1713_v18 = vpop.eup %1712  ;;  %1174 = vst.msk [vmem:[%s2614_s3 + $0x1c8] sm:$0xff] %vm1116_vm2, %v1109_v27  ;;  %v1108_v40 = vmul.f32 %v1711_v21, %v2395_v5 }
 0x14c   :  { %v1715_v31 = vpop.eup %1714  ;;  %1141 = vst.msk [vmem:[%s2614_s3 + $0xc0] sm:$0xff] %vm1116_vm2, %v1076_v13  ;;  %v1079_v3 = vmul.f32 %v1713_v18, %v2399_v10 }
 0x14d   :  { %v1717_v11 = vpop.eup %1716  ;;  %1173 = vst.msk [vmem:[%s2614_s3 + $0x1c0] sm:$0xff] %vm1116_vm2, %v1108_v40  ;;  %v1111_v15 = vmul.f32 %v1715_v31, %v2403_v19 }
 0x14e   :  { %v1719_v42 = vpop.eup %1718  ;;  %1144 = vst.msk [vmem:[%s2614_s3 + $0xd8] sm:$0xff] %vm1116_vm2, %v1079_v3  ;;  %v1078_v5 = vmul.f32 %v1717_v11, %v2408_v24 }
 0x14f   :  { %v1721_v37 = vpop.eup %1720  ;;  %1176 = vst.msk [vmem:[%s2614_s3 + $0x1d8] sm:$0xff] %vm1116_vm2, %v1111_v15  ;;  %v1110_v10 = vmul.f32 %v1719_v42, %v2413_v30 }
 0x150   :  { %v1723_v16 = vpop.eup %1722  ;;  %1143 = vst.msk [vmem:[%s2614_s3 + $0xd0] sm:$0xff] %vm1116_vm2, %v1078_v5  ;;  %v1081_v19 = vmul.f32 %v1721_v37, %v2422_v55 }
 0x151   :  { %v1725_v23 = vpop.eup %1724  ;;  %1175 = vst.msk [vmem:[%s2614_s3 + $0x1d0] sm:$0xff] %vm1116_vm2, %v1110_v10  ;;  %v1113_v24 = vmul.f32 %v1723_v16, %v2431_v33 }
 0x152   :  { %v1727_v56 = vpop.eup %1726  ;;  %1146 = vst.msk [vmem:[%s2614_s3 + $0xe8] sm:$0xff] %vm1116_vm2, %v1081_v19  ;;  %v1080_v30 = vmul.f32 %v1725_v23, %v2440_v52 }
 0x153   :  { %v1729_v48 = vpop.eup %1728  ;;  %1178 = vst.msk [vmem:[%s2614_s3 + $0x1e8] sm:$0xff] %vm1116_vm2, %v1113_v24  ;;  %v1112_v55 = vmul.f32 %v1727_v56, %v2449_v57 }
 0x154   :  { %v1731_v60 = vpop.eup %1730  ;;  %1145 = vst.msk [vmem:[%s2614_s3 + $0xe0] sm:$0xff] %vm1116_vm2, %v1080_v30  ;;  %v1083_v33 = vmul.f32 %v1729_v48, %v2458_v6 }
 0x155   :  { %v1733_v26 = vpop.eup %1732  ;;  %1177 = vst.msk [vmem:[%s2614_s3 + $0x1e0] sm:$0xff] %vm1116_vm2, %v1112_v55  ;;  %v1115_v52 = vmul.f32 %v1731_v60, %v2467_v9 }
 0x156   :  { %v1735_v25 = vpop.eup %1734  ;;  %1148 = vst.msk [vmem:[%s2614_s3 + $0xf8] sm:$0xff] %vm1116_vm2, %v1083_v33  ;;  %v1082_v57 = vmul.f32 %v1733_v26, %v2476_v8 }
 0x157   :  { %1180 = vst.msk [vmem:[%s2614_s3 + $0x1f8] sm:$0xff] %vm1116_vm2, %v1115_v52  ;;  %v1114_v6 = vmul.f32 %v1735_v25, %v2487_v12 }
 0x158   :  { %1147 = vst.msk [vmem:[%s2614_s3 + $0xf0] sm:$0xff] %vm1116_vm2, %v1082_v57 }
 0x159   :  { %1179 = vst.msk [vmem:[%s2614_s3 + $0x1f0] sm:$0xff] %vm1116_vm2, %v1114_v6 }

// kernel: _lambda_.6
= control target key start
LH: loop header
LB: loop body
LE: loop exit
PB: predicated region body
PF: predicated region fallthrough
CT: control target
= control target key end

     0   :  { %vm279_vm0 = vcmask 1041408   ;;  %vm86_vm1 = vcmask 15360   ;;  %s2610_s1 = inlined_call_operand.vmem [shape: f32[2,2], index: 1, kind: input, shape index: {}]   ;;  %s2611_s0 = inlined_call_operand.vmem [shape: f32[512,2], index: 0, kind: input, shape index: {}]   ;;  %s2612_s2 = inlined_call_operand.vmem [shape: f32[1,2], index: 2, kind: input, shape index: {}]   ;;  %s2613_s3 = inlined_call_operand.vmem [shape: f32[512,2], index: 3, kind: output, shape index: {}]  }
   0x1   :  { %v78_v0 = vld [vmem:[%s2610_s1] sm:$0x3]  ;;  %v15_v3 = vld [vmem:[%s2611_s0 + $0x8] sm:$0xff]  ;;  %v16_v5 = vld [vmem:[%s2611_s0 + $0x10] sm:$0xff] }
   0x2   :  { %v14_v1 = vld [vmem:[%s2611_s0] sm:$0xff]  ;;  %1379 = vmatprep.subr.msk.mxu0 %vm279_vm0, %v78_v0  ;;  %1477 = vmatprep.subr.msk.mxu1 %vm279_vm0, %v78_v0  ;;  %v47_v4 = vld [vmem:[%s2611_s0 + $0x108] sm:$0xff]  ;;  %v48_v6 = vld [vmem:[%s2611_s0 + $0x110] sm:$0xff] }
   0x3   :  { %v46_v2 = vld [vmem:[%s2611_s0 + $0x100] sm:$0xff]  ;;  %1380 = vmatpush3.msk.msra.mxu0 %vm279_vm0, %v78_v0  ;;  %1478 = vmatpush3.msk.msra.mxu1 %vm279_vm0, %v78_v0  ;;  %v17_v7 = vld [vmem:[%s2611_s0 + $0x18] sm:$0xff]  ;;  %v19_v11 = vld [vmem:[%s2611_s0 + $0x28] sm:$0xff] }
   0x4   :  { %1381 = vmatprep.mubr.msk.f32.mxu0 %vm86_vm1, %v14_v1  ;;  %1429 = vmatprep.mubr.msk.f32.mxu1 %vm86_vm1, %v46_v2  ;;  %v49_v8 = vld [vmem:[%s2611_s0 + $0x118] sm:$0xff]  ;;  %v18_v9 = vld [vmem:[%s2611_s0 + $0x20] sm:$0xff]  ;;  %v51_v12 = vld [vmem:[%s2611_s0 + $0x128] sm:$0xff] }
   0x5   :  { %1382 = vmatmul.mubr.msk.f32.vlgmr.msra.gmra.mxu0 %vm86_vm1, %v15_v3  ;;  %1430 = vmatmul.mubr.msk.f32.vlgmr.msra.gmra.mxu1 %vm86_vm1, %v47_v4  ;;  %v50_v10 = vld [vmem:[%s2611_s0 + $0x120] sm:$0xff]  ;;  %v20_v13 = vld [vmem:[%s2611_s0 + $0x30] sm:$0xff]  ;;  %v21_v15 = vld [vmem:[%s2611_s0 + $0x38] sm:$0xff] }
   0x6   :  { %1384 = vmatprep.mubr.msk.f32.mxu0 %vm86_vm1, %v16_v5  ;;  %1432 = vmatprep.mubr.msk.f32.mxu1 %vm86_vm1, %v48_v6  ;;  %v52_v14 = vld [vmem:[%s2611_s0 + $0x130] sm:$0xff]  ;;  %v53_v16 = vld [vmem:[%s2611_s0 + $0x138] sm:$0xff]  ;;  %v22_v17 = vld [vmem:[%s2611_s0 + $0x40] sm:$0xff] }
   0x7   :  { %v54_v18 = vld [vmem:[%s2611_s0 + $0x140] sm:$0xff]  ;;  %v23_v19 = vld [vmem:[%s2611_s0 + $0x48] sm:$0xff]  ;;  %v24_v21 = vld [vmem:[%s2611_s0 + $0x50] sm:$0xff] }
   0x8   :  { %v55_v20 = vld [vmem:[%s2611_s0 + $0x148] sm:$0xff]  ;;  %v56_v22 = vld [vmem:[%s2611_s0 + $0x150] sm:$0xff]  ;;  %v25_v23 = vld [vmem:[%s2611_s0 + $0x58] sm:$0xff] }
   0x9   :  { %1385 = vmatmul.mubr.msk.f32.gmra.mxu0 %vm86_vm1, %v17_v7  ;;  %1433 = vmatmul.mubr.msk.f32.gmra.mxu1 %vm86_vm1, %v49_v8  ;;  %v57_v24 = vld [vmem:[%s2611_s0 + $0x158] sm:$0xff]  ;;  %v26_v25 = vld [vmem:[%s2611_s0 + $0x60] sm:$0xff]  ;;  %v27_v27 = vld [vmem:[%s2611_s0 + $0x68] sm:$0xff] }
   0xa   :  { %1387 = vmatprep.mubr.msk.f32.mxu0 %vm86_vm1, %v18_v9  ;;  %1435 = vmatprep.mubr.msk.f32.mxu1 %vm86_vm1, %v50_v10  ;;  %v58_v26 = vld [vmem:[%s2611_s0 + $0x160] sm:$0xff]  ;;  %v59_v28 = vld [vmem:[%s2611_s0 + $0x168] sm:$0xff]  ;;  %v28_v29 = vld [vmem:[%s2611_s0 + $0x70] sm:$0xff] }
   0xb   :  { %v60_v30 = vld [vmem:[%s2611_s0 + $0x170] sm:$0xff]  ;;  %v29_v31 = vld [vmem:[%s2611_s0 + $0x78] sm:$0xff]  ;;  %v30_v33 = vld [vmem:[%s2611_s0 + $0x80] sm:$0xff] }
   0xc   :  { %v61_v32 = vld [vmem:[%s2611_s0 + $0x178] sm:$0xff]  ;;  %v62_v34 = vld [vmem:[%s2611_s0 + $0x180] sm:$0xff]  ;;  %v31_v35 = vld [vmem:[%s2611_s0 + $0x88] sm:$0xff] }
   0xd   :  { %1388 = vmatmul.mubr.msk.f32.gmra.mxu0 %vm86_vm1, %v19_v11  ;;  %1436 = vmatmul.mubr.msk.f32.gmra.mxu1 %vm86_vm1, %v51_v12  ;;  %v63_v36 = vld [vmem:[%s2611_s0 + $0x188] sm:$0xff]  ;;  %v32_v37 = vld [vmem:[%s2611_s0 + $0x90] sm:$0xff]  ;;  %v33_v39 = vld [vmem:[%s2611_s0 + $0x98] sm:$0xff] }
   0xe   :  { %1390 = vmatprep.mubr.msk.f32.mxu0 %vm86_vm1, %v20_v13  ;;  %1438 = vmatprep.mubr.msk.f32.mxu1 %vm86_vm1, %v52_v14  ;;  %v64_v38 = vld [vmem:[%s2611_s0 + $0x190] sm:$0xff]  ;;  %v65_v40 = vld [vmem:[%s2611_s0 + $0x198] sm:$0xff]  ;;  %v34_v41 = vld [vmem:[%s2611_s0 + $0xa0] sm:$0xff] }
   0xf   :  { %v66_v42 = vld [vmem:[%s2611_s0 + $0x1a0] sm:$0xff]  ;;  %v35_v43 = vld [vmem:[%s2611_s0 + $0xa8] sm:$0xff]  ;;  %v36_v45 = vld [vmem:[%s2611_s0 + $0xb0] sm:$0xff] }
  0x10   :  { %v67_v44 = vld [vmem:[%s2611_s0 + $0x1a8] sm:$0xff]  ;;  %v68_v46 = vld [vmem:[%s2611_s0 + $0x1b0] sm:$0xff]  ;;  %v37_v47 = vld [vmem:[%s2611_s0 + $0xb8] sm:$0xff] }
  0x11   :  { %1391 = vmatmul.mubr.msk.f32.gmra.mxu0 %vm86_vm1, %v21_v15  ;;  %1439 = vmatmul.mubr.msk.f32.gmra.mxu1 %vm86_vm1, %v53_v16  ;;  %v69_v48 = vld [vmem:[%s2611_s0 + $0x1b8] sm:$0xff]  ;;  %v38_v49 = vld [vmem:[%s2611_s0 + $0xc0] sm:$0xff]  ;;  %v39_v51 = vld [vmem:[%s2611_s0 + $0xc8] sm:$0xff] }
  0x12   :  { %1393 = vmatprep.mubr.msk.f32.mxu0 %vm86_vm1, %v22_v17  ;;  %1441 = vmatprep.mubr.msk.f32.mxu1 %vm86_vm1, %v54_v18  ;;  %v70_v50 = vld [vmem:[%s2611_s0 + $0x1c0] sm:$0xff]  ;;  %v71_v52 = vld [vmem:[%s2611_s0 + $0x1c8] sm:$0xff]  ;;  %v40_v53 = vld [vmem:[%s2611_s0 + $0xd0] sm:$0xff] }
  0x13   :  { %v72_v54 = vld [vmem:[%s2611_s0 + $0x1d0] sm:$0xff]  ;;  %v41_v55 = vld [vmem:[%s2611_s0 + $0xd8] sm:$0xff]  ;;  %v42_v57 = vld [vmem:[%s2611_s0 + $0xe0] sm:$0xff] }
  0x14   :  { %v73_v56 = vld [vmem:[%s2611_s0 + $0x1d8] sm:$0xff]  ;;  %v74_v58 = vld [vmem:[%s2611_s0 + $0x1e0] sm:$0xff]  ;;  %v43_v59 = vld [vmem:[%s2611_s0 + $0xe8] sm:$0xff] }
  0x15   :  { %1394 = vmatmul.mubr.msk.f32.gmra.mxu0 %vm86_vm1, %v23_v19  ;;  %1442 = vmatmul.mubr.msk.f32.gmra.mxu1 %vm86_vm1, %v55_v20  ;;  %v75_v60 = vld [vmem:[%s2611_s0 + $0x1e8] sm:$0xff]  ;;  %v44_v61 = vld [vmem:[%s2611_s0 + $0xf0] sm:$0xff]  ;;  %v45_v63 = vld [vmem:[%s2611_s0 + $0xf8] sm:$0xff] }
  0x16   :  { %1396 = vmatprep.mubr.msk.f32.mxu0 %vm86_vm1, %v24_v21  ;;  %1444 = vmatprep.mubr.msk.f32.mxu1 %vm86_vm1, %v56_v22  ;;  %v76_v62 = vld [vmem:[%s2611_s0 + $0x1f0] sm:$0xff]  ;;  %v77_v0 = vld [vmem:[%s2611_s0 + $0x1f8] sm:$0xff]  ;;  %v2018_v1 = vld [vmem:[%s2612_s2] ss:$0 sm:$0xff] }
  0x19   :  { %1397 = vmatmul.mubr.msk.f32.gmra.mxu0 %vm86_vm1, %v25_v23  ;;  %1445 = vmatmul.mubr.msk.f32.gmra.mxu1 %vm86_vm1, %v57_v24 }
  0x1a   :  { %1399 = vmatprep.mubr.msk.f32.mxu0 %vm86_vm1, %v26_v25  ;;  %1447 = vmatprep.mubr.msk.f32.mxu1 %vm86_vm1, %v58_v26 }
  0x1d   :  { %1400 = vmatmul.mubr.msk.f32.gmra.mxu0 %vm86_vm1, %v27_v27  ;;  %1448 = vmatmul.mubr.msk.f32.gmra.mxu1 %vm86_vm1, %v59_v28 }
  0x1e   :  { %1402 = vmatprep.mubr.msk.f32.mxu0 %vm86_vm1, %v28_v29  ;;  %1450 = vmatprep.mubr.msk.f32.mxu1 %vm86_vm1, %v60_v30 }
  0x21   :  { %1403 = vmatmul.mubr.msk.f32.gmra.mxu0 %vm86_vm1, %v29_v31  ;;  %1451 = vmatmul.mubr.msk.f32.gmra.mxu1 %vm86_vm1, %v61_v32 }
  0x22   :  { %1405 = vmatprep.mubr.msk.f32.mxu0 %vm86_vm1, %v30_v33  ;;  %1453 = vmatprep.mubr.msk.f32.mxu1 %vm86_vm1, %v62_v34 }
  0x25   :  { %1406 = vmatmul.mubr.msk.f32.gmra.mxu0 %vm86_vm1, %v31_v35  ;;  %1454 = vmatmul.mubr.msk.f32.gmra.mxu1 %vm86_vm1, %v63_v36 }
  0x26   :  { %1408 = vmatprep.mubr.msk.f32.mxu0 %vm86_vm1, %v32_v37  ;;  %1456 = vmatprep.mubr.msk.f32.mxu1 %vm86_vm1, %v64_v38 }
  0x29   :  { %1409 = vmatmul.mubr.msk.f32.gmra.mxu0 %vm86_vm1, %v33_v39  ;;  %1457 = vmatmul.mubr.msk.f32.gmra.mxu1 %vm86_vm1, %v65_v40 }
  0x2a   :  { %1411 = vmatprep.mubr.msk.f32.mxu0 %vm86_vm1, %v34_v41  ;;  %1459 = vmatprep.mubr.msk.f32.mxu1 %vm86_vm1, %v66_v42 }
  0x2d   :  { %1412 = vmatmul.mubr.msk.f32.gmra.mxu0 %vm86_vm1, %v35_v43  ;;  %1460 = vmatmul.mubr.msk.f32.gmra.mxu1 %vm86_vm1, %v67_v44 }
  0x2e   :  { %1414 = vmatprep.mubr.msk.f32.mxu0 %vm86_vm1, %v36_v45  ;;  %1462 = vmatprep.mubr.msk.f32.mxu1 %vm86_vm1, %v68_v46 }
  0x31   :  { %1415 = vmatmul.mubr.msk.f32.gmra.mxu0 %vm86_vm1, %v37_v47  ;;  %1463 = vmatmul.mubr.msk.f32.gmra.mxu1 %vm86_vm1, %v69_v48 }
  0x32   :  { %1417 = vmatprep.mubr.msk.f32.mxu0 %vm86_vm1, %v38_v49  ;;  %1465 = vmatprep.mubr.msk.f32.mxu1 %vm86_vm1, %v70_v50 }
  0x35   :  { %1418 = vmatmul.mubr.msk.f32.gmra.mxu0 %vm86_vm1, %v39_v51  ;;  %1466 = vmatmul.mubr.msk.f32.gmra.mxu1 %vm86_vm1, %v71_v52 }
  0x36   :  { %1420 = vmatprep.mubr.msk.f32.mxu0 %vm86_vm1, %v40_v53  ;;  %1468 = vmatprep.mubr.msk.f32.mxu1 %vm86_vm1, %v72_v54 }
  0x39   :  { %1421 = vmatmul.mubr.msk.f32.gmra.mxu0 %vm86_vm1, %v41_v55  ;;  %1469 = vmatmul.mubr.msk.f32.gmra.mxu1 %vm86_vm1, %v73_v56 }
  0x3a   :  { %1423 = vmatprep.mubr.msk.f32.mxu0 %vm86_vm1, %v42_v57  ;;  %1471 = vmatprep.mubr.msk.f32.mxu1 %vm86_vm1, %v74_v58 }
  0x3d   :  { %1424 = vmatmul.mubr.msk.f32.gmra.mxu0 %vm86_vm1, %v43_v59  ;;  %1472 = vmatmul.mubr.msk.f32.gmra.mxu1 %vm86_vm1, %v75_v60 }
  0x3e   :  { %1426 = vmatprep.mubr.msk.f32.mxu0 %vm86_vm1, %v44_v61  ;;  %1474 = vmatprep.mubr.msk.f32.mxu1 %vm86_vm1, %v76_v62 }
  0x41   :  { %1427 = vmatmul.mubr.msk.f32.gmra.mxu0 %vm86_vm1, %v45_v63  ;;  %1475 = vmatmul.mubr.msk.f32.gmra.mxu1 %vm86_vm1, %v77_v0 }
  0xc5   :  { %v1383_v2 = vpop.f32.mrf.mxu0  ;;  %v1431_v3 = vpop.f32.mrf.mxu1 }
  0xc6   :  { %v2021_v4 = vadd.f32 %v1383_v2, %v2018_v1  ;;  %v2024_v5 = vadd.f32 %v1431_v3, %v2018_v1 }
  0xc7   :  { %v349_v6 = vpop.f32.mrf.mxu0  ;;  %v509_v7 = vpop.f32.mrf.mxu1 }
  0xc8   :  { %v1251_v8 = vmul.f32 -1.442695, %v2021_v4  ;;  %v1283_v9 = vmul.f32 -1.442695, %v2024_v5  ;;  %v2029_v10 = vadd.f32 %v2018_v1, %v349_v6  ;;  %v2032_v11 = vadd.f32 %v2018_v1, %v509_v7 }
  0xc9   :  { %v1386_v12 = vpop.f32.mrf.mxu0  ;;  %v1434_v13 = vpop.f32.mrf.mxu1 }
  0xca   :  { %1479 = vpow2.f32 %v1251_v8  ;;  %v1250_v14 = vmul.f32 -1.442695, %v2029_v10  ;;  %v1282_v15 = vmul.f32 -1.442695, %v2032_v11  ;;  %v2037_v16 = vadd.f32 %v1386_v12, %v2018_v1 }
  0xcb   :  { %1481 = vpow2.f32 %v1283_v9  ;;  %v2040_v17 = vadd.f32 %v1434_v13, %v2018_v1  ;;  %v359_v18 = vpop.f32.mrf.mxu0  ;;  %v519_v19 = vpop.f32.mrf.mxu1 }
  0xcc   :  { %1483 = vpow2.f32 %v1250_v14  ;;  %v1253_v20 = vmul.f32 -1.442695, %v2037_v16  ;;  %v2044_v21 = vadd.f32 %v2018_v1, %v359_v18  ;;  %v2047_v22 = vadd.f32 %v2018_v1, %v519_v19 }
  0xcd   :  { %1485 = vpow2.f32 %v1282_v15  ;;  %v1285_v23 = vmul.f32 -1.442695, %v2040_v17  ;;  %v1389_v24 = vpop.f32.mrf.mxu0  ;;  %v1437_v25 = vpop.f32.mrf.mxu1 }
  0xce   :  { %1487 = vpow2.f32 %v1253_v20  ;;  %v1252_v26 = vmul.f32 -1.442695, %v2044_v21  ;;  %v1284_v27 = vmul.f32 -1.442695, %v2047_v22  ;;  %v2053_v28 = vadd.f32 %v1389_v24, %v2018_v1 }
  0xcf   :  { %1489 = vpow2.f32 %v1285_v23  ;;  %v2056_v29 = vadd.f32 %v1437_v25, %v2018_v1  ;;  %v369_v30 = vpop.f32.mrf.mxu0  ;;  %v529_v31 = vpop.f32.mrf.mxu1 }
  0xd0   :  { %1491 = vpow2.f32 %v1252_v26  ;;  %v1255_v32 = vmul.f32 -1.442695, %v2053_v28  ;;  %v2060_v33 = vadd.f32 %v2018_v1, %v369_v30  ;;  %v2063_v34 = vadd.f32 %v2018_v1, %v529_v31 }
  0xd1   :  { %1493 = vpow2.f32 %v1284_v27  ;;  %v1287_v35 = vmul.f32 -1.442695, %v2056_v29  ;;  %v1392_v36 = vpop.f32.mrf.mxu0  ;;  %v1440_v37 = vpop.f32.mrf.mxu1 }
  0xd2   :  { %1495 = vpow2.f32 %v1255_v32  ;;  %v1254_v38 = vmul.f32 -1.442695, %v2060_v33  ;;  %v1286_v39 = vmul.f32 -1.442695, %v2063_v34  ;;  %v2069_v40 = vadd.f32 %v1392_v36, %v2018_v1 }
  0xd3   :  { %1497 = vpow2.f32 %v1287_v35  ;;  %v2072_v41 = vadd.f32 %v1440_v37, %v2018_v1  ;;  %v379_v42 = vpop.f32.mrf.mxu0  ;;  %v539_v43 = vpop.f32.mrf.mxu1 }
  0xd4   :  { %1499 = vpow2.f32 %v1254_v38  ;;  %v1257_v44 = vmul.f32 -1.442695, %v2069_v40  ;;  %v2076_v45 = vadd.f32 %v2018_v1, %v379_v42  ;;  %v2079_v46 = vadd.f32 %v2018_v1, %v539_v43 }
  0xd5   :  { %1501 = vpow2.f32 %v1286_v39  ;;  %v1289_v47 = vmul.f32 -1.442695, %v2072_v41  ;;  %v1395_v48 = vpop.f32.mrf.mxu0  ;;  %v1443_v49 = vpop.f32.mrf.mxu1 }
  0xd6   :  { %1503 = vpow2.f32 %v1257_v44  ;;  %v1256_v50 = vmul.f32 -1.442695, %v2076_v45  ;;  %v1288_v51 = vmul.f32 -1.442695, %v2079_v46  ;;  %v2085_v27 = vadd.f32 %v1395_v48, %v2018_v1 }
  0xd7   :  { %v1480_v52 = vpop.eup %1479  ;;  %1505 = vpow2.f32 %v1289_v47  ;;  %v389_v53 = vpop.f32.mrf.mxu0  ;;  %v2088_v35 = vadd.f32 %v1443_v49, %v2018_v1 }
  0xd8   :  { %v549_v54 = vpop.f32.mrf.mxu1  ;;  %v1482_v55 = vpop.eup %1481  ;;  %v861_v56 = vadd.f32 1.0, %v1480_v52  ;;  %1507 = vpow2.f32 %v1256_v50  ;;  %v2091_v38 = vadd.f32 %v2018_v1, %v389_v53  ;;  %v1259_v50 = vmul.f32 -1.442695, %v2085_v27 }
  0xd9   :  { %v1484_v57 = vpop.eup %1483  ;;  %v893_v58 = vadd.f32 1.0, %v1482_v55  ;;  %1509 = vpow2.f32 %v1288_v51  ;;  %v1398_v59 = vpop.f32.mrf.mxu0  ;;  %v2094_v43 = vadd.f32 %v2018_v1, %v549_v54  ;;  %v1291_v55 = vmul.f32 -1.442695, %v2088_v35 }
  0xda   :  { %v1486_v60 = vpop.eup %1485  ;;  %1511 = vrcp.f32 %v861_v56  ;;  %v860_v61 = vadd.f32 1.0, %v1484_v57  ;;  %v1446_v62 = vpop.f32.mrf.mxu1  ;;  %v2098_v49 = vadd.f32 %v1398_v59, %v2018_v1 }
  0xdb   :  { %v1488_v63 = vpop.eup %1487  ;;  %1513 = vrcp.f32 %v893_v58  ;;  %v892_v0 = vadd.f32 1.0, %v1486_v60  ;;  %v399_v8 = vpop.f32.mrf.mxu0  ;;  %v2102_v56 = vadd.f32 %v1446_v62, %v2018_v1  ;;  %v1258_v58 = vmul.f32 -1.442695, %v2091_v38 }
  0xdc   :  { %v1490_v2 = vpop.eup %1489  ;;  %1515 = vrcp.f32 %v860_v61  ;;  %v863_v3 = vadd.f32 1.0, %v1488_v63  ;;  %v559_v13 = vpop.f32.mrf.mxu1  ;;  %v2107_v60 = vadd.f32 %v2018_v1, %v399_v8  ;;  %v1290_v63 = vmul.f32 -1.442695, %v2094_v43 }
  0xdd   :  { %v1492_v6 = vpop.eup %1491  ;;  %1517 = vrcp.f32 %v892_v0  ;;  %v895_v7 = vadd.f32 1.0, %v1490_v2  ;;  %v1401_v24 = vpop.f32.mrf.mxu0  ;;  %v2112_v0 = vadd.f32 %v2018_v1, %v559_v13 }
  0xde   :  { %v1494_v9 = vpop.eup %1493  ;;  %1519 = vrcp.f32 %v863_v3  ;;  %v862_v12 = vadd.f32 1.0, %v1492_v6  ;;  %v1449_v30 = vpop.f32.mrf.mxu1  ;;  %v1261_v3 = vmul.f32 -1.442695, %v2098_v49 }
  0xdf   :  { %v1496_v14 = vpop.eup %1495  ;;  %1521 = vrcp.f32 %v895_v7  ;;  %v894_v15 = vadd.f32 1.0, %v1494_v9  ;;  %v409_v44 = vpop.f32.mrf.mxu0  ;;  %v1293_v9 = vmul.f32 -1.442695, %v2102_v56 }
  0xe0   :  { %v1498_v18 = vpop.eup %1497  ;;  %1523 = vrcp.f32 %v862_v12  ;;  %v865_v19 = vadd.f32 1.0, %v1496_v14  ;;  %v569_v51 = vpop.f32.mrf.mxu1  ;;  %v1260_v14 = vmul.f32 -1.442695, %v2107_v60 }
  0xe1   :  { %v1500_v20 = vpop.eup %1499  ;;  %1525 = vrcp.f32 %v894_v15  ;;  %v897_v23 = vadd.f32 1.0, %v1498_v18  ;;  %v1404_v62 = vpop.f32.mrf.mxu0  ;;  %v2139_v15 = vadd.f32 %v2018_v1, %v409_v44 }
  0xe2   :  { %v1502_v25 = vpop.eup %1501  ;;  %1527 = vrcp.f32 %v865_v19  ;;  %v864_v26 = vadd.f32 1.0, %v1500_v20  ;;  %v1452_v6 = vpop.f32.mrf.mxu1  ;;  %v1292_v19 = vmul.f32 -1.442695, %v2112_v0  ;;  %v2148_v20 = vadd.f32 %v2018_v1, %v569_v51 }
  0xe3   :  { %v1504_v31 = vpop.eup %1503  ;;  %1529 = vrcp.f32 %v897_v23  ;;  %v896_v32 = vadd.f32 1.0, %v1502_v25 }
  0xe4   :  { %v1506_v36 = vpop.eup %1505  ;;  %1531 = vrcp.f32 %v864_v26  ;;  %v867_v37 = vadd.f32 1.0, %v1504_v31  ;;  %v579_v26 = vpop.f32.mrf.mxu1 }
  0xe5   :  { %v1508_v39 = vpop.eup %1507  ;;  %1533 = vrcp.f32 %v896_v32  ;;  %v899_v42 = vadd.f32 1.0, %v1506_v36 }
  0xe6   :  { %v1510_v47 = vpop.eup %1509  ;;  %1535 = vrcp.f32 %v867_v37  ;;  %v866_v48 = vadd.f32 1.0, %v1508_v39  ;;  %v1262_v39 = vmul.f32 -1.442695, %v2139_v15 }
  0xe7   :  { %v1512_v52 = vpop.eup %1511  ;;  %1537 = vrcp.f32 %v899_v42  ;;  %v898_v53 = vadd.f32 1.0, %v1510_v47  ;;  %v1294_v47 = vmul.f32 -1.442695, %v2148_v20 }
  0xe8   :  { %v1514_v54 = vpop.eup %1513  ;;  %v1053_v57 = vmul.f32 %v1512_v52, %v2021_v4  ;;  %1539 = vrcp.f32 %v866_v48  ;;  %v2184_v48 = vadd.f32 %v2018_v1, %v579_v26 }
  0xe9   :  { %v1516_v59 = vpop.eup %1515  ;;  %v1085_v61 = vmul.f32 %v1514_v54, %v2024_v5  ;;  %1541 = vrcp.f32 %v898_v53  ;;  %v2121_v5 = vadd.f32 %v1401_v24, %v2018_v1 }
  0xea   :  { %v1518_v2 = vpop.eup %1517  ;;  %1117 = vst.msk [vmem:[%s2613_s3 + $0x8] sm:$0xff] %vm86_vm1, %v1053_v57  ;;  %v1052_v4 = vmul.f32 %v1516_v59, %v2029_v10  ;;  %1543 = vpow2.f32 %v1259_v50  ;;  %v2130_v10 = vadd.f32 %v1449_v30, %v2018_v1 }
  0xeb   :  { %v1520_v7 = vpop.eup %1519  ;;  %1149 = vst.msk [vmem:[%s2613_s3 + $0x108] sm:$0xff] %vm86_vm1, %v1085_v61  ;;  %v1084_v8 = vmul.f32 %v1518_v2, %v2032_v11  ;;  %1545 = vpow2.f32 %v1291_v55  ;;  %v1263_v25 = vmul.f32 -1.442695, %v2121_v5  ;;  %v1296_v61 = vmul.f32 -1.442695, %v2184_v48 }
  0xec   :  { %v1522_v12 = vpop.eup %1521  ;;  %1116 = vst.msk [vmem:[%s2613_s3] sm:$0xff] %vm86_vm1, %v1052_v4  ;;  %v1055_v13 = vmul.f32 %v1520_v7, %v2037_v16  ;;  %1547 = vpow2.f32 %v1258_v58  ;;  %v419_v16 = vpop.f32.mrf.mxu0  ;;  %v1295_v32 = vmul.f32 -1.442695, %v2130_v10 }
  0xed   :  { %v1524_v11 = vpop.eup %1523  ;;  %1148 = vst.msk [vmem:[%s2613_s3 + $0x100] sm:$0xff] %vm86_vm1, %v1084_v8  ;;  %v1087_v18 = vmul.f32 %v1522_v12, %v2040_v17  ;;  %1549 = vpow2.f32 %v1290_v63  ;;  %v2157_v17 = vadd.f32 %v1404_v62, %v2018_v1  ;;  %v2175_v42 = vadd.f32 %v2018_v1, %v419_v16 }
  0xee   :  { %v1526_v23 = vpop.eup %1525  ;;  %1119 = vst.msk [vmem:[%s2613_s3 + $0x18] sm:$0xff] %vm86_vm1, %v1055_v13  ;;  %v1054_v24 = vmul.f32 %v1524_v11, %v2044_v21  ;;  %1551 = vpow2.f32 %v1261_v3  ;;  %v2166_v21 = vadd.f32 %v1452_v6, %v2018_v1 }
  0xef   :  { %v1528_v30 = vpop.eup %1527  ;;  %1151 = vst.msk [vmem:[%s2613_s3 + $0x118] sm:$0xff] %vm86_vm1, %v1087_v18  ;;  %v1086_v31 = vmul.f32 %v1526_v23, %v2047_v22  ;;  %1553 = vpow2.f32 %v1293_v9  ;;  %v1265_v52 = vmul.f32 -1.442695, %v2157_v17  ;;  %v1264_v58 = vmul.f32 -1.442695, %v2175_v42 }
  0xf0   :  { %v1530_v36 = vpop.eup %1529  ;;  %1118 = vst.msk [vmem:[%s2613_s3 + $0x10] sm:$0xff] %vm86_vm1, %v1054_v24  ;;  %v1057_v37 = vmul.f32 %v1528_v30, %v2053_v28  ;;  %1555 = vpow2.f32 %v1260_v14  ;;  %v2186_v28 = vpop.f32.mrf.mxu0  ;;  %v1297_v54 = vmul.f32 -1.442695, %v2166_v21 }
  0xf1   :  { %v1532_v22 = vpop.eup %1531  ;;  %1150 = vst.msk [vmem:[%s2613_s3 + $0x110] sm:$0xff] %vm86_vm1, %v1086_v31  ;;  %v1089_v44 = vmul.f32 %v1530_v36, %v2056_v29  ;;  %1557 = vpow2.f32 %v1292_v19  ;;  %v2194_v29 = vpop.f32.mrf.mxu1 }
  0xf2   :  { %v1534_v50 = vpop.eup %1533  ;;  %1121 = vst.msk [vmem:[%s2613_s3 + $0x28] sm:$0xff] %vm86_vm1, %v1057_v37  ;;  %v1056_v51 = vmul.f32 %v1532_v22, %v2060_v33  ;;  %1559 = vpow2.f32 %v1263_v25  ;;  %v429_v63 = vpop.f32.mrf.mxu0 }
  0xf3   :  { %v1536_v53 = vpop.eup %1535  ;;  %1153 = vst.msk [vmem:[%s2613_s3 + $0x128] sm:$0xff] %vm86_vm1, %v1089_v44  ;;  %v1088_v55 = vmul.f32 %v1534_v50, %v2063_v34  ;;  %1561 = vpow2.f32 %v1295_v32  ;;  %v589_v2 = vpop.f32.mrf.mxu1  ;;  %v2234_v50 = vadd.f32 %v2186_v28, %v2018_v1 }
  0xf4   :  { %v1538_v57 = vpop.eup %1537  ;;  %1120 = vst.msk [vmem:[%s2613_s3 + $0x20] sm:$0xff] %vm86_vm1, %v1056_v51  ;;  %v1059_v33 = vmul.f32 %v1536_v53, %v2069_v40  ;;  %1563 = vpow2.f32 %v1262_v39  ;;  %v1410_v8 = vpop.f32.mrf.mxu0  ;;  %v2244_v28 = vadd.f32 %v2018_v1, %v589_v2 }
  0xf5   :  { %v1540_v59 = vpop.eup %1539  ;;  %1152 = vst.msk [vmem:[%s2613_s3 + $0x120] sm:$0xff] %vm86_vm1, %v1088_v55  ;;  %v1091_v34 = vmul.f32 %v1538_v57, %v2072_v41  ;;  %1565 = vpow2.f32 %v1294_v47  ;;  %v1458_v12 = vpop.f32.mrf.mxu1  ;;  %v2238_v55 = vadd.f32 %v2194_v29, %v2018_v1  ;;  %v2248_v29 = vadd.f32 %v1410_v8, %v2018_v1 }
  0xf6   :  { %v1542_v62 = vpop.eup %1541  ;;  %1123 = vst.msk [vmem:[%s2613_s3 + $0x38] sm:$0xff] %vm86_vm1, %v1059_v33  ;;  %v1058_v40 = vmul.f32 %v1540_v59, %v2076_v45  ;;  %1567 = vpow2.f32 %v1265_v52  ;;  %v439_v23 = vpop.f32.mrf.mxu0  ;;  %v2241_v33 = vadd.f32 %v2018_v1, %v429_v63 }
  0xf7   :  { %v1544_v4 = vpop.eup %1543  ;;  %1155 = vst.msk [vmem:[%s2613_s3 + $0x138] sm:$0xff] %vm86_vm1, %v1091_v34  ;;  %v1090_v41 = vmul.f32 %v1542_v62, %v2079_v46  ;;  %1569 = vpow2.f32 %v1297_v54  ;;  %v599_v26 = vpop.f32.mrf.mxu1 }
  0xf8   :  { %v1546_v3 = vpop.eup %1545  ;;  %1122 = vst.msk [vmem:[%s2613_s3 + $0x30] sm:$0xff] %vm86_vm1, %v1058_v40  ;;  %v869_v6 = vadd.f32 1.0, %v1544_v4  ;;  %1571 = vpow2.f32 %v1264_v58  ;;  %v1413_v22 = vpop.f32.mrf.mxu0  ;;  %v1267_v40 = vmul.f32 -1.442695, %v2234_v50 }
  0xf9   :  { %v1548_v45 = vpop.eup %1547  ;;  %1154 = vst.msk [vmem:[%s2613_s3 + $0x130] sm:$0xff] %vm86_vm1, %v1090_v41  ;;  %v901_v7 = vadd.f32 1.0, %v1546_v3  ;;  %1573 = vpow2.f32 %v1296_v61  ;;  %v1461_v51 = vpop.f32.mrf.mxu1  ;;  %v1299_v3 = vmul.f32 -1.442695, %v2238_v55 }
  0xfa   :  { %v1550_v9 = vpop.eup %1549  ;;  %1575 = vrcp.f32 %v869_v6  ;;  %v868_v46 = vadd.f32 1.0, %v1548_v45  ;;  %v449_v34 = vpop.f32.mrf.mxu0  ;;  %v2252_v6 = vadd.f32 %v1458_v12, %v2018_v1 }
  0xfb   :  { %v1552_v13 = vpop.eup %1551  ;;  %1577 = vrcp.f32 %v901_v7  ;;  %v900_v14 = vadd.f32 1.0, %v1550_v9  ;;  %v609_v4 = vpop.f32.mrf.mxu1  ;;  %v1266_v7 = vmul.f32 -1.442695, %v2241_v33  ;;  %v2257_v9 = vadd.f32 %v2018_v1, %v439_v23 }
  0xfc   :  { %v1554_v11 = vpop.eup %1553  ;;  %1579 = vrcp.f32 %v868_v46  ;;  %v871_v18 = vadd.f32 1.0, %v1552_v13  ;;  %v1298_v13 = vmul.f32 -1.442695, %v2244_v28  ;;  %v1416_v12 = vpop.f32.mrf.mxu0 }
  0xfd   :  { %v1556_v19 = vpop.eup %1555  ;;  %1581 = vrcp.f32 %v900_v14  ;;  %v903_v16 = vadd.f32 1.0, %v1554_v11  ;;  %v2262_v14 = vadd.f32 %v2018_v1, %v599_v26 }
  0xfe   :  { %v1558_v24 = vpop.eup %1557  ;;  %1583 = vrcp.f32 %v871_v18  ;;  %v870_v25 = vadd.f32 1.0, %v1556_v19  ;;  %v1269_v18 = vmul.f32 -1.442695, %v2248_v29  ;;  %v1464_v19 = vpop.f32.mrf.mxu1 }
  0xff   :  { %v1560_v30 = vpop.eup %1559  ;;  %1585 = vrcp.f32 %v903_v16  ;;  %v902_v31 = vadd.f32 1.0, %v1558_v24  ;;  %v1301_v24 = vmul.f32 -1.442695, %v2252_v6 }
 0x100   :  { %v1562_v32 = vpop.eup %1561  ;;  %1587 = vrcp.f32 %v870_v25  ;;  %v873_v36 = vadd.f32 1.0, %v1560_v30  ;;  %v1268_v30 = vmul.f32 -1.442695, %v2257_v9 }
 0x101   :  { %v1564_v37 = vpop.eup %1563  ;;  %1589 = vrcp.f32 %v902_v31  ;;  %v905_v39 = vadd.f32 1.0, %v1562_v32  ;;  %v2289_v31 = vadd.f32 %v2018_v1, %v449_v34 }
 0x102   :  { %v1566_v44 = vpop.eup %1565  ;;  %1591 = vrcp.f32 %v873_v36  ;;  %v872_v47 = vadd.f32 1.0, %v1564_v37  ;;  %v1300_v36 = vmul.f32 -1.442695, %v2262_v14  ;;  %v2298_v37 = vadd.f32 %v2018_v1, %v609_v4 }
 0x103   :  { %v1568_v52 = vpop.eup %1567  ;;  %1593 = vrcp.f32 %v905_v39  ;;  %v904_v53 = vadd.f32 1.0, %v1566_v44 }
 0x104   :  { %v1570_v54 = vpop.eup %1569  ;;  %1595 = vrcp.f32 %v872_v47  ;;  %v875_v57 = vadd.f32 1.0, %v1568_v52  ;;  %v619_v47 = vpop.f32.mrf.mxu1 }
 0x105   :  { %v1572_v58 = vpop.eup %1571  ;;  %1597 = vrcp.f32 %v904_v53  ;;  %v907_v59 = vadd.f32 1.0, %v1570_v54 }
 0x106   :  { %v1574_v61 = vpop.eup %1573  ;;  %1599 = vrcp.f32 %v875_v57  ;;  %v874_v62 = vadd.f32 1.0, %v1572_v58  ;;  %v1270_v58 = vmul.f32 -1.442695, %v2289_v31 }
 0x107   :  { %v1576_v41 = vpop.eup %1575  ;;  %1601 = vrcp.f32 %v907_v59  ;;  %v906_v63 = vadd.f32 1.0, %v1574_v61  ;;  %v1302_v61 = vmul.f32 -1.442695, %v2298_v37 }
 0x108   :  { %v1578_v2 = vpop.eup %1577  ;;  %v1061_v45 = vmul.f32 %v1576_v41, %v2085_v27  ;;  %1603 = vrcp.f32 %v874_v62  ;;  %v2334_v62 = vadd.f32 %v2018_v1, %v619_v47 }
 0x109   :  { %v1580_v8 = vpop.eup %1579  ;;  %v1093_v46 = vmul.f32 %v1578_v2, %v2088_v35  ;;  %1605 = vrcp.f32 %v906_v63  ;;  %v2271_v35 = vadd.f32 %v1413_v22, %v2018_v1 }
 0x10a   :  { %v1582_v11 = vpop.eup %1581  ;;  %1125 = vst.msk [vmem:[%s2613_s3 + $0x48] sm:$0xff] %vm86_vm1, %v1061_v45  ;;  %v1060_v27 = vmul.f32 %v1580_v8, %v2091_v38  ;;  %1607 = vpow2.f32 %v1267_v40  ;;  %v2280_v38 = vadd.f32 %v1461_v51, %v2018_v1 }
 0x10b   :  { %v1584_v16 = vpop.eup %1583  ;;  %1157 = vst.msk [vmem:[%s2613_s3 + $0x148] sm:$0xff] %vm86_vm1, %v1093_v46  ;;  %v1092_v23 = vmul.f32 %v1582_v11, %v2094_v43  ;;  %1609 = vpow2.f32 %v1299_v3  ;;  %v1271_v44 = vmul.f32 -1.442695, %v2271_v35  ;;  %v1304_v46 = vmul.f32 -1.442695, %v2334_v62 }
 0x10c   :  { %v1586_v25 = vpop.eup %1585  ;;  %1124 = vst.msk [vmem:[%s2613_s3 + $0x40] sm:$0xff] %vm86_vm1, %v1060_v27  ;;  %v1063_v26 = vmul.f32 %v1584_v16, %v2098_v49  ;;  %1611 = vpow2.f32 %v1266_v7  ;;  %v459_v49 = vpop.f32.mrf.mxu0  ;;  %v1303_v53 = vmul.f32 -1.442695, %v2280_v38 }
 0x10d   :  { %v1588_v43 = vpop.eup %1587  ;;  %1156 = vst.msk [vmem:[%s2613_s3 + $0x140] sm:$0xff] %vm86_vm1, %v1092_v23  ;;  %v1095_v32 = vmul.f32 %v1586_v25, %v2102_v56  ;;  %1613 = vpow2.f32 %v1298_v13  ;;  %v2307_v56 = vadd.f32 %v1416_v12, %v2018_v1  ;;  %v2325_v59 = vadd.f32 %v2018_v1, %v459_v49 }
 0x10e   :  { %v1590_v39 = vpop.eup %1589  ;;  %1127 = vst.msk [vmem:[%s2613_s3 + $0x58] sm:$0xff] %vm86_vm1, %v1063_v26  ;;  %v1062_v22 = vmul.f32 %v1588_v43, %v2107_v60  ;;  %1615 = vpow2.f32 %v1269_v18  ;;  %v2316_v60 = vadd.f32 %v1464_v19, %v2018_v1 }
 0x10f   :  { %v1592_v51 = vpop.eup %1591  ;;  %1159 = vst.msk [vmem:[%s2613_s3 + $0x158] sm:$0xff] %vm86_vm1, %v1095_v32  ;;  %v1094_v52 = vmul.f32 %v1590_v39, %v2112_v0  ;;  %1617 = vpow2.f32 %v1301_v24  ;;  %v1273_v41 = vmul.f32 -1.442695, %v2307_v56  ;;  %v1272_v7 = vmul.f32 -1.442695, %v2325_v59 }
 0x110   :  { %v1594_v54 = vpop.eup %1593  ;;  %1126 = vst.msk [vmem:[%s2613_s3 + $0x50] sm:$0xff] %vm86_vm1, %v1062_v22  ;;  %v1065_v57 = vmul.f32 %v1592_v51, %v2121_v5  ;;  %1619 = vpow2.f32 %v1268_v30  ;;  %v2336_v5 = vpop.f32.mrf.mxu0  ;;  %v1305_v2 = vmul.f32 -1.442695, %v2316_v60 }
 0x111   :  { %v1596_v0 = vpop.eup %1595  ;;  %1158 = vst.msk [vmem:[%s2613_s3 + $0x150] sm:$0xff] %vm86_vm1, %v1094_v52  ;;  %v1097_v34 = vmul.f32 %v1594_v54, %v2130_v10  ;;  %1621 = vpow2.f32 %v1300_v36  ;;  %v2344_v10 = vpop.f32.mrf.mxu1 }
 0x112   :  { %v1598_v40 = vpop.eup %1597  ;;  %1129 = vst.msk [vmem:[%s2613_s3 + $0x68] sm:$0xff] %vm86_vm1, %v1065_v57  ;;  %v1064_v4 = vmul.f32 %v1596_v0, %v2139_v15  ;;  %1623 = vpow2.f32 %v1271_v44  ;;  %v469_v13 = vpop.f32.mrf.mxu0 }
 0x113   :  { %v1600_v63 = vpop.eup %1599  ;;  %1161 = vst.msk [vmem:[%s2613_s3 + $0x168] sm:$0xff] %vm86_vm1, %v1097_v34  ;;  %v1096_v3 = vmul.f32 %v1598_v40, %v2148_v20  ;;  %1625 = vpow2.f32 %v1303_v53  ;;  %v629_v11 = vpop.f32.mrf.mxu1  ;;  %v2384_v40 = vadd.f32 %v2336_v5, %v2018_v1 }
 0x114   :  { %v1602_v45 = vpop.eup %1601  ;;  %1128 = vst.msk [vmem:[%s2613_s3 + $0x60] sm:$0xff] %vm86_vm1, %v1064_v4  ;;  %v1067_v15 = vmul.f32 %v1600_v63, %v2157_v17  ;;  %1627 = vpow2.f32 %v1270_v58  ;;  %v1422_v23 = vpop.f32.mrf.mxu0  ;;  %v2394_v5 = vadd.f32 %v2018_v1, %v629_v11 }
 0x115   :  { %v1604_v8 = vpop.eup %1603  ;;  %1160 = vst.msk [vmem:[%s2613_s3 + $0x160] sm:$0xff] %vm86_vm1, %v1096_v3  ;;  %v1099_v20 = vmul.f32 %v1602_v45, %v2166_v21  ;;  %1629 = vpow2.f32 %v1302_v61  ;;  %v1470_v25 = vpop.f32.mrf.mxu1  ;;  %v2388_v3 = vadd.f32 %v2344_v10, %v2018_v1  ;;  %v2398_v10 = vadd.f32 %v1422_v23, %v2018_v1 }
 0x116   :  { %v1606_v12 = vpop.eup %1605  ;;  %1131 = vst.msk [vmem:[%s2613_s3 + $0x78] sm:$0xff] %vm86_vm1, %v1067_v15  ;;  %v1066_v17 = vmul.f32 %v1604_v8, %v2175_v42  ;;  %1631 = vpow2.f32 %v1273_v41  ;;  %v479_v39 = vpop.f32.mrf.mxu0  ;;  %v2391_v15 = vadd.f32 %v2018_v1, %v469_v13 }
 0x117   :  { %v1608_v27 = vpop.eup %1607  ;;  %1163 = vst.msk [vmem:[%s2613_s3 + $0x178] sm:$0xff] %vm86_vm1, %v1099_v20  ;;  %v1098_v21 = vmul.f32 %v1606_v12, %v2184_v48  ;;  %1633 = vpow2.f32 %v1305_v2  ;;  %v639_v47 = vpop.f32.mrf.mxu1 }
 0x118   :  { %v1610_v18 = vpop.eup %1609  ;;  %1130 = vst.msk [vmem:[%s2613_s3 + $0x70] sm:$0xff] %vm86_vm1, %v1066_v17  ;;  %v877_v19 = vadd.f32 1.0, %v1608_v27  ;;  %1635 = vpow2.f32 %v1272_v7  ;;  %v1425_v0 = vpop.f32.mrf.mxu0  ;;  %v1275_v17 = vmul.f32 -1.442695, %v2384_v40 }
 0x119   :  { %v1612_v42 = vpop.eup %1611  ;;  %1162 = vst.msk [vmem:[%s2613_s3 + $0x170] sm:$0xff] %vm86_vm1, %v1098_v21  ;;  %v909_v16 = vadd.f32 1.0, %v1610_v18  ;;  %1637 = vpow2.f32 %v1304_v46  ;;  %v1473_v4 = vpop.f32.mrf.mxu1  ;;  %v1307_v18 = vmul.f32 -1.442695, %v2388_v3 }
 0x11a   :  { %v1614_v24 = vpop.eup %1613  ;;  %1639 = vrcp.f32 %v877_v19  ;;  %v876_v48 = vadd.f32 1.0, %v1612_v42  ;;  %v489_v20 = vpop.f32.mrf.mxu0  ;;  %v2402_v19 = vadd.f32 %v1470_v25, %v2018_v1 }
 0x11b   :  { %v1616_v26 = vpop.eup %1615  ;;  %1641 = vrcp.f32 %v909_v16  ;;  %v908_v30 = vadd.f32 1.0, %v1614_v24  ;;  %v649_v27 = vpop.f32.mrf.mxu1  ;;  %v1274_v16 = vmul.f32 -1.442695, %v2391_v15  ;;  %v2407_v24 = vadd.f32 %v2018_v1, %v479_v39 }
 0x11c   :  { %v1618_v43 = vpop.eup %1617  ;;  %1643 = vrcp.f32 %v876_v48  ;;  %v879_v32 = vadd.f32 1.0, %v1616_v26  ;;  %v1306_v26 = vmul.f32 -1.442695, %v2394_v5  ;;  %v1428_v25 = vpop.f32.mrf.mxu0 }
 0x11d   :  { %v1620_v36 = vpop.eup %1619  ;;  %1645 = vrcp.f32 %v908_v30  ;;  %v911_v49 = vadd.f32 1.0, %v1618_v43  ;;  %v2412_v30 = vadd.f32 %v2018_v1, %v639_v47 }
 0x11e   :  { %v1622_v22 = vpop.eup %1621  ;;  %1647 = vrcp.f32 %v879_v32  ;;  %v878_v44 = vadd.f32 1.0, %v1620_v36  ;;  %v1277_v32 = vmul.f32 -1.442695, %v2398_v10  ;;  %v1476_v36 = vpop.f32.mrf.mxu1 }
 0x11f   :  { %v1624_v51 = vpop.eup %1623  ;;  %1649 = vrcp.f32 %v911_v49  ;;  %v910_v52 = vadd.f32 1.0, %v1622_v22  ;;  %v1309_v22 = vmul.f32 -1.442695, %v2402_v19 }
 0x120   :  { %v1626_v53 = vpop.eup %1625  ;;  %1651 = vrcp.f32 %v878_v44  ;;  %v881_v54 = vadd.f32 1.0, %v1624_v51  ;;  %v1276_v51 = vmul.f32 -1.442695, %v2407_v24 }
 0x121   :  { %v1628_v57 = vpop.eup %1627  ;;  %1653 = vrcp.f32 %v910_v52  ;;  %v913_v58 = vadd.f32 1.0, %v1626_v53  ;;  %v2439_v52 = vadd.f32 %v2018_v1, %v489_v20 }
 0x122   :  { %v1630_v34 = vpop.eup %1629  ;;  %1655 = vrcp.f32 %v881_v54  ;;  %v880_v61 = vadd.f32 1.0, %v1628_v57  ;;  %v1308_v54 = vmul.f32 -1.442695, %v2412_v30  ;;  %v2448_v57 = vadd.f32 %v2018_v1, %v649_v27 }
 0x123   :  { %v1632_v41 = vpop.eup %1631  ;;  %1657 = vrcp.f32 %v913_v58  ;;  %v912_v63 = vadd.f32 1.0, %v1630_v34 }
 0x124   :  { %v1634_v2 = vpop.eup %1633  ;;  %1659 = vrcp.f32 %v880_v61  ;;  %v883_v45 = vadd.f32 1.0, %v1632_v41  ;;  %v659_v61 = vpop.f32.mrf.mxu1 }
 0x125   :  { %v1636_v7 = vpop.eup %1635  ;;  %1661 = vrcp.f32 %v912_v63  ;;  %v915_v8 = vadd.f32 1.0, %v1634_v2 }
 0x126   :  { %v1638_v46 = vpop.eup %1637  ;;  %1663 = vrcp.f32 %v883_v45  ;;  %v882_v12 = vadd.f32 1.0, %v1636_v7  ;;  %v1278_v7 = vmul.f32 -1.442695, %v2439_v52 }
 0x127   :  { %v1640_v21 = vpop.eup %1639  ;;  %1665 = vrcp.f32 %v915_v8  ;;  %v914_v13 = vadd.f32 1.0, %v1638_v46  ;;  %v1310_v46 = vmul.f32 -1.442695, %v2448_v57 }
 0x128   :  { %v1642_v11 = vpop.eup %1641  ;;  %v1069_v42 = vmul.f32 %v1640_v21, %v2234_v50  ;;  %1667 = vrcp.f32 %v882_v12 }
 0x129   :  { %v1644_v23 = vpop.eup %1643  ;;  %v1101_v48 = vmul.f32 %v1642_v11, %v2238_v55  ;;  %1669 = vrcp.f32 %v914_v13  ;;  %v2421_v55 = vadd.f32 %v1425_v0, %v2018_v1 }
 0x12a   :  { %v1646_v43 = vpop.eup %1645  ;;  %1133 = vst.msk [vmem:[%s2613_s3 + $0x88] sm:$0xff] %vm86_vm1, %v1069_v42  ;;  %v1068_v50 = vmul.f32 %v1644_v23, %v2241_v33  ;;  %1671 = vpow2.f32 %v1275_v17  ;;  %v2430_v33 = vadd.f32 %v1473_v4, %v2018_v1 }
 0x12b   :  { %v1648_v49 = vpop.eup %1647  ;;  %1165 = vst.msk [vmem:[%s2613_s3 + $0x188] sm:$0xff] %vm86_vm1, %v1101_v48  ;;  %v1100_v39 = vmul.f32 %v1646_v43, %v2244_v28  ;;  %1673 = vpow2.f32 %v1307_v18  ;;  %v1279_v34 = vmul.f32 -1.442695, %v2421_v55 }
 0x12c   :  { %v1650_v44 = vpop.eup %1649  ;;  %1132 = vst.msk [vmem:[%s2613_s3 + $0x80] sm:$0xff] %vm86_vm1, %v1068_v50  ;;  %v1071_v47 = vmul.f32 %v1648_v49, %v2248_v29  ;;  %1675 = vpow2.f32 %v1274_v16  ;;  %v499_v29 = vpop.f32.mrf.mxu0  ;;  %v1311_v63 = vmul.f32 -1.442695, %v2430_v33 }
 0x12d   :  { %v1652_v28 = vpop.eup %1651  ;;  %1164 = vst.msk [vmem:[%s2613_s3 + $0x180] sm:$0xff] %vm86_vm1, %v1100_v39  ;;  %v1103_v53 = vmul.f32 %v1650_v44, %v2252_v6  ;;  %1677 = vpow2.f32 %v1306_v26  ;;  %v2457_v6 = vadd.f32 %v1428_v25, %v2018_v1  ;;  %v2475_v8 = vadd.f32 %v2018_v1, %v499_v29 }
 0x12e   :  { %v1654_v58 = vpop.eup %1653  ;;  %1135 = vst.msk [vmem:[%s2613_s3 + $0x98] sm:$0xff] %vm86_vm1, %v1071_v47  ;;  %v1070_v0 = vmul.f32 %v1652_v28, %v2257_v9  ;;  %1679 = vpow2.f32 %v1277_v32  ;;  %v2466_v9 = vadd.f32 %v1476_v36, %v2018_v1 }
 0x12f   :  { %v1656_v4 = vpop.eup %1655  ;;  %1167 = vst.msk [vmem:[%s2613_s3 + $0x198] sm:$0xff] %vm86_vm1, %v1103_v53  ;;  %v1102_v41 = vmul.f32 %v1654_v58, %v2262_v14  ;;  %1681 = vpow2.f32 %v1309_v22  ;;  %v1280_v11 = vmul.f32 -1.442695, %v2475_v8 }
 0x130   :  { %v1658_v2 = vpop.eup %1657  ;;  %1134 = vst.msk [vmem:[%s2613_s3 + $0x90] sm:$0xff] %vm86_vm1, %v1070_v0  ;;  %v1073_v45 = vmul.f32 %v1656_v4, %v2271_v35  ;;  %1683 = vpow2.f32 %v1276_v51  ;;  %v1735_v35 = vld [vmem:[%s2612_s2] ss:$0 sm:$0xff]  ;;  %v1313_v13 = vmul.f32 -1.442695, %v2466_v9 }
 0x131   :  { %v1660_v14 = vpop.eup %1659  ;;  %1166 = vst.msk [vmem:[%s2613_s3 + $0x190] sm:$0xff] %vm86_vm1, %v1102_v41  ;;  %v1105_v20 = vmul.f32 %v1658_v2, %v2280_v38  ;;  %1685 = vpow2.f32 %v1308_v54  ;;  %v2486_v12 = vadd.f32 %v1735_v35, %v659_v61  ;;  %v1281_v38 = vmul.f32 -1.442695, %v2457_v6 }
 0x132   :  { %v1662_v17 = vpop.eup %1661  ;;  %1137 = vst.msk [vmem:[%s2613_s3 + $0xa8] sm:$0xff] %vm86_vm1, %v1073_v45  ;;  %v1072_v1 = vmul.f32 %v1660_v14, %v2289_v31  ;;  %1687 = vpow2.f32 %v1279_v34 }
 0x133   :  { %v1664_v27 = vpop.eup %1663  ;;  %1169 = vst.msk [vmem:[%s2613_s3 + $0x1a8] sm:$0xff] %vm86_vm1, %v1105_v20  ;;  %v1104_v21 = vmul.f32 %v1662_v17, %v2298_v37  ;;  %1689 = vpow2.f32 %v1311_v63  ;;  %v1312_v16 = vmul.f32 -1.442695, %v2486_v12 }
 0x134   :  { %v1666_v18 = vpop.eup %1665  ;;  %1136 = vst.msk [vmem:[%s2613_s3 + $0xa0] sm:$0xff] %vm86_vm1, %v1072_v1  ;;  %v1075_v31 = vmul.f32 %v1664_v27, %v2307_v56  ;;  %1691 = vpow2.f32 %v1278_v7 }
 0x135   :  { %v1668_v42 = vpop.eup %1667  ;;  %1168 = vst.msk [vmem:[%s2613_s3 + $0x1a0] sm:$0xff] %vm86_vm1, %v1104_v21  ;;  %v1107_v37 = vmul.f32 %v1666_v18, %v2316_v60  ;;  %1693 = vpow2.f32 %v1310_v46 }
 0x136   :  { %v1670_v23 = vpop.eup %1669  ;;  %1139 = vst.msk [vmem:[%s2613_s3 + $0xb8] sm:$0xff] %vm86_vm1, %v1075_v31  ;;  %v1074_v56 = vmul.f32 %v1668_v42, %v2325_v59  ;;  %1695 = vpow2.f32 %v1281_v38 }
 0x137   :  { %v1672_v48 = vpop.eup %1671  ;;  %1171 = vst.msk [vmem:[%s2613_s3 + $0x1b8] sm:$0xff] %vm86_vm1, %v1107_v37  ;;  %v1106_v60 = vmul.f32 %v1670_v23, %v2334_v62  ;;  %1697 = vpow2.f32 %v1313_v13 }
 0x138   :  { %v1674_v26 = vpop.eup %1673  ;;  %1138 = vst.msk [vmem:[%s2613_s3 + $0xb0] sm:$0xff] %vm86_vm1, %v1074_v56  ;;  %v885_v25 = vadd.f32 1.0, %v1672_v48  ;;  %1699 = vpow2.f32 %v1280_v11 }
 0x139   :  { %v1676_v43 = vpop.eup %1675  ;;  %1170 = vst.msk [vmem:[%s2613_s3 + $0x1b0] sm:$0xff] %vm86_vm1, %v1106_v60  ;;  %v917_v59 = vadd.f32 1.0, %v1674_v26  ;;  %1701 = vpow2.f32 %v1312_v16 }
 0x13a   :  { %v1678_v50 = vpop.eup %1677  ;;  %1703 = vrcp.f32 %v885_v25  ;;  %v884_v62 = vadd.f32 1.0, %v1676_v43 }
 0x13b   :  { %v1680_v32 = vpop.eup %1679  ;;  %1705 = vrcp.f32 %v917_v59  ;;  %v916_v36 = vadd.f32 1.0, %v1678_v50 }
 0x13c   :  { %v1682_v49 = vpop.eup %1681  ;;  %1707 = vrcp.f32 %v884_v62  ;;  %v887_v39 = vadd.f32 1.0, %v1680_v32 }
 0x13d   :  { %v1684_v22 = vpop.eup %1683  ;;  %1709 = vrcp.f32 %v916_v36  ;;  %v919_v44 = vadd.f32 1.0, %v1682_v49 }
 0x13e   :  { %v1686_v47 = vpop.eup %1685  ;;  %1711 = vrcp.f32 %v887_v39  ;;  %v886_v51 = vadd.f32 1.0, %v1684_v22 }
 0x13f   :  { %v1688_v28 = vpop.eup %1687  ;;  %1713 = vrcp.f32 %v919_v44  ;;  %v918_v53 = vadd.f32 1.0, %v1686_v47 }
 0x140   :  { %v1690_v54 = vpop.eup %1689  ;;  %1715 = vrcp.f32 %v886_v51  ;;  %v889_v29 = vadd.f32 1.0, %v1688_v28 }
 0x141   :  { %v1692_v58 = vpop.eup %1691  ;;  %1717 = vrcp.f32 %v918_v53  ;;  %v921_v0 = vadd.f32 1.0, %v1690_v54 }
 0x142   :  { %v1694_v34 = vpop.eup %1693  ;;  %1719 = vrcp.f32 %v889_v29  ;;  %v888_v61 = vadd.f32 1.0, %v1692_v58 }
 0x143   :  { %v1696_v4 = vpop.eup %1695  ;;  %1721 = vrcp.f32 %v921_v0  ;;  %v920_v41 = vadd.f32 1.0, %v1694_v34 }
 0x144   :  { %v1698_v63 = vpop.eup %1697  ;;  %1723 = vrcp.f32 %v888_v61  ;;  %v891_v2 = vadd.f32 1.0, %v1696_v4 }
 0x145   :  { %v1700_v45 = vpop.eup %1699  ;;  %1725 = vrcp.f32 %v920_v41  ;;  %v923_v7 = vadd.f32 1.0, %v1698_v63 }
 0x146   :  { %v1702_v14 = vpop.eup %1701  ;;  %1727 = vrcp.f32 %v891_v2  ;;  %v890_v20 = vadd.f32 1.0, %v1700_v45 }
 0x147   :  { %v1704_v46 = vpop.eup %1703  ;;  %1729 = vrcp.f32 %v923_v7  ;;  %v922_v35 = vadd.f32 1.0, %v1702_v14 }
 0x148   :  { %v1706_v17 = vpop.eup %1705  ;;  %v1077_v1 = vmul.f32 %v1704_v46, %v2384_v40  ;;  %1731 = vrcp.f32 %v890_v20 }
 0x149   :  { %v1708_v38 = vpop.eup %1707  ;;  %v1109_v27 = vmul.f32 %v1706_v17, %v2388_v3  ;;  %1733 = vrcp.f32 %v922_v35 }
 0x14a   :  { %v1710_v21 = vpop.eup %1709  ;;  %1141 = vst.msk [vmem:[%s2613_s3 + $0xc8] sm:$0xff] %vm86_vm1, %v1077_v1  ;;  %v1076_v13 = vmul.f32 %v1708_v38, %v2391_v15 }
 0x14b   :  { %v1712_v18 = vpop.eup %1711  ;;  %1173 = vst.msk [vmem:[%s2613_s3 + $0x1c8] sm:$0xff] %vm86_vm1, %v1109_v27  ;;  %v1108_v40 = vmul.f32 %v1710_v21, %v2394_v5 }
 0x14c   :  { %v1714_v31 = vpop.eup %1713  ;;  %1140 = vst.msk [vmem:[%s2613_s3 + $0xc0] sm:$0xff] %vm86_vm1, %v1076_v13  ;;  %v1079_v3 = vmul.f32 %v1712_v18, %v2398_v10 }
 0x14d   :  { %v1716_v11 = vpop.eup %1715  ;;  %1172 = vst.msk [vmem:[%s2613_s3 + $0x1c0] sm:$0xff] %vm86_vm1, %v1108_v40  ;;  %v1111_v15 = vmul.f32 %v1714_v31, %v2402_v19 }
 0x14e   :  { %v1718_v42 = vpop.eup %1717  ;;  %1143 = vst.msk [vmem:[%s2613_s3 + $0xd8] sm:$0xff] %vm86_vm1, %v1079_v3  ;;  %v1078_v5 = vmul.f32 %v1716_v11, %v2407_v24 }
 0x14f   :  { %v1720_v37 = vpop.eup %1719  ;;  %1175 = vst.msk [vmem:[%s2613_s3 + $0x1d8] sm:$0xff] %vm86_vm1, %v1111_v15  ;;  %v1110_v10 = vmul.f32 %v1718_v42, %v2412_v30 }
 0x150   :  { %v1722_v16 = vpop.eup %1721  ;;  %1142 = vst.msk [vmem:[%s2613_s3 + $0xd0] sm:$0xff] %vm86_vm1, %v1078_v5  ;;  %v1081_v19 = vmul.f32 %v1720_v37, %v2421_v55 }
 0x151   :  { %v1724_v23 = vpop.eup %1723  ;;  %1174 = vst.msk [vmem:[%s2613_s3 + $0x1d0] sm:$0xff] %vm86_vm1, %v1110_v10  ;;  %v1113_v24 = vmul.f32 %v1722_v16, %v2430_v33 }
 0x152   :  { %v1726_v56 = vpop.eup %1725  ;;  %1145 = vst.msk [vmem:[%s2613_s3 + $0xe8] sm:$0xff] %vm86_vm1, %v1081_v19  ;;  %v1080_v30 = vmul.f32 %v1724_v23, %v2439_v52 }
 0x153   :  { %v1728_v48 = vpop.eup %1727  ;;  %1177 = vst.msk [vmem:[%s2613_s3 + $0x1e8] sm:$0xff] %vm86_vm1, %v1113_v24  ;;  %v1112_v55 = vmul.f32 %v1726_v56, %v2448_v57 }
 0x154   :  { %v1730_v60 = vpop.eup %1729  ;;  %1144 = vst.msk [vmem:[%s2613_s3 + $0xe0] sm:$0xff] %vm86_vm1, %v1080_v30  ;;  %v1083_v33 = vmul.f32 %v1728_v48, %v2457_v6 }
 0x155   :  { %v1732_v26 = vpop.eup %1731  ;;  %1176 = vst.msk [vmem:[%s2613_s3 + $0x1e0] sm:$0xff] %vm86_vm1, %v1112_v55  ;;  %v1115_v52 = vmul.f32 %v1730_v60, %v2466_v9 }
 0x156   :  { %v1734_v25 = vpop.eup %1733  ;;  %1147 = vst.msk [vmem:[%s2613_s3 + $0xf8] sm:$0xff] %vm86_vm1, %v1083_v33  ;;  %v1082_v57 = vmul.f32 %v1732_v26, %v2475_v8 }
 0x157   :  { %1179 = vst.msk [vmem:[%s2613_s3 + $0x1f8] sm:$0xff] %vm86_vm1, %v1115_v52  ;;  %v1114_v6 = vmul.f32 %v1734_v25, %v2486_v12 }
 0x158   :  { %1146 = vst.msk [vmem:[%s2613_s3 + $0xf0] sm:$0xff] %vm86_vm1, %v1082_v57 }
 0x159   :  { %1178 = vst.msk [vmem:[%s2613_s3 + $0x1f0] sm:$0xff] %vm86_vm1, %v1114_v6 }

// kernel: _lambda_.9
= control target key start
LH: loop header
LB: loop body
LE: loop exit
PB: predicated region body
PF: predicated region fallthrough
CT: control target
= control target key end

     0   :  { %vm343_vm0 = vcmask 1041408   ;;  %vm150_vm1 = vcmask 15360   ;;  %vm1831_vm2 = vcmask 31744   ;;  %s3816_s3 = inlined_call_operand.vmem [shape: f32[2,4], index: 3, kind: input, shape index: {}]   ;;  %s3817_s2 = inlined_call_operand.vmem [shape: f32[2,4], index: 2, kind: input, shape index: {}]   ;;  %s3818_s1 = inlined_call_operand.vmem [shape: f32[512,2], index: 1, kind: input, shape index: {}]   ;;  %s3819_s0 = inlined_call_operand.vmem [shape: f32[512,2], index: 0, kind: input, shape index: {}]   ;;  %s3820_s4 = inlined_call_operand.vmem [shape: f32[1,4], index: 4, kind: input, shape index: {}]   ;;  %s3821_s5 = inlined_call_operand.vmem [shape: f32[512,4], index: 5, kind: output, shape index: {}]  }
   0x1   :  { %v149_v0 = vld [vmem:[%s3816_s3] sm:$0x3]  ;;  %v86_v4 = vld [vmem:[%s3818_s1 + $0x8] sm:$0xff]  ;;  %v87_v6 = vld [vmem:[%s3818_s1 + $0x10] sm:$0xff] }
   0x2   :  { %v84_v1 = vld [vmem:[%s3817_s2] sm:$0x3]  ;;  %2225 = vmatprep.subr.msk.mxu0 %vm343_vm0, %v149_v0  ;;  %v21_v5 = vld [vmem:[%s3819_s0 + $0x8] sm:$0xff]  ;;  %v22_v7 = vld [vmem:[%s3819_s0 + $0x10] sm:$0xff] }
   0x3   :  { %v85_v2 = vld [vmem:[%s3818_s1] sm:$0xff]  ;;  %2323 = vmatprep.subr.msk.mxu1 %vm343_vm0, %v84_v1  ;;  %2226 = vmatpush3.msk.msra.mxu0 %vm343_vm0, %v149_v0  ;;  %v88_v8 = vld [vmem:[%s3818_s1 + $0x18] sm:$0xff]  ;;  %v90_v12 = vld [vmem:[%s3818_s1 + $0x28] sm:$0xff] }
   0x4   :  { %v20_v3 = vld [vmem:[%s3819_s0] sm:$0xff]  ;;  %2227 = vmatprep.mubr.msk.f32.mxu0 %vm150_vm1, %v85_v2  ;;  %2324 = vmatpush3.msk.msra.mxu1 %vm343_vm0, %v84_v1  ;;  %v23_v9 = vld [vmem:[%s3819_s0 + $0x18] sm:$0xff]  ;;  %v25_v13 = vld [vmem:[%s3819_s0 + $0x28] sm:$0xff] }
   0x5   :  { %2325 = vmatprep.mubr.msk.f32.mxu1 %vm150_vm1, %v20_v3  ;;  %2228 = vmatmul.mubr.msk.f32.vlgmr.msra.gmra.mxu0 %vm150_vm1, %v86_v4  ;;  %v89_v10 = vld [vmem:[%s3818_s1 + $0x20] sm:$0xff]  ;;  %v91_v14 = vld [vmem:[%s3818_s1 + $0x30] sm:$0xff]  ;;  %v92_v16 = vld [vmem:[%s3818_s1 + $0x38] sm:$0xff] }
   0x6   :  { %2326 = vmatmul.mubr.msk.f32.vlgmr.msra.gmra.mxu1 %vm150_vm1, %v21_v5  ;;  %2230 = vmatprep.mubr.msk.f32.mxu0 %vm150_vm1, %v87_v6  ;;  %v24_v11 = vld [vmem:[%s3819_s0 + $0x20] sm:$0xff]  ;;  %v26_v15 = vld [vmem:[%s3819_s0 + $0x30] sm:$0xff]  ;;  %v27_v17 = vld [vmem:[%s3819_s0 + $0x38] sm:$0xff] }
   0x7   :  { %2328 = vmatprep.mubr.msk.f32.mxu1 %vm150_vm1, %v22_v7  ;;  %v93_v18 = vld [vmem:[%s3818_s1 + $0x40] sm:$0xff]  ;;  %v94_v20 = vld [vmem:[%s3818_s1 + $0x48] sm:$0xff]  ;;  %v95_v22 = vld [vmem:[%s3818_s1 + $0x50] sm:$0xff] }
   0x8   :  { %v28_v19 = vld [vmem:[%s3819_s0 + $0x40] sm:$0xff]  ;;  %v29_v21 = vld [vmem:[%s3819_s0 + $0x48] sm:$0xff]  ;;  %v30_v23 = vld [vmem:[%s3819_s0 + $0x50] sm:$0xff] }
   0x9   :  { %2231 = vmatmul.mubr.msk.f32.gmra.mxu0 %vm150_vm1, %v88_v8  ;;  %v96_v24 = vld [vmem:[%s3818_s1 + $0x58] sm:$0xff]  ;;  %v97_v26 = vld [vmem:[%s3818_s1 + $0x60] sm:$0xff]  ;;  %v98_v28 = vld [vmem:[%s3818_s1 + $0x68] sm:$0xff] }
   0xa   :  { %2329 = vmatmul.mubr.msk.f32.gmra.mxu1 %vm150_vm1, %v23_v9  ;;  %2233 = vmatprep.mubr.msk.f32.mxu0 %vm150_vm1, %v89_v10  ;;  %v31_v25 = vld [vmem:[%s3819_s0 + $0x58] sm:$0xff]  ;;  %v32_v27 = vld [vmem:[%s3819_s0 + $0x60] sm:$0xff]  ;;  %v33_v29 = vld [vmem:[%s3819_s0 + $0x68] sm:$0xff] }
   0xb   :  { %2331 = vmatprep.mubr.msk.f32.mxu1 %vm150_vm1, %v24_v11  ;;  %v99_v30 = vld [vmem:[%s3818_s1 + $0x70] sm:$0xff]  ;;  %v100_v32 = vld [vmem:[%s3818_s1 + $0x78] sm:$0xff]  ;;  %v101_v34 = vld [vmem:[%s3818_s1 + $0x80] sm:$0xff] }
   0xc   :  { %v34_v31 = vld [vmem:[%s3819_s0 + $0x70] sm:$0xff]  ;;  %v35_v33 = vld [vmem:[%s3819_s0 + $0x78] sm:$0xff]  ;;  %v36_v35 = vld [vmem:[%s3819_s0 + $0x80] sm:$0xff] }
   0xd   :  { %2234 = vmatmul.mubr.msk.f32.gmra.mxu0 %vm150_vm1, %v90_v12  ;;  %v102_v36 = vld [vmem:[%s3818_s1 + $0x88] sm:$0xff]  ;;  %v103_v38 = vld [vmem:[%s3818_s1 + $0x90] sm:$0xff]  ;;  %v104_v40 = vld [vmem:[%s3818_s1 + $0x98] sm:$0xff] }
   0xe   :  { %2332 = vmatmul.mubr.msk.f32.gmra.mxu1 %vm150_vm1, %v25_v13  ;;  %2236 = vmatprep.mubr.msk.f32.mxu0 %vm150_vm1, %v91_v14  ;;  %v37_v37 = vld [vmem:[%s3819_s0 + $0x88] sm:$0xff]  ;;  %v38_v39 = vld [vmem:[%s3819_s0 + $0x90] sm:$0xff]  ;;  %v39_v41 = vld [vmem:[%s3819_s0 + $0x98] sm:$0xff] }
   0xf   :  { %2334 = vmatprep.mubr.msk.f32.mxu1 %vm150_vm1, %v26_v15  ;;  %v105_v42 = vld [vmem:[%s3818_s1 + $0xa0] sm:$0xff]  ;;  %v106_v44 = vld [vmem:[%s3818_s1 + $0xa8] sm:$0xff]  ;;  %v107_v46 = vld [vmem:[%s3818_s1 + $0xb0] sm:$0xff] }
  0x10   :  { %v40_v43 = vld [vmem:[%s3819_s0 + $0xa0] sm:$0xff]  ;;  %v41_v45 = vld [vmem:[%s3819_s0 + $0xa8] sm:$0xff]  ;;  %v42_v47 = vld [vmem:[%s3819_s0 + $0xb0] sm:$0xff] }
  0x11   :  { %2237 = vmatmul.mubr.msk.f32.gmra.mxu0 %vm150_vm1, %v92_v16  ;;  %v108_v48 = vld [vmem:[%s3818_s1 + $0xb8] sm:$0xff]  ;;  %v109_v50 = vld [vmem:[%s3818_s1 + $0xc0] sm:$0xff]  ;;  %v110_v52 = vld [vmem:[%s3818_s1 + $0xc8] sm:$0xff] }
  0x12   :  { %2335 = vmatmul.mubr.msk.f32.gmra.mxu1 %vm150_vm1, %v27_v17  ;;  %2239 = vmatprep.mubr.msk.f32.mxu0 %vm150_vm1, %v93_v18  ;;  %v43_v49 = vld [vmem:[%s3819_s0 + $0xb8] sm:$0xff]  ;;  %v44_v51 = vld [vmem:[%s3819_s0 + $0xc0] sm:$0xff]  ;;  %v45_v53 = vld [vmem:[%s3819_s0 + $0xc8] sm:$0xff] }
  0x13   :  { %2337 = vmatprep.mubr.msk.f32.mxu1 %vm150_vm1, %v28_v19  ;;  %v111_v54 = vld [vmem:[%s3818_s1 + $0xd0] sm:$0xff]  ;;  %v112_v56 = vld [vmem:[%s3818_s1 + $0xd8] sm:$0xff]  ;;  %v113_v58 = vld [vmem:[%s3818_s1 + $0xe0] sm:$0xff] }
  0x14   :  { %v46_v55 = vld [vmem:[%s3819_s0 + $0xd0] sm:$0xff]  ;;  %v47_v57 = vld [vmem:[%s3819_s0 + $0xd8] sm:$0xff]  ;;  %v48_v59 = vld [vmem:[%s3819_s0 + $0xe0] sm:$0xff] }
  0x15   :  { %2240 = vmatmul.mubr.msk.f32.gmra.mxu0 %vm150_vm1, %v94_v20  ;;  %v114_v60 = vld [vmem:[%s3818_s1 + $0xe8] sm:$0xff]  ;;  %v115_v62 = vld [vmem:[%s3818_s1 + $0xf0] sm:$0xff]  ;;  %v116_v0 = vld [vmem:[%s3818_s1 + $0xf8] sm:$0xff] }
  0x16   :  { %2338 = vmatmul.mubr.msk.f32.gmra.mxu1 %vm150_vm1, %v29_v21  ;;  %2242 = vmatprep.mubr.msk.f32.mxu0 %vm150_vm1, %v95_v22  ;;  %v49_v61 = vld [vmem:[%s3819_s0 + $0xe8] sm:$0xff]  ;;  %v50_v63 = vld [vmem:[%s3819_s0 + $0xf0] sm:$0xff]  ;;  %v51_v1 = vld [vmem:[%s3819_s0 + $0xf8] sm:$0xff] }
  0x17   :  { %2340 = vmatprep.mubr.msk.f32.mxu1 %vm150_vm1, %v30_v23  ;;  %v117_v2 = vld [vmem:[%s3818_s1 + $0x100] sm:$0xff]  ;;  %v118_v4 = vld [vmem:[%s3818_s1 + $0x108] sm:$0xff]  ;;  %v119_v6 = vld [vmem:[%s3818_s1 + $0x110] sm:$0xff] }
  0x18   :  { %v52_v3 = vld [vmem:[%s3819_s0 + $0x100] sm:$0xff]  ;;  %v53_v5 = vld [vmem:[%s3819_s0 + $0x108] sm:$0xff]  ;;  %v54_v7 = vld [vmem:[%s3819_s0 + $0x110] sm:$0xff] }
  0x19   :  { %2243 = vmatmul.mubr.msk.f32.gmra.mxu0 %vm150_vm1, %v96_v24  ;;  %v120_v8 = vld [vmem:[%s3818_s1 + $0x118] sm:$0xff]  ;;  %v121_v10 = vld [vmem:[%s3818_s1 + $0x120] sm:$0xff]  ;;  %v122_v12 = vld [vmem:[%s3818_s1 + $0x128] sm:$0xff] }
  0x1a   :  { %2341 = vmatmul.mubr.msk.f32.gmra.mxu1 %vm150_vm1, %v31_v25  ;;  %2245 = vmatprep.mubr.msk.f32.mxu0 %vm150_vm1, %v97_v26  ;;  %v55_v9 = vld [vmem:[%s3819_s0 + $0x118] sm:$0xff]  ;;  %v56_v11 = vld [vmem:[%s3819_s0 + $0x120] sm:$0xff]  ;;  %v57_v13 = vld [vmem:[%s3819_s0 + $0x128] sm:$0xff] }
  0x1b   :  { %2343 = vmatprep.mubr.msk.f32.mxu1 %vm150_vm1, %v32_v27  ;;  %v123_v14 = vld [vmem:[%s3818_s1 + $0x130] sm:$0xff]  ;;  %v124_v16 = vld [vmem:[%s3818_s1 + $0x138] sm:$0xff]  ;;  %v125_v18 = vld [vmem:[%s3818_s1 + $0x140] sm:$0xff] }
  0x1c   :  { %v58_v15 = vld [vmem:[%s3819_s0 + $0x130] sm:$0xff]  ;;  %v59_v17 = vld [vmem:[%s3819_s0 + $0x138] sm:$0xff]  ;;  %v60_v19 = vld [vmem:[%s3819_s0 + $0x140] sm:$0xff] }
  0x1d   :  { %2246 = vmatmul.mubr.msk.f32.gmra.mxu0 %vm150_vm1, %v98_v28  ;;  %v126_v20 = vld [vmem:[%s3818_s1 + $0x148] sm:$0xff]  ;;  %v127_v22 = vld [vmem:[%s3818_s1 + $0x150] sm:$0xff]  ;;  %v128_v24 = vld [vmem:[%s3818_s1 + $0x158] sm:$0xff] }
  0x1e   :  { %2344 = vmatmul.mubr.msk.f32.gmra.mxu1 %vm150_vm1, %v33_v29  ;;  %2248 = vmatprep.mubr.msk.f32.mxu0 %vm150_vm1, %v99_v30  ;;  %v61_v21 = vld [vmem:[%s3819_s0 + $0x148] sm:$0xff]  ;;  %v62_v23 = vld [vmem:[%s3819_s0 + $0x150] sm:$0xff]  ;;  %v63_v25 = vld [vmem:[%s3819_s0 + $0x158] sm:$0xff] }
  0x1f   :  { %2346 = vmatprep.mubr.msk.f32.mxu1 %vm150_vm1, %v34_v31  ;;  %v129_v26 = vld [vmem:[%s3818_s1 + $0x160] sm:$0xff]  ;;  %v130_v28 = vld [vmem:[%s3818_s1 + $0x168] sm:$0xff]  ;;  %v131_v30 = vld [vmem:[%s3818_s1 + $0x170] sm:$0xff] }
  0x20   :  { %v64_v27 = vld [vmem:[%s3819_s0 + $0x160] sm:$0xff]  ;;  %v65_v29 = vld [vmem:[%s3819_s0 + $0x168] sm:$0xff]  ;;  %v66_v31 = vld [vmem:[%s3819_s0 + $0x170] sm:$0xff] }
  0x21   :  { %2249 = vmatmul.mubr.msk.f32.gmra.mxu0 %vm150_vm1, %v100_v32  ;;  %v132_v32 = vld [vmem:[%s3818_s1 + $0x178] sm:$0xff] }
  0x22   :  { %2347 = vmatmul.mubr.msk.f32.gmra.mxu1 %vm150_vm1, %v35_v33  ;;  %2251 = vmatprep.mubr.msk.f32.mxu0 %vm150_vm1, %v101_v34  ;;  %v67_v33 = vld [vmem:[%s3819_s0 + $0x178] sm:$0xff]  ;;  %v133_v34 = vld [vmem:[%s3818_s1 + $0x180] sm:$0xff] }
  0x23   :  { %2349 = vmatprep.mubr.msk.f32.mxu1 %vm150_vm1, %v36_v35  ;;  %v68_v35 = vld [vmem:[%s3819_s0 + $0x180] sm:$0xff] }
  0x25   :  { %2252 = vmatmul.mubr.msk.f32.gmra.mxu0 %vm150_vm1, %v102_v36  ;;  %v134_v36 = vld [vmem:[%s3818_s1 + $0x188] sm:$0xff] }
  0x26   :  { %2350 = vmatmul.mubr.msk.f32.gmra.mxu1 %vm150_vm1, %v37_v37  ;;  %2254 = vmatprep.mubr.msk.f32.mxu0 %vm150_vm1, %v103_v38  ;;  %v69_v37 = vld [vmem:[%s3819_s0 + $0x188] sm:$0xff]  ;;  %v135_v38 = vld [vmem:[%s3818_s1 + $0x190] sm:$0xff] }
  0x27   :  { %2352 = vmatprep.mubr.msk.f32.mxu1 %vm150_vm1, %v38_v39  ;;  %v70_v39 = vld [vmem:[%s3819_s0 + $0x190] sm:$0xff] }
  0x29   :  { %2255 = vmatmul.mubr.msk.f32.gmra.mxu0 %vm150_vm1, %v104_v40  ;;  %v136_v40 = vld [vmem:[%s3818_s1 + $0x198] sm:$0xff] }
  0x2a   :  { %2353 = vmatmul.mubr.msk.f32.gmra.mxu1 %vm150_vm1, %v39_v41  ;;  %2257 = vmatprep.mubr.msk.f32.mxu0 %vm150_vm1, %v105_v42  ;;  %v71_v41 = vld [vmem:[%s3819_s0 + $0x198] sm:$0xff]  ;;  %v137_v42 = vld [vmem:[%s3818_s1 + $0x1a0] sm:$0xff] }
  0x2b   :  { %2355 = vmatprep.mubr.msk.f32.mxu1 %vm150_vm1, %v40_v43  ;;  %v72_v43 = vld [vmem:[%s3819_s0 + $0x1a0] sm:$0xff] }
  0x2d   :  { %2258 = vmatmul.mubr.msk.f32.gmra.mxu0 %vm150_vm1, %v106_v44  ;;  %v138_v44 = vld [vmem:[%s3818_s1 + $0x1a8] sm:$0xff] }
  0x2e   :  { %2356 = vmatmul.mubr.msk.f32.gmra.mxu1 %vm150_vm1, %v41_v45  ;;  %2260 = vmatprep.mubr.msk.f32.mxu0 %vm150_vm1, %v107_v46  ;;  %v73_v45 = vld [vmem:[%s3819_s0 + $0x1a8] sm:$0xff]  ;;  %v139_v46 = vld [vmem:[%s3818_s1 + $0x1b0] sm:$0xff] }
  0x2f   :  { %2358 = vmatprep.mubr.msk.f32.mxu1 %vm150_vm1, %v42_v47  ;;  %v74_v47 = vld [vmem:[%s3819_s0 + $0x1b0] sm:$0xff] }
  0x31   :  { %2261 = vmatmul.mubr.msk.f32.gmra.mxu0 %vm150_vm1, %v108_v48  ;;  %v140_v48 = vld [vmem:[%s3818_s1 + $0x1b8] sm:$0xff] }
  0x32   :  { %2359 = vmatmul.mubr.msk.f32.gmra.mxu1 %vm150_vm1, %v43_v49  ;;  %2263 = vmatprep.mubr.msk.f32.mxu0 %vm150_vm1, %v109_v50  ;;  %v75_v49 = vld [vmem:[%s3819_s0 + $0x1b8] sm:$0xff]  ;;  %v141_v50 = vld [vmem:[%s3818_s1 + $0x1c0] sm:$0xff] }
  0x33   :  { %2361 = vmatprep.mubr.msk.f32.mxu1 %vm150_vm1, %v44_v51  ;;  %v76_v51 = vld [vmem:[%s3819_s0 + $0x1c0] sm:$0xff] }
  0x35   :  { %2264 = vmatmul.mubr.msk.f32.gmra.mxu0 %vm150_vm1, %v110_v52  ;;  %v142_v52 = vld [vmem:[%s3818_s1 + $0x1c8] sm:$0xff] }
  0x36   :  { %2362 = vmatmul.mubr.msk.f32.gmra.mxu1 %vm150_vm1, %v45_v53  ;;  %2266 = vmatprep.mubr.msk.f32.mxu0 %vm150_vm1, %v111_v54  ;;  %v77_v53 = vld [vmem:[%s3819_s0 + $0x1c8] sm:$0xff]  ;;  %v143_v54 = vld [vmem:[%s3818_s1 + $0x1d0] sm:$0xff] }
  0x37   :  { %2364 = vmatprep.mubr.msk.f32.mxu1 %vm150_vm1, %v46_v55  ;;  %v78_v55 = vld [vmem:[%s3819_s0 + $0x1d0] sm:$0xff] }
  0x39   :  { %2267 = vmatmul.mubr.msk.f32.gmra.mxu0 %vm150_vm1, %v112_v56  ;;  %v144_v56 = vld [vmem:[%s3818_s1 + $0x1d8] sm:$0xff] }
  0x3a   :  { %2365 = vmatmul.mubr.msk.f32.gmra.mxu1 %vm150_vm1, %v47_v57  ;;  %2269 = vmatprep.mubr.msk.f32.mxu0 %vm150_vm1, %v113_v58  ;;  %v79_v57 = vld [vmem:[%s3819_s0 + $0x1d8] sm:$0xff]  ;;  %v145_v58 = vld [vmem:[%s3818_s1 + $0x1e0] sm:$0xff] }
  0x3b   :  { %2367 = vmatprep.mubr.msk.f32.mxu1 %vm150_vm1, %v48_v59  ;;  %v80_v59 = vld [vmem:[%s3819_s0 + $0x1e0] sm:$0xff] }
  0x3d   :  { %2270 = vmatmul.mubr.msk.f32.gmra.mxu0 %vm150_vm1, %v114_v60  ;;  %v146_v60 = vld [vmem:[%s3818_s1 + $0x1e8] sm:$0xff] }
  0x3e   :  { %2368 = vmatmul.mubr.msk.f32.gmra.mxu1 %vm150_vm1, %v49_v61  ;;  %2272 = vmatprep.mubr.msk.f32.mxu0 %vm150_vm1, %v115_v62  ;;  %v81_v61 = vld [vmem:[%s3819_s0 + $0x1e8] sm:$0xff]  ;;  %v147_v62 = vld [vmem:[%s3818_s1 + $0x1f0] sm:$0xff] }
  0x3f   :  { %2370 = vmatprep.mubr.msk.f32.mxu1 %vm150_vm1, %v50_v63  ;;  %v82_v63 = vld [vmem:[%s3819_s0 + $0x1f0] sm:$0xff] }
  0x41   :  { %2273 = vmatmul.mubr.msk.f32.gmra.mxu0 %vm150_vm1, %v116_v0  ;;  %v148_v0 = vld [vmem:[%s3818_s1 + $0x1f8] sm:$0xff] }
  0x42   :  { %2371 = vmatmul.mubr.msk.f32.gmra.mxu1 %vm150_vm1, %v51_v1  ;;  %2275 = vmatprep.mubr.msk.f32.mxu0 %vm150_vm1, %v117_v2  ;;  %v83_v1 = vld [vmem:[%s3819_s0 + $0x1f8] sm:$0xff] }
  0x43   :  { %2373 = vmatprep.mubr.msk.f32.mxu1 %vm150_vm1, %v52_v3 }
  0x45   :  { %2276 = vmatmul.mubr.msk.f32.gmra.mxu0 %vm150_vm1, %v118_v4  ;;  %v3233_v4 = vld [vmem:[%s3820_s4] ss:$0 sm:$0xff] }
  0x46   :  { %2374 = vmatmul.mubr.msk.f32.gmra.mxu1 %vm150_vm1, %v53_v5  ;;  %2278 = vmatprep.mubr.msk.f32.mxu0 %vm150_vm1, %v119_v6 }
  0x47   :  { %2376 = vmatprep.mubr.msk.f32.mxu1 %vm150_vm1, %v54_v7 }
  0x49   :  { %2279 = vmatmul.mubr.msk.f32.gmra.mxu0 %vm150_vm1, %v120_v8 }
  0x4a   :  { %2377 = vmatmul.mubr.msk.f32.gmra.mxu1 %vm150_vm1, %v55_v9  ;;  %2281 = vmatprep.mubr.msk.f32.mxu0 %vm150_vm1, %v121_v10 }
  0x4b   :  { %2379 = vmatprep.mubr.msk.f32.mxu1 %vm150_vm1, %v56_v11 }
  0x4d   :  { %2282 = vmatmul.mubr.msk.f32.gmra.mxu0 %vm150_vm1, %v122_v12 }
  0x4e   :  { %2380 = vmatmul.mubr.msk.f32.gmra.mxu1 %vm150_vm1, %v57_v13  ;;  %2284 = vmatprep.mubr.msk.f32.mxu0 %vm150_vm1, %v123_v14 }
  0x4f   :  { %2382 = vmatprep.mubr.msk.f32.mxu1 %vm150_vm1, %v58_v15 }
  0x51   :  { %2285 = vmatmul.mubr.msk.f32.gmra.mxu0 %vm150_vm1, %v124_v16 }
  0x52   :  { %2383 = vmatmul.mubr.msk.f32.gmra.mxu1 %vm150_vm1, %v59_v17  ;;  %2287 = vmatprep.mubr.msk.f32.mxu0 %vm150_vm1, %v125_v18 }
  0x53   :  { %2385 = vmatprep.mubr.msk.f32.mxu1 %vm150_vm1, %v60_v19 }
  0x55   :  { %2288 = vmatmul.mubr.msk.f32.gmra.mxu0 %vm150_vm1, %v126_v20 }
  0x56   :  { %2386 = vmatmul.mubr.msk.f32.gmra.mxu1 %vm150_vm1, %v61_v21  ;;  %2290 = vmatprep.mubr.msk.f32.mxu0 %vm150_vm1, %v127_v22 }
  0x57   :  { %2388 = vmatprep.mubr.msk.f32.mxu1 %vm150_vm1, %v62_v23 }
  0x59   :  { %2291 = vmatmul.mubr.msk.f32.gmra.mxu0 %vm150_vm1, %v128_v24 }
  0x5a   :  { %2389 = vmatmul.mubr.msk.f32.gmra.mxu1 %vm150_vm1, %v63_v25  ;;  %2293 = vmatprep.mubr.msk.f32.mxu0 %vm150_vm1, %v129_v26 }
  0x5b   :  { %2391 = vmatprep.mubr.msk.f32.mxu1 %vm150_vm1, %v64_v27 }
  0x5d   :  { %2294 = vmatmul.mubr.msk.f32.gmra.mxu0 %vm150_vm1, %v130_v28 }
  0x5e   :  { %2392 = vmatmul.mubr.msk.f32.gmra.mxu1 %vm150_vm1, %v65_v29  ;;  %2296 = vmatprep.mubr.msk.f32.mxu0 %vm150_vm1, %v131_v30 }
  0x5f   :  { %2394 = vmatprep.mubr.msk.f32.mxu1 %vm150_vm1, %v66_v31 }
  0x61   :  { %2297 = vmatmul.mubr.msk.f32.gmra.mxu0 %vm150_vm1, %v132_v32 }
  0x62   :  { %2395 = vmatmul.mubr.msk.f32.gmra.mxu1 %vm150_vm1, %v67_v33  ;;  %2299 = vmatprep.mubr.msk.f32.mxu0 %vm150_vm1, %v133_v34 }
  0x63   :  { %2397 = vmatprep.mubr.msk.f32.mxu1 %vm150_vm1, %v68_v35 }
  0x65   :  { %2300 = vmatmul.mubr.msk.f32.gmra.mxu0 %vm150_vm1, %v134_v36 }
  0x66   :  { %2398 = vmatmul.mubr.msk.f32.gmra.mxu1 %vm150_vm1, %v69_v37  ;;  %2302 = vmatprep.mubr.msk.f32.mxu0 %vm150_vm1, %v135_v38 }
  0x67   :  { %2400 = vmatprep.mubr.msk.f32.mxu1 %vm150_vm1, %v70_v39 }
  0x69   :  { %2303 = vmatmul.mubr.msk.f32.gmra.mxu0 %vm150_vm1, %v136_v40 }
  0x6a   :  { %2401 = vmatmul.mubr.msk.f32.gmra.mxu1 %vm150_vm1, %v71_v41  ;;  %2305 = vmatprep.mubr.msk.f32.mxu0 %vm150_vm1, %v137_v42 }
  0x6b   :  { %2403 = vmatprep.mubr.msk.f32.mxu1 %vm150_vm1, %v72_v43 }
  0x6d   :  { %2306 = vmatmul.mubr.msk.f32.gmra.mxu0 %vm150_vm1, %v138_v44 }
  0x6e   :  { %2404 = vmatmul.mubr.msk.f32.gmra.mxu1 %vm150_vm1, %v73_v45  ;;  %2308 = vmatprep.mubr.msk.f32.mxu0 %vm150_vm1, %v139_v46 }
  0x6f   :  { %2406 = vmatprep.mubr.msk.f32.mxu1 %vm150_vm1, %v74_v47 }
  0x71   :  { %2309 = vmatmul.mubr.msk.f32.gmra.mxu0 %vm150_vm1, %v140_v48 }
  0x72   :  { %2407 = vmatmul.mubr.msk.f32.gmra.mxu1 %vm150_vm1, %v75_v49  ;;  %2311 = vmatprep.mubr.msk.f32.mxu0 %vm150_vm1, %v141_v50 }
  0x73   :  { %2409 = vmatprep.mubr.msk.f32.mxu1 %vm150_vm1, %v76_v51 }
  0x75   :  { %2312 = vmatmul.mubr.msk.f32.gmra.mxu0 %vm150_vm1, %v142_v52 }
  0x76   :  { %2410 = vmatmul.mubr.msk.f32.gmra.mxu1 %vm150_vm1, %v77_v53  ;;  %2314 = vmatprep.mubr.msk.f32.mxu0 %vm150_vm1, %v143_v54 }
  0x77   :  { %2412 = vmatprep.mubr.msk.f32.mxu1 %vm150_vm1, %v78_v55 }
  0x79   :  { %2315 = vmatmul.mubr.msk.f32.gmra.mxu0 %vm150_vm1, %v144_v56 }
  0x7a   :  { %2413 = vmatmul.mubr.msk.f32.gmra.mxu1 %vm150_vm1, %v79_v57  ;;  %2317 = vmatprep.mubr.msk.f32.mxu0 %vm150_vm1, %v145_v58 }
  0x7b   :  { %2415 = vmatprep.mubr.msk.f32.mxu1 %vm150_vm1, %v80_v59 }
  0x7d   :  { %2318 = vmatmul.mubr.msk.f32.gmra.mxu0 %vm150_vm1, %v146_v60 }
  0x7e   :  { %2416 = vmatmul.mubr.msk.f32.gmra.mxu1 %vm150_vm1, %v81_v61  ;;  %2320 = vmatprep.mubr.msk.f32.mxu0 %vm150_vm1, %v147_v62 }
  0x7f   :  { %2418 = vmatprep.mubr.msk.f32.mxu1 %vm150_vm1, %v82_v63 }
  0x81   :  { %2321 = vmatmul.mubr.msk.f32.gmra.mxu0 %vm150_vm1, %v148_v0 }
  0x82   :  { %2419 = vmatmul.mubr.msk.f32.gmra.mxu1 %vm150_vm1, %v83_v1 }
  0xc5   :  { %v2229_v2 = vpop.f32.mrf.mxu0 }
  0xc6   :  { %v2327_v3 = vpop.f32.mrf.mxu1 }
  0xc7   :  { %v999_v5 = vadd.f32 %v2327_v3, %v2229_v2  ;;  %v413_v6 = vpop.f32.mrf.mxu0 }
  0xc8   :  { %v993_v7 = vpop.f32.mrf.mxu1 }
  0xc9   :  { %v3236_v8 = vadd.f32 %v3233_v4, %v999_v5  ;;  %v994_v9 = vadd.f32 %v993_v7, %v413_v6  ;;  %v2232_v10 = vpop.f32.mrf.mxu0 }
  0xca   :  { %v2330_v11 = vpop.f32.mrf.mxu1 }
  0xcb   :  { %v2032_v12 = vmul.f32 -1.442695, %v3236_v8  ;;  %v3240_v13 = vadd.f32 %v3233_v4, %v994_v9  ;;  %v1009_v14 = vadd.f32 %v2330_v11, %v2232_v10  ;;  %v423_v15 = vpop.f32.mrf.mxu0 }
  0xcc   :  { %v1003_v16 = vpop.f32.mrf.mxu1 }
  0xcd   :  { %2421 = vpow2.f32 %v2032_v12  ;;  %v2031_v17 = vmul.f32 -1.442695, %v3240_v13  ;;  %v3244_v18 = vadd.f32 %v3233_v4, %v1009_v14  ;;  %v1004_v19 = vadd.f32 %v1003_v16, %v423_v15  ;;  %v2235_v20 = vpop.f32.mrf.mxu0 }
  0xce   :  { %v2333_v21 = vpop.f32.mrf.mxu1 }
  0xcf   :  { %2423 = vpow2.f32 %v2031_v17  ;;  %v2034_v22 = vmul.f32 -1.442695, %v3244_v18  ;;  %v3248_v23 = vadd.f32 %v3233_v4, %v1004_v19  ;;  %v1019_v24 = vadd.f32 %v2333_v21, %v2235_v20  ;;  %v433_v25 = vpop.f32.mrf.mxu0 }
  0xd0   :  { %v1013_v26 = vpop.f32.mrf.mxu1 }
  0xd1   :  { %2425 = vpow2.f32 %v2034_v22  ;;  %v2033_v27 = vmul.f32 -1.442695, %v3248_v23  ;;  %v3252_v28 = vadd.f32 %v3233_v4, %v1019_v24  ;;  %v1014_v29 = vadd.f32 %v1013_v26, %v433_v25  ;;  %v2238_v30 = vpop.f32.mrf.mxu0 }
  0xd2   :  { %v2336_v31 = vpop.f32.mrf.mxu1 }
  0xd3   :  { %2427 = vpow2.f32 %v2033_v27  ;;  %v2036_v32 = vmul.f32 -1.442695, %v3252_v28  ;;  %v3256_v33 = vadd.f32 %v3233_v4, %v1014_v29  ;;  %v1029_v34 = vadd.f32 %v2336_v31, %v2238_v30  ;;  %v443_v35 = vpop.f32.mrf.mxu0 }
  0xd4   :  { %v1023_v36 = vpop.f32.mrf.mxu1 }
  0xd5   :  { %2429 = vpow2.f32 %v2036_v32  ;;  %v2035_v37 = vmul.f32 -1.442695, %v3256_v33  ;;  %v3260_v38 = vadd.f32 %v3233_v4, %v1029_v34  ;;  %v1024_v39 = vadd.f32 %v1023_v36, %v443_v35  ;;  %v2241_v40 = vpop.f32.mrf.mxu0 }
  0xd6   :  { %v2339_v41 = vpop.f32.mrf.mxu1 }
  0xd7   :  { %2431 = vpow2.f32 %v2035_v37  ;;  %v2038_v42 = vmul.f32 -1.442695, %v3260_v38  ;;  %v3264_v43 = vadd.f32 %v3233_v4, %v1024_v39  ;;  %v1039_v44 = vadd.f32 %v2339_v41, %v2241_v40  ;;  %v453_v45 = vpop.f32.mrf.mxu0 }
  0xd8   :  { %v1033_v46 = vpop.f32.mrf.mxu1 }
  0xd9   :  { %2433 = vpow2.f32 %v2038_v42  ;;  %v2037_v47 = vmul.f32 -1.442695, %v3264_v43  ;;  %v3268_v48 = vadd.f32 %v3233_v4, %v1039_v44  ;;  %v1034_v49 = vadd.f32 %v1033_v46, %v453_v45  ;;  %v2244_v51 = vpop.f32.mrf.mxu0 }
  0xda   :  { %v2422_v50 = vpop.eup %2421  ;;  %v2342_v52 = vpop.f32.mrf.mxu1 }
  0xdb   :  { %v1576_v53 = vadd.f32 1.0, %v2422_v50  ;;  %2435 = vpow2.f32 %v2037_v47  ;;  %v2040_v54 = vmul.f32 -1.442695, %v3268_v48  ;;  %v3272_v55 = vadd.f32 %v3233_v4, %v1034_v49  ;;  %v463_v58 = vpop.f32.mrf.mxu0 }
  0xdc   :  { %v2424_v56 = vpop.eup %2423  ;;  %v1049_v57 = vadd.f32 %v2342_v52, %v2244_v51  ;;  %v1043_v59 = vpop.f32.mrf.mxu1 }
  0xdd   :  { %2437 = vrcp.f32 %v1576_v53  ;;  %v1575_v60 = vadd.f32 1.0, %v2424_v56  ;;  %v2039_v61 = vmul.f32 -1.442695, %v3272_v55  ;;  %v1044_v62 = vadd.f32 %v1043_v59, %v463_v58  ;;  %v2247_v1 = vpop.f32.mrf.mxu0 }
  0xde   :  { %v2426_v63 = vpop.eup %2425  ;;  %2439 = vpow2.f32 %v2040_v54  ;;  %v3276_v0 = vadd.f32 %v3233_v4, %v1049_v57  ;;  %v2345_v2 = vpop.f32.mrf.mxu1 }
  0xdf   :  { %2441 = vrcp.f32 %v1575_v60  ;;  %v1578_v3 = vadd.f32 1.0, %v2426_v63  ;;  %v3279_v5 = vadd.f32 %v3233_v4, %v1044_v62  ;;  %v1059_v6 = vadd.f32 %v2345_v2, %v2247_v1  ;;  %v473_v10 = vpop.f32.mrf.mxu0 }
  0xe0   :  { %v2428_v7 = vpop.eup %2427  ;;  %2443 = vpow2.f32 %v2039_v61  ;;  %v2042_v9 = vmul.f32 -1.442695, %v3276_v0  ;;  %v1053_v11 = vpop.f32.mrf.mxu1 }
  0xe1   :  { %2445 = vrcp.f32 %v1578_v3  ;;  %v1577_v12 = vadd.f32 1.0, %v2428_v7  ;;  %v2041_v14 = vmul.f32 -1.442695, %v3279_v5  ;;  %v3284_v15 = vadd.f32 %v3233_v4, %v1059_v6  ;;  %v2250_v19 = vpop.f32.mrf.mxu0 }
  0xe2   :  { %v2430_v16 = vpop.eup %2429  ;;  %2447 = vpow2.f32 %v2042_v9  ;;  %v1054_v17 = vadd.f32 %v1053_v11, %v473_v10  ;;  %v2348_v20 = vpop.f32.mrf.mxu1 }
  0xe3   :  { %2449 = vrcp.f32 %v1577_v12  ;;  %v1580_v21 = vadd.f32 1.0, %v2430_v16  ;;  %v2044_v22 = vmul.f32 -1.442695, %v3284_v15  ;;  %v1069_v24 = vadd.f32 %v2348_v20, %v2250_v19  ;;  %v483_v27 = vpop.f32.mrf.mxu0 }
  0xe4   :  { %v2432_v25 = vpop.eup %2431  ;;  %2451 = vpow2.f32 %v2041_v14  ;;  %v3288_v26 = vadd.f32 %v3233_v4, %v1054_v17  ;;  %v1063_v29 = vpop.f32.mrf.mxu1 }
  0xe5   :  { %2453 = vrcp.f32 %v1580_v21  ;;  %v1579_v30 = vadd.f32 1.0, %v2432_v25  ;;  %v3291_v31 = vadd.f32 %v3233_v4, %v1069_v24  ;;  %v1064_v32 = vadd.f32 %v1063_v29, %v483_v27  ;;  %v2253_v36 = vpop.f32.mrf.mxu0 }
  0xe6   :  { %v2434_v34 = vpop.eup %2433  ;;  %2455 = vpow2.f32 %v2044_v22  ;;  %v2043_v35 = vmul.f32 -1.442695, %v3288_v26  ;;  %v2351_v37 = vpop.f32.mrf.mxu1 }
  0xe7   :  { %2457 = vrcp.f32 %v1579_v30  ;;  %v1582_v39 = vadd.f32 1.0, %v2434_v34  ;;  %v2046_v40 = vmul.f32 -1.442695, %v3291_v31  ;;  %v3296_v41 = vadd.f32 %v3233_v4, %v1064_v32  ;;  %v493_v45 = vpop.f32.mrf.mxu0 }
  0xe8   :  { %v2436_v42 = vpop.eup %2435  ;;  %2459 = vpow2.f32 %v2043_v35  ;;  %v1079_v44 = vadd.f32 %v2351_v37, %v2253_v36  ;;  %v1073_v46 = vpop.f32.mrf.mxu1 }
  0xe9   :  { %2461 = vrcp.f32 %v1582_v39  ;;  %v1581_v47 = vadd.f32 1.0, %v2436_v42  ;;  %v2045_v49 = vmul.f32 -1.442695, %v3296_v41  ;;  %v1074_v50 = vadd.f32 %v1073_v46, %v493_v45  ;;  %v2256_v53 = vpop.f32.mrf.mxu0 }
  0xea   :  { %v2438_v51 = vpop.eup %2437  ;;  %2463 = vpow2.f32 %v2046_v40  ;;  %v3300_v52 = vadd.f32 %v3233_v4, %v1079_v44  ;;  %v2354_v54 = vpop.f32.mrf.mxu1 }
  0xeb   :  { %v2440_v56 = vpop.eup %2439  ;;  %v1768_v57 = vmul.f32 %v2438_v51, %v3236_v8  ;;  %2465 = vrcp.f32 %v1581_v47  ;;  %v3304_v58 = vadd.f32 %v3233_v4, %v1074_v50  ;;  %v1089_v59 = vadd.f32 %v2354_v54, %v2256_v53  ;;  %v503_v63 = vpop.f32.mrf.mxu0 }
  0xec   :  { %v2442_v60 = vpop.eup %2441  ;;  %v1584_v61 = vadd.f32 1.0, %v2440_v56  ;;  %2467 = vpow2.f32 %v2045_v49  ;;  %v2048_v62 = vmul.f32 -1.442695, %v3300_v52  ;;  %v1083_v1 = vpop.f32.mrf.mxu1 }
  0xed   :  { %v2444_v2 = vpop.eup %2443  ;;  %1833 = vst.msk [vmem:[%s3821_s5 + $0x8] sm:$0xff] %vm1831_vm2, %v1768_v57  ;;  %v1767_v8 = vmul.f32 %v2442_v60, %v3240_v13  ;;  %v2047_v3 = vmul.f32 -1.442695, %v3304_v58  ;;  %v3314_v6 = vadd.f32 %v3233_v4, %v1089_v59  ;;  %v1084_v7 = vadd.f32 %v1083_v1, %v503_v63  ;;  %v2259_v11 = vpop.f32.mrf.mxu0 }
  0xee   :  { %v2446_v9 = vpop.eup %2445  ;;  %2469 = vrcp.f32 %v1584_v61  ;;  %v1583_v10 = vadd.f32 1.0, %v2444_v2  ;;  %v2357_v12 = vpop.f32.mrf.mxu1 }
  0xef   :  { %v2448_v14 = vpop.eup %2447  ;;  %1832 = vst.msk [vmem:[%s3821_s5] sm:$0xff] %vm1831_vm2, %v1767_v8  ;;  %v1770_v16 = vmul.f32 %v2446_v9, %v3244_v18  ;;  %2471 = vpow2.f32 %v2048_v62  ;;  %v2050_v13 = vmul.f32 -1.442695, %v3314_v6  ;;  %v3323_v17 = vadd.f32 %v3233_v4, %v1084_v7  ;;  %v513_v22 = vpop.f32.mrf.mxu0 }
  0xf0   :  { %v2450_v19 = vpop.eup %2449  ;;  %2473 = vrcp.f32 %v1583_v10  ;;  %v1586_v20 = vadd.f32 1.0, %v2448_v14  ;;  %v1099_v21 = vadd.f32 %v2357_v12, %v2259_v11  ;;  %v1093_v24 = vpop.f32.mrf.mxu1 }
  0xf1   :  { %v2452_v25 = vpop.eup %2451  ;;  %1835 = vst.msk [vmem:[%s3821_s5 + $0x18] sm:$0xff] %vm1831_vm2, %v1770_v16  ;;  %v1769_v18 = vmul.f32 %v2450_v19, %v3248_v23  ;;  %2475 = vpow2.f32 %v2047_v3  ;;  %v2049_v27 = vmul.f32 -1.442695, %v3323_v17  ;;  %v1094_v29 = vadd.f32 %v1093_v24, %v513_v22  ;;  %v2262_v35 = vpop.f32.mrf.mxu0 }
  0xf2   :  { %v2454_v30 = vpop.eup %2453  ;;  %2477 = vrcp.f32 %v1586_v20  ;;  %v1585_v32 = vadd.f32 1.0, %v2452_v25  ;;  %v3332_v34 = vadd.f32 %v3233_v4, %v1099_v21  ;;  %v2360_v36 = vpop.f32.mrf.mxu1 }
  0xf3   :  { %v2456_v37 = vpop.eup %2455  ;;  %1834 = vst.msk [vmem:[%s3821_s5 + $0x10] sm:$0xff] %vm1831_vm2, %v1769_v18  ;;  %v1772_v23 = vmul.f32 %v2454_v30, %v3252_v28  ;;  %2479 = vpow2.f32 %v2050_v13  ;;  %v3340_v39 = vadd.f32 %v3233_v4, %v1094_v29  ;;  %v1109_v40 = vadd.f32 %v2360_v36, %v2262_v35  ;;  %v523_v46 = vpop.f32.mrf.mxu0 }
  0xf4   :  { %v2458_v42 = vpop.eup %2457  ;;  %2481 = vrcp.f32 %v1585_v32  ;;  %v1588_v44 = vadd.f32 1.0, %v2456_v37  ;;  %v2052_v45 = vmul.f32 -1.442695, %v3332_v34  ;;  %v1103_v47 = vpop.f32.mrf.mxu1 }
  0xf5   :  { %v2460_v49 = vpop.eup %2459  ;;  %1837 = vst.msk [vmem:[%s3821_s5 + $0x28] sm:$0xff] %vm1831_vm2, %v1772_v23  ;;  %v1771_v28 = vmul.f32 %v2458_v42, %v3256_v33  ;;  %2483 = vpow2.f32 %v2049_v27  ;;  %v2051_v50 = vmul.f32 -1.442695, %v3340_v39  ;;  %v3350_v51 = vadd.f32 %v3233_v4, %v1109_v40  ;;  %v2265_v57 = vpop.f32.mrf.mxu0 }
  0xf6   :  { %v2462_v53 = vpop.eup %2461  ;;  %2485 = vrcp.f32 %v1588_v44  ;;  %v1587_v54 = vadd.f32 1.0, %v2460_v49  ;;  %v1104_v56 = vadd.f32 %v1103_v47, %v523_v46  ;;  %v2363_v59 = vpop.f32.mrf.mxu1 }
  0xf7   :  { %v2464_v60 = vpop.eup %2463  ;;  %1836 = vst.msk [vmem:[%s3821_s5 + $0x20] sm:$0xff] %vm1831_vm2, %v1771_v28  ;;  %v1774_v33 = vmul.f32 %v2462_v53, %v3260_v38  ;;  %2487 = vpow2.f32 %v2052_v45  ;;  %v2054_v61 = vmul.f32 -1.442695, %v3350_v51  ;;  %v1119_v62 = vadd.f32 %v2363_v59, %v2265_v57  ;;  %v533_v8 = vpop.f32.mrf.mxu0 }
  0xf8   :  { %v2466_v63 = vpop.eup %2465  ;;  %2489 = vrcp.f32 %v1587_v54  ;;  %v1590_v1 = vadd.f32 1.0, %v2464_v60  ;;  %v3359_v2 = vadd.f32 %v3233_v4, %v1104_v56  ;;  %v1113_v3 = vpop.f32.mrf.mxu1 }
  0xf9   :  { %v2468_v7 = vpop.eup %2467  ;;  %1839 = vst.msk [vmem:[%s3821_s5 + $0x38] sm:$0xff] %vm1831_vm2, %v1774_v33  ;;  %v1773_v38 = vmul.f32 %v2466_v63, %v3264_v43  ;;  %2491 = vpow2.f32 %v2051_v50  ;;  %v3367_v9 = vadd.f32 %v3233_v4, %v1119_v62  ;;  %v1114_v10 = vadd.f32 %v1113_v3, %v533_v8  ;;  %v2268_v14 = vpop.f32.mrf.mxu0 }
  0xfa   :  { %2493 = vrcp.f32 %v1590_v1  ;;  %v1589_v11 = vadd.f32 1.0, %v2468_v7  ;;  %v2053_v12 = vmul.f32 -1.442695, %v3359_v2  ;;  %v2366_v16 = vpop.f32.mrf.mxu1 }
  0xfb   :  { %v2470_v13 = vpop.eup %2469  ;;  %1838 = vst.msk [vmem:[%s3821_s5 + $0x30] sm:$0xff] %vm1831_vm2, %v1773_v38  ;;  %2495 = vpow2.f32 %v2054_v61  ;;  %v2056_v43 = vmul.f32 -1.442695, %v3367_v9  ;;  %v3376_v19 = vadd.f32 %v3233_v4, %v1114_v10  ;;  %v1129_v20 = vadd.f32 %v2366_v16, %v2268_v14  ;;  %v543_v24 = vpop.f32.mrf.mxu0 }
  0xfc   :  { %v2472_v21 = vpop.eup %2471  ;;  %v1776_v22 = vmul.f32 %v2470_v13, %v3268_v48  ;;  %2497 = vrcp.f32 %v1589_v11  ;;  %v1123_v25 = vpop.f32.mrf.mxu1 }
  0xfd   :  { %v2474_v18 = vpop.eup %2473  ;;  %v1592_v27 = vadd.f32 1.0, %v2472_v21  ;;  %2499 = vpow2.f32 %v2053_v12  ;;  %v2055_v29 = vmul.f32 -1.442695, %v3376_v19  ;;  %v3381_v30 = vadd.f32 %v3233_v4, %v1129_v20  ;;  %v2271_v36 = vpop.f32.mrf.mxu0 }
  0xfe   :  { %v2476_v32 = vpop.eup %2475  ;;  %1841 = vst.msk [vmem:[%s3821_s5 + $0x48] sm:$0xff] %vm1831_vm2, %v1776_v22  ;;  %v1775_v35 = vmul.f32 %v2474_v18, %v3272_v55  ;;  %2501 = vpow2.f32 %v2056_v43  ;;  %v1124_v48 = vadd.f32 %v1123_v25, %v543_v24  ;;  %v2369_v37 = vpop.f32.mrf.mxu1 }
  0xff   :  { %v2478_v23 = vpop.eup %2477  ;;  %2503 = vrcp.f32 %v1592_v27  ;;  %v1591_v40 = vadd.f32 1.0, %v2476_v32  ;;  %v2058_v42 = vmul.f32 -1.442695, %v3381_v30  ;;  %v1139_v44 = vadd.f32 %v2369_v37, %v2271_v36  ;;  %v553_v47 = vpop.f32.mrf.mxu0 }
 0x100   :  { %v2480_v45 = vpop.eup %2479  ;;  %1840 = vst.msk [vmem:[%s3821_s5 + $0x40] sm:$0xff] %vm1831_vm2, %v1775_v35  ;;  %v1778_v46 = vmul.f32 %v2478_v23, %v3276_v0  ;;  %2505 = vpow2.f32 %v2055_v29  ;;  %v3395_v55 = vadd.f32 %v3233_v4, %v1124_v48  ;;  %v1133_v49 = vpop.f32.mrf.mxu1 }
 0x101   :  { %v2482_v28 = vpop.eup %2481  ;;  %2507 = vrcp.f32 %v1591_v40  ;;  %v1594_v50 = vadd.f32 1.0, %v2480_v45  ;;  %v3398_v53 = vadd.f32 %v3233_v4, %v1139_v44  ;;  %v1134_v54 = vadd.f32 %v1133_v49, %v553_v47  ;;  %v2274_v59 = vpop.f32.mrf.mxu0 }
 0x102   :  { %v2484_v56 = vpop.eup %2483  ;;  %1843 = vst.msk [vmem:[%s3821_s5 + $0x58] sm:$0xff] %vm1831_vm2, %v1778_v46  ;;  %v1777_v0 = vmul.f32 %v2482_v28, %v3279_v5  ;;  %2509 = vpow2.f32 %v2058_v42  ;;  %v2057_v57 = vmul.f32 -1.442695, %v3395_v55  ;;  %v2372_v60 = vpop.f32.mrf.mxu1 }
 0x103   :  { %v2486_v33 = vpop.eup %2485  ;;  %2511 = vrcp.f32 %v1594_v50  ;;  %v1593_v61 = vadd.f32 1.0, %v2484_v56  ;;  %v2060_v62 = vmul.f32 -1.442695, %v3398_v53  ;;  %v3408_v63 = vadd.f32 %v3233_v4, %v1134_v54  ;;  %v563_v3 = vpop.f32.mrf.mxu0 }
 0x104   :  { %v2488_v1 = vpop.eup %2487  ;;  %1842 = vst.msk [vmem:[%s3821_s5 + $0x50] sm:$0xff] %vm1831_vm2, %v1777_v0  ;;  %v1780_v5 = vmul.f32 %v2486_v33, %v3284_v15  ;;  %2513 = vpow2.f32 %v2057_v57  ;;  %v1149_v8 = vadd.f32 %v2372_v60, %v2274_v59  ;;  %v1143_v7 = vpop.f32.mrf.mxu1 }
 0x105   :  { %v2490_v38 = vpop.eup %2489  ;;  %2515 = vrcp.f32 %v1593_v61  ;;  %v1596_v10 = vadd.f32 1.0, %v2488_v1  ;;  %v2059_v11 = vmul.f32 -1.442695, %v3408_v63  ;;  %v1144_v12 = vadd.f32 %v1143_v7, %v563_v3  ;;  %v2277_v13 = vpop.f32.mrf.mxu0 }
 0x106   :  { %v2492_v14 = vpop.eup %2491  ;;  %1845 = vst.msk [vmem:[%s3821_s5 + $0x68] sm:$0xff] %vm1831_vm2, %v1780_v5  ;;  %v1779_v16 = vmul.f32 %v2490_v38, %v3288_v26  ;;  %2517 = vpow2.f32 %v2060_v62  ;;  %v3422_v15 = vadd.f32 %v3233_v4, %v1149_v8  ;;  %v2375_v43 = vpop.f32.mrf.mxu1 }
 0x107   :  { %v2494_v20 = vpop.eup %2493  ;;  %2519 = vrcp.f32 %v1596_v10  ;;  %v1595_v21 = vadd.f32 1.0, %v2492_v14  ;;  %v3425_v22 = vadd.f32 %v3233_v4, %v1144_v12  ;;  %v1159_v24 = vadd.f32 %v2375_v43, %v2277_v13  ;;  %v573_v27 = vpop.f32.mrf.mxu0 }
 0x108   :  { %v2496_v25 = vpop.eup %2495  ;;  %1844 = vst.msk [vmem:[%s3821_s5 + $0x60] sm:$0xff] %vm1831_vm2, %v1779_v16  ;;  %v1782_v26 = vmul.f32 %v2494_v20, %v3291_v31  ;;  %2521 = vpow2.f32 %v2059_v11  ;;  %v2062_v18 = vmul.f32 -1.442695, %v3422_v15  ;;  %v1153_v29 = vpop.f32.mrf.mxu1 }
 0x109   :  { %v2498_v32 = vpop.eup %2497  ;;  %2523 = vrcp.f32 %v1595_v21  ;;  %v1598_v35 = vadd.f32 1.0, %v2496_v25  ;;  %v2061_v48 = vmul.f32 -1.442695, %v3425_v22  ;;  %v3435_v36 = vadd.f32 %v3233_v4, %v1159_v24  ;;  %v2280_v40 = vpop.f32.mrf.mxu0 }
 0x10a   :  { %v2500_v37 = vpop.eup %2499  ;;  %1847 = vst.msk [vmem:[%s3821_s5 + $0x78] sm:$0xff] %vm1831_vm2, %v1782_v26  ;;  %v1781_v31 = vmul.f32 %v2498_v32, %v3296_v41  ;;  %2525 = vpow2.f32 %v2062_v18  ;;  %v1154_v23 = vadd.f32 %v1153_v29, %v573_v27  ;;  %v2378_v42 = vpop.f32.mrf.mxu1 }
 0x10b   :  { %v2502_v44 = vpop.eup %2501  ;;  %2527 = vrcp.f32 %v1598_v35  ;;  %v1597_v45 = vadd.f32 1.0, %v2500_v37  ;;  %v2064_v46 = vmul.f32 -1.442695, %v3435_v36  ;;  %v1169_v47 = vadd.f32 %v2378_v42, %v2280_v40  ;;  %v583_v50 = vpop.f32.mrf.mxu0 }
 0x10c   :  { %v2504_v49 = vpop.eup %2503  ;;  %1846 = vst.msk [vmem:[%s3821_s5 + $0x70] sm:$0xff] %vm1831_vm2, %v1781_v31  ;;  %v1600_v28 = vadd.f32 1.0, %v2502_v44  ;;  %2529 = vpow2.f32 %v2061_v48  ;;  %v3448_v41 = vadd.f32 %v3233_v4, %v1154_v23  ;;  %v1163_v54 = vpop.f32.mrf.mxu1 }
 0x10d   :  { %v2506_v56 = vpop.eup %2505  ;;  %v1784_v0 = vmul.f32 %v2504_v49, %v3300_v52  ;;  %2531 = vrcp.f32 %v1597_v45  ;;  %v3452_v57 = vadd.f32 %v3233_v4, %v1169_v47  ;;  %v1164_v59 = vadd.f32 %v1163_v54, %v583_v50  ;;  %v2283_v62 = vpop.f32.mrf.mxu0 }
 0x10e   :  { %v2508_v60 = vpop.eup %2507  ;;  %2533 = vrcp.f32 %v1600_v28  ;;  %v1599_v33 = vadd.f32 1.0, %v2506_v56  ;;  %v2063_v61 = vmul.f32 -1.442695, %v3448_v41  ;;  %v2381_v1 = vpop.f32.mrf.mxu1 }
 0x10f   :  { %v2510_v5 = vpop.eup %2509  ;;  %1849 = vst.msk [vmem:[%s3821_s5 + $0x88] sm:$0xff] %vm1831_vm2, %v1784_v0  ;;  %v1783_v52 = vmul.f32 %v2508_v60, %v3304_v58  ;;  %2535 = vpow2.f32 %v2064_v46  ;;  %v2066_v8 = vmul.f32 -1.442695, %v3452_v57  ;;  %v3462_v3 = vadd.f32 %v3233_v4, %v1164_v59  ;;  %v593_v11 = vpop.f32.mrf.mxu0 }
 0x110   :  { %v2512_v7 = vpop.eup %2511  ;;  %2537 = vrcp.f32 %v1599_v33  ;;  %v1602_v38 = vadd.f32 1.0, %v2510_v5  ;;  %v1179_v10 = vadd.f32 %v2381_v1, %v2283_v62  ;;  %v1173_v12 = vpop.f32.mrf.mxu1 }
 0x111   :  { %v2514_v14 = vpop.eup %2513  ;;  %1848 = vst.msk [vmem:[%s3821_s5 + $0x80] sm:$0xff] %vm1831_vm2, %v1783_v52  ;;  %v1786_v58 = vmul.f32 %v2512_v7, %v3314_v6  ;;  %2539 = vpow2.f32 %v2063_v61  ;;  %v2065_v16 = vmul.f32 -1.442695, %v3462_v3  ;;  %v1174_v13 = vadd.f32 %v1173_v12, %v593_v11  ;;  %v2286_v24 = vpop.f32.mrf.mxu0 }
 0x112   :  { %v2516_v43 = vpop.eup %2515  ;;  %2541 = vrcp.f32 %v1602_v38  ;;  %v1601_v20 = vadd.f32 1.0, %v2514_v14  ;;  %v3471_v21 = vadd.f32 %v3233_v4, %v1179_v10  ;;  %v2384_v25 = vpop.f32.mrf.mxu1 }
 0x113   :  { %v2518_v26 = vpop.eup %2517  ;;  %1851 = vst.msk [vmem:[%s3821_s5 + $0x98] sm:$0xff] %vm1831_vm2, %v1786_v58  ;;  %v1785_v6 = vmul.f32 %v2516_v43, %v3323_v17  ;;  %2543 = vpow2.f32 %v2066_v8  ;;  %v3479_v18 = vadd.f32 %v3233_v4, %v1174_v13  ;;  %v1189_v27 = vadd.f32 %v2384_v25, %v2286_v24  ;;  %v603_v48 = vpop.f32.mrf.mxu0 }
 0x114   :  { %v2520_v29 = vpop.eup %2519  ;;  %2545 = vrcp.f32 %v1601_v20  ;;  %v1604_v32 = vadd.f32 1.0, %v2518_v26  ;;  %v2068_v35 = vmul.f32 -1.442695, %v3471_v21  ;;  %v1183_v37 = vpop.f32.mrf.mxu1 }
 0x115   :  { %v2522_v31 = vpop.eup %2521  ;;  %1850 = vst.msk [vmem:[%s3821_s5 + $0x90] sm:$0xff] %vm1831_vm2, %v1785_v6  ;;  %v1788_v17 = vmul.f32 %v2520_v29, %v3332_v34  ;;  %2547 = vpow2.f32 %v2065_v16  ;;  %v2067_v23 = vmul.f32 -1.442695, %v3479_v18  ;;  %v3489_v40 = vadd.f32 %v3233_v4, %v1189_v27  ;;  %v2289_v46 = vpop.f32.mrf.mxu0 }
 0x116   :  { %v2524_v42 = vpop.eup %2523  ;;  %2549 = vrcp.f32 %v1604_v32  ;;  %v1603_v44 = vadd.f32 1.0, %v2522_v31  ;;  %v1184_v45 = vadd.f32 %v1183_v37, %v603_v48  ;;  %v2387_v47 = vpop.f32.mrf.mxu1 }
 0x117   :  { %v2526_v49 = vpop.eup %2525  ;;  %1853 = vst.msk [vmem:[%s3821_s5 + $0xa8] sm:$0xff] %vm1831_vm2, %v1788_v17  ;;  %v1787_v34 = vmul.f32 %v2524_v42, %v3340_v39  ;;  %2551 = vpow2.f32 %v2068_v35  ;;  %v2070_v28 = vmul.f32 -1.442695, %v3489_v40  ;;  %v1199_v50 = vadd.f32 %v2387_v47, %v2289_v46  ;;  %v613_v59 = vpop.f32.mrf.mxu0 }
 0x118   :  { %v2528_v54 = vpop.eup %2527  ;;  %2553 = vrcp.f32 %v1603_v44  ;;  %v1606_v56 = vadd.f32 1.0, %v2526_v49  ;;  %v3498_v0 = vadd.f32 %v3233_v4, %v1184_v45  ;;  %v1193_v60 = vpop.f32.mrf.mxu1 }
 0x119   :  { %v2530_v33 = vpop.eup %2529  ;;  %1852 = vst.msk [vmem:[%s3821_s5 + $0xa0] sm:$0xff] %vm1831_vm2, %v1787_v34  ;;  %v1790_v39 = vmul.f32 %v2528_v54, %v3350_v51  ;;  %2555 = vpow2.f32 %v2067_v23  ;;  %v3506_v61 = vadd.f32 %v3233_v4, %v1199_v50  ;;  %v1194_v62 = vadd.f32 %v1193_v60, %v613_v59  ;;  %v2292_v8 = vpop.f32.mrf.mxu0 }
 0x11a   :  { %v2532_v1 = vpop.eup %2531  ;;  %2557 = vrcp.f32 %v1606_v56  ;;  %v1605_v5 = vadd.f32 1.0, %v2530_v33  ;;  %v2069_v52 = vmul.f32 -1.442695, %v3498_v0  ;;  %v2390_v7 = vpop.f32.mrf.mxu1 }
 0x11b   :  { %v2534_v38 = vpop.eup %2533  ;;  %1855 = vst.msk [vmem:[%s3821_s5 + $0xb8] sm:$0xff] %vm1831_vm2, %v1790_v39  ;;  %v1789_v51 = vmul.f32 %v2532_v1, %v3359_v2  ;;  %2559 = vpow2.f32 %v2070_v28  ;;  %v2072_v10 = vmul.f32 -1.442695, %v3506_v61  ;;  %v3516_v11 = vadd.f32 %v3233_v4, %v1194_v62  ;;  %v623_v16 = vpop.f32.mrf.mxu0 }
 0x11c   :  { %v2536_v12 = vpop.eup %2535  ;;  %v1792_v14 = vmul.f32 %v2534_v38, %v3367_v9  ;;  %2561 = vrcp.f32 %v1605_v5  ;;  %v1209_v58 = vadd.f32 %v2390_v7, %v2292_v8  ;;  %v1203_v13 = vpop.f32.mrf.mxu1 }
 0x11d   :  { %v2538_v43 = vpop.eup %2537  ;;  %1854 = vst.msk [vmem:[%s3821_s5 + $0xb0] sm:$0xff] %vm1831_vm2, %v1789_v51  ;;  %v1608_v2 = vadd.f32 1.0, %v2536_v12  ;;  %2563 = vpow2.f32 %v2069_v52  ;;  %v2071_v20 = vmul.f32 -1.442695, %v3516_v11  ;;  %v1204_v24 = vadd.f32 %v1203_v13, %v623_v16  ;;  %v2295_v6 = vpop.f32.mrf.mxu0 }
 0x11e   :  { %v2540_v25 = vpop.eup %2539  ;;  %1857 = vst.msk [vmem:[%s3821_s5 + $0xc8] sm:$0xff] %vm1831_vm2, %v1792_v14  ;;  %v1791_v9 = vmul.f32 %v2538_v43, %v3376_v19  ;;  %2565 = vpow2.f32 %v2072_v10  ;;  %v3530_v26 = vadd.f32 %v3233_v4, %v1209_v58  ;;  %v2393_v27 = vpop.f32.mrf.mxu1 }
 0x11f   :  { %v2542_v29 = vpop.eup %2541  ;;  %2567 = vrcp.f32 %v1608_v2  ;;  %v1607_v32 = vadd.f32 1.0, %v2540_v25  ;;  %v3533_v35 = vadd.f32 %v3233_v4, %v1204_v24  ;;  %v1219_v48 = vadd.f32 %v2393_v27, %v2295_v6  ;;  %v633_v17 = vpop.f32.mrf.mxu0 }
 0x120   :  { %v2544_v37 = vpop.eup %2543  ;;  %1856 = vst.msk [vmem:[%s3821_s5 + $0xc0] sm:$0xff] %vm1831_vm2, %v1791_v9  ;;  %v1794_v19 = vmul.f32 %v2542_v29, %v3381_v30  ;;  %2569 = vpow2.f32 %v2071_v20  ;;  %v2074_v31 = vmul.f32 -1.442695, %v3530_v26  ;;  %v1213_v23 = vpop.f32.mrf.mxu1 }
 0x121   :  { %v2546_v42 = vpop.eup %2545  ;;  %2571 = vrcp.f32 %v1607_v32  ;;  %v1610_v44 = vadd.f32 1.0, %v2544_v37  ;;  %v2073_v45 = vmul.f32 -1.442695, %v3533_v35  ;;  %v3543_v46 = vadd.f32 %v3233_v4, %v1219_v48  ;;  %v2298_v34 = vpop.f32.mrf.mxu0 }
 0x122   :  { %v2548_v47 = vpop.eup %2547  ;;  %1859 = vst.msk [vmem:[%s3821_s5 + $0xd8] sm:$0xff] %vm1831_vm2, %v1794_v19  ;;  %v1793_v30 = vmul.f32 %v2546_v42, %v3395_v55  ;;  %2573 = vpow2.f32 %v2074_v31  ;;  %v1214_v49 = vadd.f32 %v1213_v23, %v633_v17  ;;  %v2396_v28 = vpop.f32.mrf.mxu1  ;;  %v3589_v31 = vld [vmem:[%s3820_s4] ss:$0 sm:$0xff] }
 0x123   :  { %v2550_v50 = vpop.eup %2549  ;;  %2575 = vrcp.f32 %v1610_v44  ;;  %v1609_v54 = vadd.f32 1.0, %v2548_v47  ;;  %v2076_v56 = vmul.f32 -1.442695, %v3543_v46  ;;  %v1229_v59 = vadd.f32 %v2396_v28, %v2298_v34  ;;  %v643_v39 = vpop.f32.mrf.mxu0 }
 0x124   :  { %v2552_v60 = vpop.eup %2551  ;;  %1858 = vst.msk [vmem:[%s3821_s5 + $0xd0] sm:$0xff] %vm1831_vm2, %v1793_v30  ;;  %v1796_v33 = vmul.f32 %v2550_v50, %v3398_v53  ;;  %2577 = vpow2.f32 %v2073_v45  ;;  %v3557_v55 = vadd.f32 %v3233_v4, %v1214_v49  ;;  %v1223_v62 = vpop.f32.mrf.mxu1 }
 0x125   :  { %v2554_v1 = vpop.eup %2553  ;;  %2579 = vrcp.f32 %v1609_v54  ;;  %v1612_v5 = vadd.f32 1.0, %v2552_v60  ;;  %v3560_v52 = vadd.f32 %v3233_v4, %v1229_v59  ;;  %v1224_v8 = vadd.f32 %v1223_v62, %v643_v39  ;;  %v2301_v51 = vpop.f32.mrf.mxu0 }
 0x126   :  { %v2556_v7 = vpop.eup %2555  ;;  %1861 = vst.msk [vmem:[%s3821_s5 + $0xe8] sm:$0xff] %vm1831_vm2, %v1796_v33  ;;  %v1795_v53 = vmul.f32 %v2554_v1, %v3408_v63  ;;  %2581 = vpow2.f32 %v2076_v56  ;;  %v2075_v38 = vmul.f32 -1.442695, %v3557_v55  ;;  %v2399_v10 = vpop.f32.mrf.mxu1 }
 0x127   :  { %v2558_v12 = vpop.eup %2557  ;;  %2583 = vrcp.f32 %v1612_v5  ;;  %v1611_v14 = vadd.f32 1.0, %v2556_v7  ;;  %v2078_v58 = vmul.f32 -1.442695, %v3560_v52  ;;  %v3570_v16 = vadd.f32 %v3233_v4, %v1224_v8  ;;  %v653_v2 = vpop.f32.mrf.mxu0 }
 0x128   :  { %v2560_v13 = vpop.eup %2559  ;;  %1860 = vst.msk [vmem:[%s3821_s5 + $0xe0] sm:$0xff] %vm1831_vm2, %v1795_v53  ;;  %v1798_v63 = vmul.f32 %v2558_v12, %v3422_v15  ;;  %2585 = vpow2.f32 %v2075_v38  ;;  %v1239_v43 = vadd.f32 %v2399_v10, %v2301_v51  ;;  %v1233_v20 = vpop.f32.mrf.mxu1 }
 0x129   :  { %v2562_v24 = vpop.eup %2561  ;;  %2587 = vrcp.f32 %v1611_v14  ;;  %v1614_v25 = vadd.f32 1.0, %v2560_v13  ;;  %v2077_v9 = vmul.f32 -1.442695, %v3570_v16  ;;  %v1234_v6 = vadd.f32 %v1233_v20, %v653_v2  ;;  %v2304_v32 = vpop.f32.mrf.mxu0 }
 0x12a   :  { %v2564_v27 = vpop.eup %2563  ;;  %1863 = vst.msk [vmem:[%s3821_s5 + $0xf8] sm:$0xff] %vm1831_vm2, %v1798_v63  ;;  %v1797_v29 = vmul.f32 %v2562_v24, %v3425_v22  ;;  %2589 = vpow2.f32 %v2078_v58  ;;  %v3584_v15 = vadd.f32 %v3233_v4, %v1239_v43  ;;  %v2402_v48 = vpop.f32.mrf.mxu1 }
 0x12b   :  { %v2566_v37 = vpop.eup %2565  ;;  %2591 = vrcp.f32 %v1614_v25  ;;  %v1613_v19 = vadd.f32 1.0, %v2564_v27  ;;  %v3592_v17 = vadd.f32 %v3589_v31, %v1234_v6  ;;  %v1249_v23 = vadd.f32 %v2402_v48, %v2304_v32  ;;  %v663_v44 = vpop.f32.mrf.mxu0 }
 0x12c   :  { %v2568_v42 = vpop.eup %2567  ;;  %1862 = vst.msk [vmem:[%s3821_s5 + $0xf0] sm:$0xff] %vm1831_vm2, %v1797_v29  ;;  %v1616_v4 = vadd.f32 1.0, %v2566_v37  ;;  %2593 = vpow2.f32 %v2077_v9  ;;  %v2080_v22 = vmul.f32 -1.442695, %v3584_v15  ;;  %v1243_v45 = vpop.f32.mrf.mxu1 }
 0x12d   :  { %v2570_v47 = vpop.eup %2569  ;;  %v1800_v30 = vmul.f32 %v2568_v42, %v3435_v36  ;;  %2595 = vrcp.f32 %v1613_v19  ;;  %v2079_v49 = vmul.f32 -1.442695, %v3592_v17  ;;  %v3602_v34 = vadd.f32 %v3589_v31, %v1249_v23  ;;  %v2307_v56 = vpop.f32.mrf.mxu0 }
 0x12e   :  { %v2572_v28 = vpop.eup %2571  ;;  %2597 = vrcp.f32 %v1616_v4  ;;  %v1615_v50 = vadd.f32 1.0, %v2570_v47  ;;  %v1244_v54 = vadd.f32 %v1243_v45, %v663_v44  ;;  %v2405_v59 = vpop.f32.mrf.mxu1 }
 0x12f   :  { %v2574_v60 = vpop.eup %2573  ;;  %1865 = vst.msk [vmem:[%s3821_s5 + $0x108] sm:$0xff] %vm1831_vm2, %v1800_v30  ;;  %v1799_v36 = vmul.f32 %v2572_v28, %v3448_v41  ;;  %2599 = vpow2.f32 %v2080_v22  ;;  %v2082_v33 = vmul.f32 -1.442695, %v3602_v34  ;;  %v1259_v39 = vadd.f32 %v2405_v59, %v2307_v56  ;;  %v673_v8 = vpop.f32.mrf.mxu0 }
 0x130   :  { %v2576_v62 = vpop.eup %2575  ;;  %2601 = vrcp.f32 %v1615_v50  ;;  %v1618_v1 = vadd.f32 1.0, %v2574_v60  ;;  %v3611_v5 = vadd.f32 %v3589_v31, %v1244_v54  ;;  %v1253_v7 = vpop.f32.mrf.mxu1 }
 0x131   :  { %v2578_v53 = vpop.eup %2577  ;;  %1864 = vst.msk [vmem:[%s3821_s5 + $0x100] sm:$0xff] %vm1831_vm2, %v1799_v36  ;;  %v1802_v41 = vmul.f32 %v2576_v62, %v3452_v57  ;;  %2603 = vpow2.f32 %v2079_v49  ;;  %v3619_v38 = vadd.f32 %v3589_v31, %v1259_v39  ;;  %v1254_v51 = vadd.f32 %v1253_v7, %v673_v8  ;;  %v2310_v58 = vpop.f32.mrf.mxu0 }
 0x132   :  { %v2580_v10 = vpop.eup %2579  ;;  %2605 = vrcp.f32 %v1618_v1  ;;  %v1617_v12 = vadd.f32 1.0, %v2578_v53  ;;  %v2081_v14 = vmul.f32 -1.442695, %v3611_v5  ;;  %v2408_v13 = vpop.f32.mrf.mxu1 }
 0x133   :  { %v2582_v63 = vpop.eup %2581  ;;  %1867 = vst.msk [vmem:[%s3821_s5 + $0x118] sm:$0xff] %vm1831_vm2, %v1802_v41  ;;  %v1801_v57 = vmul.f32 %v2580_v10, %v3462_v3  ;;  %2607 = vpow2.f32 %v2082_v33  ;;  %v2084_v43 = vmul.f32 -1.442695, %v3619_v38  ;;  %v3629_v2 = vadd.f32 %v3589_v31, %v1254_v51  ;;  %v683_v9 = vpop.f32.mrf.mxu0 }
 0x134   :  { %v2584_v20 = vpop.eup %2583  ;;  %2609 = vrcp.f32 %v1617_v12  ;;  %v1620_v24 = vadd.f32 1.0, %v2582_v63  ;;  %v1269_v25 = vadd.f32 %v2408_v13, %v2310_v58  ;;  %v1263_v6 = vpop.f32.mrf.mxu1 }
 0x135   :  { %v2586_v27 = vpop.eup %2585  ;;  %1866 = vst.msk [vmem:[%s3821_s5 + $0x110] sm:$0xff] %vm1831_vm2, %v1801_v57  ;;  %v1804_v3 = vmul.f32 %v2584_v20, %v3471_v21  ;;  %2611 = vpow2.f32 %v2081_v14  ;;  %v2083_v29 = vmul.f32 -1.442695, %v3629_v2  ;;  %v1264_v32 = vadd.f32 %v1263_v6, %v683_v9  ;;  %v2313_v23 = vpop.f32.mrf.mxu0 }
 0x136   :  { %v2588_v48 = vpop.eup %2587  ;;  %2613 = vrcp.f32 %v1620_v24  ;;  %v1619_v37 = vadd.f32 1.0, %v2586_v27  ;;  %v3638_v19 = vadd.f32 %v3589_v31, %v1269_v25  ;;  %v2411_v42 = vpop.f32.mrf.mxu1 }
 0x137   :  { %v2590_v4 = vpop.eup %2589  ;;  %1869 = vst.msk [vmem:[%s3821_s5 + $0x128] sm:$0xff] %vm1831_vm2, %v1804_v3  ;;  %v1803_v21 = vmul.f32 %v2588_v48, %v3479_v18  ;;  %2615 = vpow2.f32 %v2084_v43  ;;  %v3646_v22 = vadd.f32 %v3589_v31, %v1264_v32  ;;  %v1279_v44 = vadd.f32 %v2411_v42, %v2313_v23  ;;  %v693_v49 = vpop.f32.mrf.mxu0 }
 0x138   :  { %v2592_v45 = vpop.eup %2591  ;;  %2617 = vrcp.f32 %v1619_v37  ;;  %v1622_v47 = vadd.f32 1.0, %v2590_v4  ;;  %v2086_v30 = vmul.f32 -1.442695, %v3638_v19  ;;  %v1273_v28 = vpop.f32.mrf.mxu1 }
 0x139   :  { %v2594_v50 = vpop.eup %2593  ;;  %1868 = vst.msk [vmem:[%s3821_s5 + $0x120] sm:$0xff] %vm1831_vm2, %v1803_v21  ;;  %v1806_v18 = vmul.f32 %v2592_v45, %v3489_v40  ;;  %2619 = vpow2.f32 %v2083_v29  ;;  %v2085_v54 = vmul.f32 -1.442695, %v3646_v22  ;;  %v3656_v56 = vadd.f32 %v3589_v31, %v1279_v44  ;;  %v2316_v33 = vpop.f32.mrf.mxu0 }
 0x13a   :  { %v2596_v59 = vpop.eup %2595  ;;  %2621 = vrcp.f32 %v1622_v47  ;;  %v1621_v60 = vadd.f32 1.0, %v2594_v50  ;;  %v1274_v36 = vadd.f32 %v1273_v28, %v693_v49  ;;  %v2414_v39 = vpop.f32.mrf.mxu1 }
 0x13b   :  { %v2598_v62 = vpop.eup %2597  ;;  %1871 = vst.msk [vmem:[%s3821_s5 + $0x138] sm:$0xff] %vm1831_vm2, %v1806_v18  ;;  %v1805_v40 = vmul.f32 %v2596_v59, %v3498_v0  ;;  %2623 = vpow2.f32 %v2086_v30  ;;  %v2088_v1 = vmul.f32 -1.442695, %v3656_v56  ;;  %v1289_v8 = vadd.f32 %v2414_v39, %v2316_v33  ;;  %v703_v51 = vpop.f32.mrf.mxu0 }
 0x13c   :  { %v2600_v7 = vpop.eup %2599  ;;  %v1808_v53 = vmul.f32 %v2598_v62, %v3506_v61  ;;  %2625 = vrcp.f32 %v1621_v60  ;;  %v3666_v41 = vadd.f32 %v3589_v31, %v1274_v36  ;;  %v1283_v10 = vpop.f32.mrf.mxu1 }
 0x13d   :  { %v2602_v12 = vpop.eup %2601  ;;  %1870 = vst.msk [vmem:[%s3821_s5 + $0x130] sm:$0xff] %vm1831_vm2, %v1805_v40  ;;  %v1624_v0 = vadd.f32 1.0, %v2600_v7  ;;  %2627 = vpow2.f32 %v2085_v54  ;;  %v3673_v14 = vadd.f32 %v3589_v31, %v1289_v8  ;;  %v1284_v58 = vadd.f32 %v1283_v10, %v703_v51  ;;  %v2319_v57 = vpop.f32.mrf.mxu0 }
 0x13e   :  { %v2604_v13 = vpop.eup %2603  ;;  %1873 = vst.msk [vmem:[%s3821_s5 + $0x148] sm:$0xff] %vm1831_vm2, %v1808_v53  ;;  %v1807_v61 = vmul.f32 %v2602_v12, %v3516_v11  ;;  %2629 = vpow2.f32 %v2088_v1  ;;  %v2087_v63 = vmul.f32 -1.442695, %v3666_v41  ;;  %v2417_v43 = vpop.f32.mrf.mxu1 }
 0x13f   :  { %v2606_v20 = vpop.eup %2605  ;;  %2631 = vrcp.f32 %v1624_v0  ;;  %v1623_v24 = vadd.f32 1.0, %v2604_v13  ;;  %v2090_v25 = vmul.f32 -1.442695, %v3673_v14  ;;  %v3683_v9 = vadd.f32 %v3589_v31, %v1284_v58  ;;  %v713_v3 = vpop.f32.mrf.mxu0 }
 0x140   :  { %v2608_v6 = vpop.eup %2607  ;;  %1872 = vst.msk [vmem:[%s3821_s5 + $0x140] sm:$0xff] %vm1831_vm2, %v1807_v61  ;;  %v1810_v11 = vmul.f32 %v2606_v20, %v3530_v26  ;;  %2633 = vpow2.f32 %v2087_v63  ;;  %v1299_v27 = vadd.f32 %v2417_v43, %v2319_v57  ;;  %v1293_v29 = vpop.f32.mrf.mxu1 }
 0x141   :  { %v2610_v32 = vpop.eup %2609  ;;  %2635 = vrcp.f32 %v1623_v24  ;;  %v1626_v48 = vadd.f32 1.0, %v2608_v6  ;;  %v2089_v37 = vmul.f32 -1.442695, %v3683_v9  ;;  %v1294_v23 = vadd.f32 %v1293_v29, %v713_v3  ;;  %v2322_v21 = vpop.f32.mrf.mxu0 }
 0x142   :  { %v2612_v42 = vpop.eup %2611  ;;  %1875 = vst.msk [vmem:[%s3821_s5 + $0x158] sm:$0xff] %vm1831_vm2, %v1810_v11  ;;  %v1809_v4 = vmul.f32 %v2610_v32, %v3533_v35  ;;  %2637 = vpow2.f32 %v2090_v25  ;;  %v3697_v26 = vadd.f32 %v3589_v31, %v1299_v27  ;;  %v2420_v44 = vpop.f32.mrf.mxu1 }
 0x143   :  { %v2614_v45 = vpop.eup %2613  ;;  %2639 = vrcp.f32 %v1626_v48  ;;  %v1625_v47 = vadd.f32 1.0, %v2612_v42  ;;  %v3700_v30 = vadd.f32 %v3589_v31, %v1294_v23  ;;  %v1309_v49 = vadd.f32 %v2420_v44, %v2322_v21  ;;  %v723_v18 = vpop.f32.mrf.mxu0 }
 0x144   :  { %v2616_v28 = vpop.eup %2615  ;;  %1874 = vst.msk [vmem:[%s3821_s5 + $0x150] sm:$0xff] %vm1831_vm2, %v1809_v4  ;;  %v1812_v35 = vmul.f32 %v2614_v45, %v3543_v46  ;;  %2641 = vpow2.f32 %v2089_v37  ;;  %v2092_v50 = vmul.f32 -1.442695, %v3697_v26  ;;  %v1303_v54 = vpop.f32.mrf.mxu1 }
 0x145   :  { %v2618_v59 = vpop.eup %2617  ;;  %2643 = vrcp.f32 %v1625_v47  ;;  %v1628_v60 = vadd.f32 1.0, %v2616_v28  ;;  %v2091_v36 = vmul.f32 -1.442695, %v3700_v30  ;;  %v3710_v33 = vadd.f32 %v3589_v31, %v1309_v49 }
 0x146   :  { %v2620_v39 = vpop.eup %2619  ;;  %1877 = vst.msk [vmem:[%s3821_s5 + $0x168] sm:$0xff] %vm1831_vm2, %v1812_v35  ;;  %v1811_v46 = vmul.f32 %v2618_v59, %v3557_v55  ;;  %2645 = vpow2.f32 %v2092_v50  ;;  %v1304_v62 = vadd.f32 %v1303_v54, %v723_v18 }
 0x147   :  { %v2622_v40 = vpop.eup %2621  ;;  %2647 = vrcp.f32 %v1628_v60  ;;  %v1627_v1 = vadd.f32 1.0, %v2620_v39  ;;  %v2094_v8 = vmul.f32 -1.442695, %v3710_v33 }
 0x148   :  { %v2624_v7 = vpop.eup %2623  ;;  %1876 = vst.msk [vmem:[%s3821_s5 + $0x160] sm:$0xff] %vm1831_vm2, %v1811_v46  ;;  %v1814_v53 = vmul.f32 %v2622_v40, %v3560_v52  ;;  %2649 = vpow2.f32 %v2091_v36  ;;  %v3724_v51 = vadd.f32 %v3589_v31, %v1304_v62 }
 0x149   :  { %v2626_v55 = vpop.eup %2625  ;;  %2651 = vrcp.f32 %v1627_v1  ;;  %v1630_v10 = vadd.f32 1.0, %v2624_v7 }
 0x14a   :  { %v2628_v12 = vpop.eup %2627  ;;  %1879 = vst.msk [vmem:[%s3821_s5 + $0x178] sm:$0xff] %vm1831_vm2, %v1814_v53  ;;  %v1813_v0 = vmul.f32 %v2626_v55, %v3570_v16  ;;  %2653 = vpow2.f32 %v2094_v8  ;;  %v2093_v58 = vmul.f32 -1.442695, %v3724_v51 }
 0x14b   :  { %v2630_v13 = vpop.eup %2629  ;;  %2655 = vrcp.f32 %v1630_v10  ;;  %v1629_v52 = vadd.f32 1.0, %v2628_v12 }
 0x14c   :  { %v2632_v61 = vpop.eup %2631  ;;  %1878 = vst.msk [vmem:[%s3821_s5 + $0x170] sm:$0xff] %vm1831_vm2, %v1813_v0  ;;  %v1632_v31 = vadd.f32 1.0, %v2630_v13  ;;  %2657 = vpow2.f32 %v2093_v58 }
 0x14d   :  { %v2634_v63 = vpop.eup %2633  ;;  %v1816_v57 = vmul.f32 %v2632_v61, %v3584_v15  ;;  %2659 = vrcp.f32 %v1629_v52 }
 0x14e   :  { %v2636_v43 = vpop.eup %2635  ;;  %2661 = vrcp.f32 %v1632_v31  ;;  %v1631_v16 = vadd.f32 1.0, %v2634_v63 }
 0x14f   :  { %v2638_v20 = vpop.eup %2637  ;;  %1881 = vst.msk [vmem:[%s3821_s5 + $0x188] sm:$0xff] %vm1831_vm2, %v1816_v57  ;;  %v1815_v24 = vmul.f32 %v2636_v43, %v3592_v17 }
 0x150   :  { %v2640_v25 = vpop.eup %2639  ;;  %2663 = vrcp.f32 %v1631_v16  ;;  %v1634_v6 = vadd.f32 1.0, %v2638_v20 }
 0x151   :  { %v2642_v11 = vpop.eup %2641  ;;  %1880 = vst.msk [vmem:[%s3821_s5 + $0x180] sm:$0xff] %vm1831_vm2, %v1815_v24  ;;  %v1818_v15 = vmul.f32 %v2640_v25, %v3602_v34 }
 0x152   :  { %v2644_v27 = vpop.eup %2643  ;;  %2665 = vrcp.f32 %v1634_v6  ;;  %v1633_v3 = vadd.f32 1.0, %v2642_v11 }
 0x153   :  { %v2646_v29 = vpop.eup %2645  ;;  %1883 = vst.msk [vmem:[%s3821_s5 + $0x198] sm:$0xff] %vm1831_vm2, %v1818_v15  ;;  %v1817_v17 = vmul.f32 %v2644_v27, %v3611_v5 }
 0x154   :  { %v2648_v32 = vpop.eup %2647  ;;  %2667 = vrcp.f32 %v1633_v3  ;;  %v1636_v48 = vadd.f32 1.0, %v2646_v29 }
 0x155   :  { %v2650_v37 = vpop.eup %2649  ;;  %1882 = vst.msk [vmem:[%s3821_s5 + $0x190] sm:$0xff] %vm1831_vm2, %v1817_v17  ;;  %v1820_v34 = vmul.f32 %v2648_v32, %v3619_v38 }
 0x156   :  { %v2652_v23 = vpop.eup %2651  ;;  %2669 = vrcp.f32 %v1636_v48  ;;  %v1635_v42 = vadd.f32 1.0, %v2650_v37 }
 0x157   :  { %v2654_v4 = vpop.eup %2653  ;;  %1885 = vst.msk [vmem:[%s3821_s5 + $0x1a8] sm:$0xff] %vm1831_vm2, %v1820_v34  ;;  %v1819_v5 = vmul.f32 %v2652_v23, %v3629_v2 }
 0x158   :  { %v2656_v21 = vpop.eup %2655  ;;  %2671 = vrcp.f32 %v1635_v42  ;;  %v1638_v44 = vadd.f32 1.0, %v2654_v4 }
 0x159   :  { %v2658_v45 = vpop.eup %2657  ;;  %1884 = vst.msk [vmem:[%s3821_s5 + $0x1a0] sm:$0xff] %vm1831_vm2, %v1819_v5  ;;  %v1822_v38 = vmul.f32 %v2656_v21, %v3638_v19 }
 0x15a   :  { %v2660_v47 = vpop.eup %2659  ;;  %2673 = vrcp.f32 %v1638_v44  ;;  %v1637_v49 = vadd.f32 1.0, %v2658_v45 }
 0x15b   :  { %v2662_v28 = vpop.eup %2661  ;;  %1887 = vst.msk [vmem:[%s3821_s5 + $0x1b8] sm:$0xff] %vm1831_vm2, %v1822_v38  ;;  %v1821_v2 = vmul.f32 %v2660_v47, %v3646_v22 }
 0x15c   :  { %v1824_v35 = vmul.f32 %v2662_v28, %v3656_v56  ;;  %2675 = vrcp.f32 %v1637_v49 }
 0x15d   :  { %v2664_v50 = vpop.eup %2663  ;;  %1886 = vst.msk [vmem:[%s3821_s5 + $0x1b0] sm:$0xff] %vm1831_vm2, %v1821_v2 }
 0x15e   :  { %1889 = vst.msk [vmem:[%s3821_s5 + $0x1c8] sm:$0xff] %vm1831_vm2, %v1824_v35  ;;  %v1823_v19 = vmul.f32 %v2664_v50, %v3666_v41 }
 0x15f   :  { %v2666_v18 = vpop.eup %2665 }
 0x160   :  { %1888 = vst.msk [vmem:[%s3821_s5 + $0x1c0] sm:$0xff] %vm1831_vm2, %v1823_v19  ;;  %v1826_v22 = vmul.f32 %v2666_v18, %v3673_v14 }
 0x161   :  { %v2668_v56 = vpop.eup %2667 }
 0x162   :  { %1891 = vst.msk [vmem:[%s3821_s5 + $0x1d8] sm:$0xff] %vm1831_vm2, %v1826_v22  ;;  %v1825_v54 = vmul.f32 %v2668_v56, %v3683_v9 }
 0x163   :  { %v2670_v59 = vpop.eup %2669 }
 0x164   :  { %1890 = vst.msk [vmem:[%s3821_s5 + $0x1d0] sm:$0xff] %vm1831_vm2, %v1825_v54  ;;  %v1828_v41 = vmul.f32 %v2670_v59, %v3697_v26 }
 0x165   :  { %v2672_v60 = vpop.eup %2671 }
 0x166   :  { %1893 = vst.msk [vmem:[%s3821_s5 + $0x1e8] sm:$0xff] %vm1831_vm2, %v1828_v41  ;;  %v1827_v14 = vmul.f32 %v2672_v60, %v3700_v30 }
 0x167   :  { %v2674_v36 = vpop.eup %2673 }
 0x168   :  { %1892 = vst.msk [vmem:[%s3821_s5 + $0x1e0] sm:$0xff] %vm1831_vm2, %v1827_v14  ;;  %v1830_v9 = vmul.f32 %v2674_v36, %v3710_v33 }
 0x169   :  { %v2676_v39 = vpop.eup %2675 }
 0x16a   :  { %1895 = vst.msk [vmem:[%s3821_s5 + $0x1f8] sm:$0xff] %vm1831_vm2, %v1830_v9  ;;  %v1829_v26 = vmul.f32 %v2676_v39, %v3724_v51 }
 0x16c   :  { %1894 = vst.msk [vmem:[%s3821_s5 + $0x1f0] sm:$0xff] %vm1831_vm2, %v1829_v26 }

// kernel: _lambda_.7
= control target key start
LH: loop header
LB: loop body
LE: loop exit
PB: predicated region body
PF: predicated region fallthrough
CT: control target
= control target key end

     0   :  { %s5486_s15 = smov 0   ;;  %s7195_s0 = inlined_call_operand.vmem [shape: f32[2,16,16,2], index: 0, kind: input, shape index: {}]   ;;  %s7196_s1 = inlined_call_operand.vmem [shape: f32[9,2,2], index: 1, kind: input, shape index: {}]   ;;  %s7197_s2 = inlined_call_operand.vmem [shape: f32[1,2], index: 2, kind: input, shape index: {}]   ;;  %s7198_s3 = inlined_call_operand.vmem [shape: f32[2,16,16,2], index: 3, kind: input, shape index: {}]   ;;  %s7199_s4 = inlined_call_operand.vmem [shape: f32[2,16,16,2], index: 4, kind: output, shape index: {}]  }
   0x1 LB: > { %s4212_s16 = sadd.s32 4294967295, %s5458_s15   ;;  %p4216_p0 = scmp.ge.s32.totalorder %s5458_s15, 1  ;;  %s5458_s15 = sphi %s5486_s15, %s14_s15  }
   0x2   : > { %p172_p1 = scmp.lt.s32.totalorder %s5458_s15, 3 }
   0x4   : > { %p173_p2 = pnand %p4216_p0, %p172_p1 }
   0x6   : > { %176 = sbr.rel (%p173_p2) target bundleno = 576 (0x240), region = 36 }
   0xb   : > { %v4223_v0 = vld [vmem:[%s7196_s1 + $0x2] sm:$0x3]  ;;  %vm502_vm0 = vcmask 1041408   ;;  %vm218_vm1 = vcmask 15360   ;;  %p5499_p3 = scmp.lt.s32.totalorder %s4212_s16, 1  ;;  %v5460_v1 = vmov 0.0  }
   0xc   : > { %5313 = vmatprep.subr.msk.mxu1 %vm502_vm0, %v4223_v0  ;;  %4863 = vmatprep.subr.msk.mxu0 %vm502_vm0, %v4223_v0  ;;  %219 = vst.msk [vmem:[#allocation2] sm:$0xff] %vm218_vm1, %v5460_v1  ;;  %220 = vst.msk [vmem:[#allocation2 + $0x8] sm:$0xff] %vm218_vm1, %v5460_v1  ;;  %v5544_v2 = vld [vmem:[%s7196_s1] sm:$0x3]  ;;  %vm221_vm2 = vcmask 9216  }
   0xd   : > { %223 = vst.msk [vmem:[#allocation2 + $0x18] sm:$0xff] %vm218_vm1, %v5460_v1  ;;  %224 = vst.msk [vmem:[#allocation2 + $0x20] sm:$0xff] %vm218_vm1, %v5460_v1  ;;  %v4290_v3 = vld [vmem:[%s7196_s1 + $0x4] sm:$0x3]  ;;  %5314 = vmatpush3.msk.msra.mxu1 %vm502_vm0, %v4223_v0  ;;  %4864 = vmatpush3.msk.msra.mxu0 %vm502_vm0, %v4223_v0  ;;  %s7396_s16 = smov (!%p5499_p3, %s4212_s16), 1 }
   0xe   : > { %226 = vst.msk [vmem:[#allocation2 + $0x30] sm:$0xff] %vm218_vm1, %v5460_v1  ;;  %227 = vst.msk [vmem:[#allocation2 + $0x38] sm:$0xff] %vm218_vm1, %v5460_v1  ;;  %4913 = vmatprep.subr.msk.mxu1 %vm502_vm0, %v5544_v2  ;;  %4963 = vmatprep.subr.msk.mxu0 %vm502_vm0, %v4290_v3  ;;  %s5576_s24 = sshll.u32 %s7396_s16, 8  ;;  %v5596_v10 = vld [vmem:[%s7196_s1 + $0x8] sm:$0x3] }
   0xf   : > { %229 = vst.msk [vmem:[#allocation2 + $0x48] sm:$0xff] %vm218_vm1, %v5460_v1  ;;  %230 = vst.msk [vmem:[#allocation2 + $0x50] sm:$0xff] %vm218_vm1, %v5460_v1  ;;  %s5582_s27 = scalar_lea.vmem %s7195_s0, %s5576_s24  ;;  %v5655_v34 = vld [vmem:[%s7196_s1 + $0x6] sm:$0x3]  ;;  %s6951_s19 = scalar_lea.vmem %s7198_s3, %s5576_s24 }
  0x10   : > { %232 = vst.msk [vmem:[#allocation2 + $0x60] sm:$0xff] %vm218_vm1, %v5460_v1  ;;  %233 = vst.msk [vmem:[#allocation2 + $0x68] sm:$0xff] %vm218_vm1, %v5460_v1  ;;  %v288_v4 = vld [vmem:[%s5582_s27 + $0x70] sm:$0xff]  ;;  %v289_v5 = vld [vmem:[%s5582_s27 + $0x78] sm:$0xff]  ;;  %s6976_s22 = scalar_lea.vmem %s7199_s4, %s5576_s24 }
  0x11   : > { %235 = vst.msk [vmem:[#allocation2 + $0x78] sm:$0xff] %vm218_vm1, %v5460_v1  ;;  %236 = vst.msk [vmem:[#allocation2 + $0x80] sm:$0xff] %vm218_vm1, %v5460_v1  ;;  %v274_v6 = vld [vmem:[%s5582_s27] sm:$0xff]  ;;  %v275_v8 = vld [vmem:[%s5582_s27 + $0x8] sm:$0xff] }
  0x12   : > { %238 = vst.msk [vmem:[#allocation2 + $0x90] sm:$0xff] %vm218_vm1, %v5460_v1  ;;  %239 = vst.msk [vmem:[#allocation2 + $0x98] sm:$0xff] %vm218_vm1, %v5460_v1  ;;  %v290_v7 = vld [vmem:[%s5582_s27 + $0x80] sm:$0xff]  ;;  %v291_v9 = vld [vmem:[%s5582_s27 + $0x88] sm:$0xff] }
  0x13   : > { %241 = vst.msk [vmem:[#allocation2 + $0xa8] sm:$0xff] %vm218_vm1, %v5460_v1  ;;  %242 = vst.msk [vmem:[#allocation2 + $0xb0] sm:$0xff] %vm218_vm1, %v5460_v1  ;;  %v372_v11 = vld [vmem:[#allocation2 + $0x1] sm:$0xff]  ;;  %v276_v12 = vld [vmem:[%s5582_s27 + $0x10] sm:$0xff] }
  0x14   : > { %244 = vst.msk [vmem:[#allocation2 + $0xc0] sm:$0xff] %vm218_vm1, %v5460_v1  ;;  %245 = vst.msk [vmem:[#allocation2 + $0xc8] sm:$0xff] %vm218_vm1, %v5460_v1  ;;  %v292_v13 = vld [vmem:[%s5582_s27 + $0x90] sm:$0xff]  ;;  %4865 = vmatprep.mubr.msk.f32.mxu0 %vm218_vm1, %v372_v11  ;;  %v277_v15 = vld [vmem:[%s5582_s27 + $0x18] sm:$0xff] }
  0x15   : > { %247 = vst.msk [vmem:[#allocation2 + $0xd8] sm:$0xff] %vm218_vm1, %v5460_v1  ;;  %248 = vst.msk [vmem:[#allocation2 + $0xe0] sm:$0xff] %vm218_vm1, %v5460_v1  ;;  %v293_v16 = vld [vmem:[%s5582_s27 + $0x98] sm:$0xff]  ;;  %v278_v17 = vld [vmem:[%s5582_s27 + $0x20] sm:$0xff] }
  0x16   : > { %250 = vst.msk [vmem:[#allocation2 + $0xf0] sm:$0xff] %vm218_vm1, %v5460_v1  ;;  %251 = vst.msk [vmem:[#allocation2 + $0xf8] sm:$0xff] %vm218_vm1, %v5460_v1  ;;  %v294_v18 = vld [vmem:[%s5582_s27 + $0xa0] sm:$0xff]  ;;  %v279_v19 = vld [vmem:[%s5582_s27 + $0x28] sm:$0xff] }
  0x17   : > { %253 = vst.msk [vmem:[#allocation2 + $0x108] sm:$0xff] %vm218_vm1, %v5460_v1  ;;  %254 = vst.msk [vmem:[#allocation2 + $0x110] sm:$0xff] %vm218_vm1, %v5460_v1  ;;  %v295_v20 = vld [vmem:[%s5582_s27 + $0xa8] sm:$0xff]  ;;  %v280_v21 = vld [vmem:[%s5582_s27 + $0x30] sm:$0xff] }
  0x18   : > { %256 = vst.msk [vmem:[#allocation2 + $0x120] sm:$0xff] %vm218_vm1, %v5460_v1  ;;  %257 = vst.msk [vmem:[#allocation2 + $0x128] sm:$0xff] %vm218_vm1, %v5460_v1  ;;  %v296_v22 = vld [vmem:[%s5582_s27 + $0xb0] sm:$0xff]  ;;  %v281_v23 = vld [vmem:[%s5582_s27 + $0x38] sm:$0xff] }
  0x19   : > { %259 = vst.msk [vmem:[#allocation2 + $0x138] sm:$0xff] %vm218_vm1, %v5460_v1  ;;  %260 = vst.msk [vmem:[#allocation2 + $0x140] sm:$0xff] %vm218_vm1, %v5460_v1  ;;  %v297_v24 = vld [vmem:[%s5582_s27 + $0xb8] sm:$0xff]  ;;  %v282_v25 = vld [vmem:[%s5582_s27 + $0x40] sm:$0xff] }
  0x1a   : > { %262 = vst.msk [vmem:[#allocation2 + $0x150] sm:$0xff] %vm218_vm1, %v5460_v1  ;;  %263 = vst.msk [vmem:[#allocation2 + $0x158] sm:$0xff] %vm218_vm1, %v5460_v1  ;;  %v298_v26 = vld [vmem:[%s5582_s27 + $0xc0] sm:$0xff]  ;;  %v283_v27 = vld [vmem:[%s5582_s27 + $0x48] sm:$0xff] }
  0x1b   : > { %265 = vst.msk [vmem:[#allocation2 + $0x168] sm:$0xff] %vm218_vm1, %v5460_v1  ;;  %266 = vst.msk [vmem:[#allocation2 + $0x170] sm:$0xff] %vm218_vm1, %v5460_v1  ;;  %v299_v28 = vld [vmem:[%s5582_s27 + $0xc8] sm:$0xff]  ;;  %v284_v36 = vld [vmem:[%s5582_s27 + $0x50] sm:$0xff] }
  0x1c   : > { %268 = vst.msk [vmem:[#allocation2 + $0x180] sm:$0xff] %vm218_vm1, %v5460_v1  ;;  %269 = vst.msk [vmem:[#allocation2 + $0x188] sm:$0xff] %vm218_vm1, %v5460_v1  ;;  %v300_v39 = vld [vmem:[%s5582_s27 + $0xd0] sm:$0xff]  ;;  %v285_v46 = vld [vmem:[%s5582_s27 + $0x58] sm:$0xff] }
  0x1d   : > { %271 = vst.msk [vmem:[#allocation2 + $0x198] sm:$0xff] %vm218_vm1, %v5460_v1  ;;  %272 = vst.msk [vmem:[#allocation2 + $0x1a0] sm:$0xff] %vm218_vm1, %v5460_v1  ;;  %v301_v47 = vld [vmem:[%s5582_s27 + $0xd8] sm:$0xff]  ;;  %v286_v48 = vld [vmem:[%s5582_s27 + $0x60] sm:$0xff] }
  0x1e   : > { %222 = vst.msk [vmem:[#allocation2 + $0x10] sm:$0x3] %vm221_vm2, %v5460_v1  ;;  %225 = vst.msk [vmem:[#allocation2 + $0x28] sm:$0x3] %vm221_vm2, %v5460_v1  ;;  %v302_v49 = vld [vmem:[%s5582_s27 + $0xe0] sm:$0xff]  ;;  %v287_v50 = vld [vmem:[%s5582_s27 + $0x68] sm:$0xff] }
  0x1f   : > { %228 = vst.msk [vmem:[#allocation2 + $0x40] sm:$0x3] %vm221_vm2, %v5460_v1  ;;  %231 = vst.msk [vmem:[#allocation2 + $0x58] sm:$0x3] %vm221_vm2, %v5460_v1  ;;  %v303_v51 = vld [vmem:[%s5582_s27 + $0xe8] sm:$0xff] }
  0x20   : > { %234 = vst.msk [vmem:[#allocation2 + $0x70] sm:$0x3] %vm221_vm2, %v5460_v1  ;;  %237 = vst.msk [vmem:[#allocation2 + $0x88] sm:$0x3] %vm221_vm2, %v5460_v1 }
  0x21   : > { %240 = vst.msk [vmem:[#allocation2 + $0xa0] sm:$0x3] %vm221_vm2, %v5460_v1  ;;  %243 = vst.msk [vmem:[#allocation2 + $0xb8] sm:$0x3] %vm221_vm2, %v5460_v1 }
  0x22   : > { %246 = vst.msk [vmem:[#allocation2 + $0xd0] sm:$0x3] %vm221_vm2, %v5460_v1  ;;  %249 = vst.msk [vmem:[#allocation2 + $0xe8] sm:$0x3] %vm221_vm2, %v5460_v1 }
  0x23   : > { %252 = vst.msk [vmem:[#allocation2 + $0x100] sm:$0x3] %vm221_vm2, %v5460_v1  ;;  %255 = vst.msk [vmem:[#allocation2 + $0x118] sm:$0x3] %vm221_vm2, %v5460_v1 }
  0x24   : > { %258 = vst.msk [vmem:[#allocation2 + $0x130] sm:$0x3] %vm221_vm2, %v5460_v1  ;;  %261 = vst.msk [vmem:[#allocation2 + $0x148] sm:$0x3] %vm221_vm2, %v5460_v1 }
  0x25   : > { %264 = vst.msk [vmem:[#allocation2 + $0x160] sm:$0x3] %vm221_vm2, %v5460_v1  ;;  %267 = vst.msk [vmem:[#allocation2 + $0x178] sm:$0x3] %vm221_vm2, %v5460_v1  ;;  %v373_v14 = vld [vmem:[#allocation2 + $0x9] sm:$0xff] }
  0x26   : > { %270 = vst.msk [vmem:[#allocation2 + $0x190] sm:$0x3] %vm221_vm2, %v5460_v1  ;;  %273 = vst.msk [vmem:[#allocation2 + $0x1a8] sm:$0x3] %vm221_vm2, %v5460_v1  ;;  %4866 = vmatmul.mubr.msk.f32.vlgmr.msra.gmra.mxu0 %vm218_vm1, %v373_v14  ;;  %v5808_v14 = vld [vmem:[%s7196_s1 + $0xa] sm:$0x3] }
  0x27   : > { %321 = vst.msk [vmem:[#allocation2 + $0xc1] sm:$0xff] %vm218_vm1, %v288_v4  ;;  %322 = vst.msk [vmem:[#allocation2 + $0xc9] sm:$0xff] %vm218_vm1, %v289_v5  ;;  %4964 = vmatpush3.msk.msra.mxu0 %vm502_vm0, %v4290_v3  ;;  %v1055_v3 = vld [vmem:[#allocation2 + $0x2] sm:$0xff]  ;;  %v1056_v5 = vld [vmem:[#allocation2 + $0xa] sm:$0xff] }
  0x28   : > { %307 = vst.msk [vmem:[#allocation2 + $0x19] sm:$0xff] %vm218_vm1, %v274_v6  ;;  %323 = vst.msk [vmem:[#allocation2 + $0xd9] sm:$0xff] %vm218_vm1, %v290_v7  ;;  %5063 = vmatprep.subr.msk.mxu0 %vm502_vm0, %v5596_v10  ;;  %v339_v6 = vld [vmem:[#allocation2] sm:$0xff] }
  0x29   : > { %308 = vst.msk [vmem:[#allocation2 + $0x21] sm:$0xff] %vm218_vm1, %v275_v8  ;;  %324 = vst.msk [vmem:[#allocation2 + $0xe1] sm:$0xff] %vm218_vm1, %v291_v9  ;;  %v5787_v8 = vld [vmem:[%s7196_s1 + $0xc] sm:$0x3] }
  0x2a   : > { %309 = vst.msk [vmem:[#allocation2 + $0x31] sm:$0xff] %vm218_vm1, %v276_v12  ;;  %325 = vst.msk [vmem:[#allocation2 + $0xf1] sm:$0xff] %vm218_vm1, %v292_v13  ;;  %v340_v9 = vld [vmem:[#allocation2 + $0x8] sm:$0xff] }
  0x2b   : > { %310 = vst.msk [vmem:[#allocation2 + $0x39] sm:$0xff] %vm218_vm1, %v277_v15  ;;  %326 = vst.msk [vmem:[#allocation2 + $0xf9] sm:$0xff] %vm218_vm1, %v293_v16  ;;  %v305_v15 = vld [vmem:[%s5582_s27 + $0xf8] sm:$0xff] }
  0x2c   : > { %311 = vst.msk [vmem:[#allocation2 + $0x49] sm:$0xff] %vm218_vm1, %v278_v17  ;;  %327 = vst.msk [vmem:[#allocation2 + $0x109] sm:$0xff] %vm218_vm1, %v294_v18 }
  0x2d   : > { %312 = vst.msk [vmem:[#allocation2 + $0x51] sm:$0xff] %vm218_vm1, %v279_v19  ;;  %328 = vst.msk [vmem:[#allocation2 + $0x111] sm:$0xff] %vm218_vm1, %v295_v20 }
  0x2e   : > { %313 = vst.msk [vmem:[#allocation2 + $0x61] sm:$0xff] %vm218_vm1, %v280_v21  ;;  %329 = vst.msk [vmem:[#allocation2 + $0x121] sm:$0xff] %vm218_vm1, %v296_v22  ;;  %v5635_v29 = vld [vmem:[#allocation2 + $0xc1] sm:$0xff]  ;;  %v5637_v30 = vld [vmem:[#allocation2 + $0xc9] sm:$0xff] }
  0x2f   : > { %314 = vst.msk [vmem:[#allocation2 + $0x69] sm:$0xff] %vm218_vm1, %v281_v23  ;;  %330 = vst.msk [vmem:[#allocation2 + $0x129] sm:$0xff] %vm218_vm1, %v297_v24  ;;  %v5639_v31 = vld [vmem:[#allocation2 + $0x19] sm:$0xff]  ;;  %4889 = vmatprep.mubr.msk.f32.mxu1 %vm218_vm1, %v5635_v29 }
  0x30   : > { %315 = vst.msk [vmem:[#allocation2 + $0x79] sm:$0xff] %vm218_vm1, %v282_v25  ;;  %331 = vst.msk [vmem:[#allocation2 + $0x139] sm:$0xff] %vm218_vm1, %v298_v26  ;;  %4868 = vmatprep.mubr.msk.f32.mxu0 %vm218_vm1, %v5639_v31  ;;  %v5648_v32 = vld [vmem:[#allocation2 + $0xd9] sm:$0xff]  ;;  %v5650_v33 = vld [vmem:[#allocation2 + $0x21] sm:$0xff]  ;;  %4890 = vmatmul.mubr.msk.f32.vlgmr.msra.gmra.mxu1 %vm218_vm1, %v5637_v30 }
  0x31   : > { %316 = vst.msk [vmem:[#allocation2 + $0x81] sm:$0xff] %vm218_vm1, %v283_v27  ;;  %332 = vst.msk [vmem:[#allocation2 + $0x141] sm:$0xff] %vm218_vm1, %v299_v28  ;;  %4869 = vmatmul.mubr.msk.f32.gmra.mxu0 %vm218_vm1, %v5650_v33  ;;  %v5661_v35 = vld [vmem:[#allocation2 + $0x31] sm:$0xff]  ;;  %4914 = vmatpush3.msk.msra.mxu1 %vm502_vm0, %v5544_v2  ;;  %v5668_v37 = vld [vmem:[#allocation2 + $0xe1] sm:$0xff] }
  0x32   : > { %4892 = vmatprep.mubr.msk.f32.mxu1 %vm218_vm1, %v5648_v32  ;;  %v5670_v38 = vld [vmem:[#allocation2 + $0x39] sm:$0xff]  ;;  %317 = vst.msk [vmem:[#allocation2 + $0x91] sm:$0xff] %vm218_vm1, %v284_v36  ;;  %4871 = vmatprep.mubr.msk.f32.mxu0 %vm218_vm1, %v5661_v35  ;;  %v5676_v40 = vld [vmem:[#allocation2 + $0xf1] sm:$0xff]  ;;  %333 = vst.msk [vmem:[#allocation2 + $0x151] sm:$0xff] %vm218_vm1, %v300_v39 }
  0x33   : > { %v5678_v41 = vld [vmem:[#allocation2 + $0x49] sm:$0xff]  ;;  %5013 = vmatprep.subr.msk.mxu1 %vm502_vm0, %v5655_v34  ;;  %v5687_v42 = vld [vmem:[#allocation2 + $0xf9] sm:$0xff]  ;;  %318 = vst.msk [vmem:[#allocation2 + $0x99] sm:$0xff] %vm218_vm1, %v285_v46  ;;  %334 = vst.msk [vmem:[#allocation2 + $0x159] sm:$0xff] %vm218_vm1, %v301_v47 }
  0x34   : > { %4893 = vmatmul.mubr.msk.f32.gmra.mxu1 %vm218_vm1, %v5668_v37  ;;  %v5693_v43 = vld [vmem:[#allocation2 + $0x109] sm:$0xff]  ;;  %v5695_v44 = vld [vmem:[#allocation2 + $0x51] sm:$0xff]  ;;  %319 = vst.msk [vmem:[#allocation2 + $0xa9] sm:$0xff] %vm218_vm1, %v286_v48  ;;  %335 = vst.msk [vmem:[#allocation2 + $0x169] sm:$0xff] %vm218_vm1, %v302_v49 }
  0x35   : > { %4872 = vmatmul.mubr.msk.f32.gmra.mxu0 %vm218_vm1, %v5670_v38  ;;  %4895 = vmatprep.mubr.msk.f32.mxu1 %vm218_vm1, %v5676_v40  ;;  %v5697_v45 = vld [vmem:[#allocation2 + $0x61] sm:$0xff]  ;;  %320 = vst.msk [vmem:[#allocation2 + $0xb1] sm:$0xff] %vm218_vm1, %v287_v50  ;;  %336 = vst.msk [vmem:[#allocation2 + $0x171] sm:$0xff] %vm218_vm1, %v303_v51  ;;  %v5717_v52 = vld [vmem:[#allocation2 + $0x111] sm:$0xff] }
  0x36   : > { %4874 = vmatprep.mubr.msk.f32.mxu0 %vm218_vm1, %v5678_v41  ;;  %v5721_v53 = vld [vmem:[#allocation2 + $0x69] sm:$0xff]  ;;  %v5723_v54 = vld [vmem:[#allocation2 + $0x121] sm:$0xff]  ;;  %v5797_v12 = vld [vmem:[#allocation2 + $0x18] sm:$0xff]  ;;  %338 = vst.msk [vmem:[#allocation2 + $0x189] sm:$0xff] %vm218_vm1, %v305_v15 }
  0x37   : > { %v5725_v55 = vld [vmem:[#allocation2 + $0x79] sm:$0xff]  ;;  %v5733_v56 = vld [vmem:[#allocation2 + $0x129] sm:$0xff] }
  0x38   : > { %4896 = vmatmul.mubr.msk.f32.gmra.mxu1 %vm218_vm1, %v5687_v42  ;;  %v5737_v57 = vld [vmem:[#allocation2 + $0x81] sm:$0xff]  ;;  %v5739_v58 = vld [vmem:[#allocation2 + $0x139] sm:$0xff]  ;;  %v5825_v18 = vld [vmem:[#allocation2 + $0x30] sm:$0xff] }
  0x39   : > { %4875 = vmatmul.mubr.msk.f32.gmra.mxu0 %vm218_vm1, %v5695_v44  ;;  %4898 = vmatprep.mubr.msk.f32.mxu1 %vm218_vm1, %v5693_v43  ;;  %v5741_v59 = vld [vmem:[#allocation2 + $0x91] sm:$0xff]  ;;  %v5749_v60 = vld [vmem:[#allocation2 + $0x141] sm:$0xff] }
  0x3a   : > { %4877 = vmatprep.mubr.msk.f32.mxu0 %vm218_vm1, %v5697_v45  ;;  %v5753_v61 = vld [vmem:[#allocation2 + $0x99] sm:$0xff]  ;;  %v5755_v62 = vld [vmem:[#allocation2 + $0x151] sm:$0xff]  ;;  %v5795_v11 = vld [vmem:[#allocation2 + $0x22] sm:$0xff] }
  0x3b   : > { %v5757_v63 = vld [vmem:[#allocation2 + $0xa9] sm:$0xff]  ;;  %v5765_v0 = vld [vmem:[#allocation2 + $0x159] sm:$0xff]  ;;  %7258 = vst [vmem:[#allocation4_spill] sm:$0xff] %v5795_v11 }
  0x3c   : > { %4899 = vmatmul.mubr.msk.f32.gmra.mxu1 %vm218_vm1, %v5717_v52  ;;  %v5769_v1 = vld [vmem:[#allocation2 + $0xb1] sm:$0xff]  ;;  %v5771_v2 = vld [vmem:[#allocation2 + $0x169] sm:$0xff]  ;;  %v5782_v7 = vld [vmem:[#allocation2 + $0x1a] sm:$0xff] }
  0x3d   : > { %4878 = vmatmul.mubr.msk.f32.gmra.mxu0 %vm218_vm1, %v5721_v53  ;;  %4901 = vmatprep.mubr.msk.f32.mxu1 %vm218_vm1, %v5723_v54  ;;  %v5779_v4 = vld [vmem:[#allocation2 + $0x171] sm:$0xff]  ;;  %7257 = vst [vmem:[#allocation3_spill] sm:$0xff] %v5782_v7  ;;  %v5819_v16 = vld [vmem:[#allocation2 + $0x20] sm:$0xff]  ;;  %v5845_v22 = vld [vmem:[#allocation2 + $0x48] sm:$0xff] }
  0x3e   : > { %4880 = vmatprep.mubr.msk.f32.mxu0 %vm218_vm1, %v5725_v55  ;;  %v5803_v13 = vld [vmem:[#allocation2 + $0x32] sm:$0xff]  ;;  %v5821_v17 = vld [vmem:[#allocation2 + $0x3a] sm:$0xff]  ;;  %v5829_v19 = vld [vmem:[#allocation2 + $0x4a] sm:$0xff] }
  0x3f   : > { %7259 = vst [vmem:[#allocation5_spill] sm:$0xff] %v5803_v13  ;;  %7260 = vst [vmem:[#allocation6_spill] sm:$0xff] %v5821_v17  ;;  %v5839_v20 = vld [vmem:[#allocation2 + $0x38] sm:$0xff]  ;;  %v5847_v23 = vld [vmem:[#allocation2 + $0x62] sm:$0xff] }
  0x40   : > { %4902 = vmatmul.mubr.msk.f32.gmra.mxu1 %vm218_vm1, %v5733_v56  ;;  %7261 = vst [vmem:[#allocation7_spill] sm:$0xff] %v5829_v19  ;;  %v5843_v21 = vld [vmem:[#allocation2 + $0x52] sm:$0xff]  ;;  %7263 = vst [vmem:[#allocation9_spill] sm:$0xff] %v5847_v23  ;;  %v5859_v25 = vld [vmem:[#allocation2 + $0x6a] sm:$0xff] }
  0x41   : > { %4881 = vmatmul.mubr.msk.f32.gmra.mxu0 %vm218_vm1, %v5737_v57  ;;  %4904 = vmatprep.mubr.msk.f32.mxu1 %vm218_vm1, %v5739_v58  ;;  %7262 = vst [vmem:[#allocation8_spill] sm:$0xff] %v5843_v21  ;;  %v5855_v24 = vld [vmem:[#allocation2 + $0x50] sm:$0xff]  ;;  %7264 = vst [vmem:[#allocation10_spill] sm:$0xff] %v5859_v25  ;;  %v5861_v26 = vld [vmem:[#allocation2 + $0x60] sm:$0xff] }
  0x42   : > { %4883 = vmatprep.mubr.msk.f32.mxu0 %vm218_vm1, %v5741_v59  ;;  %v5863_v27 = vld [vmem:[#allocation2 + $0x7a] sm:$0xff]  ;;  %v5871_v28 = vld [vmem:[#allocation2 + $0x68] sm:$0xff]  ;;  %v5879_v39 = vld [vmem:[#allocation2 + $0x92] sm:$0xff] }
  0x43   : > { %7265 = vst [vmem:[#allocation11_spill] sm:$0xff] %v5863_v27  ;;  %v5877_v36 = vld [vmem:[#allocation2 + $0x78] sm:$0xff]  ;;  %7267 = vst [vmem:[#allocation13_spill] sm:$0xff] %v5879_v39  ;;  %v5887_v46 = vld [vmem:[#allocation2 + $0x80] sm:$0xff] }
  0x44   : > { %4905 = vmatmul.mubr.msk.f32.gmra.mxu1 %vm218_vm1, %v5749_v60  ;;  %v5891_v47 = vld [vmem:[#allocation2 + $0x9a] sm:$0xff]  ;;  %v5893_v48 = vld [vmem:[#allocation2 + $0x90] sm:$0xff] }
  0x45   : > { %4884 = vmatmul.mubr.msk.f32.gmra.mxu0 %vm218_vm1, %v5753_v61  ;;  %4907 = vmatprep.mubr.msk.f32.mxu1 %vm218_vm1, %v5755_v62  ;;  %7268 = vst [vmem:[#allocation14_spill] sm:$0xff] %v5891_v47  ;;  %v5895_v49 = vld [vmem:[#allocation2 + $0xaa] sm:$0xff]  ;;  %v5903_v50 = vld [vmem:[#allocation2 + $0x98] sm:$0xff] }
  0x46   : > { %4886 = vmatprep.mubr.msk.f32.mxu0 %vm218_vm1, %v5757_v63  ;;  %7269 = vst [vmem:[#allocation15_spill] sm:$0xff] %v5895_v49  ;;  %v5907_v51 = vld [vmem:[#allocation2 + $0xb2] sm:$0xff]  ;;  %v5927_v15 = vld [vmem:[#allocation2 + $0xda] sm:$0xff] }
  0x47   : > { %7270 = vst [vmem:[#allocation16_spill] sm:$0xff] %v5907_v51  ;;  %7273 = vst [vmem:[#allocation19_spill] sm:$0xff] %v5927_v15 }
  0x48   : > { %4908 = vmatmul.mubr.msk.f32.gmra.mxu1 %vm218_vm1, %v5765_v0 }
  0x49   : > { %4887 = vmatmul.mubr.msk.f32.gmra.mxu0 %vm218_vm1, %v5769_v1  ;;  %4910 = vmatprep.mubr.msk.f32.mxu1 %vm218_vm1, %v5771_v2 }
  0x4a   : > { %4965 = vmatprep.mubr.msk.f32.mxu0 %vm218_vm1, %v1055_v3  ;;  %v5909_v3 = vld [vmem:[#allocation2 + $0xa8] sm:$0xff] }
  0x4c   : > { %4911 = vmatmul.mubr.msk.f32.gmra.mxu1 %vm218_vm1, %v5779_v4 }
  0x4d   : > { %4966 = vmatmul.mubr.msk.f32.vlgmr.msra.gmra.mxu0 %vm218_vm1, %v1056_v5  ;;  %4915 = vmatprep.mubr.msk.f32.mxu1 %vm218_vm1, %v339_v6  ;;  %v5911_v5 = vld [vmem:[#allocation2 + $0xc2] sm:$0xff]  ;;  %v5919_v6 = vld [vmem:[#allocation2 + $0xb0] sm:$0xff] }
  0x4e   : > { %5064 = vmatpush3.msk.msra.mxu0 %vm502_vm0, %v5596_v10  ;;  %4968 = vmatprep.mubr.msk.f32.mxu0 %vm218_vm1, %v5782_v7  ;;  %v304_v10 = vld [vmem:[%s5582_s27 + $0xf0] sm:$0xff]  ;;  %7271 = vst [vmem:[#allocation17_spill] sm:$0xff] %v5911_v5  ;;  %v6037_v7 = vld [vmem:[#allocation2 + $0x168] sm:$0xff] }
  0x4f   : > { %5163 = vmatprep.subr.msk.mxu0 %vm502_vm0, %v5787_v8  ;;  %337 = vst.msk [vmem:[#allocation2 + $0x181] sm:$0xff] %vm218_vm1, %v304_v10  ;;  %v5925_v10 = vld [vmem:[#allocation2 + $0xc0] sm:$0xff] }
  0x50   : > { %4916 = vmatmul.mubr.msk.f32.vlgmr.msra.gmra.mxu1 %vm218_vm1, %v340_v9  ;;  %v5923_v9 = vld [vmem:[#allocation2 + $0xca] sm:$0xff] }
  0x51   : > { %4969 = vmatmul.mubr.msk.f32.gmra.mxu0 %vm218_vm1, %v5795_v11  ;;  %5014 = vmatpush3.msk.msra.mxu1 %vm502_vm0, %v5655_v34  ;;  %v5875_v34 = vld [vmem:[#allocation2 + $0x82] sm:$0xff]  ;;  %7272 = vst [vmem:[#allocation18_spill] sm:$0xff] %v5923_v9  ;;  %v6023_v11 = vld [vmem:[#allocation2 + $0x16a] sm:$0xff] }
  0x52   : > { %4918 = vmatprep.mubr.msk.f32.mxu1 %vm218_vm1, %v5797_v12  ;;  %4971 = vmatprep.mubr.msk.f32.mxu0 %vm218_vm1, %v5803_v13  ;;  %7266 = vst [vmem:[#allocation12_spill] sm:$0xff] %v5875_v34  ;;  %v6021_v13 = vld [vmem:[#allocation2 + $0x150] sm:$0xff]  ;;  %7285 = vst [vmem:[#allocation31_spill] sm:$0xff] %v6023_v11 }
  0x53   : > { %5113 = vmatprep.subr.msk.mxu1 %vm502_vm0, %v5808_v14 }
  0x54   : > { %4919 = vmatmul.mubr.msk.f32.gmra.mxu1 %vm218_vm1, %v5819_v16 }
  0x55   : > { %4972 = vmatmul.mubr.msk.f32.gmra.mxu0 %vm218_vm1, %v5821_v17  ;;  %4921 = vmatprep.mubr.msk.f32.mxu1 %vm218_vm1, %v5825_v18  ;;  %v6007_v17 = vld [vmem:[#allocation2 + $0x152] sm:$0xff] }
  0x56   : > { %4974 = vmatprep.mubr.msk.f32.mxu0 %vm218_vm1, %v5829_v19  ;;  %v6005_v19 = vld [vmem:[#allocation2 + $0x138] sm:$0xff]  ;;  %7283 = vst [vmem:[#allocation29_spill] sm:$0xff] %v6007_v17 }
  0x58   : > { %4922 = vmatmul.mubr.msk.f32.gmra.mxu1 %vm218_vm1, %v5839_v20 }
  0x59   : > { %4975 = vmatmul.mubr.msk.f32.gmra.mxu0 %vm218_vm1, %v5843_v21  ;;  %4924 = vmatprep.mubr.msk.f32.mxu1 %vm218_vm1, %v5845_v22  ;;  %v5991_v21 = vld [vmem:[#allocation2 + $0x13a] sm:$0xff] }
  0x5a   : > { %4977 = vmatprep.mubr.msk.f32.mxu0 %vm218_vm1, %v5847_v23  ;;  %v5989_v23 = vld [vmem:[#allocation2 + $0x120] sm:$0xff]  ;;  %7281 = vst [vmem:[#allocation27_spill] sm:$0xff] %v5991_v21 }
  0x5c   : > { %4925 = vmatmul.mubr.msk.f32.gmra.mxu1 %vm218_vm1, %v5855_v24 }
  0x5d   : > { %4978 = vmatmul.mubr.msk.f32.gmra.mxu0 %vm218_vm1, %v5859_v25  ;;  %4927 = vmatprep.mubr.msk.f32.mxu1 %vm218_vm1, %v5861_v26  ;;  %v5975_v25 = vld [vmem:[#allocation2 + $0x122] sm:$0xff] }
  0x5e   : > { %4980 = vmatprep.mubr.msk.f32.mxu0 %vm218_vm1, %v5863_v27  ;;  %v5973_v27 = vld [vmem:[#allocation2 + $0x108] sm:$0xff]  ;;  %7279 = vst [vmem:[#allocation25_spill] sm:$0xff] %v5975_v25 }
  0x60   : > { %4928 = vmatmul.mubr.msk.f32.gmra.mxu1 %vm218_vm1, %v5871_v28 }
  0x61   : > { %4981 = vmatmul.mubr.msk.f32.gmra.mxu0 %vm218_vm1, %v5875_v34  ;;  %4930 = vmatprep.mubr.msk.f32.mxu1 %vm218_vm1, %v5877_v36  ;;  %v5959_v34 = vld [vmem:[#allocation2 + $0x10a] sm:$0xff] }
  0x62   : > { %4983 = vmatprep.mubr.msk.f32.mxu0 %vm218_vm1, %v5879_v39  ;;  %v5957_v39 = vld [vmem:[#allocation2 + $0xf0] sm:$0xff]  ;;  %7277 = vst [vmem:[#allocation23_spill] sm:$0xff] %v5959_v34 }
  0x64   : > { %4931 = vmatmul.mubr.msk.f32.gmra.mxu1 %vm218_vm1, %v5887_v46 }
  0x65   : > { %4984 = vmatmul.mubr.msk.f32.gmra.mxu0 %vm218_vm1, %v5891_v47  ;;  %4933 = vmatprep.mubr.msk.f32.mxu1 %vm218_vm1, %v5893_v48  ;;  %v5943_v47 = vld [vmem:[#allocation2 + $0xf2] sm:$0xff] }
  0x66   : > { %4986 = vmatprep.mubr.msk.f32.mxu0 %vm218_vm1, %v5895_v49  ;;  %v5941_v49 = vld [vmem:[#allocation2 + $0xd8] sm:$0xff]  ;;  %7275 = vst [vmem:[#allocation21_spill] sm:$0xff] %v5943_v47 }
  0x68   : > { %4934 = vmatmul.mubr.msk.f32.gmra.mxu1 %vm218_vm1, %v5903_v50 }
  0x69   : > { %4987 = vmatmul.mubr.msk.f32.gmra.mxu0 %vm218_vm1, %v5907_v51  ;;  %4936 = vmatprep.mubr.msk.f32.mxu1 %vm218_vm1, %v5909_v3  ;;  %v5935_v51 = vld [vmem:[#allocation2 + $0xc8] sm:$0xff] }
  0x6a   : > { %4989 = vmatprep.mubr.msk.f32.mxu0 %vm218_vm1, %v5911_v5  ;;  %v5939_v5 = vld [vmem:[#allocation2 + $0xe2] sm:$0xff] }
  0x6b   : > { %7274 = vst [vmem:[#allocation20_spill] sm:$0xff] %v5939_v5 }
  0x6c   : > { %4937 = vmatmul.mubr.msk.f32.gmra.mxu1 %vm218_vm1, %v5919_v6 }
  0x6d   : > { %4990 = vmatmul.mubr.msk.f32.gmra.mxu0 %vm218_vm1, %v5923_v9  ;;  %4939 = vmatprep.mubr.msk.f32.mxu1 %vm218_vm1, %v5925_v10  ;;  %v5951_v9 = vld [vmem:[#allocation2 + $0xe0] sm:$0xff] }
  0x6e   : > { %4992 = vmatprep.mubr.msk.f32.mxu0 %vm218_vm1, %v5927_v15  ;;  %v5955_v15 = vld [vmem:[#allocation2 + $0xfa] sm:$0xff] }
  0x6f   : > { %7276 = vst [vmem:[#allocation22_spill] sm:$0xff] %v5955_v15 }
  0x70   : > { %4940 = vmatmul.mubr.msk.f32.gmra.mxu1 %vm218_vm1, %v5935_v51 }
  0x71   : > { %4993 = vmatmul.mubr.msk.f32.gmra.mxu0 %vm218_vm1, %v5939_v5  ;;  %4942 = vmatprep.mubr.msk.f32.mxu1 %vm218_vm1, %v5941_v49  ;;  %v5967_v5 = vld [vmem:[#allocation2 + $0xf8] sm:$0xff] }
  0x72   : > { %4995 = vmatprep.mubr.msk.f32.mxu0 %vm218_vm1, %v5943_v47  ;;  %v5971_v47 = vld [vmem:[#allocation2 + $0x112] sm:$0xff] }
  0x73   : > { %7278 = vst [vmem:[#allocation24_spill] sm:$0xff] %v5971_v47 }
  0x74   : > { %4943 = vmatmul.mubr.msk.f32.gmra.mxu1 %vm218_vm1, %v5951_v9 }
  0x75   : > { %4996 = vmatmul.mubr.msk.f32.gmra.mxu0 %vm218_vm1, %v5955_v15  ;;  %4945 = vmatprep.mubr.msk.f32.mxu1 %vm218_vm1, %v5957_v39  ;;  %v5983_v15 = vld [vmem:[#allocation2 + $0x110] sm:$0xff] }
  0x76   : > { %4998 = vmatprep.mubr.msk.f32.mxu0 %vm218_vm1, %v5959_v34  ;;  %v5987_v34 = vld [vmem:[#allocation2 + $0x12a] sm:$0xff] }
  0x77   : > { %7280 = vst [vmem:[#allocation26_spill] sm:$0xff] %v5987_v34 }
  0x78   : > { %4946 = vmatmul.mubr.msk.f32.gmra.mxu1 %vm218_vm1, %v5967_v5 }
  0x79   : > { %4999 = vmatmul.mubr.msk.f32.gmra.mxu0 %vm218_vm1, %v5971_v47  ;;  %4948 = vmatprep.mubr.msk.f32.mxu1 %vm218_vm1, %v5973_v27  ;;  %v5999_v47 = vld [vmem:[#allocation2 + $0x128] sm:$0xff] }
  0x7a   : > { %5001 = vmatprep.mubr.msk.f32.mxu0 %vm218_vm1, %v5975_v25  ;;  %v6003_v25 = vld [vmem:[#allocation2 + $0x142] sm:$0xff] }
  0x7b   : > { %7282 = vst [vmem:[#allocation28_spill] sm:$0xff] %v6003_v25 }
  0x7c   : > { %4949 = vmatmul.mubr.msk.f32.gmra.mxu1 %vm218_vm1, %v5983_v15 }
  0x7d   : > { %5002 = vmatmul.mubr.msk.f32.gmra.mxu0 %vm218_vm1, %v5987_v34  ;;  %4951 = vmatprep.mubr.msk.f32.mxu1 %vm218_vm1, %v5989_v23  ;;  %v6015_v34 = vld [vmem:[#allocation2 + $0x140] sm:$0xff] }
  0x7e   : > { %5004 = vmatprep.mubr.msk.f32.mxu0 %vm218_vm1, %v5991_v21  ;;  %v6019_v21 = vld [vmem:[#allocation2 + $0x15a] sm:$0xff] }
  0x7f   : > { %7284 = vst [vmem:[#allocation30_spill] sm:$0xff] %v6019_v21 }
  0x80   : > { %4952 = vmatmul.mubr.msk.f32.gmra.mxu1 %vm218_vm1, %v5999_v47 }
  0x81   : > { %5005 = vmatmul.mubr.msk.f32.gmra.mxu0 %vm218_vm1, %v6003_v25  ;;  %4954 = vmatprep.mubr.msk.f32.mxu1 %vm218_vm1, %v6005_v19  ;;  %v6031_v25 = vld [vmem:[#allocation2 + $0x158] sm:$0xff] }
  0x82   : > { %5007 = vmatprep.mubr.msk.f32.mxu0 %vm218_vm1, %v6007_v17  ;;  %v6035_v17 = vld [vmem:[#allocation2 + $0x172] sm:$0xff] }
  0x84   : > { %4955 = vmatmul.mubr.msk.f32.gmra.mxu1 %vm218_vm1, %v6015_v34 }
  0x85   : > { %5008 = vmatmul.mubr.msk.f32.gmra.mxu0 %vm218_vm1, %v6019_v21  ;;  %4957 = vmatprep.mubr.msk.f32.mxu1 %vm218_vm1, %v6021_v13  ;;  %v6045_v21 = vld [vmem:[#allocation2 + $0x170] sm:$0xff] }
  0x86   : > { %5010 = vmatprep.mubr.msk.f32.mxu0 %vm218_vm1, %v6023_v11  ;;  %v6052_v11 = vld [vmem:[%s7196_s1 + $0x10] sm:$0x3] }
  0x88   : > { %4958 = vmatmul.mubr.msk.f32.gmra.mxu1 %vm218_vm1, %v6031_v25 }
  0x89   : > { %5011 = vmatmul.mubr.msk.f32.gmra.mxu0 %vm218_vm1, %v6035_v17  ;;  %4960 = vmatprep.mubr.msk.f32.mxu1 %vm218_vm1, %v6037_v7 }
  0x8a   : > { %5065 = vmatprep.mubr.msk.f32.mxu0 %vm218_vm1, %v5639_v31  ;;  %v6069_v31 = vld [vmem:[%s7196_s1 + $0xe] sm:$0x3] }
  0x8c   : > { %4961 = vmatmul.mubr.msk.f32.gmra.mxu1 %vm218_vm1, %v6045_v21 }
  0x8d   : > { %5066 = vmatmul.mubr.msk.f32.vlgmr.msra.gmra.mxu0 %vm218_vm1, %v5650_v33  ;;  %5015 = vmatprep.mubr.msk.f32.mxu1 %vm218_vm1, %v5797_v12  ;;  %v6199_v33 = vld [vmem:[#allocation2 + $0x188] sm:$0xff] }
  0x8e   : > { %5164 = vmatpush3.msk.msra.mxu0 %vm502_vm0, %v5787_v8  ;;  %5068 = vmatprep.mubr.msk.f32.mxu0 %vm218_vm1, %v5661_v35  ;;  %v7288_v35 = vld [vmem:[#allocation3_spill] sm:$0xff] }
  0x8f   : > { %5263 = vmatprep.subr.msk.mxu0 %vm502_vm0, %v6052_v11 }
  0x90   : > { %5016 = vmatmul.mubr.msk.f32.vlgmr.msra.gmra.mxu1 %vm218_vm1, %v5819_v16 }
  0x91   : > { %5069 = vmatmul.mubr.msk.f32.gmra.mxu0 %vm218_vm1, %v5670_v38  ;;  %5114 = vmatpush3.msk.msra.mxu1 %vm502_vm0, %v5808_v14  ;;  %v7290_v38 = vld [vmem:[#allocation5_spill] sm:$0xff]  ;;  %v7308_v14 = vld [vmem:[#allocation23_spill] sm:$0xff] }
  0x92   : > { %5018 = vmatprep.mubr.msk.f32.mxu1 %vm218_vm1, %v5825_v18  ;;  %5071 = vmatprep.mubr.msk.f32.mxu0 %vm218_vm1, %v5678_v41  ;;  %v7292_v41 = vld [vmem:[#allocation7_spill] sm:$0xff] }
  0x93   : > { %5213 = vmatprep.subr.msk.mxu1 %vm502_vm0, %v6069_v31 }
  0x94   : > { %5019 = vmatmul.mubr.msk.f32.gmra.mxu1 %vm218_vm1, %v5839_v20 }
  0x95   : > { %5072 = vmatmul.mubr.msk.f32.gmra.mxu0 %vm218_vm1, %v5695_v44  ;;  %5021 = vmatprep.mubr.msk.f32.mxu1 %vm218_vm1, %v5845_v22  ;;  %v7295_v44 = vld [vmem:[#allocation10_spill] sm:$0xff] }
  0x96   : > { %5074 = vmatprep.mubr.msk.f32.mxu0 %vm218_vm1, %v5697_v45  ;;  %v7296_v45 = vld [vmem:[#allocation11_spill] sm:$0xff] }
  0x98   : > { %5022 = vmatmul.mubr.msk.f32.gmra.mxu1 %vm218_vm1, %v5855_v24 }
  0x99   : > { %5075 = vmatmul.mubr.msk.f32.gmra.mxu0 %vm218_vm1, %v5721_v53  ;;  %5024 = vmatprep.mubr.msk.f32.mxu1 %vm218_vm1, %v5861_v26  ;;  %v7298_v53 = vld [vmem:[#allocation13_spill] sm:$0xff] }
  0x9a   : > { %5077 = vmatprep.mubr.msk.f32.mxu0 %vm218_vm1, %v5725_v55  ;;  %v7300_v55 = vld [vmem:[#allocation15_spill] sm:$0xff] }
  0x9c   : > { %5025 = vmatmul.mubr.msk.f32.gmra.mxu1 %vm218_vm1, %v5871_v28 }
  0x9d   : > { %5078 = vmatmul.mubr.msk.f32.gmra.mxu0 %vm218_vm1, %v5737_v57  ;;  %5027 = vmatprep.mubr.msk.f32.mxu1 %vm218_vm1, %v5877_v36  ;;  %v7302_v57 = vld [vmem:[#allocation17_spill] sm:$0xff] }
  0x9e   : > { %5080 = vmatprep.mubr.msk.f32.mxu0 %vm218_vm1, %v5741_v59  ;;  %v7303_v59 = vld [vmem:[#allocation18_spill] sm:$0xff] }
  0xa0   : > { %5028 = vmatmul.mubr.msk.f32.gmra.mxu1 %vm218_vm1, %v5887_v46 }
  0xa1   : > { %5081 = vmatmul.mubr.msk.f32.gmra.mxu0 %vm218_vm1, %v5753_v61  ;;  %5030 = vmatprep.mubr.msk.f32.mxu1 %vm218_vm1, %v5893_v48  ;;  %v7304_v61 = vld [vmem:[#allocation19_spill] sm:$0xff] }
  0xa2   : > { %5083 = vmatprep.mubr.msk.f32.mxu0 %vm218_vm1, %v5757_v63  ;;  %v7305_v63 = vld [vmem:[#allocation20_spill] sm:$0xff] }
  0xa4   : > { %5031 = vmatmul.mubr.msk.f32.gmra.mxu1 %vm218_vm1, %v5903_v50 }
  0xa5   : > { %5084 = vmatmul.mubr.msk.f32.gmra.mxu0 %vm218_vm1, %v5769_v1  ;;  %5033 = vmatprep.mubr.msk.f32.mxu1 %vm218_vm1, %v5909_v3  ;;  %v7306_v1 = vld [vmem:[#allocation21_spill] sm:$0xff] }
  0xa6   : > { %5086 = vmatprep.mubr.msk.f32.mxu0 %vm218_vm1, %v5635_v29  ;;  %v6179_v29 = vld [vmem:[#allocation2 + $0x181] sm:$0xff] }
  0xa7   : > { %7286 = vst [vmem:[#allocation32_spill] sm:$0xff] %v6179_v29 }
  0xa8   : > { %5034 = vmatmul.mubr.msk.f32.gmra.mxu1 %vm218_vm1, %v5919_v6 }
  0xa9   : > { %5087 = vmatmul.mubr.msk.f32.gmra.mxu0 %vm218_vm1, %v5637_v30  ;;  %5036 = vmatprep.mubr.msk.f32.mxu1 %vm218_vm1, %v5925_v10  ;;  %v6189_v30 = vld [vmem:[#allocation2 + $0x189] sm:$0xff] }
  0xaa   : > { %5089 = vmatprep.mubr.msk.f32.mxu0 %vm218_vm1, %v5648_v32  ;;  %7287 = vst [vmem:[#allocation33_spill] sm:$0xff] %v6189_v30  ;;  %v6191_v32 = vld [vmem:[#allocation2 + $0x180] sm:$0xff] }
  0xac   : > { %5037 = vmatmul.mubr.msk.f32.gmra.mxu1 %vm218_vm1, %v5935_v51 }
  0xad   : > { %5090 = vmatmul.mubr.msk.f32.gmra.mxu0 %vm218_vm1, %v5668_v37  ;;  %5039 = vmatprep.mubr.msk.f32.mxu1 %vm218_vm1, %v5941_v49  ;;  %v7289_v37 = vld [vmem:[#allocation4_spill] sm:$0xff] }
  0xae   : > { %5092 = vmatprep.mubr.msk.f32.mxu0 %vm218_vm1, %v5676_v40  ;;  %v7291_v40 = vld [vmem:[#allocation6_spill] sm:$0xff] }
  0xb0   : > { %5040 = vmatmul.mubr.msk.f32.gmra.mxu1 %vm218_vm1, %v5951_v9 }
  0xb1   : > { %5093 = vmatmul.mubr.msk.f32.gmra.mxu0 %vm218_vm1, %v5687_v42  ;;  %5042 = vmatprep.mubr.msk.f32.mxu1 %vm218_vm1, %v5957_v39  ;;  %v7293_v42 = vld [vmem:[#allocation8_spill] sm:$0xff] }
  0xb2   : > { %5095 = vmatprep.mubr.msk.f32.mxu0 %vm218_vm1, %v5693_v43  ;;  %v7294_v43 = vld [vmem:[#allocation9_spill] sm:$0xff] }
  0xb4   : > { %5043 = vmatmul.mubr.msk.f32.gmra.mxu1 %vm218_vm1, %v5967_v5 }
  0xb5   : > { %5096 = vmatmul.mubr.msk.f32.gmra.mxu0 %vm218_vm1, %v5717_v52  ;;  %5045 = vmatprep.mubr.msk.f32.mxu1 %vm218_vm1, %v5973_v27  ;;  %v7297_v52 = vld [vmem:[#allocation12_spill] sm:$0xff] }
  0xb6   : > { %5098 = vmatprep.mubr.msk.f32.mxu0 %vm218_vm1, %v5723_v54  ;;  %v7299_v54 = vld [vmem:[#allocation14_spill] sm:$0xff] }
  0xb8   : > { %5046 = vmatmul.mubr.msk.f32.gmra.mxu1 %vm218_vm1, %v5983_v15 }
  0xb9   : > { %5099 = vmatmul.mubr.msk.f32.gmra.mxu0 %vm218_vm1, %v5733_v56  ;;  %5048 = vmatprep.mubr.msk.f32.mxu1 %vm218_vm1, %v5989_v23  ;;  %v7301_v56 = vld [vmem:[#allocation16_spill] sm:$0xff] }
  0xba   : > { %5101 = vmatprep.mubr.msk.f32.mxu0 %vm218_vm1, %v5739_v58 }
  0xbc   : > { %5049 = vmatmul.mubr.msk.f32.gmra.mxu1 %vm218_vm1, %v5999_v47 }
  0xbd   : > { %5102 = vmatmul.mubr.msk.f32.gmra.mxu0 %vm218_vm1, %v5749_v60  ;;  %5051 = vmatprep.mubr.msk.f32.mxu1 %vm218_vm1, %v6005_v19 }
  0xbe   : > { %5104 = vmatprep.mubr.msk.f32.mxu0 %vm218_vm1, %v5755_v62 }
  0xc0   : > { %5052 = vmatmul.mubr.msk.f32.gmra.mxu1 %vm218_vm1, %v6015_v34 }
  0xc1   : > { %5105 = vmatmul.mubr.msk.f32.gmra.mxu0 %vm218_vm1, %v5765_v0  ;;  %5054 = vmatprep.mubr.msk.f32.mxu1 %vm218_vm1, %v6021_v13 }
  0xc2   : > { %5107 = vmatprep.mubr.msk.f32.mxu0 %vm218_vm1, %v5771_v2 }
  0xc4   : > { %5055 = vmatmul.mubr.msk.f32.gmra.mxu1 %vm218_vm1, %v6031_v25 }
  0xc5   : > { %5108 = vmatmul.mubr.msk.f32.gmra.mxu0 %vm218_vm1, %v5779_v4  ;;  %5057 = vmatprep.mubr.msk.f32.mxu1 %vm218_vm1, %v6037_v7 }
  0xc6   : > { %5110 = vmatprep.mubr.msk.f32.mxu0 %vm218_vm1, %v6179_v29 }
  0xc8   : > { %5058 = vmatmul.mubr.msk.f32.gmra.mxu1 %vm218_vm1, %v6045_v21 }
  0xc9   : > { %5111 = vmatmul.mubr.msk.f32.gmra.mxu0 %vm218_vm1, %v6189_v30  ;;  %5060 = vmatprep.mubr.msk.f32.mxu1 %vm218_vm1, %v6191_v32 }
  0xca   : > { %5165 = vmatprep.mubr.msk.f32.mxu0 %vm218_vm1, %v5825_v18 }
  0xcc   : > { %5061 = vmatmul.mubr.msk.f32.gmra.mxu1 %vm218_vm1, %v6199_v33 }
  0xcd   : > { %5166 = vmatmul.mubr.msk.f32.vlgmr.msra.gmra.mxu0 %vm218_vm1, %v5839_v20  ;;  %5115 = vmatprep.mubr.msk.f32.mxu1 %vm218_vm1, %v7288_v35 }
  0xce   : > { %5264 = vmatpush3.msk.msra.mxu0 %vm502_vm0, %v6052_v11  ;;  %5168 = vmatprep.mubr.msk.f32.mxu0 %vm218_vm1, %v5845_v22  ;;  %v7307_v11 = vld [vmem:[#allocation22_spill] sm:$0xff]  ;;  %v7309_v22 = vld [vmem:[#allocation24_spill] sm:$0xff] }
  0xd0   : > { %5116 = vmatmul.mubr.msk.f32.vlgmr.msra.gmra.mxu1 %vm218_vm1, %v7289_v37 }
  0xd1   : > { %5169 = vmatmul.mubr.msk.f32.gmra.mxu0 %vm218_vm1, %v5855_v24  ;;  %5214 = vmatpush3.msk.msra.mxu1 %vm502_vm0, %v6069_v31  ;;  %v7310_v24 = vld [vmem:[#allocation25_spill] sm:$0xff] }
  0xd2   : > { %5118 = vmatprep.mubr.msk.f32.mxu1 %vm218_vm1, %v7290_v38  ;;  %5171 = vmatprep.mubr.msk.f32.mxu0 %vm218_vm1, %v5861_v26 }
  0xd4   : > { %5119 = vmatmul.mubr.msk.f32.gmra.mxu1 %vm218_vm1, %v7291_v40 }
  0xd5   : > { %5172 = vmatmul.mubr.msk.f32.gmra.mxu0 %vm218_vm1, %v5871_v28  ;;  %5121 = vmatprep.mubr.msk.f32.mxu1 %vm218_vm1, %v7292_v41  ;;  %v7311_v28 = vld [vmem:[#allocation26_spill] sm:$0xff] }
  0xd6   : > { %5174 = vmatprep.mubr.msk.f32.mxu0 %vm218_vm1, %v5877_v36 }
  0xd8   : > { %5122 = vmatmul.mubr.msk.f32.gmra.mxu1 %vm218_vm1, %v7293_v42 }
  0xd9   : > { %5175 = vmatmul.mubr.msk.f32.gmra.mxu0 %vm218_vm1, %v5887_v46  ;;  %5124 = vmatprep.mubr.msk.f32.mxu1 %vm218_vm1, %v7294_v43 }
  0xda   : > { %5177 = vmatprep.mubr.msk.f32.mxu0 %vm218_vm1, %v5893_v48 }
  0xdc   : > { %5125 = vmatmul.mubr.msk.f32.gmra.mxu1 %vm218_vm1, %v7295_v44 }
  0xdd   : > { %5178 = vmatmul.mubr.msk.f32.gmra.mxu0 %vm218_vm1, %v5903_v50  ;;  %5127 = vmatprep.mubr.msk.f32.mxu1 %vm218_vm1, %v7296_v45  ;;  %v2646_v50 = vld [vmem:[#allocation2 + $0x198] sm:$0xff] }
  0xde   : > { %5180 = vmatprep.mubr.msk.f32.mxu0 %vm218_vm1, %v5909_v3  ;;  %v7316_v3 = vld [vmem:[#allocation30_spill] sm:$0xff] }
  0xe0   : > { %5128 = vmatmul.mubr.msk.f32.gmra.mxu1 %vm218_vm1, %v7297_v52 }
  0xe1   : > { %5181 = vmatmul.mubr.msk.f32.gmra.mxu0 %vm218_vm1, %v5919_v6  ;;  %5130 = vmatprep.mubr.msk.f32.mxu1 %vm218_vm1, %v7298_v53  ;;  %v2647_v6 = vld [vmem:[#allocation2 + $0x1a0] sm:$0xff] }
  0xe2   : > { %5183 = vmatprep.mubr.msk.f32.mxu0 %vm218_vm1, %v5925_v10 }
  0xe4   : > { %5131 = vmatmul.mubr.msk.f32.gmra.mxu1 %vm218_vm1, %v7299_v54 }
  0xe5   : > { %5184 = vmatmul.mubr.msk.f32.gmra.mxu0 %vm218_vm1, %v5935_v51  ;;  %5133 = vmatprep.mubr.msk.f32.mxu1 %vm218_vm1, %v7300_v55 }
  0xe6   : > { %5186 = vmatprep.mubr.msk.f32.mxu0 %vm218_vm1, %v5941_v49  ;;  %v6271_v58 = vpop.f32.mrf.mxu0 }
  0xe8   : > { %5134 = vmatmul.mubr.msk.f32.gmra.mxu1 %vm218_vm1, %v7301_v56  ;;  %v6277_v60 = vpop.f32.mrf.mxu0 }
  0xe9   : > { %5187 = vmatmul.mubr.msk.f32.gmra.mxu0 %vm218_vm1, %v5951_v9  ;;  %5136 = vmatprep.mubr.msk.f32.mxu1 %vm218_vm1, %v7302_v57 }
  0xea   : > { %5189 = vmatprep.mubr.msk.f32.mxu0 %vm218_vm1, %v5957_v39 }
  0xec   : > { %5137 = vmatmul.mubr.msk.f32.gmra.mxu1 %vm218_vm1, %v7303_v59 }
  0xed   : > { %5190 = vmatmul.mubr.msk.f32.gmra.mxu0 %vm218_vm1, %v5967_v5  ;;  %5139 = vmatprep.mubr.msk.f32.mxu1 %vm218_vm1, %v7304_v61 }
  0xee   : > { %5192 = vmatprep.mubr.msk.f32.mxu0 %vm218_vm1, %v5973_v27 }
  0xf0   : > { %v6283_v62 = vpop.f32.mrf.mxu1  ;;  %5140 = vmatmul.mubr.msk.f32.gmra.mxu1 %vm218_vm1, %v7305_v63 }
  0xf1   : > { %v6287_v0 = vpop.f32.mrf.mxu0  ;;  %5193 = vmatmul.mubr.msk.f32.gmra.mxu0 %vm218_vm1, %v5983_v15  ;;  %5142 = vmatprep.mubr.msk.f32.mxu1 %vm218_vm1, %v7306_v1  ;;  %v6378_v15 = vld [vmem:[#allocation2 + $0x182] sm:$0xff] }
  0xf2   : > { %5195 = vmatprep.mubr.msk.f32.mxu0 %vm218_vm1, %v5989_v23  ;;  %v6295_v2 = vpop.f32.mrf.mxu1 }
  0xf3   : > { %v6297_v4 = vpop.f32.mrf.mxu0 }
  0xf4   : > { %v6299_v8 = vpop.f32.mrf.mxu1  ;;  %5143 = vmatmul.mubr.msk.f32.gmra.mxu1 %vm218_vm1, %v7307_v11 }
  0xf5   : > { %v6303_v12 = vpop.f32.mrf.mxu0  ;;  %5196 = vmatmul.mubr.msk.f32.gmra.mxu0 %vm218_vm1, %v5999_v47  ;;  %5145 = vmatprep.mubr.msk.f32.mxu1 %vm218_vm1, %v7308_v14  ;;  %v7313_v47 = vld [vmem:[#allocation28_spill] sm:$0xff] }
  0xf6   : > { %5198 = vmatprep.mubr.msk.f32.mxu0 %vm218_vm1, %v6005_v19  ;;  %v6311_v16 = vpop.f32.mrf.mxu1 }
  0xf7   : > { %v6313_v18 = vpop.f32.mrf.mxu0 }
  0xf8   : > { %v6315_v20 = vpop.f32.mrf.mxu1  ;;  %5146 = vmatmul.mubr.msk.f32.gmra.mxu1 %vm218_vm1, %v7309_v22 }
  0xf9   : > { %v6319_v23 = vpop.f32.mrf.mxu0  ;;  %5199 = vmatmul.mubr.msk.f32.gmra.mxu0 %vm218_vm1, %v6015_v34  ;;  %5148 = vmatprep.mubr.msk.f32.mxu1 %vm218_vm1, %v7310_v24  ;;  %v7312_v34 = vld [vmem:[#allocation27_spill] sm:$0xff] }
  0xfa   : > { %5201 = vmatprep.mubr.msk.f32.mxu0 %vm218_vm1, %v6021_v13  ;;  %v6327_v19 = vpop.f32.mrf.mxu1 }
  0xfb   : > { %v6329_v26 = vpop.f32.mrf.mxu0 }
  0xfc   : > { %v6331_v27 = vpop.f32.mrf.mxu1  ;;  %5149 = vmatmul.mubr.msk.f32.gmra.mxu1 %vm218_vm1, %v7311_v28 }
  0xfd   : > { %v6335_v36 = vpop.f32.mrf.mxu0  ;;  %5202 = vmatmul.mubr.msk.f32.gmra.mxu0 %vm218_vm1, %v6031_v25  ;;  %5151 = vmatprep.mubr.msk.f32.mxu1 %vm218_vm1, %v7312_v34  ;;  %v7314_v25 = vld [vmem:[#allocation29_spill] sm:$0xff] }
  0xfe   : > { %5204 = vmatprep.mubr.msk.f32.mxu0 %vm218_vm1, %v6037_v7  ;;  %v6343_v13 = vpop.f32.mrf.mxu1 }
  0xff   : > { %v6345_v39 = vpop.f32.mrf.mxu0 }
 0x100   : > { %v6347_v46 = vpop.f32.mrf.mxu1  ;;  %5152 = vmatmul.mubr.msk.f32.gmra.mxu1 %vm218_vm1, %v7313_v47 }
 0x101   : > { %v6351_v48 = vpop.f32.mrf.mxu0  ;;  %5205 = vmatmul.mubr.msk.f32.gmra.mxu0 %vm218_vm1, %v6045_v21  ;;  %5154 = vmatprep.mubr.msk.f32.mxu1 %vm218_vm1, %v7314_v25  ;;  %v7317_v21 = vld [vmem:[#allocation31_spill] sm:$0xff] }
 0x102   : > { %5207 = vmatprep.mubr.msk.f32.mxu0 %vm218_vm1, %v6191_v32  ;;  %v6359_v7 = vpop.f32.mrf.mxu1 }
 0x103   : > { %v6361_v49 = vpop.f32.mrf.mxu0 }
 0x104   : > { %v6363_v51 = vpop.f32.mrf.mxu1  ;;  %5155 = vmatmul.mubr.msk.f32.gmra.mxu1 %vm218_vm1, %v7316_v3 }
 0x105   : > { %7315 = vst [vmem:[#allocation3_spill] sm:$0xff] %v6363_v51  ;;  %v6367_v5 = vpop.f32.mrf.mxu0  ;;  %5208 = vmatmul.mubr.msk.f32.gmra.mxu0 %vm218_vm1, %v6199_v33  ;;  %5157 = vmatprep.mubr.msk.f32.mxu1 %vm218_vm1, %v7317_v21  ;;  %v6389_v33 = vld [vmem:[#allocation2 + $0x18a] sm:$0xff]  ;;  %v3007_v21 = vld [vmem:[#allocation2 + $0x39] sm:$0xff] }
 0x106   : > { %5210 = vmatprep.mubr.msk.f32.mxu0 %vm218_vm1, %v2646_v50  ;;  %v6374_v9 = vpop.f32.mrf.mxu1  ;;  %v3006_v50 = vld [vmem:[#allocation2 + $0x31] sm:$0xff] }
 0x107   : > { %7318 = vst [vmem:[#allocation4_spill] sm:$0xff] %v6374_v9  ;;  %v6376_v10 = vpop.f32.mrf.mxu0 }
 0x108   : > { %v6380_v31 = vpop.f32.mrf.mxu1  ;;  %5158 = vmatmul.mubr.msk.f32.gmra.mxu1 %vm218_vm1, %v6035_v17 }
 0x109   : > { %7319 = vst [vmem:[#allocation5_spill] sm:$0xff] %v6380_v31  ;;  %v6384_v32 = vpop.f32.mrf.mxu0  ;;  %5211 = vmatmul.mubr.msk.f32.gmra.mxu0 %vm218_vm1, %v2647_v6  ;;  %5160 = vmatprep.mubr.msk.f32.mxu1 %vm218_vm1, %v6378_v15 }
 0x10a   : > { %5265 = vmatprep.mubr.msk.f32.mxu0 %vm218_vm1, %v7290_v38  ;;  %v6393_v35 = vpop.f32.mrf.mxu1 }
 0x10b   : > { %7320 = vst [vmem:[#allocation6_spill] sm:$0xff] %v6393_v35  ;;  %v6395_v37 = vpop.f32.mrf.mxu0  ;;  %v3008_v35 = vld [vmem:[#allocation2 + $0x49] sm:$0xff] }
 0x10c   : > { %v6397_v3 = vpop.f32.mrf.mxu1  ;;  %5161 = vmatmul.mubr.msk.f32.gmra.mxu1 %vm218_vm1, %v6389_v33 }
 0x10d   : > { %7321 = vst [vmem:[#allocation7_spill] sm:$0xff] %v6397_v3  ;;  %v4967_v17 = vpop.f32.mrf.mxu0  ;;  %5266 = vmatmul.mubr.msk.f32.vlgmr.msra.gmra.mxu0 %vm218_vm1, %v7291_v40  ;;  %5215 = vmatprep.mubr.msk.f32.mxu1 %vm218_vm1, %v3006_v50  ;;  %v3009_v40 = vld [vmem:[#allocation2 + $0x51] sm:$0xff] }
 0x10e   : > { %5268 = vmatprep.mubr.msk.f32.mxu0 %vm218_vm1, %v7292_v41  ;;  %v6406_v38 = vpop.f32.mrf.mxu1 }
 0x10f   : > { %7322 = vst [vmem:[#allocation8_spill] sm:$0xff] %v6406_v38  ;;  %v1254_v6 = vpop.f32.mrf.mxu0  ;;  %v3010_v38 = vld [vmem:[#allocation2 + $0x61] sm:$0xff] }
 0x110   : > { %v4917_v31 = vpop.f32.mrf.mxu1  ;;  %5216 = vmatmul.mubr.msk.f32.vlgmr.msra.gmra.mxu1 %vm218_vm1, %v3007_v21 }
 0x111   : > { %v4970_v3 = vpop.f32.mrf.mxu0  ;;  %5269 = vmatmul.mubr.msk.f32.gmra.mxu0 %vm218_vm1, %v7293_v42  ;;  %v902_v30 = vadd.f32 %v4917_v31, %v6271_v58  ;;  %5218 = vmatprep.mubr.msk.f32.mxu1 %vm218_vm1, %v3008_v35 }
 0x112   : > { %5271 = vmatprep.mubr.msk.f32.mxu0 %vm218_vm1, %v7294_v43  ;;  %v896_v41 = vpop.f32.mrf.mxu1  ;;  %v3011_v43 = vld [vmem:[#allocation2 + $0x69] sm:$0xff] }
 0x113   : > { %v1264_v50 = vpop.f32.mrf.mxu0  ;;  %v6415_v9 = vadd.f32 %v4967_v17, %v902_v30  ;;  %v897_v29 = vadd.f32 %v896_v41, %v6277_v60  ;;  %v3012_v60 = vld [vmem:[#allocation2 + $0x79] sm:$0xff] }
 0x114   : > { %v4920_v21 = vpop.f32.mrf.mxu1  ;;  %5219 = vmatmul.mubr.msk.f32.gmra.mxu1 %vm218_vm1, %v3009_v40 }
 0x115   : > { %v4973_v51 = vpop.f32.mrf.mxu0  ;;  %5272 = vmatmul.mubr.msk.f32.gmra.mxu0 %vm218_vm1, %v7295_v44  ;;  %v6421_v42 = vadd.f32 %v1254_v6, %v897_v29  ;;  %v912_v58 = vadd.f32 %v4920_v21, %v6287_v0  ;;  %5221 = vmatprep.mubr.msk.f32.mxu1 %vm218_vm1, %v3010_v38 }
 0x116   : > { %5274 = vmatprep.mubr.msk.f32.mxu0 %vm218_vm1, %v7296_v45  ;;  %v906_v30 = vpop.f32.mrf.mxu1  ;;  %v3013_v45 = vld [vmem:[#allocation2 + $0x81] sm:$0xff] }
 0x117   : > { %v1274_v31 = vpop.f32.mrf.mxu0  ;;  %v6427_v35 = vadd.f32 %v4970_v3, %v912_v58  ;;  %v907_v17 = vadd.f32 %v906_v30, %v6297_v4  ;;  %v3014_v4 = vld [vmem:[#allocation2 + $0x91] sm:$0xff] }
 0x118   : > { %v4923_v40 = vpop.f32.mrf.mxu1  ;;  %5222 = vmatmul.mubr.msk.f32.gmra.mxu1 %vm218_vm1, %v3011_v43 }
 0x119   : > { %v4976_v29 = vpop.f32.mrf.mxu0  ;;  %5275 = vmatmul.mubr.msk.f32.gmra.mxu0 %vm218_vm1, %v7297_v52  ;;  %v6433_v44 = vadd.f32 %v1264_v50, %v907_v17  ;;  %v922_v0 = vadd.f32 %v4923_v40, %v6303_v12  ;;  %5224 = vmatprep.mubr.msk.f32.mxu1 %vm218_vm1, %v3012_v60 }
 0x11a   : > { %5277 = vmatprep.mubr.msk.f32.mxu0 %vm218_vm1, %v7298_v53  ;;  %v916_v3 = vpop.f32.mrf.mxu1  ;;  %v3015_v53 = vld [vmem:[#allocation2 + $0x99] sm:$0xff] }
 0x11b   : > { %v1284_v38 = vpop.f32.mrf.mxu0  ;;  %v6439_v6 = vadd.f32 %v4973_v51, %v922_v0  ;;  %v917_v41 = vadd.f32 %v916_v3, %v6313_v18  ;;  %v3016_v18 = vld [vmem:[#allocation2 + $0xa9] sm:$0xff] }
 0x11c   : > { %v4926_v21 = vpop.f32.mrf.mxu1  ;;  %5225 = vmatmul.mubr.msk.f32.gmra.mxu1 %vm218_vm1, %v3013_v45 }
 0x11d   : > { %v4979_v52 = vpop.f32.mrf.mxu0  ;;  %5278 = vmatmul.mubr.msk.f32.gmra.mxu0 %vm218_vm1, %v7299_v54  ;;  %v6445_v12 = vadd.f32 %v1274_v31, %v917_v41  ;;  %v932_v50 = vadd.f32 %v4926_v21, %v6319_v23  ;;  %5227 = vmatprep.mubr.msk.f32.mxu1 %vm218_vm1, %v3014_v4 }
 0x11e   : > { %5280 = vmatprep.mubr.msk.f32.mxu0 %vm218_vm1, %v7300_v55  ;;  %v926_v51 = vpop.f32.mrf.mxu1  ;;  %v3017_v55 = vld [vmem:[#allocation2 + $0xb1] sm:$0xff] }
 0x11f   : > { %v1294_v58 = vpop.f32.mrf.mxu0  ;;  %v6451_v43 = vadd.f32 %v4976_v29, %v932_v50  ;;  %v927_v30 = vadd.f32 %v926_v51, %v6329_v26  ;;  %v3018_v26 = vld [vmem:[#allocation2 + $0xc1] sm:$0xff] }
 0x120   : > { %v4929_v60 = vpop.f32.mrf.mxu1  ;;  %5228 = vmatmul.mubr.msk.f32.gmra.mxu1 %vm218_vm1, %v3015_v53 }
 0x121   : > { %v4982_v54 = vpop.f32.mrf.mxu0  ;;  %5281 = vmatmul.mubr.msk.f32.gmra.mxu0 %vm218_vm1, %v7301_v56  ;;  %v6457_v23 = vadd.f32 %v1284_v38, %v927_v30  ;;  %v942_v31 = vadd.f32 %v4929_v60, %v6335_v36  ;;  %5230 = vmatprep.mubr.msk.f32.mxu1 %vm218_vm1, %v3016_v18 }
 0x122   : > { %5283 = vmatprep.mubr.msk.f32.mxu0 %vm218_vm1, %v7302_v57  ;;  %v936_v17 = vpop.f32.mrf.mxu1  ;;  %v3019_v57 = vld [vmem:[#allocation2 + $0xc9] sm:$0xff] }
 0x123   : > { %v1304_v40 = vpop.f32.mrf.mxu0  ;;  %v6463_v29 = vadd.f32 %v4979_v52, %v942_v31  ;;  %v937_v0 = vadd.f32 %v936_v17, %v6345_v39  ;;  %v3020_v39 = vld [vmem:[#allocation2 + $0xd9] sm:$0xff] }
 0x124   : > { %v4932_v45 = vpop.f32.mrf.mxu1  ;;  %5231 = vmatmul.mubr.msk.f32.gmra.mxu1 %vm218_vm1, %v3017_v55 }
 0x125   : > { %v4985_v56 = vpop.f32.mrf.mxu0  ;;  %5284 = vmatmul.mubr.msk.f32.gmra.mxu0 %vm218_vm1, %v7303_v59  ;;  %v6469_v36 = vadd.f32 %v1294_v58, %v937_v0  ;;  %v952_v3 = vadd.f32 %v4932_v45, %v6351_v48  ;;  %5233 = vmatprep.mubr.msk.f32.mxu1 %vm218_vm1, %v3018_v26 }
 0x126   : > { %5286 = vmatprep.mubr.msk.f32.mxu0 %vm218_vm1, %v7304_v61  ;;  %v946_v38 = vpop.f32.mrf.mxu1  ;;  %v3021_v61 = vld [vmem:[#allocation2 + $0xe1] sm:$0xff] }
 0x127   : > { %v1314_v4 = vpop.f32.mrf.mxu0  ;;  %v6475_v41 = vadd.f32 %v4982_v54, %v952_v3  ;;  %v947_v21 = vadd.f32 %v946_v38, %v6361_v49  ;;  %v3022_v49 = vld [vmem:[#allocation2 + $0xf1] sm:$0xff] }
 0x128   : > { %v4935_v52 = vpop.f32.mrf.mxu1  ;;  %5234 = vmatmul.mubr.msk.f32.gmra.mxu1 %vm218_vm1, %v3019_v57 }
 0x129   : > { %v4988_v59 = vpop.f32.mrf.mxu0  ;;  %5287 = vmatmul.mubr.msk.f32.gmra.mxu0 %vm218_vm1, %v7305_v63  ;;  %v6481_v48 = vadd.f32 %v1304_v40, %v947_v21  ;;  %v962_v50 = vadd.f32 %v4935_v52, %v6367_v5  ;;  %5236 = vmatprep.mubr.msk.f32.mxu1 %vm218_vm1, %v3020_v39 }
 0x12a   : > { %5289 = vmatprep.mubr.msk.f32.mxu0 %vm218_vm1, %v7306_v1  ;;  %v956_v53 = vpop.f32.mrf.mxu1  ;;  %v3023_v1 = vld [vmem:[#allocation2 + $0xf9] sm:$0xff] }
 0x12b   : > { %v1324_v51 = vpop.f32.mrf.mxu0  ;;  %v6487_v58 = vadd.f32 %v4985_v56, %v962_v50  ;;  %v957_v18 = vadd.f32 %v956_v53, %v6376_v10  ;;  %v3024_v10 = vld [vmem:[#allocation2 + $0x109] sm:$0xff] }
 0x12c   : > { %v4938_v30 = vpop.f32.mrf.mxu1  ;;  %5237 = vmatmul.mubr.msk.f32.gmra.mxu1 %vm218_vm1, %v3021_v61  ;;  %v3421_v61 = vld [vmem:[#allocation2 + $0x15a] sm:$0xff] }
 0x12d   : > { %v4991_v63 = vpop.f32.mrf.mxu0  ;;  %5290 = vmatmul.mubr.msk.f32.gmra.mxu0 %vm218_vm1, %v7307_v11  ;;  %v6493_v5 = vadd.f32 %v1314_v4, %v957_v18  ;;  %v972_v60 = vadd.f32 %v4938_v30, %v6384_v32  ;;  %5239 = vmatprep.mubr.msk.f32.mxu1 %vm218_vm1, %v3022_v49  ;;  %v3422_v49 = vld [vmem:[#allocation2 + $0x16a] sm:$0xff] }
 0x12e   : > { %5292 = vmatprep.mubr.msk.f32.mxu0 %vm218_vm1, %v7308_v14  ;;  %v966_v54 = vpop.f32.mrf.mxu1  ;;  %v3025_v14 = vld [vmem:[#allocation2 + $0x111] sm:$0xff] }
 0x12f   : > { %v1334_v31 = vpop.f32.mrf.mxu0  ;;  %v6499_v55 = vadd.f32 %v4988_v59, %v972_v60  ;;  %v967_v17 = vadd.f32 %v966_v54, %v6395_v37  ;;  %v3026_v37 = vld [vmem:[#allocation2 + $0x121] sm:$0xff] }
 0x130   : > { %v4941_v40 = vpop.f32.mrf.mxu1  ;;  %5240 = vmatmul.mubr.msk.f32.gmra.mxu1 %vm218_vm1, %v3023_v1  ;;  %v3423_v1 = vld [vmem:[#allocation2 + $0x172] sm:$0xff] }
 0x131   : > { %v4994_v11 = vpop.f32.mrf.mxu0  ;;  %5293 = vmatmul.mubr.msk.f32.gmra.mxu0 %vm218_vm1, %v7309_v22  ;;  %v6505_v32 = vadd.f32 %v1324_v51, %v967_v17  ;;  %v982_v26 = vadd.f32 %v4941_v40, %v6283_v62  ;;  %5242 = vmatprep.mubr.msk.f32.mxu1 %vm218_vm1, %v3024_v10  ;;  %v3030_v51 = vld [vmem:[#allocation2 + $0x151] sm:$0xff]  ;;  %v3032_v10 = vld [vmem:[#allocation2 + $0x169] sm:$0xff] }
 0x132   : > { %5295 = vmatprep.mubr.msk.f32.mxu0 %vm218_vm1, %v7310_v24  ;;  %v976_v0 = vpop.f32.mrf.mxu1  ;;  %v3027_v24 = vld [vmem:[#allocation2 + $0x129] sm:$0xff] }
 0x133   : > { %v1344_v45 = vpop.f32.mrf.mxu0  ;;  %v6511_v56 = vadd.f32 %v4991_v63, %v982_v26  ;;  %v977_v3 = vadd.f32 %v976_v0, %v6295_v2  ;;  %v3028_v2 = vld [vmem:[#allocation2 + $0x139] sm:$0xff] }
 0x134   : > { %v4944_v57 = vpop.f32.mrf.mxu1  ;;  %5243 = vmatmul.mubr.msk.f32.gmra.mxu1 %vm218_vm1, %v3025_v14  ;;  %v3033_v14 = vld [vmem:[#allocation2 + $0x171] sm:$0xff] }
 0x135   : > { %v4997_v22 = vpop.f32.mrf.mxu0  ;;  %5296 = vmatmul.mubr.msk.f32.gmra.mxu0 %vm218_vm1, %v7311_v28  ;;  %v6517_v62 = vadd.f32 %v1334_v31, %v977_v3  ;;  %v992_v38 = vadd.f32 %v4944_v57, %v6299_v8  ;;  %5245 = vmatprep.mubr.msk.f32.mxu1 %vm218_vm1, %v3026_v37  ;;  %v3426_v37 = vld [vmem:[#allocation2 + $0x19a] sm:$0xff] }
 0x136   : > { %5298 = vmatprep.mubr.msk.f32.mxu0 %vm218_vm1, %v7312_v34  ;;  %v986_v4 = vpop.f32.mrf.mxu1  ;;  %v3029_v34 = vld [vmem:[#allocation2 + $0x141] sm:$0xff] }
 0x137   : > { %v1354_v39 = vpop.f32.mrf.mxu0  ;;  %v6523_v21 = vadd.f32 %v4994_v11, %v992_v38  ;;  %v987_v52 = vadd.f32 %v986_v4, %v6311_v16  ;;  %v7323_v38 = vld [vmem:[#allocation3_spill] sm:$0xff]  ;;  %v7324_v4 = vld [vmem:[#allocation32_spill] sm:$0xff] }
 0x138   : > { %v4947_v59 = vpop.f32.mrf.mxu1  ;;  %5246 = vmatmul.mubr.msk.f32.gmra.mxu1 %vm218_vm1, %v3027_v24 }
 0x139   : > { %v5000_v28 = vpop.f32.mrf.mxu0  ;;  %5299 = vmatmul.mubr.msk.f32.gmra.mxu0 %vm218_vm1, %v7313_v47  ;;  %v6529_v8 = vadd.f32 %v1344_v45, %v987_v52  ;;  %v1002_v50 = vadd.f32 %v4947_v59, %v6315_v20  ;;  %5248 = vmatprep.mubr.msk.f32.mxu1 %vm218_vm1, %v3028_v2  ;;  %v7325_v59 = vld [vmem:[#allocation4_spill] sm:$0xff] }
 0x13a   : > { %5301 = vmatprep.mubr.msk.f32.mxu0 %vm218_vm1, %v7314_v25  ;;  %v996_v53 = vpop.f32.mrf.mxu1  ;;  %v3031_v25 = vld [vmem:[#allocation2 + $0x159] sm:$0xff] }
 0x13b   : > { %v1364_v16 = vpop.f32.mrf.mxu0  ;;  %v6535_v18 = vadd.f32 %v4997_v22, %v1002_v50  ;;  %v997_v30 = vadd.f32 %v996_v53, %v6327_v19  ;;  %v7327_v53 = vld [vmem:[#allocation5_spill] sm:$0xff] }
 0x13c   : > { %v4950_v47 = vpop.f32.mrf.mxu1  ;;  %5249 = vmatmul.mubr.msk.f32.gmra.mxu1 %vm218_vm1, %v3029_v34  ;;  %v7326_v34 = vld [vmem:[#allocation33_spill] sm:$0xff] }
 0x13d   : > { %v5003_v63 = vpop.f32.mrf.mxu0  ;;  %5302 = vmatmul.mubr.msk.f32.gmra.mxu0 %vm218_vm1, %v3421_v61  ;;  %v6540_v20 = vadd.f32 %v1354_v39, %v997_v30  ;;  %v1012_v60 = vadd.f32 %v4950_v47, %v6331_v27  ;;  %5251 = vmatprep.mubr.msk.f32.mxu1 %vm218_vm1, %v3030_v51  ;;  %v3037_v51 = vld [vmem:[#allocation2 + $0x1a1] sm:$0xff] }
 0x13e   : > { %5304 = vmatprep.mubr.msk.f32.mxu0 %vm218_vm1, %v3422_v49  ;;  %v1006_v54 = vpop.f32.mrf.mxu1 }
 0x13f   : > { %v1374_v31 = vpop.f32.mrf.mxu0  ;;  %v6545_v19 = vadd.f32 %v5000_v28, %v1012_v60  ;;  %v1007_v17 = vadd.f32 %v1006_v54, %v6343_v13 }
 0x140   : > { %v4953_v40 = vpop.f32.mrf.mxu1  ;;  %5252 = vmatmul.mubr.msk.f32.gmra.mxu1 %vm218_vm1, %v3031_v25 }
 0x141   : > { %v5006_v11 = vpop.f32.mrf.mxu0  ;;  %5305 = vmatmul.mubr.msk.f32.gmra.mxu0 %vm218_vm1, %v3423_v1  ;;  %v6550_v27 = vadd.f32 %v1364_v16, %v1007_v17  ;;  %v1022_v26 = vadd.f32 %v4953_v40, %v6347_v46  ;;  %5254 = vmatprep.mubr.msk.f32.mxu1 %vm218_vm1, %v3032_v10 }
 0x142   : > { %5307 = vmatprep.mubr.msk.f32.mxu0 %vm218_vm1, %v6378_v15  ;;  %v1016_v0 = vpop.f32.mrf.mxu1  ;;  %v3427_v15 = vld [vmem:[#allocation2 + $0x1a2] sm:$0xff] }
 0x143   : > { %v1384_v45 = vpop.f32.mrf.mxu0  ;;  %v6556_v13 = vadd.f32 %v5003_v63, %v1022_v26  ;;  %v1017_v3 = vadd.f32 %v1016_v0, %v6359_v7  ;;  %v3036_v7 = vld [vmem:[#allocation2 + $0x199] sm:$0xff]  ;;  %v7328_v63 = vld [vmem:[#allocation6_spill] sm:$0xff] }
 0x144   : > { %v4956_v57 = vpop.f32.mrf.mxu1  ;;  %5255 = vmatmul.mubr.msk.f32.gmra.mxu1 %vm218_vm1, %v3033_v14  ;;  %v7330_v26 = vld [vmem:[#allocation8_spill] sm:$0xff] }
 0x145   : > { %v5009_v22 = vpop.f32.mrf.mxu0  ;;  %5308 = vmatmul.mubr.msk.f32.gmra.mxu0 %vm218_vm1, %v6389_v33  ;;  %v6562_v46 = vadd.f32 %v1374_v31, %v1017_v3  ;;  %v1032_v24 = vadd.f32 %v4956_v57, %v7323_v38  ;;  %5257 = vmatprep.mubr.msk.f32.mxu1 %vm218_vm1, %v7324_v4  ;;  %v7329_v31 = vld [vmem:[#allocation7_spill] sm:$0xff] }
 0x146   : > { %5310 = vmatprep.mubr.msk.f32.mxu0 %vm218_vm1, %v3426_v37  ;;  %v1026_v39 = vpop.f32.mrf.mxu1 }
 0x147   : > { %v1394_v2 = vpop.f32.mrf.mxu0  ;;  %v6568_v52 = vadd.f32 %v5006_v11, %v1032_v24  ;;  %v1027_v28 = vadd.f32 %v1026_v39, %v7325_v59 }
 0x148   : > { %v4959_v50 = vpop.f32.mrf.mxu1  ;;  %5258 = vmatmul.mubr.msk.f32.gmra.mxu1 %vm218_vm1, %v7326_v34 }
 0x149   : > { %v5012_v33 = vpop.f32.mrf.mxu0  ;;  %5311 = vmatmul.mubr.msk.f32.gmra.mxu0 %vm218_vm1, %v3427_v15  ;;  %v6574_v61 = vadd.f32 %v1384_v45, %v1027_v28  ;;  %v1042_v16 = vadd.f32 %v4959_v50, %v7327_v53  ;;  %5260 = vmatprep.mubr.msk.f32.mxu1 %vm218_vm1, %v3036_v7 }
 0x14a   : > { %v1036_v49 = vpop.f32.mrf.mxu1 }
 0x14b   : > { %v1404_v30 = vpop.f32.mrf.mxu0  ;;  %v6578_v47 = vadd.f32 %v5009_v22, %v1042_v16  ;;  %v1037_v60 = vadd.f32 %v1036_v49, %v7328_v63 }
 0x14c   : > { %v4962_v25 = vpop.f32.mrf.mxu1  ;;  %5261 = vmatmul.mubr.msk.f32.gmra.mxu1 %vm218_vm1, %v3037_v51 }
 0x14d   : > { %v5067_v1 = vpop.f32.mrf.mxu0  ;;  %v6582_v54 = vadd.f32 %v1394_v2, %v1037_v60  ;;  %v1052_v10 = vadd.f32 %v4962_v25, %v7329_v31 }
 0x14e   : > { %v1046_v17 = vpop.f32.mrf.mxu1 }
 0x14f   : > { %v2034_v40 = vpop.f32.mrf.mxu0  ;;  %v6585_v11 = vadd.f32 %v5012_v33, %v1052_v10  ;;  %v1047_v14 = vadd.f32 %v1046_v17, %v7330_v26 }
 0x150   : > { %v5017_v0 = vpop.f32.mrf.mxu1 }
 0x151   : > { %v5070_v45 = vpop.f32.mrf.mxu0  ;;  %v6588_v37 = vadd.f32 %v1404_v30, %v1047_v14  ;;  %v1804_v3 = vadd.f32 %v5017_v0, %v6415_v9 }
 0x152   : > { %v1644_v57 = vpop.f32.mrf.mxu1 }
 0x153   : > { %v2044_v22 = vpop.f32.mrf.mxu0  ;;  %v6591_v38 = vadd.f32 %v5067_v1, %v1804_v3  ;;  %v1803_v24 = vadd.f32 %v1644_v57, %v6421_v42 }
 0x154   : > { %v5020_v4 = vpop.f32.mrf.mxu1 }
 0x155   : > { %v5073_v15 = vpop.f32.mrf.mxu0  ;;  %v6594_v39 = vadd.f32 %v2034_v40, %v1803_v24  ;;  %v1806_v2 = vadd.f32 %v5020_v4, %v6427_v35 }
 0x156   : > { %v1654_v7 = vpop.f32.mrf.mxu1 }
 0x157   : > { %v2054_v59 = vpop.f32.mrf.mxu0  ;;  %v6597_v28 = vadd.f32 %v5070_v45, %v1806_v2  ;;  %v1805_v50 = vadd.f32 %v1654_v7, %v6433_v44 }
 0x158   : > { %v5023_v34 = vpop.f32.mrf.mxu1 }
 0x159   : > { %v5076_v9 = vpop.f32.mrf.mxu0  ;;  %v6600_v33 = vadd.f32 %v2044_v22, %v1805_v50  ;;  %v1808_v53 = vadd.f32 %v5023_v34, %v6439_v6 }
 0x15a   : > { %v1664_v16 = vpop.f32.mrf.mxu1 }
 0x15b   : > { %v2064_v42 = vpop.f32.mrf.mxu0  ;;  %v6603_v51 = vadd.f32 %v5073_v15, %v1808_v53  ;;  %v1807_v49 = vadd.f32 %v1664_v16, %v6445_v12 }
 0x15c   : > { %v5026_v30 = vpop.f32.mrf.mxu1 }
 0x15d   : > { %v5079_v35 = vpop.f32.mrf.mxu0  ;;  %v6606_v63 = vadd.f32 %v2054_v59, %v1807_v49  ;;  %v1810_v60 = vadd.f32 %v5026_v30, %v6451_v43 }
 0x15e   : > { %v1674_v25 = vpop.f32.mrf.mxu1 }
 0x15f   : > { %v2074_v44 = vpop.f32.mrf.mxu0  ;;  %v6609_v1 = vadd.f32 %v5076_v9, %v1810_v60  ;;  %v1809_v31 = vadd.f32 %v1674_v25, %v6457_v23 }
 0x160   : > { %v5029_v10 = vpop.f32.mrf.mxu1 }
 0x161   : > { %v5082_v6 = vpop.f32.mrf.mxu0  ;;  %v6612_v17 = vadd.f32 %v2064_v42, %v1809_v31  ;;  %v1812_v40 = vadd.f32 %v5029_v10, %v6463_v29 }
 0x162   : > { %v1684_v26 = vpop.f32.mrf.mxu1 }
 0x163   : > { %v2084_v12 = vpop.f32.mrf.mxu0  ;;  %v6615_v14 = vadd.f32 %v5079_v35, %v1812_v40  ;;  %v1811_v0 = vadd.f32 %v1684_v26, %v6469_v36 }
 0x164   : > { %v5032_v45 = vpop.f32.mrf.mxu1 }
 0x165   : > { %v5085_v43 = vpop.f32.mrf.mxu0  ;;  %v6618_v3 = vadd.f32 %v2074_v44, %v1811_v0  ;;  %v1814_v57 = vadd.f32 %v5032_v45, %v6475_v41 }
 0x166   : > { %v1694_v22 = vpop.f32.mrf.mxu1 }
 0x167   : > { %v2094_v23 = vpop.f32.mrf.mxu0  ;;  %v6621_v24 = vadd.f32 %v5082_v6, %v1814_v57  ;;  %v1813_v4 = vadd.f32 %v1694_v22, %v6481_v48 }
 0x168   : > { %v5035_v15 = vpop.f32.mrf.mxu1 }
 0x169   : > { %v5088_v29 = vpop.f32.mrf.mxu0  ;;  %v6624_v2 = vadd.f32 %v2084_v12, %v1813_v4  ;;  %v1816_v7 = vadd.f32 %v5035_v15, %v6487_v58 }
 0x16a   : > { %v1704_v59 = vpop.f32.mrf.mxu1 }
 0x16b   : > { %v2104_v36 = vpop.f32.mrf.mxu0  ;;  %v6627_v50 = vadd.f32 %v5085_v43, %v1816_v7  ;;  %v1815_v34 = vadd.f32 %v1704_v59, %v6493_v5 }
 0x16c   : > { %v5038_v9 = vpop.f32.mrf.mxu1 }
 0x16d   : > { %v5091_v41 = vpop.f32.mrf.mxu0  ;;  %v6630_v53 = vadd.f32 %v2094_v23, %v1815_v34  ;;  %v1818_v16 = vadd.f32 %v5038_v9, %v6499_v55 }
 0x16e   : > { %v1714_v42 = vpop.f32.mrf.mxu1 }
 0x16f   : > { %7331 = vst [vmem:[#allocation9_spill] sm:$0xff] %v6630_v53  ;;  %v2114_v48 = vpop.f32.mrf.mxu0  ;;  %v6633_v49 = vadd.f32 %v5088_v29, %v1818_v16  ;;  %v1817_v30 = vadd.f32 %v1714_v42, %v6505_v32 }
 0x170   : > { %v5041_v35 = vpop.f32.mrf.mxu1 }
 0x171   : > { %7332 = vst [vmem:[#allocation10_spill] sm:$0xff] %v6633_v49  ;;  %v5094_v58 = vpop.f32.mrf.mxu0  ;;  %v6636_v60 = vadd.f32 %v2104_v36, %v1817_v30  ;;  %v1820_v25 = vadd.f32 %v5041_v35, %v6511_v56 }
 0x172   : > { %v1724_v44 = vpop.f32.mrf.mxu1 }
 0x173   : > { %7333 = vst [vmem:[#allocation11_spill] sm:$0xff] %v6636_v60  ;;  %v2124_v5 = vpop.f32.mrf.mxu0  ;;  %v6639_v31 = vadd.f32 %v5091_v41, %v1820_v25  ;;  %v1819_v10 = vadd.f32 %v1724_v44, %v6517_v62 }
 0x174   : > { %v5044_v6 = vpop.f32.mrf.mxu1 }
 0x175   : > { %7334 = vst [vmem:[#allocation12_spill] sm:$0xff] %v6639_v31  ;;  %v5097_v55 = vpop.f32.mrf.mxu0  ;;  %v6642_v40 = vadd.f32 %v2114_v48, %v1819_v10  ;;  %v1822_v26 = vadd.f32 %v5044_v6, %v6523_v21 }
 0x176   : > { %v1734_v12 = vpop.f32.mrf.mxu1 }
 0x177   : > { %7335 = vst [vmem:[#allocation13_spill] sm:$0xff] %v6642_v40  ;;  %v2134_v32 = vpop.f32.mrf.mxu0  ;;  %v6645_v0 = vadd.f32 %v5094_v58, %v1822_v26  ;;  %v1821_v45 = vadd.f32 %v1734_v12, %v6529_v8 }
 0x178   : > { %v5047_v43 = vpop.f32.mrf.mxu1 }
 0x179   : > { %7336 = vst [vmem:[#allocation14_spill] sm:$0xff] %v6645_v0  ;;  %v5100_v56 = vpop.f32.mrf.mxu0  ;;  %v6648_v57 = vadd.f32 %v2124_v5, %v1821_v45  ;;  %v1824_v22 = vadd.f32 %v5047_v43, %v6535_v18 }
 0x17a   : > { %v1744_v23 = vpop.f32.mrf.mxu1 }
 0x17b   : > { %7337 = vst [vmem:[#allocation15_spill] sm:$0xff] %v6648_v57  ;;  %v2144_v62 = vpop.f32.mrf.mxu0  ;;  %v6651_v4 = vadd.f32 %v5097_v55, %v1824_v22  ;;  %v1823_v15 = vadd.f32 %v1744_v23, %v6540_v20 }
 0x17c   : > { %v5050_v29 = vpop.f32.mrf.mxu1 }
 0x17d   : > { %7338 = vst [vmem:[#allocation16_spill] sm:$0xff] %v6651_v4  ;;  %v5103_v21 = vpop.f32.mrf.mxu0  ;;  %v6654_v7 = vadd.f32 %v2134_v32, %v1823_v15  ;;  %v1826_v59 = vadd.f32 %v5050_v29, %v6545_v19 }
 0x17e   : > { %v1754_v36 = vpop.f32.mrf.mxu1 }
 0x17f   : > { %7339 = vst [vmem:[#allocation17_spill] sm:$0xff] %v6654_v7  ;;  %v2154_v8 = vpop.f32.mrf.mxu0  ;;  %v6657_v34 = vadd.f32 %v5100_v56, %v1826_v59  ;;  %v1825_v9 = vadd.f32 %v1754_v36, %v6550_v27 }
 0x180   : > { %v5053_v41 = vpop.f32.mrf.mxu1 }
 0x181   : > { %v5106_v18 = vpop.f32.mrf.mxu0  ;;  %v6660_v16 = vadd.f32 %v2144_v62, %v1825_v9  ;;  %v1828_v42 = vadd.f32 %v5053_v41, %v6556_v13 }
 0x182   : > { %v1764_v48 = vpop.f32.mrf.mxu1 }
 0x183   : > { %7340 = vst [vmem:[#allocation18_spill] sm:$0xff] %v6660_v16  ;;  %v2164_v20 = vpop.f32.mrf.mxu0  ;;  %v6663_v30 = vadd.f32 %v5103_v21, %v1828_v42  ;;  %v1827_v35 = vadd.f32 %v1764_v48, %v6562_v46 }
 0x184   : > { %v5056_v58 = vpop.f32.mrf.mxu1 }
 0x185   : > { %v5109_v19 = vpop.f32.mrf.mxu0  ;;  %v6666_v25 = vadd.f32 %v2154_v8, %v1827_v35  ;;  %v1830_v44 = vadd.f32 %v5056_v58, %v6568_v52 }
 0x186   : > { %v1774_v5 = vpop.f32.mrf.mxu1 }
 0x187   : > { %v2174_v27 = vpop.f32.mrf.mxu0  ;;  %v6669_v10 = vadd.f32 %v5106_v18, %v1830_v44  ;;  %v1829_v6 = vadd.f32 %v1774_v5, %v6574_v61 }
 0x188   : > { %v5059_v55 = vpop.f32.mrf.mxu1 }
 0x189   : > { %v5112_v13 = vpop.f32.mrf.mxu0  ;;  %v6672_v26 = vadd.f32 %v2164_v20, %v1829_v6  ;;  %v1832_v12 = vadd.f32 %v5059_v55, %v6578_v47 }
 0x18a   : > { %v1784_v32 = vpop.f32.mrf.mxu1 }
 0x18b   : > { %v2184_v46 = vpop.f32.mrf.mxu0  ;;  %v6675_v45 = vadd.f32 %v5109_v19, %v1832_v12  ;;  %v1831_v43 = vadd.f32 %v1784_v32, %v6582_v54 }
 0x18c   : > { %v5062_v56 = vpop.f32.mrf.mxu1 }
 0x18d   : > { %v6678_v52 = vpop.f32.mrf.mxu0  ;;  %v6680_v22 = vadd.f32 %v2174_v27, %v1831_v43  ;;  %v1834_v23 = vadd.f32 %v5062_v56, %v6585_v11 }
 0x18e   : > { %v1794_v61 = vpop.f32.mrf.mxu1 }
 0x18f   : > { %v6683_v62 = vpop.f32.mrf.mxu0  ;;  %v6685_v15 = vadd.f32 %v5112_v13, %v1834_v23  ;;  %v1833_v47 = vadd.f32 %v1794_v61, %v6588_v37 }
 0x190   : > { %v6688_v29 = vpop.f32.mrf.mxu1 }
 0x191   : > { %v6690_v21 = vpop.f32.mrf.mxu0  ;;  %v6692_v59 = vadd.f32 %v2184_v46, %v1833_v47 }
 0x192   : > { %v6694_v54 = vpop.f32.mrf.mxu1 }
 0x193   : > { %v6696_v36 = vpop.f32.mrf.mxu0 }
 0x194   : > { %v6698_v8 = vpop.f32.mrf.mxu1 }
 0x195   : > { %v6700_v11 = vpop.f32.mrf.mxu0 }
 0x196   : > { %v6702_v9 = vpop.f32.mrf.mxu1 }
 0x197   : > { %v6704_v41 = vpop.f32.mrf.mxu0 }
 0x198   : > { %v6706_v18 = vpop.f32.mrf.mxu1 }
 0x199   : > { %v6708_v37 = vpop.f32.mrf.mxu0 }
 0x19a   : > { %v6710_v42 = vpop.f32.mrf.mxu1 }
 0x19b   : > { %v6712_v48 = vpop.f32.mrf.mxu0 }
 0x19c   : > { %v6714_v20 = vpop.f32.mrf.mxu1 }
 0x19d   : > { %v6716_v35 = vpop.f32.mrf.mxu0 }
 0x19e   : > { %v6718_v58 = vpop.f32.mrf.mxu1 }
 0x19f   : > { %v6720_v19 = vpop.f32.mrf.mxu0 }
 0x1a0   : > { %v6722_v44 = vpop.f32.mrf.mxu1 }
 0x1a1   : > { %v6724_v5 = vpop.f32.mrf.mxu0 }
 0x1a2   : > { %v6726_v27 = vpop.f32.mrf.mxu1 }
 0x1a3   : > { %v6728_v6 = vpop.f32.mrf.mxu0 }
 0x1a4   : > { %v6730_v55 = vpop.f32.mrf.mxu1 }
 0x1a5   : > { %v6732_v13 = vpop.f32.mrf.mxu0 }
 0x1a6   : > { %7341 = vst [vmem:[#allocation19_spill] sm:$0xff] %v6732_v13  ;;  %v6734_v12 = vpop.f32.mrf.mxu1 }
 0x1a7   : > { %v6736_v32 = vpop.f32.mrf.mxu0 }
 0x1a8   : > { %7342 = vst [vmem:[#allocation20_spill] sm:$0xff] %v6736_v32  ;;  %v6738_v46 = vpop.f32.mrf.mxu1 }
 0x1a9   : > { %v6740_v43 = vpop.f32.mrf.mxu0 }
 0x1aa   : > { %7343 = vst [vmem:[#allocation21_spill] sm:$0xff] %v6740_v43  ;;  %v6742_v56 = vpop.f32.mrf.mxu1 }
 0x1ab   : > { %7344 = vst [vmem:[#allocation22_spill] sm:$0xff] %v6742_v56  ;;  %v6744_v23 = vpop.f32.mrf.mxu0 }
 0x1ac   : > { %7345 = vst [vmem:[#allocation23_spill] sm:$0xff] %v6744_v23  ;;  %v6746_v61 = vpop.f32.mrf.mxu1 }
 0x1ad   : > { %7346 = vst [vmem:[#allocation24_spill] sm:$0xff] %v6746_v61  ;;  %v6748_v47 = vpop.f32.mrf.mxu0 }
 0x1ae   : > { %7347 = vst [vmem:[#allocation25_spill] sm:$0xff] %v6748_v47  ;;  %v6750_v16 = vpop.f32.mrf.mxu1 }
 0x1af   : > { %7348 = vst [vmem:[#allocation26_spill] sm:$0xff] %v6750_v16  ;;  %v6752_v7 = vpop.f32.mrf.mxu0 }
 0x1b0   : > { %7349 = vst [vmem:[#allocation27_spill] sm:$0xff] %v6752_v7  ;;  %v6754_v4 = vpop.f32.mrf.mxu1 }
 0x1b1   : > { %7350 = vst [vmem:[#allocation28_spill] sm:$0xff] %v6754_v4  ;;  %v6756_v57 = vpop.f32.mrf.mxu0 }
 0x1b2   : > { %7351 = vst [vmem:[#allocation29_spill] sm:$0xff] %v6756_v57  ;;  %v6758_v0 = vpop.f32.mrf.mxu1 }
 0x1b3   : > { %7352 = vst [vmem:[#allocation30_spill] sm:$0xff] %v6758_v0  ;;  %v6760_v32 = vpop.f32.mrf.mxu0 }
 0x1b4   : > { %7353 = vst [vmem:[#allocation31_spill] sm:$0xff] %v6760_v32  ;;  %v6762_v43 = vpop.f32.mrf.mxu1 }
 0x1b5   : > { %7354 = vst [vmem:[#allocation3_spill] sm:$0xff] %v6762_v43  ;;  %v6764_v40 = vpop.f32.mrf.mxu0 }
 0x1b6   : > { %7355 = vst [vmem:[#allocation32_spill] sm:$0xff] %v6764_v40  ;;  %v6766_v23 = vpop.f32.mrf.mxu1 }
 0x1b7   : > { %7356 = vst [vmem:[#allocation4_spill] sm:$0xff] %v6766_v23  ;;  %v6768_v31 = vpop.f32.mrf.mxu0 }
 0x1b8   : > { %7357 = vst [vmem:[#allocation33_spill] sm:$0xff] %v6768_v31  ;;  %v6770_v47 = vpop.f32.mrf.mxu1 }
 0x1b9   : > { %7358 = vst [vmem:[#allocation5_spill] sm:$0xff] %v6770_v47  ;;  %v5200_v16 = vpop.f32.mrf.mxu0 }
 0x1ba   : > { %v6772_v7 = vpop.f32.mrf.mxu1 }
 0x1bb   : > { %7359 = vst [vmem:[#allocation6_spill] sm:$0xff] %v6772_v7  ;;  %v6774_v4 = vpop.f32.mrf.mxu0 }
 0x1bc   : > { %7360 = vst [vmem:[#allocation7_spill] sm:$0xff] %v6774_v4  ;;  %v5150_v57 = vpop.f32.mrf.mxu1 }
 0x1bd   : > { %v5203_v60 = vpop.f32.mrf.mxu0  ;;  %v2606_v0 = vadd.f32 %v5150_v57, %v6657_v34 }
 0x1be   : > { %v6777_v32 = vpop.f32.mrf.mxu1 }
 0x1bf   : > { %7361 = vst [vmem:[#allocation8_spill] sm:$0xff] %v6777_v32  ;;  %v2935_v43 = vpop.f32.mrf.mxu0  ;;  %v6779_v61 = vadd.f32 %v5200_v16, %v2606_v0 }
 0x1c0   : > { %v5153_v40 = vpop.f32.mrf.mxu1 }
 0x1c1   : > { %7362 = vst [vmem:[#allocation34_spill] sm:$0xff] %v6779_v61  ;;  %v5206_v23 = vpop.f32.mrf.mxu0  ;;  %v2608_v31 = vadd.f32 %v5153_v40, %v6663_v30 }
 0x1c2   : > { %v2544_v49 = vpop.f32.mrf.mxu1 }
 0x1c3   : > { %v2945_v47 = vpop.f32.mrf.mxu0  ;;  %v6782_v56 = vadd.f32 %v5203_v60, %v2608_v31  ;;  %v2607_v7 = vadd.f32 %v2544_v49, %v6666_v25 }
 0x1c4   : > { %v5156_v4 = vpop.f32.mrf.mxu1 }
 0x1c5   : > { %v5209_v53 = vpop.f32.mrf.mxu0  ;;  %v6785_v13 = vadd.f32 %v2935_v43, %v2607_v7  ;;  %v2610_v57 = vadd.f32 %v5156_v4, %v6669_v10  ;;  %v2584_v7 = vadd.f32 %v6688_v29, %v6591_v38  ;;  %v2586_v38 = vadd.f32 %v6698_v8, %v6597_v28  ;;  %v6820_v28 = vld [vmem:[%s7197_s2] ss:$0 sm:$0xff] }
 0x1c6   : > { %v2554_v34 = vpop.f32.mrf.mxu1 }
 0x1c7   : > { %v2955_v32 = vpop.f32.mrf.mxu0  ;;  %v6788_v0 = vadd.f32 %v5206_v23, %v2610_v57  ;;  %v2609_v16 = vadd.f32 %v2554_v34, %v6672_v26  ;;  %v2583_v26 = vadd.f32 %v6694_v54, %v6594_v39  ;;  %v2585_v39 = vadd.f32 %v6702_v9, %v6600_v33 }
 0x1c8   : > { %v5159_v61 = vpop.f32.mrf.mxu1  ;;  %v2587_v33 = vadd.f32 %v6710_v42, %v6606_v63  ;;  %v2590_v9 = vadd.f32 %v6714_v20, %v6609_v1 }
 0x1c9   : > { %v5212_v40 = vpop.f32.mrf.mxu0  ;;  %v6791_v30 = vadd.f32 %v2945_v47, %v2609_v16  ;;  %v2612_v60 = vadd.f32 %v5159_v61, %v6675_v45  ;;  %v2975_v61 = vadd.f32 %v6678_v52, %v2584_v7  ;;  %v2974_v16 = vadd.f32 %v6683_v62, %v2583_v26 }
 0x1ca   : > { %v2564_v31 = vpop.f32.mrf.mxu1  ;;  %v2588_v52 = vadd.f32 %v6706_v18, %v6603_v51  ;;  %v2976_v51 = vadd.f32 %v6696_v36, %v2585_v39  ;;  %v2978_v20 = vadd.f32 %v6704_v41, %v2587_v33  ;;  %v2981_v36 = vadd.f32 %v6708_v37, %v2590_v9  ;;  %v7364_v9 = vld [vmem:[#allocation9_spill] sm:$0xff] }
 0x1cb   : > { %v2965_v49 = vpop.f32.mrf.mxu0  ;;  %v6796_v25 = vadd.f32 %v5209_v53, %v2612_v60  ;;  %v2611_v4 = vadd.f32 %v2564_v31, %v6680_v22  ;;  %v2589_v26 = vadd.f32 %v6718_v58, %v6612_v17  ;;  %v2591_v41 = vadd.f32 %v6726_v27, %v6618_v3 }
 0x1cc   : > { %v5162_v10 = vpop.f32.mrf.mxu1  ;;  %v2594_v37 = vadd.f32 %v6730_v55, %v6621_v24  ;;  %v2593_v17 = vadd.f32 %v6734_v12, %v6624_v2  ;;  %v2596_v24 = vadd.f32 %v6738_v46, %v6627_v50 }
 0x1cd   : > { %v5267_v43 = vpop.f32.mrf.mxu0  ;;  %v6801_v23 = vadd.f32 %v2955_v32, %v2611_v4  ;;  %v2614_v47 = vadd.f32 %v5162_v10, %v6685_v15  ;;  %v2977_v32 = vadd.f32 %v6690_v21, %v2586_v38  ;;  %v2979_v4 = vadd.f32 %v6700_v11, %v2588_v52 }
 0x1ce   : > { %v2574_v57 = vpop.f32.mrf.mxu1  ;;  %v2982_v52 = vadd.f32 %v6720_v19, %v2591_v41 }
 0x1cf   : > { %v3595_v45 = vpop.f32.mrf.mxu0  ;;  %v6807_v53 = vadd.f32 %v5212_v40, %v2614_v47  ;;  %v2613_v22 = vadd.f32 %v2574_v57, %v6692_v59  ;;  %v2592_v47 = vadd.f32 %v6722_v44, %v6615_v14 }
 0x1d0   : > { %v5217_v29 = vpop.f32.mrf.mxu1 }
 0x1d1   : > { %v5270_v34 = vpop.f32.mrf.mxu0  ;;  %v6813_v54 = vadd.f32 %v2965_v49, %v2613_v22  ;;  %v3365_v15 = vadd.f32 %v5217_v29, %v2975_v61  ;;  %v2983_v3 = vadd.f32 %v6716_v35, %v2592_v47 }
 0x1d2   : > { %v3205_v8 = vpop.f32.mrf.mxu1 }
 0x1d3   : > { %v3605_v59 = vpop.f32.mrf.mxu0  ;;  %v3755_v40 = vadd.f32 %v5267_v43, %v3365_v15  ;;  %v3364_v62 = vadd.f32 %v3205_v8, %v2974_v16  ;;  %v2980_v16 = vadd.f32 %v6712_v48, %v2589_v26  ;;  %v2985_v8 = vadd.f32 %v6724_v5, %v2594_v37  ;;  %v7367_v5 = vld [vmem:[#allocation24_spill] sm:$0xff] }
 0x1d4   : > { %v5220_v60 = vpop.f32.mrf.mxu1  ;;  %v7371_v26 = vld [vmem:[#allocation28_spill] sm:$0xff] }
 0x1d5   : > { %v5273_v31 = vpop.f32.mrf.mxu0  ;;  %v6829_v18 = vadd.f32 %v6820_v28, %v3755_v40  ;;  %v3754_v49 = vadd.f32 %v3595_v45, %v3364_v62  ;;  %v3367_v7 = vadd.f32 %v5220_v60, %v2977_v32  ;;  %v7363_v62 = vld [vmem:[#allocation19_spill] sm:$0xff]  ;;  %v7365_v60 = vld [vmem:[#allocation22_spill] sm:$0xff] }
 0x1d6   : > { %v3215_v21 = vpop.f32.mrf.mxu1  ;;  %v2987_v33 = vadd.f32 %v7363_v62, %v2596_v24  ;;  %v2595_v19 = vadd.f32 %v7365_v60, %v7364_v9  ;;  %v7379_v62 = vld [vmem:[#allocation25_spill] sm:$0xff]  ;;  %v7380_v60 = vld [vmem:[#allocation27_spill] sm:$0xff] }
 0x1d7   : > { %v3615_v10 = vpop.f32.mrf.mxu0  ;;  %v4530_v43 = vmul.f32 -1.442695, %v6829_v18  ;;  %v6834_v63 = vadd.f32 %v6820_v28, %v3754_v49  ;;  %v3757_v42 = vadd.f32 %v5270_v34, %v3367_v7  ;;  %v3366_v1 = vadd.f32 %v3215_v21, %v2976_v51 }
 0x1d8   : > { %v5223_v11 = vpop.f32.mrf.mxu1 }
 0x1d9   : > { %v5276_v57 = vpop.f32.mrf.mxu0  ;;  %5324 = vpow2.f32 %v4530_v43  ;;  %v4529_v45 = vmul.f32 -1.442695, %v6834_v63  ;;  %v6844_v61 = vadd.f32 %v6820_v28, %v3757_v42  ;;  %v3756_v38 = vadd.f32 %v3605_v59, %v3366_v1  ;;  %v7368_v42 = vld [vmem:[#allocation11_spill] sm:$0xff]  ;;  %v7369_v1 = vld [vmem:[#allocation26_spill] sm:$0xff] }
 0x1da   : > { %v3369_v58 = vadd.f32 %v5223_v11, %v2979_v4  ;;  %v3225_v14 = vpop.f32.mrf.mxu1  ;;  %v2984_v59 = vadd.f32 %v6728_v6, %v2593_v17  ;;  %v7372_v11 = vld [vmem:[#allocation13_spill] sm:$0xff] }
 0x1db   : > { %v3625_v44 = vpop.f32.mrf.mxu0  ;;  %5326 = vpow2.f32 %v4529_v45  ;;  %v4532_v22 = vmul.f32 -1.442695, %v6844_v61  ;;  %v6854_v29 = vadd.f32 %v6820_v28, %v3756_v38  ;;  %v3368_v34 = vadd.f32 %v3225_v14, %v2978_v20  ;;  %v7374_v14 = vld [vmem:[#allocation20_spill] sm:$0xff] }
 0x1dc   : > { %v3759_v27 = vadd.f32 %v5273_v31, %v3369_v58  ;;  %v5226_v55 = vpop.f32.mrf.mxu1  ;;  %v7366_v31 = vld [vmem:[#allocation10_spill] sm:$0xff]  ;;  %v2597_v20 = vadd.f32 %v7369_v1, %v7368_v42  ;;  %v7383_v42 = vld [vmem:[#allocation4_spill] sm:$0xff] }
 0x1dd   : > { %v5279_v2 = vpop.f32.mrf.mxu0  ;;  %5328 = vpow2.f32 %v4532_v22  ;;  %v4531_v12 = vmul.f32 -1.442695, %v6854_v29  ;;  %v3758_v39 = vadd.f32 %v3615_v10, %v3368_v34  ;;  %v3371_v15 = vadd.f32 %v5226_v55, %v2981_v36  ;;  %v7370_v36 = vld [vmem:[#allocation12_spill] sm:$0xff]  ;;  %v7375_v22 = vld [vmem:[#allocation21_spill] sm:$0xff] }
 0x1de   : > { %v6865_v48 = vadd.f32 %v6820_v28, %v3759_v27  ;;  %v3235_v35 = vpop.f32.mrf.mxu1  ;;  %v2598_v51 = vadd.f32 %v7367_v5, %v7366_v31  ;;  %v2600_v47 = vadd.f32 %v7371_v26, %v7370_v36 }
 0x1df   : > { %v3635_v32 = vpop.f32.mrf.mxu0  ;;  %5330 = vpow2.f32 %v4531_v12  ;;  %v6868_v50 = vadd.f32 %v6820_v28, %v3758_v39  ;;  %v3761_v46 = vadd.f32 %v5276_v57, %v3371_v15  ;;  %v3370_v40 = vadd.f32 %v3235_v35, %v2980_v16  ;;  %v7373_v57 = vld [vmem:[#allocation30_spill] sm:$0xff] }
 0x1e0   : > { %v4534_v6 = vmul.f32 -1.442695, %v6865_v48  ;;  %v5229_v49 = vpop.f32.mrf.mxu1  ;;  %v2599_v45 = vadd.f32 %v7373_v57, %v7372_v11  ;;  %v2989_v34 = vadd.f32 %v7375_v22, %v2598_v51  ;;  %v7376_v16 = vld [vmem:[#allocation14_spill] sm:$0xff]  ;;  %v6900_v9 = vadd.f32 %v7379_v62, %v2600_v47 }
 0x1e1   : > { %v5282_v7 = vpop.f32.mrf.mxu0  ;;  %v4533_v4 = vmul.f32 -1.442695, %v6868_v50  ;;  %v6878_v21 = vadd.f32 %v6820_v28, %v3761_v46  ;;  %v3760_v10 = vadd.f32 %v3625_v44, %v3370_v40  ;;  %v3373_v43 = vadd.f32 %v5229_v49, %v2983_v3  ;;  %v7377_v3 = vld [vmem:[#allocation3_spill] sm:$0xff] }
 0x1e2   : > { %5332 = vpow2.f32 %v4534_v6  ;;  %v3245_v38 = vpop.f32.mrf.mxu1  ;;  %v2986_v44 = vadd.f32 %v7374_v14, %v2595_v19  ;;  %v2602_v24 = vadd.f32 %v7377_v3, %v7376_v16  ;;  %v7378_v40 = vld [vmem:[#allocation23_spill] sm:$0xff]  ;;  %v6903_v19 = vadd.f32 %v7380_v60, %v2599_v45  ;;  %v7384_v45 = vld [vmem:[#allocation16_spill] sm:$0xff] }
 0x1e3   : > { %v3645_v41 = vpop.f32.mrf.mxu0  ;;  %5334 = vpow2.f32 %v4533_v4  ;;  %v4536_v37 = vmul.f32 -1.442695, %v6878_v21  ;;  %v6888_v17 = vadd.f32 %v6820_v28, %v3760_v10  ;;  %v3763_v58 = vadd.f32 %v5279_v2, %v3373_v43  ;;  %v7381_v10 = vld [vmem:[#allocation29_spill] sm:$0xff]  ;;  %v7382_v43 = vld [vmem:[#allocation15_spill] sm:$0xff] }
 0x1e4   : > { %v3372_v27 = vadd.f32 %v3245_v38, %v2982_v52  ;;  %v5232_v55 = vpop.f32.mrf.mxu1  ;;  %v2988_v2 = vadd.f32 %v7378_v40, %v2597_v20  ;;  %v2601_v1 = vadd.f32 %v7383_v42, %v7382_v43  ;;  %v7385_v38 = vld [vmem:[#allocation5_spill] sm:$0xff] }
 0x1e5   : > { %v5285_v12 = vpop.f32.mrf.mxu0  ;;  %5336 = vpow2.f32 %v4536_v37  ;;  %v4535_v39 = vmul.f32 -1.442695, %v6888_v17  ;;  %v6896_v15 = vadd.f32 %v6820_v28, %v3763_v58  ;;  %v3375_v35 = vadd.f32 %v5232_v55, %v2985_v8  ;;  %v7386_v55 = vld [vmem:[#allocation31_spill] sm:$0xff] }
 0x1e6   : > { %v5325_v46 = vpop.eup %5324  ;;  %v3762_v31 = vadd.f32 %v3635_v32, %v3372_v27  ;;  %v3255_v52 = vpop.f32.mrf.mxu1  ;;  %v6907_v8 = vadd.f32 %v7381_v10, %v2602_v24  ;;  %v2604_v37 = vadd.f32 %v7385_v38, %v7384_v45 }
 0x1e7   : > { %v3655_v5 = vpop.f32.mrf.mxu0  ;;  %v3922_v51 = vadd.f32 1.0, %v5325_v46  ;;  %5338 = vpow2.f32 %v4535_v39  ;;  %v4538_v6 = vmul.f32 -1.442695, %v6896_v15  ;;  %v3765_v49 = vadd.f32 %v5282_v7, %v3375_v35 }
 0x1e8   : > { %v5327_v4 = vpop.eup %5326  ;;  %v6912_v20 = vadd.f32 %v6820_v28, %v3762_v31  ;;  %v3374_v36 = vadd.f32 %v3255_v52, %v2984_v59  ;;  %v5235_v26 = vpop.f32.mrf.mxu1  ;;  %v6922_v39 = vadd.f32 %v7386_v55, %v2601_v1  ;;  %v7387_v31 = vld [vmem:[#allocation32_spill] sm:$0xff]  ;;  %v7388_v1 = vld [vmem:[#allocation17_spill] sm:$0xff] }
 0x1e9   : > { %v5288_v32 = vpop.f32.mrf.mxu0  ;;  %5340 = vrcp.f32 %v3922_v51  ;;  %v3921_v47 = vadd.f32 1.0, %v5327_v4  ;;  %v6915_v11 = vadd.f32 %v6820_v28, %v3765_v49  ;;  %v3377_v57 = vadd.f32 %v5235_v26, %v2987_v33 }
 0x1ea   : > { %v5329_v7 = vpop.eup %5328  ;;  %5342 = vpow2.f32 %v4538_v6  ;;  %v4537_v58 = vmul.f32 -1.442695, %v6912_v20  ;;  %v3764_v14 = vadd.f32 %v3645_v41, %v3374_v36  ;;  %v3265_v22 = vpop.f32.mrf.mxu1  ;;  %v6931_v52 = vadd.f32 %v7387_v31, %v2604_v37  ;;  %v7389_v36 = vld [vmem:[#allocation6_spill] sm:$0xff]  ;;  %v7391_v37 = vld [vmem:[#allocation8_spill] sm:$0xff] }
 0x1eb   : > { %v3665_v16 = vpop.f32.mrf.mxu0  ;;  %5344 = vrcp.f32 %v3921_v47  ;;  %v3924_v59 = vadd.f32 1.0, %v5329_v7  ;;  %v4540_v3 = vmul.f32 -1.442695, %v6915_v11  ;;  %v3767_v24 = vadd.f32 %v5285_v12, %v3377_v57 }
 0x1ec   : > { %v5331_v27 = vpop.eup %5330  ;;  %5346 = vpow2.f32 %v4537_v58  ;;  %v6925_v33 = vadd.f32 %v6820_v28, %v3764_v14  ;;  %v3376_v35 = vadd.f32 %v3265_v22, %v2986_v44  ;;  %v5238_v46 = vpop.f32.mrf.mxu1  ;;  %v2603_v26 = vadd.f32 %v7389_v36, %v7388_v1 }
 0x1ed   : > { %v5291_v40 = vpop.f32.mrf.mxu0  ;;  %5348 = vrcp.f32 %v3924_v59  ;;  %v3923_v41 = vadd.f32 1.0, %v5331_v27  ;;  %v6928_v62 = vadd.f32 %v6820_v28, %v3767_v24  ;;  %v3379_v60 = vadd.f32 %v5238_v46, %v2989_v34 }
 0x1ee   : > { %5350 = vpow2.f32 %v4540_v3  ;;  %v4539_v12 = vmul.f32 -1.442695, %v6925_v33  ;;  %v3766_v51 = vadd.f32 %v3655_v5, %v3376_v35  ;;  %v3275_v6 = vpop.f32.mrf.mxu1  ;;  %v7392_v35 = vld [vmem:[#allocation33_spill] sm:$0xff] }
 0x1ef   : > { %v3675_v49 = vpop.f32.mrf.mxu0  ;;  %v5333_v4 = vpop.eup %5332  ;;  %5352 = vrcp.f32 %v3923_v41  ;;  %v4542_v44 = vmul.f32 -1.442695, %v6928_v62  ;;  %v3769_v10 = vadd.f32 %v5288_v32, %v3379_v60  ;;  %v3378_v43 = vadd.f32 %v3275_v6, %v2988_v2  ;;  %v7390_v2 = vld [vmem:[#allocation18_spill] sm:$0xff] }
 0x1f0   : > { %v5335_v42 = vpop.eup %5334  ;;  %v3926_v34 = vadd.f32 1.0, %v5333_v4  ;;  %5354 = vpow2.f32 %v4539_v12  ;;  %v6938_v47 = vadd.f32 %v6820_v28, %v3766_v51  ;;  %v5241_v57 = vpop.f32.mrf.mxu1  ;;  %v2605_v58 = vadd.f32 %v7391_v37, %v7390_v2 }
 0x1f1   : > { %v5294_v5 = vpop.f32.mrf.mxu0  ;;  %v3925_v7 = vadd.f32 1.0, %v5335_v42  ;;  %5356 = vpow2.f32 %v4542_v44  ;;  %v6941_v45 = vadd.f32 %v6820_v28, %v3769_v10  ;;  %v3768_v38 = vadd.f32 %v3665_v16, %v3378_v43  ;;  %v7393_v44 = vld [vmem:[#allocation7_spill] sm:$0xff]  ;;  %v4050_v43 = vld [vmem:[%s6951_s19 + $0x8] sm:$0xff] }
 0x1f2   : > { %v5337_v32 = vpop.eup %5336  ;;  %5358 = vrcp.f32 %v3926_v34  ;;  %v4541_v14 = vmul.f32 -1.442695, %v6938_v47  ;;  %v3381_v22 = vadd.f32 %v5241_v57, %v6900_v9  ;;  %v3285_v59 = vpop.f32.mrf.mxu1  ;;  %v6958_v46 = vadd.f32 %v7392_v35, %v2603_v26 }
 0x1f3   : > { %v3685_v3 = vpop.f32.mrf.mxu0  ;;  %5360 = vrcp.f32 %v3925_v7  ;;  %v3928_v24 = vadd.f32 1.0, %v5337_v32  ;;  %v4544_v16 = vmul.f32 -1.442695, %v6941_v45  ;;  %v6955_v27 = vadd.f32 %v6820_v28, %v3768_v38  ;;  %v4049_v7 = vld [vmem:[%s6951_s19] sm:$0xff] }
 0x1f4   : > { %v5339_v55 = vpop.eup %5338  ;;  %5362 = vpow2.f32 %v4541_v14  ;;  %v3771_v9 = vadd.f32 %v5291_v40, %v3381_v22  ;;  %v3380_v41 = vadd.f32 %v3285_v59, %v6903_v19  ;;  %v5244_v60 = vpop.f32.mrf.mxu1  ;;  %v6964_v10 = vadd.f32 %v7393_v44, %v2605_v58  ;;  %v4052_v59 = vld [vmem:[%s6951_s19 + $0x18] sm:$0xff] }
 0x1f5   : > { %v5297_v31 = vpop.f32.mrf.mxu0  ;;  %5364 = vrcp.f32 %v3928_v24  ;;  %v3927_v12 = vadd.f32 1.0, %v5339_v55  ;;  %v4543_v51 = vmul.f32 -1.442695, %v6955_v27  ;;  %v3383_v6 = vadd.f32 %v5244_v60, %v6907_v8 }
 0x1f6   : > { %v5341_v4 = vpop.eup %5340  ;;  %5366 = vpow2.f32 %v4544_v16  ;;  %v6968_v40 = vadd.f32 %v6820_v28, %v3771_v9  ;;  %v3770_v19 = vadd.f32 %v3675_v49, %v3380_v41  ;;  %v3295_v42 = vpop.f32.mrf.mxu1 }
 0x1f7   : > { %v3695_v1 = vpop.f32.mrf.mxu0  ;;  %v5343_v36 = vpop.eup %5342  ;;  %v4018_v26 = vmul.f32 %v5341_v4, %v6829_v18  ;;  %5368 = vrcp.f32 %v3927_v12  ;;  %v3773_v34 = vadd.f32 %v5294_v5, %v3383_v6  ;;  %v3382_v8 = vadd.f32 %v3295_v42, %v6922_v39 }
 0x1f8   : > { %v5345_v57 = vpop.eup %5344  ;;  %v3930_v38 = vadd.f32 1.0, %v5343_v36  ;;  %5370 = vpow2.f32 %v4543_v51  ;;  %v4546_v49 = vmul.f32 -1.442695, %v6968_v40  ;;  %v6981_v32 = vadd.f32 %v6820_v28, %v3770_v19  ;;  %v5247_v18 = vpop.f32.mrf.mxu1  ;;  %v4051_v51 = vld [vmem:[%s6951_s19 + $0x10] sm:$0xff] }
 0x1f9   : > { %v6983_v5 = vpop.f32.mrf.mxu0  ;;  %v5347_v39 = vpop.eup %5346  ;;  %v4082_v2 = vadd.f32 %v4050_v43, %v4018_v26  ;;  %v4017_v37 = vmul.f32 %v5345_v57, %v6834_v63  ;;  %v6987_v58 = vadd.f32 %v6820_v28, %v3773_v34  ;;  %v3772_v14 = vadd.f32 %v3685_v3, %v3382_v8 }
 0x1fa   : > { %v5349_v22 = vpop.eup %5348  ;;  %5372 = vrcp.f32 %v3930_v38  ;;  %v3929_v24 = vadd.f32 1.0, %v5347_v39  ;;  %v4545_v16 = vmul.f32 -1.442695, %v6981_v32  ;;  %v3385_v55 = vadd.f32 %v5247_v18, %v6931_v52  ;;  %v3305_v35 = vpop.f32.mrf.mxu1 }
 0x1fb   : > { %v6992_v9 = vpop.f32.mrf.mxu0  ;;  %v5351_v41 = vpop.eup %5350  ;;  %4114 = vst.msk [vmem:[%s6976_s22 + $0x8] sm:$0xff] %vm218_vm1, %v4082_v2  ;;  %v4081_v63 = vadd.f32 %v4049_v7, %v4017_v37  ;;  %v4020_v60 = vmul.f32 %v5349_v22, %v6844_v61  ;;  %5374 = vpow2.f32 %v4546_v49  ;;  %v4548_v3 = vmul.f32 -1.442695, %v6987_v58  ;;  %v4054_v49 = vld [vmem:[%s6951_s19 + $0x28] sm:$0xff]  ;;  %v4053_v37 = vld [vmem:[%s6951_s19 + $0x20] sm:$0xff] }
 0x1fc   : > { %v5353_v12 = vpop.eup %5352  ;;  %5376 = vrcp.f32 %v3929_v24  ;;  %v3932_v6 = vadd.f32 1.0, %v5351_v41  ;;  %v7000_v4 = vadd.f32 %v6820_v28, %v3772_v14  ;;  %v3775_v52 = vadd.f32 %v5297_v31, %v3385_v55  ;;  %v5250_v44 = vpop.f32.mrf.mxu1  ;;  %v7394_v22 = vld [vmem:[#allocation34_spill] sm:$0xff] }
 0x1fd   : > { %v7002_v43 = vpop.f32.mrf.mxu0  ;;  %v5355_v19 = vpop.eup %5354  ;;  %4113 = vst.msk [vmem:[%s6976_s22] sm:$0xff] %vm218_vm1, %v4081_v63  ;;  %v4084_v61 = vadd.f32 %v4052_v59, %v4020_v60  ;;  %v4019_v42 = vmul.f32 %v5353_v12, %v6854_v29  ;;  %5378 = vpow2.f32 %v4545_v16  ;;  %v3384_v36 = vadd.f32 %v3305_v35, %v6958_v46  ;;  %v4056_v60 = vld [vmem:[%s6951_s19 + $0x38] sm:$0xff] }
 0x1fe   : > { %v5357_v26 = vpop.eup %5356  ;;  %5380 = vrcp.f32 %v3932_v6  ;;  %v3931_v34 = vadd.f32 1.0, %v5355_v19  ;;  %v4547_v31 = vmul.f32 -1.442695, %v7000_v4  ;;  %v7010_v8 = vadd.f32 %v6820_v28, %v3775_v52  ;;  %v3315_v57 = vpop.f32.mrf.mxu1 }
 0x1ff   : > { %v7012_v7 = vpop.f32.mrf.mxu0  ;;  %v5359_v38 = vpop.eup %5358  ;;  %4116 = vst.msk [vmem:[%s6976_s22 + $0x18] sm:$0xff] %vm218_vm1, %v4084_v61  ;;  %v4083_v29 = vadd.f32 %v4051_v51, %v4019_v42  ;;  %v3934_v18 = vadd.f32 1.0, %v5357_v26  ;;  %5382 = vpow2.f32 %v4548_v3  ;;  %v3774_v46 = vadd.f32 %v3695_v1, %v3384_v36 }
 0x200   : > { %v5361_v39 = vpop.eup %5360  ;;  %v4022_v2 = vmul.f32 %v5359_v38, %v6865_v48  ;;  %5384 = vrcp.f32 %v3931_v34  ;;  %v4550_v14 = vmul.f32 -1.442695, %v7010_v8  ;;  %v3387_v59 = vadd.f32 %v5250_v44, %v7394_v22  ;;  %v5253_v24 = vpop.f32.mrf.mxu1 }
 0x201   : > { %v7021_v16 = vpop.f32.mrf.mxu0  ;;  %v5363_v55 = vpop.eup %5362  ;;  %4115 = vst.msk [vmem:[%s6976_s22 + $0x10] sm:$0xff] %vm218_vm1, %v4083_v29  ;;  %v4021_v35 = vmul.f32 %v5361_v39, %v6868_v50  ;;  %5386 = vrcp.f32 %v3934_v18  ;;  %v7027_v1 = vadd.f32 %v6820_v28, %v3774_v46  ;;  %v3386_v48 = vadd.f32 %v3315_v57, %v6964_v10  ;;  %v4055_v10 = vld [vmem:[%s6951_s19 + $0x30] sm:$0xff]  ;;  %v4058_v39 = vld [vmem:[%s6951_s19 + $0x48] sm:$0xff] }
 0x202   : > { %v5365_v41 = vpop.eup %5364  ;;  %v4086_v63 = vadd.f32 %v4054_v49, %v4022_v2  ;;  %v3933_v3 = vadd.f32 1.0, %v5363_v55  ;;  %5388 = vpow2.f32 %v4547_v31  ;;  %v3777_v12 = vadd.f32 %v6983_v5, %v3387_v59  ;;  %v3325_v51 = vpop.f32.mrf.mxu1 }
 0x203   : > { %v5367_v6 = vpop.eup %5366  ;;  %v4085_v52 = vadd.f32 %v4053_v37, %v4021_v35  ;;  %v4024_v50 = vmul.f32 %v5365_v41, %v6878_v21  ;;  %5390 = vpow2.f32 %v4550_v14  ;;  %v4549_v44 = vmul.f32 -1.442695, %v7027_v1  ;;  %v3725_v26 = vpop.f32.mrf.mxu0 }
 0x204   : > { %v5369_v19 = vpop.eup %5368  ;;  %4118 = vst.msk [vmem:[%s6976_s22 + $0x28] sm:$0xff] %vm218_vm1, %v4086_v63  ;;  %5392 = vrcp.f32 %v3933_v3  ;;  %v3936_v61 = vadd.f32 1.0, %v5367_v6  ;;  %v7038_v42 = vadd.f32 %v6820_v28, %v3777_v12  ;;  %v3776_v5 = vadd.f32 %v6992_v9, %v3386_v48  ;;  %v5256_v36 = vpop.f32.mrf.mxu1  ;;  %v4057_v48 = vld [vmem:[%s6951_s19 + $0x40] sm:$0xff]  ;;  %v4060_v12 = vld [vmem:[%s6951_s19 + $0x58] sm:$0xff] }
 0x205   : > { %v5371_v34 = vpop.eup %5370  ;;  %4117 = vst.msk [vmem:[%s6976_s22 + $0x20] sm:$0xff] %vm218_vm1, %v4085_v52  ;;  %v4088_v21 = vadd.f32 %v4056_v60, %v4024_v50  ;;  %v4023_v31 = vmul.f32 %v5369_v19, %v6888_v17  ;;  %5394 = vpow2.f32 %v4549_v44  ;;  %v3389_v57 = vadd.f32 %v5253_v24, %v6782_v56  ;;  %v5309_v55 = vpop.f32.mrf.mxu0 }
 0x206   : > { %5396 = vrcp.f32 %v3936_v61  ;;  %v3935_v38 = vadd.f32 1.0, %v5371_v34  ;;  %v4552_v29 = vmul.f32 -1.442695, %v7038_v42  ;;  %v7047_v49 = vadd.f32 %v6820_v28, %v3776_v5  ;;  %v3335_v9 = vpop.f32.mrf.mxu1  ;;  %v4059_v5 = vld [vmem:[%s6951_s19 + $0x50] sm:$0xff] }
 0x207   : > { %v5373_v18 = vpop.eup %5372  ;;  %4120 = vst.msk [vmem:[%s6976_s22 + $0x38] sm:$0xff] %vm218_vm1, %v4088_v21  ;;  %v4087_v46 = vadd.f32 %v4055_v10, %v4023_v31  ;;  %v3779_v17 = vadd.f32 %v7002_v43, %v3389_v57  ;;  %v3388_v2 = vadd.f32 %v3325_v51, %v6785_v13  ;;  %v3391_v56 = vadd.f32 %v5256_v36, %v6788_v0  ;;  %v3735_v19 = vpop.f32.mrf.mxu0 }
 0x208   : > { %v5375_v37 = vpop.eup %5374  ;;  %v4026_v14 = vmul.f32 %v5373_v18, %v6896_v15  ;;  %5398 = vrcp.f32 %v3935_v38  ;;  %v4551_v22 = vmul.f32 -1.442695, %v7047_v49  ;;  %v3390_v59 = vadd.f32 %v3335_v9, %v6791_v30  ;;  %v5259_v24 = vpop.f32.mrf.mxu1  ;;  %v4062_v38 = vld [vmem:[%s6951_s19 + $0x68] sm:$0xff] }
 0x209   : > { %v5377_v35 = vpop.eup %5376  ;;  %4119 = vst.msk [vmem:[%s6976_s22 + $0x30] sm:$0xff] %vm218_vm1, %v4087_v46  ;;  %v3938_v43 = vadd.f32 1.0, %v5375_v37  ;;  %5400 = vpow2.f32 %v4552_v29  ;;  %v7062_v13 = vadd.f32 %v6820_v28, %v3779_v17  ;;  %v3778_v0 = vadd.f32 %v7012_v7, %v3388_v2  ;;  %v5312_v2 = vpop.f32.mrf.mxu0 }
 0x20a   : > { %v5379_v15 = vpop.eup %5378  ;;  %v4090_v41 = vadd.f32 %v4058_v39, %v4026_v14  ;;  %v4025_v63 = vmul.f32 %v5377_v35, %v6912_v20  ;;  %5402 = vpow2.f32 %v4551_v22  ;;  %v3781_v30 = vadd.f32 %v7021_v16, %v3391_v56  ;;  %v3345_v60 = vpop.f32.mrf.mxu1  ;;  %v4061_v14 = vld [vmem:[%s6951_s19 + $0x60] sm:$0xff] }
 0x20b   : > { %v5381_v3 = vpop.eup %5380  ;;  %5404 = vrcp.f32 %v3938_v43  ;;  %v3937_v51 = vadd.f32 1.0, %v5379_v15  ;;  %v4554_v6 = vmul.f32 -1.442695, %v7062_v13  ;;  %v7070_v52 = vadd.f32 %v6820_v28, %v3778_v0  ;;  %v4064_v43 = vld [vmem:[%s6951_s19 + $0x78] sm:$0xff] }
 0x20c   : > { %v5383_v7 = vpop.eup %5382  ;;  %4122 = vst.msk [vmem:[%s6976_s22 + $0x48] sm:$0xff] %vm218_vm1, %v4090_v41  ;;  %v4089_v50 = vadd.f32 %v4057_v48, %v4025_v63  ;;  %v4028_v20 = vmul.f32 %v5381_v3, %v6915_v11  ;;  %v7076_v16 = vadd.f32 %v6820_v28, %v3781_v30  ;;  %v3780_v44 = vadd.f32 %v3725_v26, %v3390_v59  ;;  %v5262_v10 = vpop.f32.mrf.mxu1 }
 0x20d   : > { %v5385_v61 = vpop.eup %5384  ;;  %5406 = vrcp.f32 %v3937_v51  ;;  %v3940_v36 = vadd.f32 1.0, %v5383_v7  ;;  %v4553_v34 = vmul.f32 -1.442695, %v7070_v52  ;;  %v3393_v21 = vadd.f32 %v5259_v24, %v6796_v25 }
 0x20e   : > { %v5387_v31 = vpop.eup %5386  ;;  %4121 = vst.msk [vmem:[%s6976_s22 + $0x40] sm:$0xff] %vm218_vm1, %v4089_v50  ;;  %v4092_v57 = vadd.f32 %v4060_v12, %v4028_v20  ;;  %v4027_v11 = vmul.f32 %v5385_v61, %v6925_v33  ;;  %5408 = vpow2.f32 %v4554_v6  ;;  %v4556_v26 = vmul.f32 -1.442695, %v7076_v16  ;;  %v3355_v56 = vpop.f32.mrf.mxu1  ;;  %v4063_v12 = vld [vmem:[%s6951_s19 + $0x70] sm:$0xff] }
 0x20f   : > { %v5389_v29 = vpop.eup %5388  ;;  %v4030_v9 = vmul.f32 %v5387_v31, %v6928_v62  ;;  %5410 = vrcp.f32 %v3940_v36  ;;  %v7088_v18 = vadd.f32 %v6820_v28, %v3780_v44  ;;  %v3783_v46 = vadd.f32 %v5309_v55, %v3393_v21  ;;  %v4066_v36 = vld [vmem:[%s6951_s19 + $0x88] sm:$0xff] }
 0x210   : > { %v5391_v25 = vpop.eup %5390  ;;  %4124 = vst.msk [vmem:[%s6976_s22 + $0x58] sm:$0xff] %vm218_vm1, %v4092_v57  ;;  %v4091_v39 = vadd.f32 %v4059_v5, %v4027_v11  ;;  %v3939_v17 = vadd.f32 1.0, %v5389_v29  ;;  %5412 = vpow2.f32 %v4553_v34  ;;  %v3392_v33 = vadd.f32 %v3345_v60, %v6801_v23  ;;  %v3745_v60 = vpop.f32.mrf.mxu0 }
 0x211   : > { %v5393_v37 = vpop.eup %5392  ;;  %v4094_v62 = vadd.f32 %v4062_v38, %v4030_v9  ;;  %v3942_v22 = vadd.f32 1.0, %v5391_v25  ;;  %5414 = vpow2.f32 %v4556_v26  ;;  %v4555_v59 = vmul.f32 -1.442695, %v7088_v18 }
 0x212   : > { %v5395_v24 = vpop.eup %5394  ;;  %4123 = vst.msk [vmem:[%s6976_s22 + $0x50] sm:$0xff] %vm218_vm1, %v4091_v39  ;;  %v4029_v55 = vmul.f32 %v5393_v37, %v6938_v47  ;;  %5416 = vrcp.f32 %v3939_v17  ;;  %v7099_v23 = vadd.f32 %v6820_v28, %v3783_v46  ;;  %v3782_v35 = vadd.f32 %v3735_v19, %v3392_v33 }
 0x213   : > { %v5397_v48 = vpop.eup %5396  ;;  %4126 = vst.msk [vmem:[%s6976_s22 + $0x68] sm:$0xff] %vm218_vm1, %v4094_v62  ;;  %5418 = vrcp.f32 %v3942_v22  ;;  %v3941_v0 = vadd.f32 1.0, %v5395_v24  ;;  %v3395_v15 = vadd.f32 %v5262_v10, %v6807_v53  ;;  %v3394_v41 = vadd.f32 %v3355_v56, %v6813_v54  ;;  %v4067_v56 = vld [vmem:[%s6951_s19 + $0x90] sm:$0xff]  ;;  %v4070_v22 = vld [vmem:[%s6951_s19 + $0xa8] sm:$0xff] }
 0x214   : > { %v4093_v63 = vadd.f32 %v4061_v14, %v4029_v55  ;;  %v4032_v47 = vmul.f32 %v5397_v48, %v6941_v45  ;;  %5420 = vpow2.f32 %v4555_v59  ;;  %v4558_v30 = vmul.f32 -1.442695, %v7099_v23 }
 0x215   : > { %v5399_v3 = vpop.eup %5398  ;;  %5422 = vrcp.f32 %v3941_v0  ;;  %v7110_v51 = vadd.f32 %v6820_v28, %v3782_v35  ;;  %v3785_v6 = vadd.f32 %v5312_v2, %v3395_v15  ;;  %v3784_v7 = vadd.f32 %v3745_v60, %v3394_v41  ;;  %v4069_v35 = vld [vmem:[%s6951_s19 + $0xa0] sm:$0xff]  ;;  %v4071_v60 = vld [vmem:[%s6951_s19 + $0xb0] sm:$0xff] }
 0x216   : > { %v5401_v53 = vpop.eup %5400  ;;  %4125 = vst.msk [vmem:[%s6976_s22 + $0x60] sm:$0xff] %vm218_vm1, %v4093_v63  ;;  %v4096_v54 = vadd.f32 %v4064_v43, %v4032_v47  ;;  %v4031_v45 = vmul.f32 %v5399_v3, %v6955_v27  ;;  %5424 = vpow2.f32 %v4558_v30 }
 0x217   : > { %v5403_v50 = vpop.eup %5402  ;;  %v3944_v20 = vadd.f32 1.0, %v5401_v53  ;;  %v4557_v44 = vmul.f32 -1.442695, %v7110_v51  ;;  %v7117_v19 = vadd.f32 %v6820_v28, %v3785_v6  ;;  %v7120_v10 = vadd.f32 %v6820_v28, %v3784_v7  ;;  %v4065_v28 = vld [vmem:[%s6951_s19 + $0x80] sm:$0xff] }
 0x218   : > { %v5405_v61 = vpop.eup %5404  ;;  %4128 = vst.msk [vmem:[%s6976_s22 + $0x78] sm:$0xff] %vm218_vm1, %v4096_v54  ;;  %v4095_v5 = vadd.f32 %v4063_v12, %v4031_v45  ;;  %v3943_v27 = vadd.f32 1.0, %v5403_v50 }
 0x219   : > { %v4034_v34 = vmul.f32 %v5405_v61, %v6968_v40  ;;  %5426 = vrcp.f32 %v3944_v20  ;;  %v4560_v21 = vmul.f32 -1.442695, %v7117_v19  ;;  %v4559_v31 = vmul.f32 -1.442695, %v7120_v10  ;;  %v4068_v40 = vld [vmem:[%s6951_s19 + $0x98] sm:$0xff]  ;;  %v4074_v20 = vld [vmem:[%s6951_s19 + $0xc8] sm:$0xff] }
 0x21a   : > { %v5407_v57 = vpop.eup %5406  ;;  %4127 = vst.msk [vmem:[%s6976_s22 + $0x70] sm:$0xff] %vm218_vm1, %v4095_v5  ;;  %5428 = vrcp.f32 %v3943_v27  ;;  %v4073_v61 = vld [vmem:[%s6951_s19 + $0xc0] sm:$0xff] }
 0x21b   : > { %v5409_v11 = vpop.eup %5408  ;;  %v4098_v38 = vadd.f32 %v4066_v36, %v4034_v34  ;;  %v4033_v26 = vmul.f32 %v5407_v57, %v6981_v32  ;;  %5430 = vpow2.f32 %v4557_v44  ;;  %v4076_v34 = vld [vmem:[%s6951_s19 + $0xd8] sm:$0xff] }
 0x21c   : > { %v5411_v29 = vpop.eup %5410  ;;  %v3946_v9 = vadd.f32 1.0, %v5409_v11  ;;  %5432 = vpow2.f32 %v4560_v21 }
 0x21d   : > { %v5413_v46 = vpop.eup %5412  ;;  %4130 = vst.msk [vmem:[%s6976_s22 + $0x88] sm:$0xff] %vm218_vm1, %v4098_v38  ;;  %v4097_v25 = vadd.f32 %v4065_v28, %v4033_v26  ;;  %v4036_v39 = vmul.f32 %v5411_v29, %v6987_v58  ;;  %5434 = vpow2.f32 %v4559_v31  ;;  %v4075_v28 = vld [vmem:[%s6951_s19 + $0xd0] sm:$0xff] }
 0x21e   : > { %v5415_v17 = vpop.eup %5414  ;;  %5436 = vrcp.f32 %v3946_v9  ;;  %v3945_v33 = vadd.f32 1.0, %v5413_v46  ;;  %v4077_v9 = vld [vmem:[%s6951_s19 + $0xe0] sm:$0xff] }
 0x21f   : > { %v5417_v32 = vpop.eup %5416  ;;  %4129 = vst.msk [vmem:[%s6976_s22 + $0x80] sm:$0xff] %vm218_vm1, %v4097_v25  ;;  %v4100_v2 = vadd.f32 %v4068_v40, %v4036_v39  ;;  %v3948_v37 = vadd.f32 1.0, %v5415_v17  ;;  %v4080_v25 = vld [vmem:[%s6951_s19 + $0xf8] sm:$0xff] }
 0x220   : > { %v5419_v62 = vpop.eup %5418  ;;  %v4035_v14 = vmul.f32 %v5417_v32, %v7000_v4  ;;  %5438 = vrcp.f32 %v3945_v33  ;;  %v4079_v33 = vld [vmem:[%s6951_s19 + $0xf0] sm:$0xff] }
 0x221   : > { %v5421_v59 = vpop.eup %5420  ;;  %4132 = vst.msk [vmem:[%s6976_s22 + $0x98] sm:$0xff] %vm218_vm1, %v4100_v2  ;;  %v4038_v58 = vmul.f32 %v5419_v62, %v7010_v8  ;;  %5440 = vrcp.f32 %v3948_v37  ;;  %v4072_v8 = vld [vmem:[%s6951_s19 + $0xb8] sm:$0xff] }
 0x222   : > { %v5423_v24 = vpop.eup %5422  ;;  %v4099_v55 = vadd.f32 %v4067_v56, %v4035_v14  ;;  %v3947_v48 = vadd.f32 1.0, %v5421_v59 }
 0x223   : > { %v5425_v43 = vpop.eup %5424  ;;  %v4102_v0 = vadd.f32 %v4070_v22, %v4038_v58  ;;  %v4037_v4 = vmul.f32 %v5423_v24, %v7027_v1 }
 0x224   : > { %4131 = vst.msk [vmem:[%s6976_s22 + $0x90] sm:$0xff] %vm218_vm1, %v4099_v55  ;;  %5442 = vrcp.f32 %v3947_v48  ;;  %v3950_v15 = vadd.f32 1.0, %v5425_v43 }
 0x225   : > { %4134 = vst.msk [vmem:[%s6976_s22 + $0xa8] sm:$0xff] %vm218_vm1, %v4102_v0  ;;  %v4101_v41 = vadd.f32 %v4069_v35, %v4037_v4 }
 0x226   : > { %v5427_v63 = vpop.eup %5426  ;;  %5444 = vrcp.f32 %v3950_v15 }
 0x227   : > { %v5429_v47 = vpop.eup %5428  ;;  %4133 = vst.msk [vmem:[%s6976_s22 + $0xa0] sm:$0xff] %vm218_vm1, %v4101_v41  ;;  %v4040_v30 = vmul.f32 %v5427_v63, %v7038_v42 }
 0x228   : > { %v5431_v1 = vpop.eup %5430  ;;  %v4039_v3 = vmul.f32 %v5429_v47, %v7047_v49 }
 0x229   : > { %v5433_v12 = vpop.eup %5432  ;;  %v4104_v6 = vadd.f32 %v4072_v8, %v4040_v30  ;;  %v3949_v7 = vadd.f32 1.0, %v5431_v1 }
 0x22a   : > { %v5435_v53 = vpop.eup %5434  ;;  %v4103_v54 = vadd.f32 %v4071_v60, %v4039_v3  ;;  %v3952_v45 = vadd.f32 1.0, %v5433_v12 }
 0x22b   : > { %v5437_v50 = vpop.eup %5436  ;;  %4136 = vst.msk [vmem:[%s6976_s22 + $0xb8] sm:$0xff] %vm218_vm1, %v4104_v6  ;;  %5446 = vrcp.f32 %v3949_v7  ;;  %v3951_v44 = vadd.f32 1.0, %v5435_v53 }
 0x22c   : > { %4135 = vst.msk [vmem:[%s6976_s22 + $0xb0] sm:$0xff] %vm218_vm1, %v4103_v54  ;;  %v4042_v42 = vmul.f32 %v5437_v50, %v7062_v13  ;;  %5448 = vrcp.f32 %v3952_v45 }
 0x22d   : > { %v5439_v49 = vpop.eup %5438  ;;  %5450 = vrcp.f32 %v3951_v44 }
 0x22e   : > { %v5441_v5 = vpop.eup %5440  ;;  %v4106_v36 = vadd.f32 %v4074_v20, %v4042_v42  ;;  %v4041_v27 = vmul.f32 %v5439_v49, %v7070_v52  ;;  %v4078_v52 = vld [vmem:[%s6951_s19 + $0xe8] sm:$0xff] }
 0x22f   : > { %v4044_v21 = vmul.f32 %v5441_v5, %v7076_v16 }
 0x230   : > { %4138 = vst.msk [vmem:[%s6976_s22 + $0xc8] sm:$0xff] %vm218_vm1, %v4106_v36  ;;  %v4105_v31 = vadd.f32 %v4073_v61, %v4041_v27 }
 0x231   : > { %v5443_v13 = vpop.eup %5442  ;;  %v4108_v57 = vadd.f32 %v4076_v34, %v4044_v21 }
 0x232   : > { %4137 = vst.msk [vmem:[%s6976_s22 + $0xc0] sm:$0xff] %vm218_vm1, %v4105_v31  ;;  %v4043_v11 = vmul.f32 %v5443_v13, %v7088_v18 }
 0x233   : > { %v5445_v38 = vpop.eup %5444  ;;  %4140 = vst.msk [vmem:[%s6976_s22 + $0xd8] sm:$0xff] %vm218_vm1, %v4108_v57 }
 0x234   : > { %v4107_v26 = vadd.f32 %v4075_v28, %v4043_v11  ;;  %v4046_v16 = vmul.f32 %v5445_v38, %v7099_v23 }
 0x236   : > { %4139 = vst.msk [vmem:[%s6976_s22 + $0xd0] sm:$0xff] %vm218_vm1, %v4107_v26  ;;  %v4110_v29 = vadd.f32 %v4078_v52, %v4046_v16 }
 0x238   : > { %v5447_v40 = vpop.eup %5446  ;;  %4142 = vst.msk [vmem:[%s6976_s22 + $0xe8] sm:$0xff] %vm218_vm1, %v4110_v29 }
 0x239   : > { %v5449_v46 = vpop.eup %5448  ;;  %v4045_v18 = vmul.f32 %v5447_v40, %v7110_v51 }
 0x23a   : > { %v5451_v39 = vpop.eup %5450  ;;  %v4048_v17 = vmul.f32 %v5449_v46, %v7117_v19 }
 0x23b   : > { %v4109_v32 = vadd.f32 %v4077_v9, %v4045_v18  ;;  %v4047_v23 = vmul.f32 %v5451_v39, %v7120_v10 }
 0x23c   : > { %v4112_v2 = vadd.f32 %v4080_v25, %v4048_v17 }
 0x23d   : > { %4141 = vst.msk [vmem:[%s6976_s22 + $0xe0] sm:$0xff] %vm218_vm1, %v4109_v32  ;;  %v4111_v56 = vadd.f32 %v4079_v33, %v4047_v23 }
 0x23e   : > { %4144 = vst.msk [vmem:[%s6976_s22 + $0xf8] sm:$0xff] %vm218_vm1, %v4112_v2 }
 0x23f   : > { %4143 = vst.msk [vmem:[%s6976_s22 + $0xf0] sm:$0xff] %vm218_vm1, %v4111_v56 }
 0x240 PF: > { %s14_s15 = sadd.s32 1, %s5458_s15  }
 0x241   : > { %p11_p4 = scmp.ge.s32.totalorder %s14_s15, 4  }
 0x243   :  { %13 = sbr.rel (!%p11_p4) target bundleno = 1 (0x1), region = 79 }

</bundles_post_ra>
